<compile_context>
chip_gen: v6e
topology: v6e:2x2x1
jax: 0.10.0
libtpu: 0.0.40
codegen_flags: <defaults>
</compile_context>

<pallas_src>
import functools
import numpy as np
import jax
import jax.numpy as jnp
from jax.experimental import pallas as pl
from jax.experimental.pallas import tpu as pltpu

LANE = 128
SUBLANE = 8
# Conservative scoped-VMEM request: v7x has only 64 MiB physical VMEM (32 MiB scoped
# default); staying at 32 MiB keeps the same tiling valid on v5e / v6e / v7x.
_VMEM_LIMIT = 32 * 1024 * 1024


def _round_up(n, m):
    return ((n + m - 1) // m) * m


def _pick_row_tile(ho, w_pad, c, *, budget_bytes=2 * 1024 * 1024, min_m=256):
    """Row-tile height for a (tho, w_pad, c) f32 accumulator.

    Takes the largest tile whose accumulator fits the budget (big tiles fill the MXU
    M dimension and amortize the ~600-cycle per-grid-step overhead).  There is NO
    divisor constraint -- callers pad output rows up to n_tiles * tho.  When the
    whole output fits in a single tile, split it in two if each half still gives an
    MXU M dim (tho * w_pad) >= min_m, so v7x's second TensorCore gets work even at
    batch = 1.
    """
    row_bytes = w_pad * c * 4
    tho = max(1, min(ho, budget_bytes // row_bytes))
    if tho == ho:
        half = pl.cdiv(ho, 2)
        if half * w_pad >= min_m:
            tho = half
    return tho


# ---------------------------- conv 3x3 + BN + ReLU ----------------------------

def _conv_bn_relu_kernel(x_ref, w_ref, scale_ref, bias_ref, o_ref, *, kh, kw):
    # x_ref:     (1, Hin_pad, Wp, Cin)  bf16  full (padded) image, resident across row tiles
    # w_ref:     (kh*kw, Cin, Cout)     bf16  one (Cin, Cout) matrix per tap
    # scale_ref: (1, Cout) f32          folded BN scale
    # bias_ref:  (1, Cout) f32          folded BN bias
    # o_ref:     (1, THO, Wp, Cout)     bf16  full-width output row tile (dense store)
    _, tho, wp, cout = o_ref.shape
    cin = x_ref.shape[-1]
    base = pl.program_id(1) * tho

    acc = jnp.zeros((tho, wp, cout), jnp.float32)
    for i in range(kh):                                   # static unroll (3x3)
        rows = x_ref[0, pl.ds(base + i, tho), :, :]       # (THO, Wp, Cin): tile-aligned load
        rows2d = rows.reshape(tho * wp, cin)              # free: Wp % 8 == 0, Cin % 128 == 0
        for j in range(kw):
            # Full-width tap matmul; the +j column shift is applied to the f32 result
            # with an XLU roll (co-issues with the MXU) instead of a sublane-offset
            # slice + reshape, so there is no per-tap VMEM relayout copy.  Wrapped
            # columns only land in padded output columns (>= Wo), discarded downstream.
            tap = jnp.dot(rows2d, w_ref[i * kw + j],
                          preferred_element_type=jnp.float32).reshape(tho, wp, cout)
            acc = acc + (tap if j == 0 else pltpu.roll(tap, shift=wp - j, axis=1))
    acc = acc * scale_ref[...] + bias_ref[...]            # folded eval-mode BatchNorm
    o_ref[0] = jnp.maximum(acc, 0.0).astype(o_ref.dtype)


def conv3x3_bn_relu(x_nhwc, w_taps, scale, bias, *, kh, kw, min_out_rows=0):
    """VALID kxk conv (no bias) + folded BN + ReLU on a bf16, channel-padded NHWC input.

    Returns a bf16 (B, Ho_pad, Wp, Cout) tensor with Wp = round_up(W, 8) and
    Ho_pad = n_tiles * tho >= max(H - kh + 1, min_out_rows).  Only
    [:, :H-kh+1, :W-kw+1, :] is valid; padded rows/columns hold finite garbage that
    valid downstream outputs never read.
    """
    B, H, W, Cin = x_nhwc.shape
    Cout = w_taps.shape[-1]
    Ho, Wo = H - kh + 1, W - kw + 1
    Wp = _round_up(W, SUBLANE)
    ho_target = max(Ho, min_out_rows)
    tho = _pick_row_tile(ho_target, Wp, Cout)
    nrt = pl.cdiv(ho_target, tho)
    Ho_pad = nrt * tho
    Hp = Ho_pad + kh - 1
    x_p = jnp.pad(x_nhwc, ((0, 0), (0, Hp - H), (0, Wp - W), (0, 0)))

    flops = 2 * B * Ho_pad * Wp * kh * kw * Cin * Cout
    bytes_acc = (x_p.size * 2 + w_taps.size * 2
                 + (scale.size + bias.size) * 4 + B * Ho_pad * Wp * Cout * 2)

    return pl.pallas_call(
        functools.partial(_conv_bn_relu_kernel, kh=kh, kw=kw),
        out_shape=jax.ShapeDtypeStruct((B, Ho_pad, Wp, Cout), jnp.bfloat16),
        grid=(B, nrt),
        in_specs=[
            pl.BlockSpec((1, Hp, Wp, Cin), lambda b, t: (b, 0, 0, 0)),
            pl.BlockSpec((kh * kw, Cin, Cout), lambda b, t: (0, 0, 0)),
            pl.BlockSpec((1, Cout), lambda b, t: (0, 0)),
            pl.BlockSpec((1, Cout), lambda b, t: (0, 0)),
        ],
        out_specs=pl.BlockSpec((1, tho, Wp, Cout), lambda b, t: (b, t, 0, 0)),
        compiler_params=pltpu.CompilerParams(
            dimension_semantics=("parallel", "parallel"),
            vmem_limit_bytes=_VMEM_LIMIT),
        cost_estimate=pl.CostEstimate(flops=flops, transcendentals=0,
                                      bytes_accessed=bytes_acc),
    )(x_p, w_taps, scale, bias)


# ------------------- depthwise cross-correlation + fused head -------------------

def _xcorr_head_kernel(s_ref, k_ref, w1_ref, s1_ref, b1_ref, w2_ref, b2_ref, o_ref,
                       *, hk, wk):
    # s_ref:  (1, Hs_pad, Wp, C)  bf16  search feature (full, resident across row tiles)
    # k_ref:  (1, Hk_pad, Wkp, C) bf16  template feature; only [:hk, :wk] is read
    # w1_ref: (C, C)    bf16           head 1x1 conv #1 (no bias)
    # s1_ref/b1_ref: (1, C) f32        folded BN scale / bias
    # w2_ref: (C, Npad) bf16           head 1x1 conv #2
    # b2_ref: (1, Npad) f32            conv #2 bias (zero in padded lanes)
    # o_ref:  (1, THO, Wp, Npad) f32   full-width output row tile (dense store)
    _, tho, wp, npad = o_ref.shape
    c = s_ref.shape[-1]
    base = pl.program_id(1) * tho

    # Depthwise cross-correlation (VPU, f32 accumulation).  Column shifts use
    # pltpu.roll (XLU slot, idle while the VPU is saturated) instead of
    # sublane-offset slices, so there are no per-tap relayout copies.
    # TODO(synk): on v6e/v7x the multiplies could stay in bf16 (2 elems/lane) for a
    # further VALU win; kept in f32 here so v5e (no bf16 VPU) is not penalized.
    acc = jnp.zeros((tho, wp, c), jnp.float32)
    for i in range(hk):                                   # static unroll (small template)
        k_row = k_ref[0, i, :, :].astype(jnp.float32)     # (Wkp, C), hoisted out of j loop
        s_rows = s_ref[0, pl.ds(base + i, tho), :, :].astype(jnp.float32)  # (THO, Wp, C)
        for j in range(wk):
            shifted = s_rows if j == 0 else pltpu.roll(s_rows, shift=wp - j, axis=1)
            acc = acc + shifted * k_row[j]                # (C,) broadcast over spatial

    # Fused head: 1x1 conv -> BN -> ReLU -> 1x1 conv + bias (bf16 MXU, f32 epilogue).
    feat = acc.reshape(tho * wp, c)                       # free: Wp % 8 == 0
    h = jnp.dot(feat.astype(jnp.bfloat16), w1_ref[...],
                preferred_element_type=jnp.float32)
    h = jnp.maximum(h * s1_ref[...] + b1_ref[...], 0.0)
    out = jnp.dot(h.astype(jnp.bfloat16), w2_ref[...],
                  preferred_element_type=jnp.float32) + b2_ref[...]
    o_ref[0] = out.reshape(tho, wp, npad).astype(o_ref.dtype)


def xcorr_head(search_feat, kernel_feat, w1, s1, b1, w2, b2, *, hk, wk, ho, tho):
    """Depthwise xcorr (template over search) fused with the 1x1-conv head.

    Inputs are the full-width, row-padded bf16 conv outputs.  Returns a full-width
    f32 (B, Ho_pad, Wp, Npad) map; only [:, :ho, :wo, :out_channels] is valid.
    """
    B, Hs_pad, Wp, C = search_feat.shape
    Hk_pad, Wkp = kernel_feat.shape[1], kernel_feat.shape[2]
    Npad = w2.shape[-1]
    nrt = pl.cdiv(ho, tho)
    assert nrt * tho + hk - 1 <= Hs_pad  # last row tile's search reads stay in-bounds

    flops = 2 * B * nrt * tho * Wp * (hk * wk * C + C * C + C * Npad)
    bytes_acc = ((search_feat.size + kernel_feat.size) * 2 + (w1.size + w2.size) * 2
                 + (s1.size + b1.size + b2.size) * 4 + B * nrt * tho * Wp * Npad * 4)

    return pl.pallas_call(
        functools.partial(_xcorr_head_kernel, hk=hk, wk=wk),
        out_shape=jax.ShapeDtypeStruct((B, nrt * tho, Wp, Npad), jnp.float32),
        grid=(B, nrt),
        in_specs=[
            pl.BlockSpec((1, Hs_pad, Wp, C), lambda b, t: (b, 0, 0, 0)),
            pl.BlockSpec((1, Hk_pad, Wkp, C), lambda b, t: (b, 0, 0, 0)),
            pl.BlockSpec((C, C), lambda b, t: (0, 0)),
            pl.BlockSpec((1, C), lambda b, t: (0, 0)),
            pl.BlockSpec((1, C), lambda b, t: (0, 0)),
            pl.BlockSpec((C, Npad), lambda b, t: (0, 0)),
            pl.BlockSpec((1, Npad), lambda b, t: (0, 0)),
        ],
        out_specs=pl.BlockSpec((1, tho, Wp, Npad), lambda b, t: (b, t, 0, 0)),
        compiler_params=pltpu.CompilerParams(
            dimension_semantics=("parallel", "parallel"),
            vmem_limit_bytes=_VMEM_LIMIT),
        cost_estimate=pl.CostEstimate(flops=flops, transcendentals=0,
                                      bytes_accessed=bytes_acc),
    )(search_feat, kernel_feat, w1, s1, b1, w2, b2)


# ---------------------------- JAX glue ----------------------------

@jax.jit
def depthwise_xcorr_forward(kernel_nchw, search_nchw, params):
    """Equivalent of DepthwiseXCorr.forward(kernel, search). Inputs/outputs NCHW."""
    out_channels = params["b2"].shape[0]
    ksize = int(round(params["wk_taps"].shape[0] ** 0.5))
    cin_pad = params["wk_taps"].shape[1]
    c_pad = params["w1_p"].shape[0]

    B, _, Hk_in, Wk_in = kernel_nchw.shape
    _, _, Hs_in, Ws_in = search_nchw.shape
    Hko, Wko = Hk_in - ksize + 1, Wk_in - ksize + 1        # template feature (valid)
    Hso, Wso = Hs_in - ksize + 1, Ws_in - ksize + 1        # search feature (valid)
    Ho2, Wo2 = Hso - Hko + 1, Wso - Wko + 1                # correlation map (valid)
    Wsp = _round_up(Ws_in, SUBLANE)                        # full-width pipeline width

    # Pick the xcorr/head row tile first so the search conv knows how many (padded)
    # feature rows the xcorr's last row tile will touch (no re-pad between stages).
    tho2 = _pick_row_tile(Ho2, Wsp, c_pad)
    n2 = pl.cdiv(Ho2, tho2)
    search_rows_needed = n2 * tho2 + Hko - 1

    def prep(x_nchw):
        # NCHW -> NHWC, zero-pad channels to the lane multiple, cast to bf16.
        # TODO(synk): drop this boundary transpose/pad/cast if the upstream pipeline
        # supplies lane-padded bf16 NHWC directly -- at tracking sizes these XLA copies
        # dominate wall time on every TPU generation.
        x = jnp.transpose(x_nchw, (0, 2, 3, 1))
        x = jnp.pad(x, ((0, 0), (0, 0), (0, 0), (0, cin_pad - x.shape[-1])))
        return x.astype(jnp.bfloat16)

    k_feat = conv3x3_bn_relu(prep(kernel_nchw), params["wk_taps"],
                             params["sk_p"], params["bk_p"], kh=ksize, kw=ksize)
    s_feat = conv3x3_bn_relu(prep(search_nchw), params["ws_taps"],
                             params["ss_p"], params["bs_p"], kh=ksize, kw=ksize,
                             min_out_rows=search_rows_needed)

    out_pad = xcorr_head(s_feat, k_feat,
                         params["w1_p"], params["s1_p"], params["b1_p"],
                         params["w2_p"], params["b2_p"],
                         hk=Hko, wk=Wko, ho=Ho2, tho=tho2)
    out = out_pad[:, :Ho2, :Wo2, :out_channels]
    return jnp.transpose(out, (0, 3, 1, 2))                # back to NCHW


# ---------------------------- params / reference ----------------------------

def init_params(key, feat_in, feat_out, out_channels, ksize):
    keys = jax.random.split(key, 17)

    def bn_fold(kg, kb, km, kv, C):
        gamma = 1.0 + 0.1 * jax.random.normal(kg, (C,), jnp.float32)
        beta = 0.1 * jax.random.normal(kb, (C,), jnp.float32)
        mean = 0.1 * jax.random.normal(km, (C,), jnp.float32)
        var = 0.5 + jax.random.uniform(kv, (C,), dtype=jnp.float32)
        scale = gamma / jnp.sqrt(var + 1e-5)
        bias = beta - mean * scale
        return scale, bias

    wk = 0.1 * jax.random.normal(keys[0], (feat_out, feat_in, ksize, ksize), jnp.float32)  # OIHW
    ws = 0.1 * jax.random.normal(keys[1], (feat_out, feat_in, ksize, ksize), jnp.float32)
    w1 = 0.1 * jax.random.normal(keys[2], (feat_out, feat_out, 1, 1), jnp.float32)
    w2 = 0.1 * jax.random.normal(keys[3], (out_channels, feat_out, 1, 1), jnp.float32)
    b2 = 0.1 * jax.random.normal(keys[4], (out_channels,), jnp.float32)
    sk, bk = bn_fold(keys[5], keys[6], keys[7], keys[8], feat_out)
    ss, bs = bn_fold(keys[9], keys[10], keys[11], keys[12], feat_out)
    s1, b1 = bn_fold(keys[13], keys[14], keys[15], keys[16], feat_out)

    cin_p = _round_up(feat_in, LANE)
    c_p = _round_up(feat_out, LANE)
    n_p = _round_up(out_channels, LANE)

    def pack_conv(w_oihw):
        # OIHW -> (kh*kw, Cin_pad, Cout_pad) bf16, zero-padded lanes.
        w = jnp.transpose(w_oihw, (2, 3, 1, 0)).reshape(ksize * ksize, feat_in, feat_out)
        w = jnp.pad(w, ((0, 0), (0, cin_p - feat_in), (0, c_p - feat_out)))
        return w.astype(jnp.bfloat16)

    def pad_vec(v, n):
        return jnp.pad(v, (0, n - v.shape[0])).reshape(1, n).astype(jnp.float32)

    return dict(
        # raw PyTorch-layout params (used by the pure-JAX reference)
        wk=wk, ws=ws, w1=w1, w2=w2, b2=b2,
        sk=sk, bk=bk, ss=ss, bs=bs, s1=s1, b1=b1,
        # packed / lane-padded params for the Pallas path
        wk_taps=pack_conv(wk), ws_taps=pack_conv(ws),
        sk_p=pad_vec(sk, c_p), bk_p=pad_vec(bk, c_p),
        ss_p=pad_vec(ss, c_p), bs_p=pad_vec(bs, c_p),
        s1_p=pad_vec(s1, c_p), b1_p=pad_vec(b1, c_p),
        w1_p=jnp.pad(w1[:, :, 0, 0].T,
                     ((0, c_p - feat_out), (0, c_p - feat_out))).astype(jnp.bfloat16),
        w2_p=jnp.pad(w2[:, :, 0, 0].T,
                     ((0, c_p - feat_out), (0, n_p - out_channels))).astype(jnp.bfloat16),
        b2_p=pad_vec(b2, n_p),
    )


def _ref_forward(kernel_in, search_in, params):
    """Pure-JAX f32 NCHW reference mirroring the PyTorch module (eval-mode BN)."""
    dn = ("NCHW", "OIHW", "NCHW")

    def conv_bn_relu(x, w, scale, bias):
        y = jax.lax.conv_general_dilated(x, w, (1, 1), "VALID", dimension_numbers=dn)
        y = y * scale[None, :, None, None] + bias[None, :, None, None]
        return jnp.maximum(y, 0.0)

    k = conv_bn_relu(kernel_in, params["wk"], params["sk"], params["bk"])
    s = conv_bn_relu(search_in, params["ws"], params["ss"], params["bs"])

    B, C, Hk, Wk = k.shape
    x = s.reshape(1, B * C, s.shape[2], s.shape[3])
    kr = k.reshape(B * C, 1, Hk, Wk)
    feat = jax.lax.conv_general_dilated(x, kr, (1, 1), "VALID",
                                        dimension_numbers=dn, feature_group_count=B * C)
    feat = feat.reshape(B, C, feat.shape[2], feat.shape[3])

    h = jax.lax.conv_general_dilated(feat, params["w1"], (1, 1), "VALID", dimension_numbers=dn)
    h = jnp.maximum(h * params["s1"][None, :, None, None] + params["b1"][None, :, None, None], 0.0)
    o = jax.lax.conv_general_dilated(h, params["w2"], (1, 1), "VALID", dimension_numbers=dn)
    return o + params["b2"][None, :, None, None]


# ---------------------------- main ----------------------------

if __name__ == "__main__":
    feat_in, feat_out, out_channels, ksize = 4, 8, 1, 3
    key = jax.random.PRNGKey(0)
    kp, kk, ks = jax.random.split(key, 3)

    params = init_params(kp, feat_in, feat_out, out_channels, ksize)
    kernel_in = jax.random.normal(kk, (2, feat_in, 8, 8), jnp.float32)     # template (NCHW)
    search_in = jax.random.normal(ks, (2, feat_in, 16, 16), jnp.float32)   # search   (NCHW)

    out = depthwise_xcorr_forward(kernel_in, search_in, params)
    out = jax.block_until_ready(out)

    ref = _ref_forward(kernel_in, search_in, params)
    assert out.shape == ref.shape == (2, out_channels, 9, 9), (out.shape, ref.shape)
    # bf16 inter-stage activations + bf16 MXU operands (f32 accumulation everywhere)
    # vs a pure-f32 reference -> wider tolerance.
    np.testing.assert_allclose(np.asarray(out), np.asarray(ref), rtol=5e-2, atol=1e-1)

    print("KERNEL_OK")
</pallas_src>

<mosaic_0001>
module attributes {stable_mosaic.version = 11 : i64} {
  func.func @_conv_bn_relu_kernel(%arg0: i32, %arg1: i32, %arg2: memref<1x8x8x128xbf16, #tpu.memory_space<vmem>>, %arg3: memref<9x128x128xbf16, #tpu.memory_space<vmem>>, %arg4: memref<1x128xf32, #tpu.memory_space<vmem>>, %arg5: memref<1x128xf32, #tpu.memory_space<vmem>>, %arg6: memref<1x6x8x128xbf16, #tpu.memory_space<vmem>>) attributes {dimension_semantics = [#tpu.dimension_semantics<parallel>, #tpu.dimension_semantics<parallel>], iteration_bounds = array<i64: 2, 1>, scalar_prefetch = 0 : i64, scratch_operands = 0 : i64, tpu.core_type = #tpu.core_type<tc>, window_params = [{transform_indices = @transform_0, window_bounds = array<i64: 1, 8, 8, 128>}, {pipeline_mode = #tpu.pipeline_mode<synchronous>, transform_indices = @transform_1, window_bounds = array<i64: 9, 128, 128>}, {pipeline_mode = #tpu.pipeline_mode<synchronous>, transform_indices = @transform_2, window_bounds = array<i64: 1, 128>}, {pipeline_mode = #tpu.pipeline_mode<synchronous>, transform_indices = @transform_3, window_bounds = array<i64: 1, 128>}, {transform_indices = @transform_4, window_bounds = array<i64: 1, 6, 8, 128>}]} {
    %c6_i32 = arith.constant 6 : i32
    %0 = arith.muli %arg1, %c6_i32 : i32
    %cst = arith.constant 0.000000e+00 : f32
    %1 = vector.broadcast %cst : f32 to vector<6x8x128xf32>
    %c0_i32 = arith.constant 0 : i32
    %2 = arith.addi %0, %c0_i32 : i32
    %c0 = arith.constant 0 : index
    %3 = arith.index_cast %2 : i32 to index
    %c0_0 = arith.constant 0 : index
    %c0_1 = arith.constant 0 : index
    %4 = vector.load %arg2[%c0, %3, %c0_0, %c0_1] : memref<1x8x8x128xbf16, #tpu.memory_space<vmem>>, vector<1x6x8x128xbf16>
    %5 = vector.shape_cast %4 : vector<1x6x8x128xbf16> to vector<6x8x128xbf16>
    %6 = vector.shape_cast %5 : vector<6x8x128xbf16> to vector<48x128xbf16>
    %c0_2 = arith.constant 0 : index
    %c0_3 = arith.constant 0 : index
    %c0_4 = arith.constant 0 : index
    %7 = vector.load %arg3[%c0_2, %c0_3, %c0_4] : memref<9x128x128xbf16, #tpu.memory_space<vmem>>, vector<1x128x128xbf16>
    %8 = vector.shape_cast %7 : vector<1x128x128xbf16> to vector<128x128xbf16>
    %cst_5 = arith.constant dense<0.000000e+00> : vector<48x128xf32>
    %9 = tpu.matmul %6, %8, %cst_5 {dimension_numbers = #tpu.dot_dimension_numbers<[1], [0], [0], [1], [0, 0, 1, 1], [], []>} : vector<48x128xbf16>, vector<128x128xbf16>, vector<48x128xf32> -> vector<48x128xf32>
    %10 = vector.shape_cast %9 : vector<48x128xf32> to vector<6x8x128xf32>
    %11 = arith.addf %1, %10 : vector<6x8x128xf32>
    %c1 = arith.constant 1 : index
    %c0_6 = arith.constant 0 : index
    %c0_7 = arith.constant 0 : index
    %12 = vector.load %arg3[%c1, %c0_6, %c0_7] : memref<9x128x128xbf16, #tpu.memory_space<vmem>>, vector<1x128x128xbf16>
    %13 = vector.shape_cast %12 : vector<1x128x128xbf16> to vector<128x128xbf16>
    %cst_8 = arith.constant dense<0.000000e+00> : vector<48x128xf32>
    %14 = tpu.matmul %6, %13, %cst_8 {dimension_numbers = #tpu.dot_dimension_numbers<[1], [0], [0], [1], [0, 0, 1, 1], [], []>} : vector<48x128xbf16>, vector<128x128xbf16>, vector<48x128xf32> -> vector<48x128xf32>
    %15 = vector.shape_cast %14 : vector<48x128xf32> to vector<6x8x128xf32>
    %c7_i32 = arith.constant 7 : i32
    %16 = tpu.dynamic_rotate %15 by %c7_i32 dim 1 : vector<6x8x128xf32>, i32 -> vector<6x8x128xf32>
    %17 = arith.addf %11, %16 : vector<6x8x128xf32>
    %c2 = arith.constant 2 : index
    %c0_9 = arith.constant 0 : index
    %c0_10 = arith.constant 0 : index
    %18 = vector.load %arg3[%c2, %c0_9, %c0_10] : memref<9x128x128xbf16, #tpu.memory_space<vmem>>, vector<1x128x128xbf16>
    %19 = vector.shape_cast %18 : vector<1x128x128xbf16> to vector<128x128xbf16>
    %cst_11 = arith.constant dense<0.000000e+00> : vector<48x128xf32>
    %20 = tpu.matmul %6, %19, %cst_11 {dimension_numbers = #tpu.dot_dimension_numbers<[1], [0], [0], [1], [0, 0, 1, 1], [], []>} : vector<48x128xbf16>, vector<128x128xbf16>, vector<48x128xf32> -> vector<48x128xf32>
    %21 = vector.shape_cast %20 : vector<48x128xf32> to vector<6x8x128xf32>
    %c6_i32_12 = arith.constant 6 : i32
    %22 = tpu.dynamic_rotate %21 by %c6_i32_12 dim 1 : vector<6x8x128xf32>, i32 -> vector<6x8x128xf32>
    %23 = arith.addf %17, %22 : vector<6x8x128xf32>
    %c1_i32 = arith.constant 1 : i32
    %24 = arith.addi %0, %c1_i32 : i32
    %c0_13 = arith.constant 0 : index
    %25 = arith.index_cast %24 : i32 to index
    %c0_14 = arith.constant 0 : index
    %c0_15 = arith.constant 0 : index
    %26 = vector.load %arg2[%c0_13, %25, %c0_14, %c0_15] : memref<1x8x8x128xbf16, #tpu.memory_space<vmem>>, vector<1x6x8x128xbf16>
    %27 = vector.shape_cast %26 : vector<1x6x8x128xbf16> to vector<6x8x128xbf16>
    %28 = vector.shape_cast %27 : vector<6x8x128xbf16> to vector<48x128xbf16>
    %c3 = arith.constant 3 : index
    %c0_16 = arith.constant 0 : index
    %c0_17 = arith.constant 0 : index
    %29 = vector.load %arg3[%c3, %c0_16, %c0_17] : memref<9x128x128xbf16, #tpu.memory_space<vmem>>, vector<1x128x128xbf16>
    %30 = vector.shape_cast %29 : vector<1x128x128xbf16> to vector<128x128xbf16>
    %cst_18 = arith.constant dense<0.000000e+00> : vector<48x128xf32>
    %31 = tpu.matmul %28, %30, %cst_18 {dimension_numbers = #tpu.dot_dimension_numbers<[1], [0], [0], [1], [0, 0, 1, 1], [], []>} : vector<48x128xbf16>, vector<128x128xbf16>, vector<48x128xf32> -> vector<48x128xf32>
    %32 = vector.shape_cast %31 : vector<48x128xf32> to vector<6x8x128xf32>
    %33 = arith.addf %23, %32 : vector<6x8x128xf32>
    %c4 = arith.constant 4 : index
    %c0_19 = arith.constant 0 : index
    %c0_20 = arith.constant 0 : index
    %34 = vector.load %arg3[%c4, %c0_19, %c0_20] : memref<9x128x128xbf16, #tpu.memory_space<vmem>>, vector<1x128x128xbf16>
    %35 = vector.shape_cast %34 : vector<1x128x128xbf16> to vector<128x128xbf16>
    %cst_21 = arith.constant dense<0.000000e+00> : vector<48x128xf32>
    %36 = tpu.matmul %28, %35, %cst_21 {dimension_numbers = #tpu.dot_dimension_numbers<[1], [0], [0], [1], [0, 0, 1, 1], [], []>} : vector<48x128xbf16>, vector<128x128xbf16>, vector<48x128xf32> -> vector<48x128xf32>
    %37 = vector.shape_cast %36 : vector<48x128xf32> to vector<6x8x128xf32>
    %c7_i32_22 = arith.constant 7 : i32
    %38 = tpu.dynamic_rotate %37 by %c7_i32_22 dim 1 : vector<6x8x128xf32>, i32 -> vector<6x8x128xf32>
    %39 = arith.addf %33, %38 : vector<6x8x128xf32>
    %c5 = arith.constant 5 : index
    %c0_23 = arith.constant 0 : index
    %c0_24 = arith.constant 0 : index
    %40 = vector.load %arg3[%c5, %c0_23, %c0_24] : memref<9x128x128xbf16, #tpu.memory_space<vmem>>, vector<1x128x128xbf16>
    %41 = vector.shape_cast %40 : vector<1x128x128xbf16> to vector<128x128xbf16>
    %cst_25 = arith.constant dense<0.000000e+00> : vector<48x128xf32>
    %42 = tpu.matmul %28, %41, %cst_25 {dimension_numbers = #tpu.dot_dimension_numbers<[1], [0], [0], [1], [0, 0, 1, 1], [], []>} : vector<48x128xbf16>, vector<128x128xbf16>, vector<48x128xf32> -> vector<48x128xf32>
    %43 = vector.shape_cast %42 : vector<48x128xf32> to vector<6x8x128xf32>
    %c6_i32_26 = arith.constant 6 : i32
    %44 = tpu.dynamic_rotate %43 by %c6_i32_26 dim 1 : vector<6x8x128xf32>, i32 -> vector<6x8x128xf32>
    %45 = arith.addf %39, %44 : vector<6x8x128xf32>
    %c2_i32 = arith.constant 2 : i32
    %46 = arith.addi %0, %c2_i32 : i32
    %c0_27 = arith.constant 0 : index
    %47 = arith.index_cast %46 : i32 to index
    %c0_28 = arith.constant 0 : index
    %c0_29 = arith.constant 0 : index
    %48 = vector.load %arg2[%c0_27, %47, %c0_28, %c0_29] : memref<1x8x8x128xbf16, #tpu.memory_space<vmem>>, vector<1x6x8x128xbf16>
    %49 = vector.shape_cast %48 : vector<1x6x8x128xbf16> to vector<6x8x128xbf16>
    %50 = vector.shape_cast %49 : vector<6x8x128xbf16> to vector<48x128xbf16>
    %c6 = arith.constant 6 : index
    %c0_30 = arith.constant 0 : index
    %c0_31 = arith.constant 0 : index
    %51 = vector.load %arg3[%c6, %c0_30, %c0_31] : memref<9x128x128xbf16, #tpu.memory_space<vmem>>, vector<1x128x128xbf16>
    %52 = vector.shape_cast %51 : vector<1x128x128xbf16> to vector<128x128xbf16>
    %cst_32 = arith.constant dense<0.000000e+00> : vector<48x128xf32>
    %53 = tpu.matmul %50, %52, %cst_32 {dimension_numbers = #tpu.dot_dimension_numbers<[1], [0], [0], [1], [0, 0, 1, 1], [], []>} : vector<48x128xbf16>, vector<128x128xbf16>, vector<48x128xf32> -> vector<48x128xf32>
    %54 = vector.shape_cast %53 : vector<48x128xf32> to vector<6x8x128xf32>
    %55 = arith.addf %45, %54 : vector<6x8x128xf32>
    %c7 = arith.constant 7 : index
    %c0_33 = arith.constant 0 : index
    %c0_34 = arith.constant 0 : index
    %56 = vector.load %arg3[%c7, %c0_33, %c0_34] : memref<9x128x128xbf16, #tpu.memory_space<vmem>>, vector<1x128x128xbf16>
    %57 = vector.shape_cast %56 : vector<1x128x128xbf16> to vector<128x128xbf16>
    %cst_35 = arith.constant dense<0.000000e+00> : vector<48x128xf32>
    %58 = tpu.matmul %50, %57, %cst_35 {dimension_numbers = #tpu.dot_dimension_numbers<[1], [0], [0], [1], [0, 0, 1, 1], [], []>} : vector<48x128xbf16>, vector<128x128xbf16>, vector<48x128xf32> -> vector<48x128xf32>
    %59 = vector.shape_cast %58 : vector<48x128xf32> to vector<6x8x128xf32>
    %c7_i32_36 = arith.constant 7 : i32
    %60 = tpu.dynamic_rotate %59 by %c7_i32_36 dim 1 : vector<6x8x128xf32>, i32 -> vector<6x8x128xf32>
    %61 = arith.addf %55, %60 : vector<6x8x128xf32>
    %c8 = arith.constant 8 : index
    %c0_37 = arith.constant 0 : index
    %c0_38 = arith.constant 0 : index
    %62 = vector.load %arg3[%c8, %c0_37, %c0_38] : memref<9x128x128xbf16, #tpu.memory_space<vmem>>, vector<1x128x128xbf16>
    %63 = vector.shape_cast %62 : vector<1x128x128xbf16> to vector<128x128xbf16>
    %cst_39 = arith.constant dense<0.000000e+00> : vector<48x128xf32>
    %64 = tpu.matmul %50, %63, %cst_39 {dimension_numbers = #tpu.dot_dimension_numbers<[1], [0], [0], [1], [0, 0, 1, 1], [], []>} : vector<48x128xbf16>, vector<128x128xbf16>, vector<48x128xf32> -> vector<48x128xf32>
    %65 = vector.shape_cast %64 : vector<48x128xf32> to vector<6x8x128xf32>
    %c6_i32_40 = arith.constant 6 : i32
    %66 = tpu.dynamic_rotate %65 by %c6_i32_40 dim 1 : vector<6x8x128xf32>, i32 -> vector<6x8x128xf32>
    %67 = arith.addf %61, %66 : vector<6x8x128xf32>
    %c0_41 = arith.constant 0 : index
    %c0_42 = arith.constant 0 : index
    %68 = vector.load %arg4[%c0_41, %c0_42] : memref<1x128xf32, #tpu.memory_space<vmem>>, vector<1x128xf32>
    %69 = vector.shape_cast %68 : vector<1x128xf32> to vector<1x1x128xf32>
    %70 = vector.broadcast %69 : vector<1x1x128xf32> to vector<6x8x128xf32>
    %71 = arith.mulf %67, %70 : vector<6x8x128xf32>
    %c0_43 = arith.constant 0 : index
    %c0_44 = arith.constant 0 : index
    %72 = vector.load %arg5[%c0_43, %c0_44] : memref<1x128xf32, #tpu.memory_space<vmem>>, vector<1x128xf32>
    %73 = vector.shape_cast %72 : vector<1x128xf32> to vector<1x1x128xf32>
    %74 = vector.broadcast %73 : vector<1x1x128xf32> to vector<6x8x128xf32>
    %75 = arith.addf %71, %74 : vector<6x8x128xf32>
    %cst_45 = arith.constant 0.000000e+00 : f32
    %76 = vector.broadcast %cst_45 : f32 to vector<6x8x128xf32>
    %77 = arith.maximumf %75, %76 : vector<6x8x128xf32>
    %78 = arith.truncf %77 : vector<6x8x128xf32> to vector<6x8x128xbf16>
    %c0_46 = arith.constant 0 : index
    %c0_47 = arith.constant 0 : index
    %c0_48 = arith.constant 0 : index
    %c0_49 = arith.constant 0 : index
    %79 = vector.load %arg6[%c0_46, %c0_47, %c0_48, %c0_49] : memref<1x6x8x128xbf16, #tpu.memory_space<vmem>>, vector<1x6x8x128xbf16>
    %80 = vector.shape_cast %79 : vector<1x6x8x128xbf16> to vector<6x8x128xbf16>
    %81 = vector.shape_cast %78 : vector<6x8x128xbf16> to vector<1x6x8x128xbf16>
    tpu.vector_store %arg6[%c0_46, %c0_47, %c0_48, %c0_49], %81 {strides = array<i32>} : memref<1x6x8x128xbf16, #tpu.memory_space<vmem>>, vector<1x6x8x128xbf16>,
    return
  }
  func.func @transform_0(%arg0: i32, %arg1: i32) -> (i32, i32, i32, i32) {
    %c0_i32 = arith.constant 0 : i32
    %c0_i32_0 = arith.constant 0 : i32
    %c0_i32_1 = arith.constant 0 : i32
    %c0_i32_2 = arith.constant 0 : i32
    return %arg0, %c0_i32, %c0_i32_0, %c0_i32_1 : i32, i32, i32, i32
  }
  func.func @transform_1(%arg0: i32, %arg1: i32) -> (i32, i32, i32) {
    %c0_i32 = arith.constant 0 : i32
    %c0_i32_0 = arith.constant 0 : i32
    %c0_i32_1 = arith.constant 0 : i32
    %c0_i32_2 = arith.constant 0 : i32
    return %c0_i32, %c0_i32_0, %c0_i32_1 : i32, i32, i32
  }
  func.func @transform_2(%arg0: i32, %arg1: i32) -> (i32, i32) {
    %c0_i32 = arith.constant 0 : i32
    %c0_i32_0 = arith.constant 0 : i32
    %c0_i32_1 = arith.constant 0 : i32
    return %c0_i32, %c0_i32_0 : i32, i32
  }
  func.func @transform_3(%arg0: i32, %arg1: i32) -> (i32, i32) {
    %c0_i32 = arith.constant 0 : i32
    %c0_i32_0 = arith.constant 0 : i32
    %c0_i32_1 = arith.constant 0 : i32
    return %c0_i32, %c0_i32_0 : i32, i32
  }
  func.func @transform_4(%arg0: i32, %arg1: i32) -> (i32, i32, i32, i32) {
    %c0_i32 = arith.constant 0 : i32
    %c0_i32_0 = arith.constant 0 : i32
    %c0_i32_1 = arith.constant 0 : i32
    return %arg0, %arg1, %c0_i32, %c0_i32_0 : i32, i32, i32, i32
  }
}

module attributes {stable_mosaic.version = 11 : i64} {
  func.func @_conv_bn_relu_kernel(%arg0: i32, %arg1: i32, %arg2: memref<1x16x16x128xbf16, #tpu.memory_space<vmem>>, %arg3: memref<9x128x128xbf16, #tpu.memory_space<vmem>>, %arg4: memref<1x128xf32, #tpu.memory_space<vmem>>, %arg5: memref<1x128xf32, #tpu.memory_space<vmem>>, %arg6: memref<1x14x16x128xbf16, #tpu.memory_space<vmem>>) attributes {dimension_semantics = [#tpu.dimension_semantics<parallel>, #tpu.dimension_semantics<parallel>], iteration_bounds = array<i64: 2, 1>, scalar_prefetch = 0 : i64, scratch_operands = 0 : i64, tpu.core_type = #tpu.core_type<tc>, window_params = [{transform_indices = @transform_0, window_bounds = array<i64: 1, 16, 16, 128>}, {pipeline_mode = #tpu.pipeline_mode<synchronous>, transform_indices = @transform_1, window_bounds = array<i64: 9, 128, 128>}, {pipeline_mode = #tpu.pipeline_mode<synchronous>, transform_indices = @transform_2, window_bounds = array<i64: 1, 128>}, {pipeline_mode = #tpu.pipeline_mode<synchronous>, transform_indices = @transform_3, window_bounds = array<i64: 1, 128>}, {transform_indices = @transform_4, window_bounds = array<i64: 1, 14, 16, 128>}]} {
    %c14_i32 = arith.constant 14 : i32
    %0 = arith.muli %arg1, %c14_i32 : i32
    %cst = arith.constant 0.000000e+00 : f32
    %1 = vector.broadcast %cst : f32 to vector<14x16x128xf32>
    %c0_i32 = arith.constant 0 : i32
    %2 = arith.addi %0, %c0_i32 : i32
    %c0 = arith.constant 0 : index
    %3 = arith.index_cast %2 : i32 to index
    %c0_0 = arith.constant 0 : index
    %c0_1 = arith.constant 0 : index
    %4 = vector.load %arg2[%c0, %3, %c0_0, %c0_1] : memref<1x16x16x128xbf16, #tpu.memory_space<vmem>>, vector<1x14x16x128xbf16>
    %5 = vector.shape_cast %4 : vector<1x14x16x128xbf16> to vector<14x16x128xbf16>
    %6 = vector.shape_cast %5 : vector<14x16x128xbf16> to vector<224x128xbf16>
    %c0_2 = arith.constant 0 : index
    %c0_3 = arith.constant 0 : index
    %c0_4 = arith.constant 0 : index
    %7 = vector.load %arg3[%c0_2, %c0_3, %c0_4] : memref<9x128x128xbf16, #tpu.memory_space<vmem>>, vector<1x128x128xbf16>
    %8 = vector.shape_cast %7 : vector<1x128x128xbf16> to vector<128x128xbf16>
    %cst_5 = arith.constant dense<0.000000e+00> : vector<224x128xf32>
    %9 = tpu.matmul %6, %8, %cst_5 {dimension_numbers = #tpu.dot_dimension_numbers<[1], [0], [0], [1], [0, 0, 1, 1], [], []>} : vector<224x128xbf16>, vector<128x128xbf16>, vector<224x128xf32> -> vector<224x128xf32>
    %10 = vector.shape_cast %9 : vector<224x128xf32> to vector<14x16x128xf32>
    %11 = arith.addf %1, %10 : vector<14x16x128xf32>
    %c1 = arith.constant 1 : index
    %c0_6 = arith.constant 0 : index
    %c0_7 = arith.constant 0 : index
    %12 = vector.load %arg3[%c1, %c0_6, %c0_7] : memref<9x128x128xbf16, #tpu.memory_space<vmem>>, vector<1x128x128xbf16>
    %13 = vector.shape_cast %12 : vector<1x128x128xbf16> to vector<128x128xbf16>
    %cst_8 = arith.constant dense<0.000000e+00> : vector<224x128xf32>
    %14 = tpu.matmul %6, %13, %cst_8 {dimension_numbers = #tpu.dot_dimension_numbers<[1], [0], [0], [1], [0, 0, 1, 1], [], []>} : vector<224x128xbf16>, vector<128x128xbf16>, vector<224x128xf32> -> vector<224x128xf32>
    %15 = vector.shape_cast %14 : vector<224x128xf32> to vector<14x16x128xf32>
    %c15_i32 = arith.constant 15 : i32
    %16 = tpu.dynamic_rotate %15 by %c15_i32 dim 1 : vector<14x16x128xf32>, i32 -> vector<14x16x128xf32>
    %17 = arith.addf %11, %16 : vector<14x16x128xf32>
    %c2 = arith.constant 2 : index
    %c0_9 = arith.constant 0 : index
    %c0_10 = arith.constant 0 : index
    %18 = vector.load %arg3[%c2, %c0_9, %c0_10] : memref<9x128x128xbf16, #tpu.memory_space<vmem>>, vector<1x128x128xbf16>
    %19 = vector.shape_cast %18 : vector<1x128x128xbf16> to vector<128x128xbf16>
    %cst_11 = arith.constant dense<0.000000e+00> : vector<224x128xf32>
    %20 = tpu.matmul %6, %19, %cst_11 {dimension_numbers = #tpu.dot_dimension_numbers<[1], [0], [0], [1], [0, 0, 1, 1], [], []>} : vector<224x128xbf16>, vector<128x128xbf16>, vector<224x128xf32> -> vector<224x128xf32>
    %21 = vector.shape_cast %20 : vector<224x128xf32> to vector<14x16x128xf32>
    %c14_i32_12 = arith.constant 14 : i32
    %22 = tpu.dynamic_rotate %21 by %c14_i32_12 dim 1 : vector<14x16x128xf32>, i32 -> vector<14x16x128xf32>
    %23 = arith.addf %17, %22 : vector<14x16x128xf32>
    %c1_i32 = arith.constant 1 : i32
    %24 = arith.addi %0, %c1_i32 : i32
    %c0_13 = arith.constant 0 : index
    %25 = arith.index_cast %24 : i32 to index
    %c0_14 = arith.constant 0 : index
    %c0_15 = arith.constant 0 : index
    %26 = vector.load %arg2[%c0_13, %25, %c0_14, %c0_15] : memref<1x16x16x128xbf16, #tpu.memory_space<vmem>>, vector<1x14x16x128xbf16>
    %27 = vector.shape_cast %26 : vector<1x14x16x128xbf16> to vector<14x16x128xbf16>
    %28 = vector.shape_cast %27 : vector<14x16x128xbf16> to vector<224x128xbf16>
    %c3 = arith.constant 3 : index
    %c0_16 = arith.constant 0 : index
    %c0_17 = arith.constant 0 : index
    %29 = vector.load %arg3[%c3, %c0_16, %c0_17] : memref<9x128x128xbf16, #tpu.memory_space<vmem>>, vector<1x128x128xbf16>
    %30 = vector.shape_cast %29 : vector<1x128x128xbf16> to vector<128x128xbf16>
    %cst_18 = arith.constant dense<0.000000e+00> : vector<224x128xf32>
    %31 = tpu.matmul %28, %30, %cst_18 {dimension_numbers = #tpu.dot_dimension_numbers<[1], [0], [0], [1], [0, 0, 1, 1], [], []>} : vector<224x128xbf16>, vector<128x128xbf16>, vector<224x128xf32> -> vector<224x128xf32>
    %32 = vector.shape_cast %31 : vector<224x128xf32> to vector<14x16x128xf32>
    %33 = arith.addf %23, %32 : vector<14x16x128xf32>
    %c4 = arith.constant 4 : index
    %c0_19 = arith.constant 0 : index
    %c0_20 = arith.constant 0 : index
    %34 = vector.load %arg3[%c4, %c0_19, %c0_20] : memref<9x128x128xbf16, #tpu.memory_space<vmem>>, vector<1x128x128xbf16>
    %35 = vector.shape_cast %34 : vector<1x128x128xbf16> to vector<128x128xbf16>
    %cst_21 = arith.constant dense<0.000000e+00> : vector<224x128xf32>
    %36 = tpu.matmul %28, %35, %cst_21 {dimension_numbers = #tpu.dot_dimension_numbers<[1], [0], [0], [1], [0, 0, 1, 1], [], []>} : vector<224x128xbf16>, vector<128x128xbf16>, vector<224x128xf32> -> vector<224x128xf32>
    %37 = vector.shape_cast %36 : vector<224x128xf32> to vector<14x16x128xf32>
    %c15_i32_22 = arith.constant 15 : i32
    %38 = tpu.dynamic_rotate %37 by %c15_i32_22 dim 1 : vector<14x16x128xf32>, i32 -> vector<14x16x128xf32>
    %39 = arith.addf %33, %38 : vector<14x16x128xf32>
    %c5 = arith.constant 5 : index
    %c0_23 = arith.constant 0 : index
    %c0_24 = arith.constant 0 : index
    %40 = vector.load %arg3[%c5, %c0_23, %c0_24] : memref<9x128x128xbf16, #tpu.memory_space<vmem>>, vector<1x128x128xbf16>
    %41 = vector.shape_cast %40 : vector<1x128x128xbf16> to vector<128x128xbf16>
    %cst_25 = arith.constant dense<0.000000e+00> : vector<224x128xf32>
    %42 = tpu.matmul %28, %41, %cst_25 {dimension_numbers = #tpu.dot_dimension_numbers<[1], [0], [0], [1], [0, 0, 1, 1], [], []>} : vector<224x128xbf16>, vector<128x128xbf16>, vector<224x128xf32> -> vector<224x128xf32>
    %43 = vector.shape_cast %42 : vector<224x128xf32> to vector<14x16x128xf32>
    %c14_i32_26 = arith.constant 14 : i32
    %44 = tpu.dynamic_rotate %43 by %c14_i32_26 dim 1 : vector<14x16x128xf32>, i32 -> vector<14x16x128xf32>
    %45 = arith.addf %39, %44 : vector<14x16x128xf32>
    %c2_i32 = arith.constant 2 : i32
    %46 = arith.addi %0, %c2_i32 : i32
    %c0_27 = arith.constant 0 : index
    %47 = arith.index_cast %46 : i32 to index
    %c0_28 = arith.constant 0 : index
    %c0_29 = arith.constant 0 : index
    %48 = vector.load %arg2[%c0_27, %47, %c0_28, %c0_29] : memref<1x16x16x128xbf16, #tpu.memory_space<vmem>>, vector<1x14x16x128xbf16>
    %49 = vector.shape_cast %48 : vector<1x14x16x128xbf16> to vector<14x16x128xbf16>
    %50 = vector.shape_cast %49 : vector<14x16x128xbf16> to vector<224x128xbf16>
    %c6 = arith.constant 6 : index
    %c0_30 = arith.constant 0 : index
    %c0_31 = arith.constant 0 : index
    %51 = vector.load %arg3[%c6, %c0_30, %c0_31] : memref<9x128x128xbf16, #tpu.memory_space<vmem>>, vector<1x128x128xbf16>
    %52 = vector.shape_cast %51 : vector<1x128x128xbf16> to vector<128x128xbf16>
    %cst_32 = arith.constant dense<0.000000e+00> : vector<224x128xf32>
    %53 = tpu.matmul %50, %52, %cst_32 {dimension_numbers = #tpu.dot_dimension_numbers<[1], [0], [0], [1], [0, 0, 1, 1], [], []>} : vector<224x128xbf16>, vector<128x128xbf16>, vector<224x128xf32> -> vector<224x128xf32>
    %54 = vector.shape_cast %53 : vector<224x128xf32> to vector<14x16x128xf32>
    %55 = arith.addf %45, %54 : vector<14x16x128xf32>
    %c7 = arith.constant 7 : index
    %c0_33 = arith.constant 0 : index
    %c0_34 = arith.constant 0 : index
    %56 = vector.load %arg3[%c7, %c0_33, %c0_34] : memref<9x128x128xbf16, #tpu.memory_space<vmem>>, vector<1x128x128xbf16>
    %57 = vector.shape_cast %56 : vector<1x128x128xbf16> to vector<128x128xbf16>
    %cst_35 = arith.constant dense<0.000000e+00> : vector<224x128xf32>
    %58 = tpu.matmul %50, %57, %cst_35 {dimension_numbers = #tpu.dot_dimension_numbers<[1], [0], [0], [1], [0, 0, 1, 1], [], []>} : vector<224x128xbf16>, vector<128x128xbf16>, vector<224x128xf32> -> vector<224x128xf32>
    %59 = vector.shape_cast %58 : vector<224x128xf32> to vector<14x16x128xf32>
    %c15_i32_36 = arith.constant 15 : i32
    %60 = tpu.dynamic_rotate %59 by %c15_i32_36 dim 1 : vector<14x16x128xf32>, i32 -> vector<14x16x128xf32>
    %61 = arith.addf %55, %60 : vector<14x16x128xf32>
    %c8 = arith.constant 8 : index
    %c0_37 = arith.constant 0 : index
    %c0_38 = arith.constant 0 : index
    %62 = vector.load %arg3[%c8, %c0_37, %c0_38] : memref<9x128x128xbf16, #tpu.memory_space<vmem>>, vector<1x128x128xbf16>
    %63 = vector.shape_cast %62 : vector<1x128x128xbf16> to vector<128x128xbf16>
    %cst_39 = arith.constant dense<0.000000e+00> : vector<224x128xf32>
    %64 = tpu.matmul %50, %63, %cst_39 {dimension_numbers = #tpu.dot_dimension_numbers<[1], [0], [0], [1], [0, 0, 1, 1], [], []>} : vector<224x128xbf16>, vector<128x128xbf16>, vector<224x128xf32> -> vector<224x128xf32>
    %65 = vector.shape_cast %64 : vector<224x128xf32> to vector<14x16x128xf32>
    %c14_i32_40 = arith.constant 14 : i32
    %66 = tpu.dynamic_rotate %65 by %c14_i32_40 dim 1 : vector<14x16x128xf32>, i32 -> vector<14x16x128xf32>
    %67 = arith.addf %61, %66 : vector<14x16x128xf32>
    %c0_41 = arith.constant 0 : index
    %c0_42 = arith.constant 0 : index
    %68 = vector.load %arg4[%c0_41, %c0_42] : memref<1x128xf32, #tpu.memory_space<vmem>>, vector<1x128xf32>
    %69 = vector.shape_cast %68 : vector<1x128xf32> to vector<1x1x128xf32>
    %70 = vector.broadcast %69 : vector<1x1x128xf32> to vector<14x16x128xf32>
    %71 = arith.mulf %67, %70 : vector<14x16x128xf32>
    %c0_43 = arith.constant 0 : index
    %c0_44 = arith.constant 0 : index
    %72 = vector.load %arg5[%c0_43, %c0_44] : memref<1x128xf32, #tpu.memory_space<vmem>>, vector<1x128xf32>
    %73 = vector.shape_cast %72 : vector<1x128xf32> to vector<1x1x128xf32>
    %74 = vector.broadcast %73 : vector<1x1x128xf32> to vector<14x16x128xf32>
    %75 = arith.addf %71, %74 : vector<14x16x128xf32>
    %cst_45 = arith.constant 0.000000e+00 : f32
    %76 = vector.broadcast %cst_45 : f32 to vector<14x16x128xf32>
    %77 = arith.maximumf %75, %76 : vector<14x16x128xf32>
    %78 = arith.truncf %77 : vector<14x16x128xf32> to vector<14x16x128xbf16>
    %c0_46 = arith.constant 0 : index
    %c0_47 = arith.constant 0 : index
    %c0_48 = arith.constant 0 : index
    %c0_49 = arith.constant 0 : index
    %79 = vector.load %arg6[%c0_46, %c0_47, %c0_48, %c0_49] : memref<1x14x16x128xbf16, #tpu.memory_space<vmem>>, vector<1x14x16x128xbf16>
    %80 = vector.shape_cast %79 : vector<1x14x16x128xbf16> to vector<14x16x128xbf16>
    %81 = vector.shape_cast %78 : vector<14x16x128xbf16> to vector<1x14x16x128xbf16>
    tpu.vector_store %arg6[%c0_46, %c0_47, %c0_48, %c0_49], %81 {strides = array<i32>} : memref<1x14x16x128xbf16, #tpu.memory_space<vmem>>, vector<1x14x16x128xbf16>,
    return
  }
  func.func @transform_0(%arg0: i32, %arg1: i32) -> (i32, i32, i32, i32) {
    %c0_i32 = arith.constant 0 : i32
    %c0_i32_0 = arith.constant 0 : i32
    %c0_i32_1 = arith.constant 0 : i32
    %c0_i32_2 = arith.constant 0 : i32
    return %arg0, %c0_i32, %c0_i32_0, %c0_i32_1 : i32, i32, i32, i32
  }
  func.func @transform_1(%arg0: i32, %arg1: i32) -> (i32, i32, i32) {
    %c0_i32 = arith.constant 0 : i32
    %c0_i32_0 = arith.constant 0 : i32
    %c0_i32_1 = arith.constant 0 : i32
    %c0_i32_2 = arith.constant 0 : i32
    return %c0_i32, %c0_i32_0, %c0_i32_1 : i32, i32, i32
  }
  func.func @transform_2(%arg0: i32, %arg1: i32) -> (i32, i32) {
    %c0_i32 = arith.constant 0 : i32
    %c0_i32_0 = arith.constant 0 : i32
    %c0_i32_1 = arith.constant 0 : i32
    return %c0_i32, %c0_i32_0 : i32, i32
  }
  func.func @transform_3(%arg0: i32, %arg1: i32) -> (i32, i32) {
    %c0_i32 = arith.constant 0 : i32
    %c0_i32_0 = arith.constant 0 : i32
    %c0_i32_1 = arith.constant 0 : i32
    return %c0_i32, %c0_i32_0 : i32, i32
  }
  func.func @transform_4(%arg0: i32, %arg1: i32) -> (i32, i32, i32, i32) {
    %c0_i32 = arith.constant 0 : i32
    %c0_i32_0 = arith.constant 0 : i32
    %c0_i32_1 = arith.constant 0 : i32
    return %arg0, %arg1, %c0_i32, %c0_i32_0 : i32, i32, i32, i32
  }
}

module attributes {stable_mosaic.version = 11 : i64} {
  func.func @_xcorr_head_kernel(%arg0: i32, %arg1: i32, %arg2: memref<1x14x16x128xbf16, #tpu.memory_space<vmem>>, %arg3: memref<1x6x8x128xbf16, #tpu.memory_space<vmem>>, %arg4: memref<128x128xbf16, #tpu.memory_space<vmem>>, %arg5: memref<1x128xf32, #tpu.memory_space<vmem>>, %arg6: memref<1x128xf32, #tpu.memory_space<vmem>>, %arg7: memref<128x128xbf16, #tpu.memory_space<vmem>>, %arg8: memref<1x128xf32, #tpu.memory_space<vmem>>, %arg9: memref<1x9x16x128xf32, #tpu.memory_space<vmem>>) attributes {dimension_semantics = [#tpu.dimension_semantics<parallel>, #tpu.dimension_semantics<parallel>], iteration_bounds = array<i64: 2, 1>, scalar_prefetch = 0 : i64, scratch_operands = 0 : i64, tpu.core_type = #tpu.core_type<tc>, window_params = [{transform_indices = @transform_0, window_bounds = array<i64: 1, 14, 16, 128>}, {transform_indices = @transform_1, window_bounds = array<i64: 1, 6, 8, 128>}, {pipeline_mode = #tpu.pipeline_mode<synchronous>, transform_indices = @transform_2, window_bounds = array<i64: 128, 128>}, {pipeline_mode = #tpu.pipeline_mode<synchronous>, transform_indices = @transform_3, window_bounds = array<i64: 1, 128>}, {pipeline_mode = #tpu.pipeline_mode<synchronous>, transform_indices = @transform_4, window_bounds = array<i64: 1, 128>}, {pipeline_mode = #tpu.pipeline_mode<synchronous>, transform_indices = @transform_5, window_bounds = array<i64: 128, 128>}, {pipeline_mode = #tpu.pipeline_mode<synchronous>, transform_indices = @transform_6, window_bounds = array<i64: 1, 128>}, {transform_indices = @transform_7, window_bounds = array<i64: 1, 9, 16, 128>}]} {
    %c9_i32 = arith.constant 9 : i32
    %0 = arith.muli %arg1, %c9_i32 : i32
    %cst = arith.constant 0.000000e+00 : f32
    %1 = vector.broadcast %cst : f32 to vector<9x16x128xf32>
    %c0 = arith.constant 0 : index
    %c0_0 = arith.constant 0 : index
    %c0_1 = arith.constant 0 : index
    %c0_2 = arith.constant 0 : index
    %2 = vector.load %arg3[%c0, %c0_0, %c0_1, %c0_2] : memref<1x6x8x128xbf16, #tpu.memory_space<vmem>>, vector<1x1x8x128xbf16>
    %3 = vector.shape_cast %2 : vector<1x1x8x128xbf16> to vector<8x128xbf16>
    %4 = arith.extf %3 : vector<8x128xbf16> to vector<8x128xf32>
    %c0_i32 = arith.constant 0 : i32
    %5 = arith.addi %0, %c0_i32 : i32
    %c0_3 = arith.constant 0 : index
    %6 = arith.index_cast %5 : i32 to index
    %c0_4 = arith.constant 0 : index
    %c0_5 = arith.constant 0 : index
    %7 = vector.load %arg2[%c0_3, %6, %c0_4, %c0_5] : memref<1x14x16x128xbf16, #tpu.memory_space<vmem>>, vector<1x9x16x128xbf16>
    %8 = vector.shape_cast %7 : vector<1x9x16x128xbf16> to vector<9x16x128xbf16>
    %9 = arith.extf %8 : vector<9x16x128xbf16> to vector<9x16x128xf32>
    %10 = vector.extract_strided_slice %4 {offsets = [0, 0], sizes = [1, 128], strides = [1, 1]} : vector<8x128xf32> to vector<1x128xf32>
    %11 = vector.shape_cast %10 : vector<1x128xf32> to vector<128xf32>
    %12 = vector.shape_cast %11 : vector<128xf32> to vector<1x1x128xf32>
    %13 = vector.broadcast %12 : vector<1x1x128xf32> to vector<9x16x128xf32>
    %14 = arith.mulf %9, %13 : vector<9x16x128xf32>
    %15 = arith.addf %1, %14 : vector<9x16x128xf32>
    %c15_i32 = arith.constant 15 : i32
    %16 = tpu.dynamic_rotate %9 by %c15_i32 dim 1 : vector<9x16x128xf32>, i32 -> vector<9x16x128xf32>
    %17 = vector.extract_strided_slice %4 {offsets = [1, 0], sizes = [1, 128], strides = [1, 1]} : vector<8x128xf32> to vector<1x128xf32>
    %18 = vector.shape_cast %17 : vector<1x128xf32> to vector<128xf32>
    %19 = vector.shape_cast %18 : vector<128xf32> to vector<1x1x128xf32>
    %20 = vector.broadcast %19 : vector<1x1x128xf32> to vector<9x16x128xf32>
    %21 = arith.mulf %16, %20 : vector<9x16x128xf32>
    %22 = arith.addf %15, %21 : vector<9x16x128xf32>
    %c14_i32 = arith.constant 14 : i32
    %23 = tpu.dynamic_rotate %9 by %c14_i32 dim 1 : vector<9x16x128xf32>, i32 -> vector<9x16x128xf32>
    %24 = vector.extract_strided_slice %4 {offsets = [2, 0], sizes = [1, 128], strides = [1, 1]} : vector<8x128xf32> to vector<1x128xf32>
    %25 = vector.shape_cast %24 : vector<1x128xf32> to vector<128xf32>
    %26 = vector.shape_cast %25 : vector<128xf32> to vector<1x1x128xf32>
    %27 = vector.broadcast %26 : vector<1x1x128xf32> to vector<9x16x128xf32>
    %28 = arith.mulf %23, %27 : vector<9x16x128xf32>
    %29 = arith.addf %22, %28 : vector<9x16x128xf32>
    %c13_i32 = arith.constant 13 : i32
    %30 = tpu.dynamic_rotate %9 by %c13_i32 dim 1 : vector<9x16x128xf32>, i32 -> vector<9x16x128xf32>
    %31 = vector.extract_strided_slice %4 {offsets = [3, 0], sizes = [1, 128], strides = [1, 1]} : vector<8x128xf32> to vector<1x128xf32>
    %32 = vector.shape_cast %31 : vector<1x128xf32> to vector<128xf32>
    %33 = vector.shape_cast %32 : vector<128xf32> to vector<1x1x128xf32>
    %34 = vector.broadcast %33 : vector<1x1x128xf32> to vector<9x16x128xf32>
    %35 = arith.mulf %30, %34 : vector<9x16x128xf32>
    %36 = arith.addf %29, %35 : vector<9x16x128xf32>
    %c12_i32 = arith.constant 12 : i32
    %37 = tpu.dynamic_rotate %9 by %c12_i32 dim 1 : vector<9x16x128xf32>, i32 -> vector<9x16x128xf32>
    %38 = vector.extract_strided_slice %4 {offsets = [4, 0], sizes = [1, 128], strides = [1, 1]} : vector<8x128xf32> to vector<1x128xf32>
    %39 = vector.shape_cast %38 : vector<1x128xf32> to vector<128xf32>
    %40 = vector.shape_cast %39 : vector<128xf32> to vector<1x1x128xf32>
    %41 = vector.broadcast %40 : vector<1x1x128xf32> to vector<9x16x128xf32>
    %42 = arith.mulf %37, %41 : vector<9x16x128xf32>
    %43 = arith.addf %36, %42 : vector<9x16x128xf32>
    %c11_i32 = arith.constant 11 : i32
    %44 = tpu.dynamic_rotate %9 by %c11_i32 dim 1 : vector<9x16x128xf32>, i32 -> vector<9x16x128xf32>
    %45 = vector.extract_strided_slice %4 {offsets = [5, 0], sizes = [1, 128], strides = [1, 1]} : vector<8x128xf32> to vector<1x128xf32>
    %46 = vector.shape_cast %45 : vector<1x128xf32> to vector<128xf32>
    %47 = vector.shape_cast %46 : vector<128xf32> to vector<1x1x128xf32>
    %48 = vector.broadcast %47 : vector<1x1x128xf32> to vector<9x16x128xf32>
    %49 = arith.mulf %44, %48 : vector<9x16x128xf32>
    %50 = arith.addf %43, %49 : vector<9x16x128xf32>
    %c0_6 = arith.constant 0 : index
    %c1 = arith.constant 1 : index
    %c0_7 = arith.constant 0 : index
    %c0_8 = arith.constant 0 : index
    %51 = vector.load %arg3[%c0_6, %c1, %c0_7, %c0_8] : memref<1x6x8x128xbf16, #tpu.memory_space<vmem>>, vector<1x1x8x128xbf16>
    %52 = vector.shape_cast %51 : vector<1x1x8x128xbf16> to vector<8x128xbf16>
    %53 = arith.extf %52 : vector<8x128xbf16> to vector<8x128xf32>
    %c1_i32 = arith.constant 1 : i32
    %54 = arith.addi %0, %c1_i32 : i32
    %c0_9 = arith.constant 0 : index
    %55 = arith.index_cast %54 : i32 to index
    %c0_10 = arith.constant 0 : index
    %c0_11 = arith.constant 0 : index
    %56 = vector.load %arg2[%c0_9, %55, %c0_10, %c0_11] : memref<1x14x16x128xbf16, #tpu.memory_space<vmem>>, vector<1x9x16x128xbf16>
    %57 = vector.shape_cast %56 : vector<1x9x16x128xbf16> to vector<9x16x128xbf16>
    %58 = arith.extf %57 : vector<9x16x128xbf16> to vector<9x16x128xf32>
    %59 = vector.extract_strided_slice %53 {offsets = [0, 0], sizes = [1, 128], strides = [1, 1]} : vector<8x128xf32> to vector<1x128xf32>
    %60 = vector.shape_cast %59 : vector<1x128xf32> to vector<128xf32>
    %61 = vector.shape_cast %60 : vector<128xf32> to vector<1x1x128xf32>
    %62 = vector.broadcast %61 : vector<1x1x128xf32> to vector<9x16x128xf32>
    %63 = arith.mulf %58, %62 : vector<9x16x128xf32>
    %64 = arith.addf %50, %63 : vector<9x16x128xf32>
    %c15_i32_12 = arith.constant 15 : i32
    %65 = tpu.dynamic_rotate %58 by %c15_i32_12 dim 1 : vector<9x16x128xf32>, i32 -> vector<9x16x128xf32>
    %66 = vector.extract_strided_slice %53 {offsets = [1, 0], sizes = [1, 128], strides = [1, 1]} : vector<8x128xf32> to vector<1x128xf32>
    %67 = vector.shape_cast %66 : vector<1x128xf32> to vector<128xf32>
    %68 = vector.shape_cast %67 : vector<128xf32> to vector<1x1x128xf32>
    %69 = vector.broadcast %68 : vector<1x1x128xf32> to vector<9x16x128xf32>
    %70 = arith.mulf %65, %69 : vector<9x16x128xf32>
    %71 = arith.addf %64, %70 : vector<9x16x128xf32>
    %c14_i32_13 = arith.constant 14 : i32
    %72 = tpu.dynamic_rotate %58 by %c14_i32_13 dim 1 : vector<9x16x128xf32>, i32 -> vector<9x16x128xf32>
    %73 = vector.extract_strided_slice %53 {offsets = [2, 0], sizes = [1, 128], strides = [1, 1]} : vector<8x128xf32> to vector<1x128xf32>
    %74 = vector.shape_cast %73 : vector<1x128xf32> to vector<128xf32>
    %75 = vector.shape_cast %74 : vector<128xf32> to vector<1x1x128xf32>
    %76 = vector.broadcast %75 : vector<1x1x128xf32> to vector<9x16x128xf32>
    %77 = arith.mulf %72, %76 : vector<9x16x128xf32>
    %78 = arith.addf %71, %77 : vector<9x16x128xf32>
    %c13_i32_14 = arith.constant 13 : i32
    %79 = tpu.dynamic_rotate %58 by %c13_i32_14 dim 1 : vector<9x16x128xf32>, i32 -> vector<9x16x128xf32>
    %80 = vector.extract_strided_slice %53 {offsets = [3, 0], sizes = [1, 128], strides = [1, 1]} : vector<8x128xf32> to vector<1x128xf32>
    %81 = vector.shape_cast %80 : vector<1x128xf32> to vector<128xf32>
    %82 = vector.shape_cast %81 : vector<128xf32> to vector<1x1x128xf32>
    %83 = vector.broadcast %82 : vector<1x1x128xf32> to vector<9x16x128xf32>
    %84 = arith.mulf %79, %83 : vector<9x16x128xf32>
    %85 = arith.addf %78, %84 : vector<9x16x128xf32>
    %c12_i32_15 = arith.constant 12 : i32
    %86 = tpu.dynamic_rotate %58 by %c12_i32_15 dim 1 : vector<9x16x128xf32>, i32 -> vector<9x16x128xf32>
    %87 = vector.extract_strided_slice %53 {offsets = [4, 0], sizes = [1, 128], strides = [1, 1]} : vector<8x128xf32> to vector<1x128xf32>
    %88 = vector.shape_cast %87 : vector<1x128xf32> to vector<128xf32>
    %89 = vector.shape_cast %88 : vector<128xf32> to vector<1x1x128xf32>
    %90 = vector.broadcast %89 : vector<1x1x128xf32> to vector<9x16x128xf32>
    %91 = arith.mulf %86, %90 : vector<9x16x128xf32>
    %92 = arith.addf %85, %91 : vector<9x16x128xf32>
    %c11_i32_16 = arith.constant 11 : i32
    %93 = tpu.dynamic_rotate %58 by %c11_i32_16 dim 1 : vector<9x16x128xf32>, i32 -> vector<9x16x128xf32>
    %94 = vector.extract_strided_slice %53 {offsets = [5, 0], sizes = [1, 128], strides = [1, 1]} : vector<8x128xf32> to vector<1x128xf32>
    %95 = vector.shape_cast %94 : vector<1x128xf32> to vector<128xf32>
    %96 = vector.shape_cast %95 : vector<128xf32> to vector<1x1x128xf32>
    %97 = vector.broadcast %96 : vector<1x1x128xf32> to vector<9x16x128xf32>
    %98 = arith.mulf %93, %97 : vector<9x16x128xf32>
    %99 = arith.addf %92, %98 : vector<9x16x128xf32>
    %c0_17 = arith.constant 0 : index
    %c2 = arith.constant 2 : index
    %c0_18 = arith.constant 0 : index
    %c0_19 = arith.constant 0 : index
    %100 = vector.load %arg3[%c0_17, %c2, %c0_18, %c0_19] : memref<1x6x8x128xbf16, #tpu.memory_space<vmem>>, vector<1x1x8x128xbf16>
    %101 = vector.shape_cast %100 : vector<1x1x8x128xbf16> to vector<8x128xbf16>
    %102 = arith.extf %101 : vector<8x128xbf16> to vector<8x128xf32>
    %c2_i32 = arith.constant 2 : i32
    %103 = arith.addi %0, %c2_i32 : i32
    %c0_20 = arith.constant 0 : index
    %104 = arith.index_cast %103 : i32 to index
    %c0_21 = arith.constant 0 : index
    %c0_22 = arith.constant 0 : index
    %105 = vector.load %arg2[%c0_20, %104, %c0_21, %c0_22] : memref<1x14x16x128xbf16, #tpu.memory_space<vmem>>, vector<1x9x16x128xbf16>
    %106 = vector.shape_cast %105 : vector<1x9x16x128xbf16> to vector<9x16x128xbf16>
    %107 = arith.extf %106 : vector<9x16x128xbf16> to vector<9x16x128xf32>
    %108 = vector.extract_strided_slice %102 {offsets = [0, 0], sizes = [1, 128], strides = [1, 1]} : vector<8x128xf32> to vector<1x128xf32>
    %109 = vector.shape_cast %108 : vector<1x128xf32> to vector<128xf32>
    %110 = vector.shape_cast %109 : vector<128xf32> to vector<1x1x128xf32>
    %111 = vector.broadcast %110 : vector<1x1x128xf32> to vector<9x16x128xf32>
    %112 = arith.mulf %107, %111 : vector<9x16x128xf32>
    %113 = arith.addf %99, %112 : vector<9x16x128xf32>
    %c15_i32_23 = arith.constant 15 : i32
    %114 = tpu.dynamic_rotate %107 by %c15_i32_23 dim 1 : vector<9x16x128xf32>, i32 -> vector<9x16x128xf32>
    %115 = vector.extract_strided_slice %102 {offsets = [1, 0], sizes = [1, 128], strides = [1, 1]} : vector<8x128xf32> to vector<1x128xf32>
    %116 = vector.shape_cast %115 : vector<1x128xf32> to vector<128xf32>
    %117 = vector.shape_cast %116 : vector<128xf32> to vector<1x1x128xf32>
    %118 = vector.broadcast %117 : vector<1x1x128xf32> to vector<9x16x128xf32>
    %119 = arith.mulf %114, %118 : vector<9x16x128xf32>
    %120 = arith.addf %113, %119 : vector<9x16x128xf32>
    %c14_i32_24 = arith.constant 14 : i32
    %121 = tpu.dynamic_rotate %107 by %c14_i32_24 dim 1 : vector<9x16x128xf32>, i32 -> vector<9x16x128xf32>
    %122 = vector.extract_strided_slice %102 {offsets = [2, 0], sizes = [1, 128], strides = [1, 1]} : vector<8x128xf32> to vector<1x128xf32>
    %123 = vector.shape_cast %122 : vector<1x128xf32> to vector<128xf32>
    %124 = vector.shape_cast %123 : vector<128xf32> to vector<1x1x128xf32>
    %125 = vector.broadcast %124 : vector<1x1x128xf32> to vector<9x16x128xf32>
    %126 = arith.mulf %121, %125 : vector<9x16x128xf32>
    %127 = arith.addf %120, %126 : vector<9x16x128xf32>
    %c13_i32_25 = arith.constant 13 : i32
    %128 = tpu.dynamic_rotate %107 by %c13_i32_25 dim 1 : vector<9x16x128xf32>, i32 -> vector<9x16x128xf32>
    %129 = vector.extract_strided_slice %102 {offsets = [3, 0], sizes = [1, 128], strides = [1, 1]} : vector<8x128xf32> to vector<1x128xf32>
    %130 = vector.shape_cast %129 : vector<1x128xf32> to vector<128xf32>
    %131 = vector.shape_cast %130 : vector<128xf32> to vector<1x1x128xf32>
    %132 = vector.broadcast %131 : vector<1x1x128xf32> to vector<9x16x128xf32>
    %133 = arith.mulf %128, %132 : vector<9x16x128xf32>
    %134 = arith.addf %127, %133 : vector<9x16x128xf32>
    %c12_i32_26 = arith.constant 12 : i32
    %135 = tpu.dynamic_rotate %107 by %c12_i32_26 dim 1 : vector<9x16x128xf32>, i32 -> vector<9x16x128xf32>
    %136 = vector.extract_strided_slice %102 {offsets = [4, 0], sizes = [1, 128], strides = [1, 1]} : vector<8x128xf32> to vector<1x128xf32>
    %137 = vector.shape_cast %136 : vector<1x128xf32> to vector<128xf32>
    %138 = vector.shape_cast %137 : vector<128xf32> to vector<1x1x128xf32>
    %139 = vector.broadcast %138 : vector<1x1x128xf32> to vector<9x16x128xf32>
    %140 = arith.mulf %135, %139 : vector<9x16x128xf32>
    %141 = arith.addf %134, %140 : vector<9x16x128xf32>
    %c11_i32_27 = arith.constant 11 : i32
    %142 = tpu.dynamic_rotate %107 by %c11_i32_27 dim 1 : vector<9x16x128xf32>, i32 -> vector<9x16x128xf32>
    %143 = vector.extract_strided_slice %102 {offsets = [5, 0], sizes = [1, 128], strides = [1, 1]} : vector<8x128xf32> to vector<1x128xf32>
    %144 = vector.shape_cast %143 : vector<1x128xf32> to vector<128xf32>
    %145 = vector.shape_cast %144 : vector<128xf32> to vector<1x1x128xf32>
    %146 = vector.broadcast %145 : vector<1x1x128xf32> to vector<9x16x128xf32>
    %147 = arith.mulf %142, %146 : vector<9x16x128xf32>
    %148 = arith.addf %141, %147 : vector<9x16x128xf32>
    %c0_28 = arith.constant 0 : index
    %c3 = arith.constant 3 : index
    %c0_29 = arith.constant 0 : index
    %c0_30 = arith.constant 0 : index
    %149 = vector.load %arg3[%c0_28, %c3, %c0_29, %c0_30] : memref<1x6x8x128xbf16, #tpu.memory_space<vmem>>, vector<1x1x8x128xbf16>
    %150 = vector.shape_cast %149 : vector<1x1x8x128xbf16> to vector<8x128xbf16>
    %151 = arith.extf %150 : vector<8x128xbf16> to vector<8x128xf32>
    %c3_i32 = arith.constant 3 : i32
    %152 = arith.addi %0, %c3_i32 : i32
    %c0_31 = arith.constant 0 : index
    %153 = arith.index_cast %152 : i32 to index
    %c0_32 = arith.constant 0 : index
    %c0_33 = arith.constant 0 : index
    %154 = vector.load %arg2[%c0_31, %153, %c0_32, %c0_33] : memref<1x14x16x128xbf16, #tpu.memory_space<vmem>>, vector<1x9x16x128xbf16>
    %155 = vector.shape_cast %154 : vector<1x9x16x128xbf16> to vector<9x16x128xbf16>
    %156 = arith.extf %155 : vector<9x16x128xbf16> to vector<9x16x128xf32>
    %157 = vector.extract_strided_slice %151 {offsets = [0, 0], sizes = [1, 128], strides = [1, 1]} : vector<8x128xf32> to vector<1x128xf32>
    %158 = vector.shape_cast %157 : vector<1x128xf32> to vector<128xf32>
    %159 = vector.shape_cast %158 : vector<128xf32> to vector<1x1x128xf32>
    %160 = vector.broadcast %159 : vector<1x1x128xf32> to vector<9x16x128xf32>
    %161 = arith.mulf %156, %160 : vector<9x16x128xf32>
    %162 = arith.addf %148, %161 : vector<9x16x128xf32>
    %c15_i32_34 = arith.constant 15 : i32
    %163 = tpu.dynamic_rotate %156 by %c15_i32_34 dim 1 : vector<9x16x128xf32>, i32 -> vector<9x16x128xf32>
    %164 = vector.extract_strided_slice %151 {offsets = [1, 0], sizes = [1, 128], strides = [1, 1]} : vector<8x128xf32> to vector<1x128xf32>
    %165 = vector.shape_cast %164 : vector<1x128xf32> to vector<128xf32>
    %166 = vector.shape_cast %165 : vector<128xf32> to vector<1x1x128xf32>
    %167 = vector.broadcast %166 : vector<1x1x128xf32> to vector<9x16x128xf32>
    %168 = arith.mulf %163, %167 : vector<9x16x128xf32>
    %169 = arith.addf %162, %168 : vector<9x16x128xf32>
    %c14_i32_35 = arith.constant 14 : i32
    %170 = tpu.dynamic_rotate %156 by %c14_i32_35 dim 1 : vector<9x16x128xf32>, i32 -> vector<9x16x128xf32>
    %171 = vector.extract_strided_slice %151 {offsets = [2, 0], sizes = [1, 128], strides = [1, 1]} : vector<8x128xf32> to vector<1x128xf32>
    %172 = vector.shape_cast %171 : vector<1x128xf32> to vector<128xf32>
    %173 = vector.shape_cast %172 : vector<128xf32> to vector<1x1x128xf32>
    %174 = vector.broadcast %173 : vector<1x1x128xf32> to vector<9x16x128xf32>
    %175 = arith.mulf %170, %174 : vector<9x16x128xf32>
    %176 = arith.addf %169, %175 : vector<9x16x128xf32>
    %c13_i32_36 = arith.constant 13 : i32
    %177 = tpu.dynamic_rotate %156 by %c13_i32_36 dim 1 : vector<9x16x128xf32>, i32 -> vector<9x16x128xf32>
    %178 = vector.extract_strided_slice %151 {offsets = [3, 0], sizes = [1, 128], strides = [1, 1]} : vector<8x128xf32> to vector<1x128xf32>
    %179 = vector.shape_cast %178 : vector<1x128xf32> to vector<128xf32>
    %180 = vector.shape_cast %179 : vector<128xf32> to vector<1x1x128xf32>
    %181 = vector.broadcast %180 : vector<1x1x128xf32> to vector<9x16x128xf32>
    %182 = arith.mulf %177, %181 : vector<9x16x128xf32>
    %183 = arith.addf %176, %182 : vector<9x16x128xf32>
    %c12_i32_37 = arith.constant 12 : i32
    %184 = tpu.dynamic_rotate %156 by %c12_i32_37 dim 1 : vector<9x16x128xf32>, i32 -> vector<9x16x128xf32>
    %185 = vector.extract_strided_slice %151 {offsets = [4, 0], sizes = [1, 128], strides = [1, 1]} : vector<8x128xf32> to vector<1x128xf32>
    %186 = vector.shape_cast %185 : vector<1x128xf32> to vector<128xf32>
    %187 = vector.shape_cast %186 : vector<128xf32> to vector<1x1x128xf32>
    %188 = vector.broadcast %187 : vector<1x1x128xf32> to vector<9x16x128xf32>
    %189 = arith.mulf %184, %188 : vector<9x16x128xf32>
    %190 = arith.addf %183, %189 : vector<9x16x128xf32>
    %c11_i32_38 = arith.constant 11 : i32
    %191 = tpu.dynamic_rotate %156 by %c11_i32_38 dim 1 : vector<9x16x128xf32>, i32 -> vector<9x16x128xf32>
    %192 = vector.extract_strided_slice %151 {offsets = [5, 0], sizes = [1, 128], strides = [1, 1]} : vector<8x128xf32> to vector<1x128xf32>
    %193 = vector.shape_cast %192 : vector<1x128xf32> to vector<128xf32>
    %194 = vector.shape_cast %193 : vector<128xf32> to vector<1x1x128xf32>
    %195 = vector.broadcast %194 : vector<1x1x128xf32> to vector<9x16x128xf32>
    %196 = arith.mulf %191, %195 : vector<9x16x128xf32>
    %197 = arith.addf %190, %196 : vector<9x16x128xf32>
    %c0_39 = arith.constant 0 : index
    %c4 = arith.constant 4 : index
    %c0_40 = arith.constant 0 : index
    %c0_41 = arith.constant 0 : index
    %198 = vector.load %arg3[%c0_39, %c4, %c0_40, %c0_41] : memref<1x6x8x128xbf16, #tpu.memory_space<vmem>>, vector<1x1x8x128xbf16>
    %199 = vector.shape_cast %198 : vector<1x1x8x128xbf16> to vector<8x128xbf16>
    %200 = arith.extf %199 : vector<8x128xbf16> to vector<8x128xf32>
    %c4_i32 = arith.constant 4 : i32
    %201 = arith.addi %0, %c4_i32 : i32
    %c0_42 = arith.constant 0 : index
    %202 = arith.index_cast %201 : i32 to index
    %c0_43 = arith.constant 0 : index
    %c0_44 = arith.constant 0 : index
    %203 = vector.load %arg2[%c0_42, %202, %c0_43, %c0_44] : memref<1x14x16x128xbf16, #tpu.memory_space<vmem>>, vector<1x9x16x128xbf16>
    %204 = vector.shape_cast %203 : vector<1x9x16x128xbf16> to vector<9x16x128xbf16>
    %205 = arith.extf %204 : vector<9x16x128xbf16> to vector<9x16x128xf32>
    %206 = vector.extract_strided_slice %200 {offsets = [0, 0], sizes = [1, 128], strides = [1, 1]} : vector<8x128xf32> to vector<1x128xf32>
    %207 = vector.shape_cast %206 : vector<1x128xf32> to vector<128xf32>
    %208 = vector.shape_cast %207 : vector<128xf32> to vector<1x1x128xf32>
    %209 = vector.broadcast %208 : vector<1x1x128xf32> to vector<9x16x128xf32>
    %210 = arith.mulf %205, %209 : vector<9x16x128xf32>
    %211 = arith.addf %197, %210 : vector<9x16x128xf32>
    %c15_i32_45 = arith.constant 15 : i32
    %212 = tpu.dynamic_rotate %205 by %c15_i32_45 dim 1 : vector<9x16x128xf32>, i32 -> vector<9x16x128xf32>
    %213 = vector.extract_strided_slice %200 {offsets = [1, 0], sizes = [1, 128], strides = [1, 1]} : vector<8x128xf32> to vector<1x128xf32>
    %214 = vector.shape_cast %213 : vector<1x128xf32> to vector<128xf32>
    %215 = vector.shape_cast %214 : vector<128xf32> to vector<1x1x128xf32>
    %216 = vector.broadcast %215 : vector<1x1x128xf32> to vector<9x16x128xf32>
    %217 = arith.mulf %212, %216 : vector<9x16x128xf32>
    %218 = arith.addf %211, %217 : vector<9x16x128xf32>
    %c14_i32_46 = arith.constant 14 : i32
    %219 = tpu.dynamic_rotate %205 by %c14_i32_46 dim 1 : vector<9x16x128xf32>, i32 -> vector<9x16x128xf32>
    %220 = vector.extract_strided_slice %200 {offsets = [2, 0], sizes = [1, 128], strides = [1, 1]} : vector<8x128xf32> to vector<1x128xf32>
    %221 = vector.shape_cast %220 : vector<1x128xf32> to vector<128xf32>
    %222 = vector.shape_cast %221 : vector<128xf32> to vector<1x1x128xf32>
    %223 = vector.broadcast %222 : vector<1x1x128xf32> to vector<9x16x128xf32>
    %224 = arith.mulf %219, %223 : vector<9x16x128xf32>
    %225 = arith.addf %218, %224 : vector<9x16x128xf32>
    %c13_i32_47 = arith.constant 13 : i32
    %226 = tpu.dynamic_rotate %205 by %c13_i32_47 dim 1 : vector<9x16x128xf32>, i32 -> vector<9x16x128xf32>
    %227 = vector.extract_strided_slice %200 {offsets = [3, 0], sizes = [1, 128], strides = [1, 1]} : vector<8x128xf32> to vector<1x128xf32>
    %228 = vector.shape_cast %227 : vector<1x128xf32> to vector<128xf32>
    %229 = vector.shape_cast %228 : vector<128xf32> to vector<1x1x128xf32>
    %230 = vector.broadcast %229 : vector<1x1x128xf32> to vector<9x16x128xf32>
    %231 = arith.mulf %226, %230 : vector<9x16x128xf32>
    %232 = arith.addf %225, %231 : vector<9x16x128xf32>
    %c12_i32_48 = arith.constant 12 : i32
    %233 = tpu.dynamic_rotate %205 by %c12_i32_48 dim 1 : vector<9x16x128xf32>, i32 -> vector<9x16x128xf32>
    %234 = vector.extract_strided_slice %200 {offsets = [4, 0], sizes = [1, 128], strides = [1, 1]} : vector<8x128xf32> to vector<1x128xf32>
    %235 = vector.shape_cast %234 : vector<1x128xf32> to vector<128xf32>
    %236 = vector.shape_cast %235 : vector<128xf32> to vector<1x1x128xf32>
    %237 = vector.broadcast %236 : vector<1x1x128xf32> to vector<9x16x128xf32>
    %238 = arith.mulf %233, %237 : vector<9x16x128xf32>
    %239 = arith.addf %232, %238 : vector<9x16x128xf32>
    %c11_i32_49 = arith.constant 11 : i32
    %240 = tpu.dynamic_rotate %205 by %c11_i32_49 dim 1 : vector<9x16x128xf32>, i32 -> vector<9x16x128xf32>
    %241 = vector.extract_strided_slice %200 {offsets = [5, 0], sizes = [1, 128], strides = [1, 1]} : vector<8x128xf32> to vector<1x128xf32>
    %242 = vector.shape_cast %241 : vector<1x128xf32> to vector<128xf32>
    %243 = vector.shape_cast %242 : vector<128xf32> to vector<1x1x128xf32>
    %244 = vector.broadcast %243 : vector<1x1x128xf32> to vector<9x16x128xf32>
    %245 = arith.mulf %240, %244 : vector<9x16x128xf32>
    %246 = arith.addf %239, %245 : vector<9x16x128xf32>
    %c0_50 = arith.constant 0 : index
    %c5 = arith.constant 5 : index
    %c0_51 = arith.constant 0 : index
    %c0_52 = arith.constant 0 : index
    %247 = vector.load %arg3[%c0_50, %c5, %c0_51, %c0_52] : memref<1x6x8x128xbf16, #tpu.memory_space<vmem>>, vector<1x1x8x128xbf16>
    %248 = vector.shape_cast %247 : vector<1x1x8x128xbf16> to vector<8x128xbf16>
    %249 = arith.extf %248 : vector<8x128xbf16> to vector<8x128xf32>
    %c5_i32 = arith.constant 5 : i32
    %250 = arith.addi %0, %c5_i32 : i32
    %c0_53 = arith.constant 0 : index
    %251 = arith.index_cast %250 : i32 to index
    %c0_54 = arith.constant 0 : index
    %c0_55 = arith.constant 0 : index
    %252 = vector.load %arg2[%c0_53, %251, %c0_54, %c0_55] : memref<1x14x16x128xbf16, #tpu.memory_space<vmem>>, vector<1x9x16x128xbf16>
    %253 = vector.shape_cast %252 : vector<1x9x16x128xbf16> to vector<9x16x128xbf16>
    %254 = arith.extf %253 : vector<9x16x128xbf16> to vector<9x16x128xf32>
    %255 = vector.extract_strided_slice %249 {offsets = [0, 0], sizes = [1, 128], strides = [1, 1]} : vector<8x128xf32> to vector<1x128xf32>
    %256 = vector.shape_cast %255 : vector<1x128xf32> to vector<128xf32>
    %257 = vector.shape_cast %256 : vector<128xf32> to vector<1x1x128xf32>
    %258 = vector.broadcast %257 : vector<1x1x128xf32> to vector<9x16x128xf32>
    %259 = arith.mulf %254, %258 : vector<9x16x128xf32>
    %260 = arith.addf %246, %259 : vector<9x16x128xf32>
    %c15_i32_56 = arith.constant 15 : i32
    %261 = tpu.dynamic_rotate %254 by %c15_i32_56 dim 1 : vector<9x16x128xf32>, i32 -> vector<9x16x128xf32>
    %262 = vector.extract_strided_slice %249 {offsets = [1, 0], sizes = [1, 128], strides = [1, 1]} : vector<8x128xf32> to vector<1x128xf32>
    %263 = vector.shape_cast %262 : vector<1x128xf32> to vector<128xf32>
    %264 = vector.shape_cast %263 : vector<128xf32> to vector<1x1x128xf32>
    %265 = vector.broadcast %264 : vector<1x1x128xf32> to vector<9x16x128xf32>
    %266 = arith.mulf %261, %265 : vector<9x16x128xf32>
    %267 = arith.addf %260, %266 : vector<9x16x128xf32>
    %c14_i32_57 = arith.constant 14 : i32
    %268 = tpu.dynamic_rotate %254 by %c14_i32_57 dim 1 : vector<9x16x128xf32>, i32 -> vector<9x16x128xf32>
    %269 = vector.extract_strided_slice %249 {offsets = [2, 0], sizes = [1, 128], strides = [1, 1]} : vector<8x128xf32> to vector<1x128xf32>
    %270 = vector.shape_cast %269 : vector<1x128xf32> to vector<128xf32>
    %271 = vector.shape_cast %270 : vector<128xf32> to vector<1x1x128xf32>
    %272 = vector.broadcast %271 : vector<1x1x128xf32> to vector<9x16x128xf32>
    %273 = arith.mulf %268, %272 : vector<9x16x128xf32>
    %274 = arith.addf %267, %273 : vector<9x16x128xf32>
    %c13_i32_58 = arith.constant 13 : i32
    %275 = tpu.dynamic_rotate %254 by %c13_i32_58 dim 1 : vector<9x16x128xf32>, i32 -> vector<9x16x128xf32>
    %276 = vector.extract_strided_slice %249 {offsets = [3, 0], sizes = [1, 128], strides = [1, 1]} : vector<8x128xf32> to vector<1x128xf32>
    %277 = vector.shape_cast %276 : vector<1x128xf32> to vector<128xf32>
    %278 = vector.shape_cast %277 : vector<128xf32> to vector<1x1x128xf32>
    %279 = vector.broadcast %278 : vector<1x1x128xf32> to vector<9x16x128xf32>
    %280 = arith.mulf %275, %279 : vector<9x16x128xf32>
    %281 = arith.addf %274, %280 : vector<9x16x128xf32>
    %c12_i32_59 = arith.constant 12 : i32
    %282 = tpu.dynamic_rotate %254 by %c12_i32_59 dim 1 : vector<9x16x128xf32>, i32 -> vector<9x16x128xf32>
    %283 = vector.extract_strided_slice %249 {offsets = [4, 0], sizes = [1, 128], strides = [1, 1]} : vector<8x128xf32> to vector<1x128xf32>
    %284 = vector.shape_cast %283 : vector<1x128xf32> to vector<128xf32>
    %285 = vector.shape_cast %284 : vector<128xf32> to vector<1x1x128xf32>
    %286 = vector.broadcast %285 : vector<1x1x128xf32> to vector<9x16x128xf32>
    %287 = arith.mulf %282, %286 : vector<9x16x128xf32>
    %288 = arith.addf %281, %287 : vector<9x16x128xf32>
    %c11_i32_60 = arith.constant 11 : i32
    %289 = tpu.dynamic_rotate %254 by %c11_i32_60 dim 1 : vector<9x16x128xf32>, i32 -> vector<9x16x128xf32>
    %290 = vector.extract_strided_slice %249 {offsets = [5, 0], sizes = [1, 128], strides = [1, 1]} : vector<8x128xf32> to vector<1x128xf32>
    %291 = vector.shape_cast %290 : vector<1x128xf32> to vector<128xf32>
    %292 = vector.shape_cast %291 : vector<128xf32> to vector<1x1x128xf32>
    %293 = vector.broadcast %292 : vector<1x1x128xf32> to vector<9x16x128xf32>
    %294 = arith.mulf %289, %293 : vector<9x16x128xf32>
    %295 = arith.addf %288, %294 : vector<9x16x128xf32>
    %296 = vector.shape_cast %295 : vector<9x16x128xf32> to vector<144x128xf32>
    %297 = arith.truncf %296 : vector<144x128xf32> to vector<144x128xbf16>
    %c0_61 = arith.constant 0 : index
    %c0_62 = arith.constant 0 : index
    %298 = vector.load %arg4[%c0_61, %c0_62] : memref<128x128xbf16, #tpu.memory_space<vmem>>, vector<128x128xbf16>
    %cst_63 = arith.constant dense<0.000000e+00> : vector<144x128xf32>
    %299 = tpu.matmul %297, %298, %cst_63 {dimension_numbers = #tpu.dot_dimension_numbers<[1], [0], [0], [1], [0, 0, 1, 1], [], []>} : vector<144x128xbf16>, vector<128x128xbf16>, vector<144x128xf32> -> vector<144x128xf32>
    %c0_64 = arith.constant 0 : index
    %c0_65 = arith.constant 0 : index
    %300 = vector.load %arg5[%c0_64, %c0_65] : memref<1x128xf32, #tpu.memory_space<vmem>>, vector<1x128xf32>
    %301 = vector.broadcast %300 : vector<1x128xf32> to vector<144x128xf32>
    %302 = arith.mulf %299, %301 : vector<144x128xf32>
    %c0_66 = arith.constant 0 : index
    %c0_67 = arith.constant 0 : index
    %303 = vector.load %arg6[%c0_66, %c0_67] : memref<1x128xf32, #tpu.memory_space<vmem>>, vector<1x128xf32>
    %304 = vector.broadcast %303 : vector<1x128xf32> to vector<144x128xf32>
    %305 = arith.addf %302, %304 : vector<144x128xf32>
    %cst_68 = arith.constant 0.000000e+00 : f32
    %306 = vector.broadcast %cst_68 : f32 to vector<144x128xf32>
    %307 = arith.maximumf %305, %306 : vector<144x128xf32>
    %308 = arith.truncf %307 : vector<144x128xf32> to vector<144x128xbf16>
    %c0_69 = arith.constant 0 : index
    %c0_70 = arith.constant 0 : index
    %309 = vector.load %arg7[%c0_69, %c0_70] : memref<128x128xbf16, #tpu.memory_space<vmem>>, vector<128x128xbf16>
    %cst_71 = arith.constant dense<0.000000e+00> : vector<144x128xf32>
    %310 = tpu.matmul %308, %309, %cst_71 {dimension_numbers = #tpu.dot_dimension_numbers<[1], [0], [0], [1], [0, 0, 1, 1], [], []>} : vector<144x128xbf16>, vector<128x128xbf16>, vector<144x128xf32> -> vector<144x128xf32>
    %c0_72 = arith.constant 0 : index
    %c0_73 = arith.constant 0 : index
    %311 = vector.load %arg8[%c0_72, %c0_73] : memref<1x128xf32, #tpu.memory_space<vmem>>, vector<1x128xf32>
    %312 = vector.broadcast %311 : vector<1x128xf32> to vector<144x128xf32>
    %313 = arith.addf %310, %312 : vector<144x128xf32>
    %314 = vector.shape_cast %313 : vector<144x128xf32> to vector<9x16x128xf32>
    %c0_74 = arith.constant 0 : index
    %c0_75 = arith.constant 0 : index
    %c0_76 = arith.constant 0 : index
    %c0_77 = arith.constant 0 : index
    %315 = vector.load %arg9[%c0_74, %c0_75, %c0_76, %c0_77] : memref<1x9x16x128xf32, #tpu.memory_space<vmem>>, vector<1x9x16x128xf32>
    %316 = vector.shape_cast %315 : vector<1x9x16x128xf32> to vector<9x16x128xf32>
    %317 = vector.shape_cast %314 : vector<9x16x128xf32> to vector<1x9x16x128xf32>
    tpu.vector_store %arg9[%c0_74, %c0_75, %c0_76, %c0_77], %317 {strides = array<i32>} : memref<1x9x16x128xf32, #tpu.memory_space<vmem>>, vector<1x9x16x128xf32>,
    return
  }
  func.func @transform_0(%arg0: i32, %arg1: i32) -> (i32, i32, i32, i32) {
    %c0_i32 = arith.constant 0 : i32
    %c0_i32_0 = arith.constant 0 : i32
    %c0_i32_1 = arith.constant 0 : i32
    %c0_i32_2 = arith.constant 0 : i32
    return %arg0, %c0_i32, %c0_i32_0, %c0_i32_1 : i32, i32, i32, i32
  }
  func.func @transform_1(%arg0: i32, %arg1: i32) -> (i32, i32, i32, i32) {
    %c0_i32 = arith.constant 0 : i32
    %c0_i32_0 = arith.constant 0 : i32
    %c0_i32_1 = arith.constant 0 : i32
    %c0_i32_2 = arith.constant 0 : i32
    return %arg0, %c0_i32, %c0_i32_0, %c0_i32_1 : i32, i32, i32, i32
  }
  func.func @transform_2(%arg0: i32, %arg1: i32) -> (i32, i32) {
    %c0_i32 = arith.constant 0 : i32
    %c0_i32_0 = arith.constant 0 : i32
    %c0_i32_1 = arith.constant 0 : i32
    return %c0_i32, %c0_i32_0 : i32, i32
  }
  func.func @transform_3(%arg0: i32, %arg1: i32) -> (i32, i32) {
    %c0_i32 = arith.constant 0 : i32
    %c0_i32_0 = arith.constant 0 : i32
    %c0_i32_1 = arith.constant 0 : i32
    return %c0_i32, %c0_i32_0 : i32, i32
  }
  func.func @transform_4(%arg0: i32, %arg1: i32) -> (i32, i32) {
    %c0_i32 = arith.constant 0 : i32
    %c0_i32_0 = arith.constant 0 : i32
    %c0_i32_1 = arith.constant 0 : i32
    return %c0_i32, %c0_i32_0 : i32, i32
  }
  func.func @transform_5(%arg0: i32, %arg1: i32) -> (i32, i32) {
    %c0_i32 = arith.constant 0 : i32
    %c0_i32_0 = arith.constant 0 : i32
    %c0_i32_1 = arith.constant 0 : i32
    return %c0_i32, %c0_i32_0 : i32, i32
  }
  func.func @transform_6(%arg0: i32, %arg1: i32) -> (i32, i32) {
    %c0_i32 = arith.constant 0 : i32
    %c0_i32_0 = arith.constant 0 : i32
    %c0_i32_1 = arith.constant 0 : i32
    return %c0_i32, %c0_i32_0 : i32, i32
  }
  func.func @transform_7(%arg0: i32, %arg1: i32) -> (i32, i32, i32, i32) {
    %c0_i32 = arith.constant 0 : i32
    %c0_i32_0 = arith.constant 0 : i32
    %c0_i32_1 = arith.constant 0 : i32
    return %arg0, %arg1, %c0_i32, %c0_i32_0 : i32, i32, i32, i32
  }
}

</mosaic_0001>

<bundles_post_ra>
// kernel: depthwise_xcorr_forward.3
= control target key start
LH: loop header
LB: loop body
LE: loop exit
PB: predicated region body
PF: predicated region fallthrough
CT: control target
= control target key end

     0   :  { %9 = vsyncpa [#allocation3], 0  ;;  %s2349_s15 = smov 0   ;;  %s2351_s16 = smov 0   ;;  %s2629_s0 = inlined_call_operand.vmem [shape: bf16[2,8,8,128], index: 0, kind: input, shape index: {}]   ;;  %s2630_s1 = inlined_call_operand.hbm [shape: bf16[9,128,128], index: 1, kind: input, shape index: {}]   ;;  %s2631_s2 = inlined_call_operand.vmem [shape: f32[1,128], index: 2, kind: input, shape index: {}]   ;;  %s2632_s3 = inlined_call_operand.vmem [shape: f32[1,128], index: 3, kind: input, shape index: {}]   ;;  %s2633_s4 = inlined_call_operand.vmem [shape: bf16[2,6,8,128], index: 4, kind: output, shape index: {}]  }
   0x1   :  { %s2353_s17 = smov 0  }
   0x2 LB: > { %s1652_s18 = sadd.s32 4294967295, %s2317_s17   ;;  %s27_s19 = sadd.s32 1, %s2313_s16  ;;  %s2317_s17 = sphi %s2353_s17, %s15_s17   ;;  %s2313_s16 = sphi %s2351_s16, %s2637_s16   ;;  %s2309_s15 = sphi %s2349_s15, %s2636_s15  }
   0x3   : > { %p29_p0 = scmp.ge.s32.totalorder %s27_s19, 2  ;;  %p1654_p1 = scmp.ge.s32.totalorder %s2317_s17, 1 }
   0x4   : > { %p149_p2 = scmp.lt.s32.totalorder %s2317_s17, 3  ;;  %p2374_p4 = scmp.eq.s32.totalorder %s1652_s18, 0 }
   0x5   : > { %s2639_s19 = smov (%p29_p0, %s27_s19), 0  ;;  %s2319_s22 = smov [#allocation2]  }
   0x6   : > { %p2370_p3 = pnand %p1654_p1, %p149_p2  ;;  %s161_s23 = sshll.u32 %s2319_s22, 4  ;;  %s162_s23 = int_to_ptr.vmem [resolvable:$true] %s161_s23 }
   0x7   : > { %s2276_s24 = scalar_lea.vmem %s162_s23, 9216  ;;  %p2284_p11 = scmp.lt.s32.totalorder %s162_s23, %s162_s23 }
   0x8   : > { %p2149_p5 = pneg %p2370_p3  ;;  %p2277_p8 = scmp.ne.s32.totalorder %s162_s23, %s2276_s24 }
   0x9   : > { %p2285_p12 = scmp.lt.s32.totalorder %s2276_s24, %s2276_s24 }
   0xa   : > { %p2150_p6 = pnand %p2374_p4, %p2149_p5 }
   0xb   : > { %p2286_p13 = por %p2285_p12, %p2284_p11 }
   0xc   : > { %p2267_p7 = pneg %p2150_p6 }
   0xe   : > { %p2279_p9 = pnand %p2277_p8, %p2267_p7 }
  0x10   : > { %p2280_p10 = pneg %p2279_p9 }
  0x12   : > { %p2287_p0 = pnand %p2286_p13, %p2280_p10 }
  0x14   : > { %2290 = shalt.err (!%p2287_p0)
}
  0x15   : > { %s2320_s25 = smov 64   ;;  %s2321_s26 = smov 4  }
  0x16   : > { %2152 = dma.hbm_to_vmem [thread:$0]  (!%p2150_p6), %s2630_s1, 9216, %s162_s23, [#allocation3], %s2320_s25, %s2320_s25, %s2321_s26  }
  0x17   : > { %191 = sbr.rel (%p2370_p3) target bundleno = 409 (0x199), region = 36 }
  0x1c   : > { %2304 = dma.done.wait (%p2374_p4), [#allocation3], 9216  }
  0x1d   : > { %2306 = vsyncadd (%p2374_p4), [#allocation3], 4294958080  ;;  %v2322_v0 = vmov 0.0   ;;  %vm2323_vm0 = vmmov 0   ;;  %v2184_v1 = vld [vmem:[#allocation2 + $0x38] sm:$0xff]   ;;  %v2186_v3 = vld [vmem:[#allocation2 + $0x30] sm:$0xff]  }
  0x1e   : > { %1876 = vmatprep.subr.bf16.mxu0 %v2322_v0  ;;  %1904 = vmatprep.subr.bf16.mxu1 %v2322_v0  ;;  %v2185_v2 = vld [vmem:[#allocation2 + $0x78] sm:$0xff]   ;;  %v2187_v4 = vld [vmem:[#allocation2 + $0x70] sm:$0xff]   ;;  %p221_p1 = scmp.lt.s32.totalorder %s2309_s15, 1  ;;  %v2188_v5 = vld [vmem:[#allocation2 + $0x28] sm:$0xff]  }
  0x1f   : > { %1920 = vmatprep.mubr.msk.bf16.mxu1 %vm2323_vm0, %v2322_v0  ;;  %1892 = vmatprep.mubr.msk.bf16.mxu0 %vm2323_vm0, %v2322_v0  ;;  %v2189_v6 = vld [vmem:[#allocation2 + $0x68] sm:$0xff]   ;;  %v2190_v7 = vld [vmem:[#allocation2 + $0x20] sm:$0xff]   ;;  %v2192_v9 = vld [vmem:[#allocation2 + $0x18] sm:$0xff]  }
  0x20   : > { %1877 = vmatpush3.bf16.msra.mxu0 %v2184_v1  ;;  %1905 = vmatpush3.bf16.msra.mxu1 %v2185_v2  ;;  %s2641_s15 = smov (!%p221_p1, %s2309_s15), 1  ;;  %v2191_v8 = vld [vmem:[#allocation2 + $0x60] sm:$0xff]   ;;  %v2193_v10 = vld [vmem:[#allocation2 + $0x58] sm:$0xff]   ;;  %v2194_v11 = vld [vmem:[#allocation2 + $0x10] sm:$0xff]  }
  0x21   : > { %1878 = vmatprep.subr.bf16.mxu0 %v2322_v0  ;;  %1906 = vmatprep.subr.bf16.mxu1 %v2322_v0  ;;  %s1759_s29 = sshll.u32 %s2641_s15, 5  ;;  %v2195_v12 = vld [vmem:[#allocation2 + $0x50] sm:$0xff]   ;;  %v2196_v13 = vld [vmem:[#allocation2 + $0x8] sm:$0xff]   ;;  %v2198_v15 = vld [vmem:[#allocation2] sm:$0xff]   ;;  %s2144_s11 = smul.u32 24, %s2641_s15 }
  0x22   : > { %s2412_s6 = scalar_lea.vmem %s2629_s0, %s1759_s29  ;;  %v2197_v14 = vld [vmem:[#allocation2 + $0x48] sm:$0xff]   ;;  %v2199_v16 = vld [vmem:[#allocation2 + $0x40] sm:$0xff]   ;;  %v2201_v18 = vld [vmem:[#allocation2 + $0xb8] sm:$0xff]  }
  0x23   : > { %v2422_v17 = vld [vmem:[%s2412_s6] sm:$0xff]   ;;  %v2202_v19 = vld [vmem:[#allocation2 + $0xf8] sm:$0xff]   ;;  %v2203_v20 = vld [vmem:[#allocation2 + $0xb0] sm:$0xff]   ;;  %s234_s14 = scalar_lea.vmem %s2633_s4, %s2144_s11 }
  0x24   : > { %1879 = vmatpush3.bf16.msra.mxu0 %v2186_v3  ;;  %1907 = vmatpush3.bf16.msra.mxu1 %v2187_v4  ;;  %v2204_v21 = vld [vmem:[#allocation2 + $0xf0] sm:$0xff]   ;;  %v2205_v22 = vld [vmem:[#allocation2 + $0xa8] sm:$0xff]   ;;  %v2208_v25 = vld [vmem:[#allocation2 + $0xa0] sm:$0xff]  }
  0x25   : > { %1880 = vmatprep.subr.bf16.mxu0 %v2322_v0  ;;  %1908 = vmatprep.subr.bf16.mxu1 %v2322_v0  ;;  %v2435_v23 = vld [vmem:[%s2412_s6 + $0x8] sm:$0xff]   ;;  %v2209_v26 = vld [vmem:[#allocation2 + $0xe0] sm:$0xff]   ;;  %v2210_v27 = vld [vmem:[#allocation2 + $0x98] sm:$0xff]  }
  0x26   : > { %v2206_v24 = vld [vmem:[#allocation2 + $0xe8] sm:$0xff]   ;;  %v2448_v28 = vld [vmem:[%s2412_s6 + $0x10] sm:$0xff]   ;;  %v2211_v29 = vld [vmem:[#allocation2 + $0xd8] sm:$0xff]  }
  0x27   : > { %v2213_v30 = vld [vmem:[#allocation2 + $0x90] sm:$0xff]   ;;  %v2215_v32 = vld [vmem:[#allocation2 + $0x88] sm:$0xff]   ;;  %v2217_v34 = vld [vmem:[#allocation2 + $0x80] sm:$0xff]  }
  0x28   : > { %1881 = vmatpush3.bf16.msra.mxu0 %v2188_v5  ;;  %1909 = vmatpush3.bf16.msra.mxu1 %v2189_v6  ;;  %v2214_v31 = vld [vmem:[#allocation2 + $0xd0] sm:$0xff]   ;;  %v2216_v33 = vld [vmem:[#allocation2 + $0xc8] sm:$0xff]   ;;  %v2218_v35 = vld [vmem:[#allocation2 + $0xc0] sm:$0xff]  }
  0x29   : > { %1882 = vmatprep.subr.bf16.mxu0 %v2322_v0  ;;  %1910 = vmatprep.subr.bf16.mxu1 %v2322_v0  ;;  %v2465_v36 = vld [vmem:[%s2412_s6 + $0x4] sm:$0xff]   ;;  %v2220_v37 = vld [vmem:[#allocation2 + $0x138] sm:$0xff]   ;;  %v2222_v39 = vld [vmem:[#allocation2 + $0x130] sm:$0xff]  }
  0x2a   : > { %v2221_v38 = vld [vmem:[#allocation2 + $0x178] sm:$0xff]   ;;  %v2223_v40 = vld [vmem:[#allocation2 + $0x170] sm:$0xff]   ;;  %v2224_v41 = vld [vmem:[#allocation2 + $0x128] sm:$0xff]  }
  0x2b   : > { %v2478_v42 = vld [vmem:[%s2412_s6 + $0xc] sm:$0xff]   ;;  %v2227_v44 = vld [vmem:[#allocation2 + $0x120] sm:$0xff]   ;;  %v2229_v46 = vld [vmem:[#allocation2 + $0x118] sm:$0xff]  }
  0x2c   : > { %1883 = vmatpush3.bf16.msra.mxu0 %v2190_v7  ;;  %1911 = vmatpush3.bf16.msra.mxu1 %v2191_v8  ;;  %v2225_v43 = vld [vmem:[#allocation2 + $0x168] sm:$0xff]   ;;  %v2228_v45 = vld [vmem:[#allocation2 + $0x160] sm:$0xff]   ;;  %v2491_v47 = vld [vmem:[%s2412_s6 + $0x14] sm:$0xff]  }
  0x2d   : > { %1884 = vmatprep.subr.bf16.mxu0 %v2322_v0  ;;  %1912 = vmatprep.subr.bf16.mxu1 %v2322_v0  ;;  %v2230_v48 = vld [vmem:[#allocation2 + $0x158] sm:$0xff]   ;;  %v2232_v49 = vld [vmem:[#allocation2 + $0x110] sm:$0xff]   ;;  %v2234_v51 = vld [vmem:[#allocation2 + $0x108] sm:$0xff]  }
  0x2e   : > { %v2233_v50 = vld [vmem:[#allocation2 + $0x150] sm:$0xff]   ;;  %v2235_v52 = vld [vmem:[#allocation2 + $0x148] sm:$0xff]   ;;  %v2236_v53 = vld [vmem:[#allocation2 + $0x100] sm:$0xff]  }
  0x2f   : > { %v2237_v54 = vld [vmem:[#allocation2 + $0x140] sm:$0xff]   ;;  %v2238_v55 = vld [vmem:[#allocation2 + $0x1b8] sm:$0xff]   ;;  %v2240_v57 = vld [vmem:[#allocation2 + $0x1b0] sm:$0xff]  }
  0x30   : > { %1885 = vmatpush3.bf16.msra.mxu0 %v2192_v9  ;;  %1913 = vmatpush3.bf16.msra.mxu1 %v2193_v10  ;;  %v2239_v56 = vld [vmem:[#allocation2 + $0x1f8] sm:$0xff]   ;;  %v2241_v58 = vld [vmem:[#allocation2 + $0x1f0] sm:$0xff]   ;;  %v2242_v59 = vld [vmem:[#allocation2 + $0x1a8] sm:$0xff]  }
  0x31   : > { %1886 = vmatprep.subr.bf16.mxu0 %v2322_v0  ;;  %1914 = vmatprep.subr.bf16.mxu1 %v2322_v0  ;;  %v2243_v60 = vld [vmem:[#allocation2 + $0x1e8] sm:$0xff]   ;;  %v2244_v61 = vld [vmem:[#allocation2 + $0x1a0] sm:$0xff]   ;;  %v2246_v63 = vld [vmem:[#allocation2 + $0x198] sm:$0xff]  }
  0x32   : > { %v2245_v62 = vld [vmem:[#allocation2 + $0x1e0] sm:$0xff]   ;;  %v2247_v1 = vld [vmem:[#allocation2 + $0x1d8] sm:$0xff]   ;;  %v2248_v2 = vld [vmem:[#allocation2 + $0x190] sm:$0xff]  }
  0x33   : > { %v2249_v3 = vld [vmem:[#allocation2 + $0x1d0] sm:$0xff]   ;;  %v2250_v4 = vld [vmem:[#allocation2 + $0x188] sm:$0xff]   ;;  %v2252_v6 = vld [vmem:[#allocation2 + $0x180] sm:$0xff]  }
  0x34   : > { %1887 = vmatpush3.bf16.msra.mxu0 %v2194_v11  ;;  %1915 = vmatpush3.bf16.msra.mxu1 %v2195_v12  ;;  %v2251_v5 = vld [vmem:[#allocation2 + $0x1c8] sm:$0xff]   ;;  %v2253_v7 = vld [vmem:[#allocation2 + $0x1c0] sm:$0xff]   ;;  %v2255_v9 = vld [vmem:[#allocation2 + $0x238] sm:$0xff]  }
  0x35   : > { %1888 = vmatprep.subr.bf16.mxu0 %v2322_v0  ;;  %1916 = vmatprep.subr.bf16.mxu1 %v2322_v0  ;;  %v2254_v8 = vld [vmem:[%s2412_s6 + $0x8] sm:$0xff]   ;;  %v2256_v10 = vld [vmem:[#allocation2 + $0x230] sm:$0xff]  }
  0x36   : > { %v2257_v11 = vld [vmem:[%s2412_s6 + $0x10] sm:$0xff]   ;;  %v2258_v12 = vld [vmem:[#allocation2 + $0x228] sm:$0xff]  }
  0x38   : > { %1889 = vmatpush3.bf16.msra.mxu0 %v2196_v13  ;;  %1917 = vmatpush3.bf16.msra.mxu1 %v2197_v14  ;;  %v2259_v13 = vld [vmem:[#allocation2 + $0x220] sm:$0xff]   ;;  %v2260_v14 = vld [vmem:[%s2412_s6 + $0x18] sm:$0xff]  }
  0x39   : > { %1890 = vmatprep.subr.bf16.mxu0 %v2322_v0  ;;  %1918 = vmatprep.subr.bf16.mxu1 %v2322_v0 }
  0x3c   : > { %1891 = vmatpush3.bf16.msra.mxu0 %v2198_v15  ;;  %1919 = vmatpush3.bf16.msra.mxu1 %v2199_v16  ;;  %v2261_v15 = vld [vmem:[#allocation2 + $0x218] sm:$0xff]   ;;  %v2262_v16 = vld [vmem:[#allocation2 + $0x210] sm:$0xff]  }
  0x3d   : > { %1932 = vmatprep.subr.bf16.mxu0 %v2322_v0  ;;  %1960 = vmatprep.subr.bf16.mxu1 %v2322_v0 }
  0x3f   : > { %1893 = vmatmul.mubr.bf16.vlgmr.msra.gmra.mxu0 %v2422_v17  ;;  %1921 = vmatmul.mubr.bf16.vlgmr.msra.gmra.mxu1 %v2422_v17 }
  0x40   : > { %1933 = vmatpush3.bf16.msra.mxu0 %v2201_v18  ;;  %1961 = vmatpush3.bf16.msra.mxu1 %v2202_v19  ;;  %v2264_v18 = vld [vmem:[#allocation2 + $0x200] sm:$0xff]  }
  0x41   : > { %1934 = vmatprep.subr.bf16.mxu0 %v2322_v0  ;;  %1962 = vmatprep.subr.bf16.mxu1 %v2322_v0 }
  0x42   : > { %1924 = vmatprep.mubr.msk.bf16.mxu1 %vm2323_vm0, %v2322_v0  ;;  %1896 = vmatprep.mubr.msk.bf16.mxu0 %vm2323_vm0, %v2322_v0 }
  0x44   : > { %1935 = vmatpush3.bf16.msra.mxu0 %v2203_v20  ;;  %1963 = vmatpush3.bf16.msra.mxu1 %v2204_v21 }
  0x45   : > { %1936 = vmatprep.subr.bf16.mxu0 %v2322_v0  ;;  %1964 = vmatprep.subr.bf16.mxu1 %v2322_v0 }
  0x47   : > { %1897 = vmatmul.mubr.bf16.gmra.mxu0 %v2435_v23  ;;  %1925 = vmatmul.mubr.bf16.gmra.mxu1 %v2435_v23 }
  0x48   : > { %1937 = vmatpush3.bf16.msra.mxu0 %v2205_v22  ;;  %1965 = vmatpush3.bf16.msra.mxu1 %v2206_v24 }
  0x49   : > { %1938 = vmatprep.subr.bf16.mxu0 %v2322_v0  ;;  %1966 = vmatprep.subr.bf16.mxu1 %v2322_v0 }
  0x4a   : > { %1928 = vmatprep.mubr.msk.bf16.mxu1 %vm2323_vm0, %v2322_v0  ;;  %1900 = vmatprep.mubr.msk.bf16.mxu0 %vm2323_vm0, %v2322_v0 }
  0x4c   : > { %1939 = vmatpush3.bf16.msra.mxu0 %v2208_v25  ;;  %1967 = vmatpush3.bf16.msra.mxu1 %v2209_v26 }
  0x4d   : > { %1940 = vmatprep.subr.bf16.mxu0 %v2322_v0  ;;  %1968 = vmatprep.subr.bf16.mxu1 %v2322_v0 }
  0x4f   : > { %1901 = vmatmul.mubr.bf16.gmra.mxu0 %v2448_v28  ;;  %1929 = vmatmul.mubr.bf16.gmra.mxu1 %v2448_v28 }
  0x50   : > { %1941 = vmatpush3.bf16.msra.mxu0 %v2210_v27  ;;  %1969 = vmatpush3.bf16.msra.mxu1 %v2211_v29 }
  0x51   : > { %1942 = vmatprep.subr.bf16.mxu0 %v2322_v0  ;;  %1970 = vmatprep.subr.bf16.mxu1 %v2322_v0 }
  0x52   : > { %1948 = vmatprep.mubr.msk.bf16.mxu0 %vm2323_vm0, %v2322_v0  ;;  %1976 = vmatprep.mubr.msk.bf16.mxu1 %vm2323_vm0, %v2322_v0 }
  0x54   : > { %1943 = vmatpush3.bf16.msra.mxu0 %v2213_v30  ;;  %1971 = vmatpush3.bf16.msra.mxu1 %v2214_v31 }
  0x55   : > { %1944 = vmatprep.subr.bf16.mxu0 %v2322_v0  ;;  %1972 = vmatprep.subr.bf16.mxu1 %v2322_v0 }
  0x58   : > { %1945 = vmatpush3.bf16.msra.mxu0 %v2215_v32  ;;  %1973 = vmatpush3.bf16.msra.mxu1 %v2216_v33 }
  0x59   : > { %1946 = vmatprep.subr.bf16.mxu0 %v2322_v0  ;;  %1974 = vmatprep.subr.bf16.mxu1 %v2322_v0 }
  0x5c   : > { %1947 = vmatpush3.bf16.msra.mxu0 %v2217_v34  ;;  %1975 = vmatpush3.bf16.msra.mxu1 %v2218_v35 }
  0x5d   : > { %1988 = vmatprep.subr.bf16.mxu0 %v2322_v0  ;;  %2016 = vmatprep.subr.bf16.mxu1 %v2322_v0 }
  0x5f   : > { %1949 = vmatmul.mubr.bf16.vlgmr.msra.gmra.mxu0 %v2422_v17  ;;  %1977 = vmatmul.mubr.bf16.vlgmr.msra.gmra.mxu1 %v2465_v36  ;;  %v2263_v17 = vld [vmem:[#allocation2 + $0x208] sm:$0xff]  }
  0x60   : > { %1989 = vmatpush3.bf16.msra.mxu0 %v2220_v37  ;;  %2017 = vmatpush3.bf16.msra.mxu1 %v2221_v38 }
  0x61   : > { %1990 = vmatprep.subr.bf16.mxu0 %v2322_v0  ;;  %2018 = vmatprep.subr.bf16.mxu1 %v2322_v0 }
  0x62   : > { %1952 = vmatprep.mubr.msk.bf16.mxu0 %vm2323_vm0, %v2322_v0  ;;  %1980 = vmatprep.mubr.msk.bf16.mxu1 %vm2323_vm0, %v2322_v0 }
  0x64   : > { %1991 = vmatpush3.bf16.msra.mxu0 %v2222_v39  ;;  %2019 = vmatpush3.bf16.msra.mxu1 %v2223_v40 }
  0x65   : > { %1992 = vmatprep.subr.bf16.mxu0 %v2322_v0  ;;  %2020 = vmatprep.subr.bf16.mxu1 %v2322_v0 }
  0x67   : > { %1953 = vmatmul.mubr.bf16.gmra.mxu0 %v2435_v23  ;;  %1981 = vmatmul.mubr.bf16.gmra.mxu1 %v2478_v42 }
  0x68   : > { %1993 = vmatpush3.bf16.msra.mxu0 %v2224_v41  ;;  %2021 = vmatpush3.bf16.msra.mxu1 %v2225_v43 }
  0x69   : > { %1994 = vmatprep.subr.bf16.mxu0 %v2322_v0  ;;  %2022 = vmatprep.subr.bf16.mxu1 %v2322_v0 }
  0x6a   : > { %1956 = vmatprep.mubr.msk.bf16.mxu0 %vm2323_vm0, %v2322_v0  ;;  %1984 = vmatprep.mubr.msk.bf16.mxu1 %vm2323_vm0, %v2322_v0 }
  0x6c   : > { %1995 = vmatpush3.bf16.msra.mxu0 %v2227_v44  ;;  %2023 = vmatpush3.bf16.msra.mxu1 %v2228_v45 }
  0x6d   : > { %1996 = vmatprep.subr.bf16.mxu0 %v2322_v0  ;;  %2024 = vmatprep.subr.bf16.mxu1 %v2322_v0 }
  0x6f   : > { %1957 = vmatmul.mubr.bf16.gmra.mxu0 %v2448_v28  ;;  %1985 = vmatmul.mubr.bf16.gmra.mxu1 %v2491_v47 }
  0x70   : > { %1997 = vmatpush3.bf16.msra.mxu0 %v2229_v46  ;;  %2025 = vmatpush3.bf16.msra.mxu1 %v2230_v48 }
  0x71   : > { %1998 = vmatprep.subr.bf16.mxu0 %v2322_v0  ;;  %2026 = vmatprep.subr.bf16.mxu1 %v2322_v0 }
  0x72   : > { %2004 = vmatprep.mubr.msk.bf16.mxu0 %vm2323_vm0, %v2322_v0  ;;  %2032 = vmatprep.mubr.msk.bf16.mxu1 %vm2323_vm0, %v2322_v0 }
  0x74   : > { %1999 = vmatpush3.bf16.msra.mxu0 %v2232_v49  ;;  %2027 = vmatpush3.bf16.msra.mxu1 %v2233_v50 }
  0x75   : > { %2000 = vmatprep.subr.bf16.mxu0 %v2322_v0  ;;  %2028 = vmatprep.subr.bf16.mxu1 %v2322_v0 }
  0x78   : > { %2001 = vmatpush3.bf16.msra.mxu0 %v2234_v51  ;;  %2029 = vmatpush3.bf16.msra.mxu1 %v2235_v52 }
  0x79   : > { %2002 = vmatprep.subr.bf16.mxu0 %v2322_v0  ;;  %2030 = vmatprep.subr.bf16.mxu1 %v2322_v0 }
  0x7c   : > { %2003 = vmatpush3.bf16.msra.mxu0 %v2236_v53  ;;  %2031 = vmatpush3.bf16.msra.mxu1 %v2237_v54 }
  0x7d   : > { %2044 = vmatprep.subr.bf16.mxu0 %v2322_v0  ;;  %2072 = vmatprep.subr.bf16.mxu1 %v2322_v0 }
  0x7f   : > { %2005 = vmatmul.mubr.bf16.vlgmr.msra.gmra.mxu0 %v2465_v36  ;;  %2033 = vmatmul.mubr.bf16.vlgmr.msra.gmra.mxu1 %v2465_v36 }
  0x80   : > { %2045 = vmatpush3.bf16.msra.mxu0 %v2238_v55  ;;  %2073 = vmatpush3.bf16.msra.mxu1 %v2239_v56 }
  0x81   : > { %2046 = vmatprep.subr.bf16.mxu0 %v2322_v0  ;;  %2074 = vmatprep.subr.bf16.mxu1 %v2322_v0 }
  0x82   : > { %2008 = vmatprep.mubr.msk.bf16.mxu0 %vm2323_vm0, %v2322_v0  ;;  %2036 = vmatprep.mubr.msk.bf16.mxu1 %vm2323_vm0, %v2322_v0 }
  0x84   : > { %2047 = vmatpush3.bf16.msra.mxu0 %v2240_v57  ;;  %2075 = vmatpush3.bf16.msra.mxu1 %v2241_v58 }
  0x85   : > { %2048 = vmatprep.subr.bf16.mxu0 %v2322_v0  ;;  %2076 = vmatprep.subr.bf16.mxu1 %v2322_v0 }
  0x87   : > { %2009 = vmatmul.mubr.bf16.gmra.mxu0 %v2478_v42  ;;  %2037 = vmatmul.mubr.bf16.gmra.mxu1 %v2478_v42 }
  0x88   : > { %2049 = vmatpush3.bf16.msra.mxu0 %v2242_v59  ;;  %2077 = vmatpush3.bf16.msra.mxu1 %v2243_v60 }
  0x89   : > { %2050 = vmatprep.subr.bf16.mxu0 %v2322_v0  ;;  %2078 = vmatprep.subr.bf16.mxu1 %v2322_v0 }
  0x8a   : > { %2012 = vmatprep.mubr.msk.bf16.mxu0 %vm2323_vm0, %v2322_v0  ;;  %2040 = vmatprep.mubr.msk.bf16.mxu1 %vm2323_vm0, %v2322_v0 }
  0x8c   : > { %2051 = vmatpush3.bf16.msra.mxu0 %v2244_v61  ;;  %2079 = vmatpush3.bf16.msra.mxu1 %v2245_v62 }
  0x8d   : > { %2052 = vmatprep.subr.bf16.mxu0 %v2322_v0  ;;  %2080 = vmatprep.subr.bf16.mxu1 %v2322_v0 }
  0x8f   : > { %2013 = vmatmul.mubr.bf16.gmra.mxu0 %v2491_v47  ;;  %2041 = vmatmul.mubr.bf16.gmra.mxu1 %v2491_v47 }
  0x90   : > { %2053 = vmatpush3.bf16.msra.mxu0 %v2246_v63  ;;  %2081 = vmatpush3.bf16.msra.mxu1 %v2247_v1 }
  0x91   : > { %2054 = vmatprep.subr.bf16.mxu0 %v2322_v0  ;;  %2082 = vmatprep.subr.bf16.mxu1 %v2322_v0 }
  0x92   : > { %2060 = vmatprep.mubr.msk.bf16.mxu0 %vm2323_vm0, %v2322_v0  ;;  %2088 = vmatprep.mubr.msk.bf16.mxu1 %vm2323_vm0, %v2322_v0 }
  0x94   : > { %2055 = vmatpush3.bf16.msra.mxu0 %v2248_v2  ;;  %2083 = vmatpush3.bf16.msra.mxu1 %v2249_v3 }
  0x95   : > { %2056 = vmatprep.subr.bf16.mxu0 %v2322_v0  ;;  %2084 = vmatprep.subr.bf16.mxu1 %v2322_v0 }
  0x98   : > { %2057 = vmatpush3.bf16.msra.mxu0 %v2250_v4  ;;  %2085 = vmatpush3.bf16.msra.mxu1 %v2251_v5 }
  0x99   : > { %2058 = vmatprep.subr.bf16.mxu0 %v2322_v0  ;;  %2086 = vmatprep.subr.bf16.mxu1 %v2322_v0 }
  0x9c   : > { %2059 = vmatpush3.bf16.msra.mxu0 %v2252_v6  ;;  %2087 = vmatpush3.bf16.msra.mxu1 %v2253_v7 }
  0x9d   : > { %2100 = vmatprep.subr.bf16.mxu0 %v2322_v0  ;;  %2128 = vmatprep.subr.bf16.mxu1 %v2322_v0 }
  0x9f   : > { %2061 = vmatmul.mubr.bf16.vlgmr.msra.gmra.mxu0 %v2254_v8  ;;  %2089 = vmatmul.mubr.bf16.vlgmr.msra.gmra.mxu1 %v2254_v8 }
  0xa0   : > { %2101 = vmatpush3.bf16.msra.mxu0 %v2255_v9  ;;  %2136 = vmatpush3.bf16.msra.mxu1 %v2255_v9 }
  0xa1   : > { %2102 = vmatprep.subr.bf16.mxu0 %v2322_v0  ;;  %2129 = vmatprep.subr.bf16.mxu1 %v2322_v0 }
  0xa2   : > { %2064 = vmatprep.mubr.msk.bf16.mxu0 %vm2323_vm0, %v2322_v0  ;;  %2092 = vmatprep.mubr.msk.bf16.mxu1 %vm2323_vm0, %v2322_v0 }
  0xa4   : > { %2103 = vmatpush3.bf16.msra.mxu0 %v2256_v10  ;;  %2137 = vmatpush3.bf16.msra.mxu1 %v2256_v10 }
  0xa5   : > { %2104 = vmatprep.subr.bf16.mxu0 %v2322_v0  ;;  %2130 = vmatprep.subr.bf16.mxu1 %v2322_v0 }
  0xa7   : > { %2065 = vmatmul.mubr.bf16.gmra.mxu0 %v2257_v11  ;;  %2093 = vmatmul.mubr.bf16.gmra.mxu1 %v2257_v11 }
  0xa8   : > { %2105 = vmatpush3.bf16.msra.mxu0 %v2258_v12  ;;  %2138 = vmatpush3.bf16.msra.mxu1 %v2258_v12 }
  0xa9   : > { %2106 = vmatprep.subr.bf16.mxu0 %v2322_v0  ;;  %2131 = vmatprep.subr.bf16.mxu1 %v2322_v0 }
  0xaa   : > { %2068 = vmatprep.mubr.msk.bf16.mxu0 %vm2323_vm0, %v2322_v0  ;;  %2096 = vmatprep.mubr.msk.bf16.mxu1 %vm2323_vm0, %v2322_v0 }
  0xac   : > { %2107 = vmatpush3.bf16.msra.mxu0 %v2259_v13  ;;  %2139 = vmatpush3.bf16.msra.mxu1 %v2259_v13 }
  0xad   : > { %2108 = vmatprep.subr.bf16.mxu0 %v2322_v0  ;;  %2132 = vmatprep.subr.bf16.mxu1 %v2322_v0 }
  0xaf   : > { %2069 = vmatmul.mubr.bf16.gmra.mxu0 %v2260_v14  ;;  %2097 = vmatmul.mubr.bf16.gmra.mxu1 %v2260_v14 }
  0xb0   : > { %2109 = vmatpush3.bf16.msra.mxu0 %v2261_v15  ;;  %2140 = vmatpush3.bf16.msra.mxu1 %v2261_v15 }
  0xb1   : > { %2110 = vmatprep.subr.bf16.mxu0 %v2322_v0  ;;  %2133 = vmatprep.subr.bf16.mxu1 %v2322_v0 }
  0xb2   : > { %2116 = vmatprep.mubr.msk.bf16.mxu0 %vm2323_vm0, %v2322_v0  ;;  %2120 = vmatprep.mubr.msk.bf16.mxu1 %vm2323_vm0, %v2322_v0 }
  0xb4   : > { %2111 = vmatpush3.bf16.msra.mxu0 %v2262_v16  ;;  %2141 = vmatpush3.bf16.msra.mxu1 %v2262_v16 }
  0xb5   : > { %2112 = vmatprep.subr.bf16.mxu0 %v2322_v0  ;;  %2134 = vmatprep.subr.bf16.mxu1 %v2322_v0 }
  0xb8   : > { %2113 = vmatpush3.bf16.msra.mxu0 %v2263_v17  ;;  %2142 = vmatpush3.bf16.msra.mxu1 %v2263_v17 }
  0xb9   : > { %2114 = vmatprep.subr.bf16.mxu0 %v2322_v0  ;;  %2135 = vmatprep.subr.bf16.mxu1 %v2322_v0 }
  0xbc   : > { %2115 = vmatpush3.bf16.msra.mxu0 %v2264_v18  ;;  %2143 = vmatpush3.bf16.msra.mxu1 %v2264_v18 }
  0xbf   : > { %2117 = vmatmul.mubr.bf16.vlgmr.msra.gmra.mxu0 %v2254_v8  ;;  %2121 = vmatmul.mubr.bf16.vlgmr.msra.gmra.mxu1 %v2257_v11 }
  0xc0   : > { %2124 = vmatprep.mubr.msk.bf16.mxu1 %vm2323_vm0, %v2322_v0 }
  0xc7   : > { %2125 = vmatmul.mubr.bf16.gmra.mxu1 %v2260_v14 }
  0xff   : > { %v362_v19 = vpop.f32.mrf.mxu0  ;;  %v490_v20 = vpop.f32.mrf.mxu1 }
 0x100   : > { %v513_v21 = vrot.slane %v490_v20, 1 }
 0x101   : > { %v1894_v22 = vpop.f32.mrf.mxu0  ;;  %v1922_v23 = vpop.f32.mrf.mxu1 }
 0x102   : > { %v519_v24 = vadd.f32 %v513_v21, %v362_v19 }
 0x103   : > { %v365_v25 = vpop.f32.mrf.mxu0  ;;  %v493_v26 = vpop.f32.mrf.mxu1 }
 0x104   : > { %v514_v27 = vrot.slane %v493_v26, 1 }
 0x105   : > { %v1895_v28 = vpop.f32.mrf.mxu0  ;;  %v1923_v29 = vpop.f32.mrf.mxu1 }
 0x106   : > { %v520_v30 = vadd.f32 %v514_v27, %v365_v25 }
 0x107   : > { %v370_v31 = vpop.f32.mrf.mxu0  ;;  %v498_v32 = vpop.f32.mrf.mxu1 }
 0x108   : > { %v515_v33 = vrot.slane %v498_v32, 1 }
 0x109   : > { %v1898_v34 = vpop.f32.mrf.mxu0  ;;  %v1926_v35 = vpop.f32.mrf.mxu1 }
 0x10a   : > { %v521_v36 = vadd.f32 %v515_v33, %v370_v31 }
 0x10b   : > { %v373_v0 = vpop.f32.mrf.mxu0  ;;  %v501_v37 = vpop.f32.mrf.mxu1 }
 0x10c   : > { %v516_v38 = vrot.slane %v501_v37, 1 }
 0x10d   : > { %v1899_v39 = vpop.f32.mrf.mxu0  ;;  %v1927_v40 = vpop.f32.mrf.mxu1 }
 0x10e   : > { %v522_v41 = vadd.f32 %v516_v38, %v373_v0 }
 0x10f   : > { %v378_v42 = vpop.f32.mrf.mxu0  ;;  %v506_v43 = vpop.f32.mrf.mxu1 }
 0x110   : > { %v517_v44 = vrot.slane %v506_v43, 1 }
 0x111   : > { %v1902_v45 = vpop.f32.mrf.mxu0  ;;  %v1930_v46 = vpop.f32.mrf.mxu1 }
 0x112   : > { %v523_v47 = vadd.f32 %v517_v44, %v378_v42 }
 0x113   : > { %v381_v48 = vpop.f32.mrf.mxu0  ;;  %v509_v49 = vpop.f32.mrf.mxu1 }
 0x114   : > { %v518_v50 = vrot.slane %v509_v49, 1 }
 0x115   : > { %v1903_v51 = vpop.f32.mrf.mxu0  ;;  %v1931_v52 = vpop.f32.mrf.mxu1 }
 0x116   : > { %v524_v53 = vadd.f32 %v518_v50, %v381_v48 }
 0x11f   : > { %v624_v54 = vpop.f32.mrf.mxu0  ;;  %v785_v56 = vpop.f32.mrf.mxu1 }
 0x120   : > { %v647_v55 = vrot.slane %v624_v54, 2 }
 0x121   : > { %v1950_v57 = vpop.f32.mrf.mxu0  ;;  %v1978_v59 = vpop.f32.mrf.mxu1 }
 0x122   : > { %v653_v58 = vadd.f32 %v647_v55, %v519_v24 }
 0x123   : > { %v627_v60 = vpop.f32.mrf.mxu0  ;;  %v788_v63 = vpop.f32.mrf.mxu1 }
 0x124   : > { %v2574_v61 = vadd.f32 %v785_v56, %v653_v58  ;;  %v648_v62 = vrot.slane %v627_v60, 2 }
 0x125   : > { %v1951_v1 = vpop.f32.mrf.mxu0  ;;  %v1979_v3 = vpop.f32.mrf.mxu1 }
 0x126   : > { %v654_v2 = vadd.f32 %v648_v62, %v520_v30 }
 0x127   : > { %v632_v4 = vpop.f32.mrf.mxu0  ;;  %v793_v7 = vpop.f32.mrf.mxu1 }
 0x128   : > { %v2576_v5 = vadd.f32 %v788_v63, %v654_v2  ;;  %v649_v6 = vrot.slane %v632_v4, 2 }
 0x129   : > { %v1954_v8 = vpop.f32.mrf.mxu0  ;;  %v1982_v10 = vpop.f32.mrf.mxu1 }
 0x12a   : > { %v655_v9 = vadd.f32 %v649_v6, %v521_v36 }
 0x12b   : > { %v635_v11 = vpop.f32.mrf.mxu0  ;;  %v796_v14 = vpop.f32.mrf.mxu1 }
 0x12c   : > { %v2578_v12 = vadd.f32 %v793_v7, %v655_v9  ;;  %v650_v13 = vrot.slane %v635_v11, 2 }
 0x12d   : > { %v1955_v15 = vpop.f32.mrf.mxu0  ;;  %v1983_v17 = vpop.f32.mrf.mxu1 }
 0x12e   : > { %v656_v16 = vadd.f32 %v650_v13, %v522_v41 }
 0x12f   : > { %v640_v18 = vpop.f32.mrf.mxu0  ;;  %v801_v21 = vpop.f32.mrf.mxu1 }
 0x130   : > { %v2580_v19 = vadd.f32 %v796_v14, %v656_v16  ;;  %v651_v20 = vrot.slane %v640_v18, 2 }
 0x131   : > { %v1958_v22 = vpop.f32.mrf.mxu0  ;;  %v1986_v24 = vpop.f32.mrf.mxu1 }
 0x132   : > { %v657_v23 = vadd.f32 %v651_v20, %v523_v47 }
 0x133   : > { %v643_v25 = vpop.f32.mrf.mxu0  ;;  %v804_v28 = vpop.f32.mrf.mxu1 }
 0x134   : > { %v2582_v26 = vadd.f32 %v801_v21, %v657_v23  ;;  %v652_v27 = vrot.slane %v643_v25, 2 }
 0x135   : > { %v1959_v29 = vpop.f32.mrf.mxu0  ;;  %v1987_v31 = vpop.f32.mrf.mxu1 }
 0x136   : > { %v658_v30 = vadd.f32 %v652_v27, %v524_v53 }
 0x138   : > { %v2584_v32 = vadd.f32 %v804_v28, %v658_v30 }
 0x13f   : > { %v913_v33 = vpop.f32.mrf.mxu0  ;;  %v1047_v34 = vpop.f32.mrf.mxu1 }
 0x140   : > { %v936_v14 = vrot.slane %v913_v33, 1  ;;  %v1070_v22 = vrot.slane %v1047_v34, 2 }
 0x141   : > { %v2006_v35 = vpop.f32.mrf.mxu0  ;;  %v2034_v36 = vpop.f32.mrf.mxu1 }
 0x142   : > { %v942_v21 = vadd.f32 %v936_v14, %v2574_v61 }
 0x143   : > { %v916_v0 = vpop.f32.mrf.mxu0  ;;  %v1050_v37 = vpop.f32.mrf.mxu1 }
 0x144   : > { %v937_v23 = vrot.slane %v916_v0, 1  ;;  %v1076_v31 = vadd.f32 %v1070_v22, %v942_v21  ;;  %v1071_v33 = vrot.slane %v1050_v37, 2 }
 0x145   : > { %v2007_v38 = vpop.f32.mrf.mxu0  ;;  %v2035_v39 = vpop.f32.mrf.mxu1 }
 0x146   : > { %v943_v30 = vadd.f32 %v937_v23, %v2576_v5 }
 0x147   : > { %v921_v40 = vpop.f32.mrf.mxu0  ;;  %v1055_v41 = vpop.f32.mrf.mxu1 }
 0x148   : > { %v938_v17 = vrot.slane %v921_v40, 1  ;;  %v1072_v29 = vrot.slane %v1055_v41, 2  ;;  %v1077_v61 = vadd.f32 %v1071_v33, %v943_v30 }
 0x149   : > { %v2010_v42 = vpop.f32.mrf.mxu0  ;;  %v2038_v43 = vpop.f32.mrf.mxu1 }
 0x14a   : > { %v944_v28 = vadd.f32 %v938_v17, %v2578_v12 }
 0x14b   : > { %v924_v44 = vpop.f32.mrf.mxu0  ;;  %v1058_v45 = vpop.f32.mrf.mxu1 }
 0x14c   : > { %v939_v25 = vrot.slane %v924_v44, 1  ;;  %v1073_v36 = vrot.slane %v1058_v45, 2  ;;  %v1078_v42 = vadd.f32 %v1072_v29, %v944_v28 }
 0x14d   : > { %v2011_v46 = vpop.f32.mrf.mxu0  ;;  %v2039_v47 = vpop.f32.mrf.mxu1 }
 0x14e   : > { %v945_v35 = vadd.f32 %v939_v25, %v2580_v19 }
 0x14f   : > { %v929_v48 = vpop.f32.mrf.mxu0  ;;  %v2586_v49 = vpop.f32.mrf.mxu1 }
 0x150   : > { %v940_v38 = vrot.slane %v929_v48, 1  ;;  %v1079_v44 = vadd.f32 %v1073_v36, %v945_v35  ;;  %v1074_v41 = vrot.slane %v2586_v49, 2 }
 0x151   : > { %v2014_v50 = vpop.f32.mrf.mxu0  ;;  %v2042_v51 = vpop.f32.mrf.mxu1 }
 0x152   : > { %v946_v12 = vadd.f32 %v940_v38, %v2582_v26 }
 0x153   : > { %v2588_v52 = vpop.f32.mrf.mxu0  ;;  %v2590_v53 = vpop.f32.mrf.mxu1 }
 0x154   : > { %v941_v43 = vrot.slane %v2588_v52, 1  ;;  %v1075_v49 = vrot.slane %v2590_v53, 2 }
 0x155   : > { %v2015_v54 = vpop.f32.mrf.mxu0  ;;  %v2043_v55 = vpop.f32.mrf.mxu1 }
 0x156   : > { %v1755_v54 = vld [vmem:[%s2631_s2] ss:$0 sm:$0xff]  ;;  %v947_v26 = vadd.f32 %v941_v43, %v2584_v32 }
 0x157   : > { %v1756_v32 = vld [vmem:[%s2632_s3] ss:$0 sm:$0xff] }
 0x15f   : > { %v1208_v56 = vpop.f32.mrf.mxu0  ;;  %v1336_v57 = vpop.f32.mrf.mxu1 }
 0x160   : > { %v1231_v39 = vadd.f32 %v1208_v56, %v1076_v31  ;;  %v1359_v40 = vrot.slane %v1336_v57, 1 }
 0x161   : > { %v2062_v58 = vpop.f32.mrf.mxu0  ;;  %v2090_v59 = vpop.f32.mrf.mxu1 }
 0x162   : > { %v1365_v5 = vadd.f32 %v1359_v40, %v1231_v39  ;;  %v1080_v58 = vadd.f32 %v1074_v41, %v946_v12 }
 0x163   : > { %v1211_v60 = vpop.f32.mrf.mxu0  ;;  %v2592_v62 = vpop.f32.mrf.mxu1 }
 0x164   : > { %v1232_v46 = vadd.f32 %v1211_v60, %v1077_v61  ;;  %v1360_v19 = vrot.slane %v2592_v62, 1 }
 0x165   : > { %v2063_v63 = vpop.f32.mrf.mxu0  ;;  %v2091_v1 = vpop.f32.mrf.mxu1 }
 0x166   : > { %v1366_v62 = vadd.f32 %v1360_v19, %v1232_v46 }
 0x167   : > { %v1216_v2 = vpop.f32.mrf.mxu0  ;;  %v1344_v3 = vpop.f32.mrf.mxu1 }
 0x168   : > { %v1233_v34 = vadd.f32 %v1216_v2, %v1078_v42  ;;  %v1361_v0 = vrot.slane %v1344_v3, 1 }
 0x169   : > { %v2066_v4 = vpop.f32.mrf.mxu0  ;;  %v2094_v6 = vpop.f32.mrf.mxu1 }
 0x16a   : > { %v1367_v51 = vadd.f32 %v1361_v0, %v1233_v34 }
 0x16b   : > { %v1219_v7 = vpop.f32.mrf.mxu0  ;;  %v1347_v8 = vpop.f32.mrf.mxu1 }
 0x16c   : > { %v1234_v45 = vadd.f32 %v1219_v7, %v1079_v44  ;;  %v1362_v47 = vrot.slane %v1347_v8, 1 }
 0x16d   : > { %v2067_v9 = vpop.f32.mrf.mxu0  ;;  %v2095_v10 = vpop.f32.mrf.mxu1 }
 0x16e   : > { %v1368_v63 = vadd.f32 %v1362_v47, %v1234_v45  ;;  %v1081_v9 = vadd.f32 %v1075_v49, %v947_v26 }
 0x16f   : > { %v1224_v11 = vpop.f32.mrf.mxu0  ;;  %v2594_v13 = vpop.f32.mrf.mxu1 }
 0x170   : > { %v1235_v4 = vadd.f32 %v1224_v11, %v1080_v58  ;;  %v1363_v6 = vrot.slane %v2594_v13, 1 }
 0x171   : > { %v2070_v15 = vpop.f32.mrf.mxu0  ;;  %v2098_v16 = vpop.f32.mrf.mxu1 }
 0x172   : > { %v1369_v23 = vadd.f32 %v1363_v6, %v1235_v4 }
 0x173   : > { %v1227_v18 = vpop.f32.mrf.mxu0  ;;  %v2596_v20 = vpop.f32.mrf.mxu1 }
 0x174   : > { %v1236_v16 = vadd.f32 %v1227_v18, %v1081_v9  ;;  %v1364_v17 = vrot.slane %v2596_v20, 1 }
 0x175   : > { %v2071_v24 = vpop.f32.mrf.mxu0  ;;  %v2099_v27 = vpop.f32.mrf.mxu1 }
 0x176   : > { %v1370_v31 = vadd.f32 %v1364_v17, %v1236_v16 }
 0x17f   : > { %v1470_v37 = vpop.f32.mrf.mxu0  ;;  %v1478_v50 = vpop.f32.mrf.mxu1 }
 0x180   : > { %v1493_v48 = vrot.slane %v1470_v37, 2  ;;  %v1495_v52 = vrot.slane %v1478_v50, 2 }
 0x181   : > { %v2118_v55 = vpop.f32.mrf.mxu0  ;;  %v2122_v57 = vpop.f32.mrf.mxu1 }
 0x182   : > { %v1499_v56 = vadd.f32 %v1493_v48, %v1365_v5  ;;  %v1501_v59 = vadd.f32 %v1495_v52, %v1367_v51 }
 0x183   : > { %v1473_v60 = vpop.f32.mrf.mxu0  ;;  %v1481_v3 = vpop.f32.mrf.mxu1 }
 0x184   : > { %v1512_v1 = vmul.f32 %v1755_v54, %v1499_v56  ;;  %v1494_v2 = vrot.slane %v1473_v60, 2  ;;  %v1514_v7 = vmul.f32 %v1755_v54, %v1501_v59  ;;  %v1496_v53 = vrot.slane %v1481_v3, 2 }
 0x185   : > { %v2119_v8 = vpop.f32.mrf.mxu0  ;;  %v2123_v14 = vpop.f32.mrf.mxu1 }
 0x186   : > { %v1500_v10 = vadd.f32 %v1494_v2, %v1366_v62  ;;  %v1502_v15 = vadd.f32 %v1496_v53, %v1368_v63  ;;  %v1525_v21 = vadd.f32 %v1756_v32, %v1512_v1  ;;  %v1527_v13 = vadd.f32 %v1756_v32, %v1514_v7 }
 0x187   : > { %v1486_v11 = vpop.f32.mrf.mxu1 }
 0x188   : > { %v1513_v22 = vmul.f32 %v1755_v54, %v1500_v10  ;;  %v1515_v24 = vmul.f32 %v1755_v54, %v1502_v15  ;;  %v1497_v25 = vrot.slane %v1486_v11, 2  ;;  %v1531_v33 = vmax.f32 %v1525_v21, 0.0 }
 0x189   : > { %v2126_v28 = vpop.f32.mrf.mxu1  ;;  %v1533_v38 = vmax.f32 %v1527_v13, 0.0 }
 0x18a   : > { %v1526_v27 = vadd.f32 %v1756_v32, %v1513_v22  ;;  %v1528_v29 = vadd.f32 %v1756_v32, %v1515_v24  ;;  %v1503_v30 = vadd.f32 %v1497_v25, %v1369_v23 }
 0x18b   : > { %v1489_v36 = vpop.f32.mrf.mxu1 }
 0x18c   : > { %v1532_v35 = vmax.f32 %v1526_v27, 0.0  ;;  %v1534_v18 = vmax.f32 %v1528_v29, 0.0  ;;  %v1516_v20 = vmul.f32 %v1755_v54, %v1503_v30  ;;  %v1498_v39 = vrot.slane %v1489_v36, 2 }
 0x18d   : > { %v2127_v42 = vpop.f32.mrf.mxu1 }
 0x18e   : > { %v1763_v40 = vpack.c.bf16 %v1532_v35, %v1531_v33  ;;  %v1768_v61 = vpack.c.bf16 %v1534_v18, %v1533_v38  ;;  %v1504_v34 = vadd.f32 %v1498_v39, %v1370_v31  ;;  %v1529_v0 = vadd.f32 %v1756_v32, %v1516_v20 }
 0x190   : > { %1764 = vst [vmem:[%s234_s14] sm:$0xff] %v1763_v40   ;;  %1775 = vst [vmem:[%s234_s14 + $0x8] sm:$0xff] %v1768_v61   ;;  %v1517_v43 = vmul.f32 %v1755_v54, %v1504_v34  ;;  %v1535_v12 = vmax.f32 %v1529_v0, 0.0 }
 0x192   : > { %v1530_v44 = vadd.f32 %v1756_v32, %v1517_v43 }
 0x194   : > { %v1536_v41 = vmax.f32 %v1530_v44, 0.0 }
 0x196   : > { %v1773_v5 = vpack.c.bf16 %v1536_v41, %v1535_v12 }
 0x198   : > { %1776 = vst [vmem:[%s234_s14 + $0x10] sm:$0xff] %v1773_v5  }
 0x199 PF: > { %s15_s17 = sadd.s32 1, %s2317_s17   ;;  %s2636_s15 = smov %s2313_s16 }
 0x19a   : > { %p12_p2 = scmp.ge.s32.totalorder %s15_s17, 4   ;;  %s2637_s16 = smov %s2639_s19 }
 0x19c   :  { %14 = sbr.rel (!%p12_p2) target bundleno = 2 (0x2), region = 82 }
 0x1a1   :  { %1579 = vsyncpa [#allocation3], 1 }
 0x1a2   :  { %1581 = vsyncpa [#allocation3 + $0x1], 1 }

// kernel: depthwise_xcorr_forward.4
= control target key start
LH: loop header
LB: loop body
LE: loop exit
PB: predicated region body
PF: predicated region fallthrough
CT: control target
= control target key end

     0   :  { %s4636_s15 = smov 0   ;;  %s4638_s16 = smov 0   ;;  %s6081_s0 = inlined_call_operand.vmem [shape: bf16[2,16,16,128], index: 0, kind: input, shape index: {}]   ;;  %s6082_s1 = inlined_call_operand.vmem [shape: bf16[9,128,128], index: 1, kind: input, shape index: {}]   ;;  %s6083_s2 = inlined_call_operand.vmem [shape: f32[1,128], index: 2, kind: input, shape index: {}]   ;;  %s6084_s3 = inlined_call_operand.vmem [shape: f32[1,128], index: 3, kind: input, shape index: {}]   ;;  %s6085_s4 = inlined_call_operand.vmem [shape: bf16[2,14,16,128], index: 4, kind: output, shape index: {}]  }
   0x1   :  { %s4640_s17 = smov 0  }
   0x2 LB: > { %s26_s18 = sadd.s32 1, %s4605_s16  ;;  %p3392_p0 = scmp.ge.s32.totalorder %s4609_s17, 1  ;;  %s4609_s17 = sphi %s4640_s17, %s14_s17   ;;  %s4605_s16 = sphi %s4638_s16, %s6123_s16   ;;  %s4601_s15 = sphi %s4636_s15, %s6122_s15  }
   0x3   : > { %p28_p1 = scmp.ge.s32.totalorder %s26_s18, 2  ;;  %p176_p2 = scmp.lt.s32.totalorder %s4609_s17, 3 }
   0x5   : > { %s6125_s18 = smov (%p28_p1, %s26_s18), 0  ;;  %p177_p3 = pnand %p3392_p0, %p176_p2 }
   0x7   : > { %180 = sbr.rel (%p177_p3) target bundleno = 518 (0x206), region = 36 }
   0xc   : > { %v4473_v0 = vld [vmem:[%s6082_s1 + $0x38] sm:$0xff]   ;;  %p207_p4 = scmp.lt.s32.totalorder %s4601_s15, 1  ;;  %v4474_v1 = vld [vmem:[%s6082_s1 + $0x30] sm:$0xff]   ;;  %v4475_v2 = vld [vmem:[%s6082_s1 + $0x28] sm:$0xff]  }
   0xd   : > { %4036 = vmatprep.subr.bf16.mxu0 %v4473_v0  ;;  %4432 = vmatprep.subr.bf16.mxu1 %v4473_v0  ;;  %v4476_v3 = vld [vmem:[%s6082_s1 + $0x20] sm:$0xff]   ;;  %v4477_v6 = vld [vmem:[%s6082_s1 + $0x18] sm:$0xff]   ;;  %v4478_v7 = vld [vmem:[%s6082_s1 + $0x10] sm:$0xff]  }
   0xe   : > { %s6127_s15 = smov (!%p207_p4, %s4601_s15), 1  ;;  %4037 = vmatpush3.bf16.msra.mxu0 %v4473_v0  ;;  %4440 = vmatpush3.bf16.msra.mxu1 %v4473_v0  ;;  %v4479_v8 = vld [vmem:[%s6082_s1 + $0x8] sm:$0xff]   ;;  %v4480_v9 = vld [vmem:[%s6082_s1] sm:$0xff]   ;;  %v4485_v10 = vld [vmem:[%s6082_s1 + $0x78] sm:$0xff]  }
   0xf   : > { %4038 = vmatprep.subr.bf16.mxu0 %v4474_v1  ;;  %4433 = vmatprep.subr.bf16.mxu1 %v4474_v1  ;;  %s3726_s25 = sshll.u32 %s6127_s15, 7  ;;  %v4486_v12 = vld [vmem:[%s6082_s1 + $0xb8] sm:$0xff]   ;;  %v4487_v14 = vld [vmem:[%s6082_s1 + $0x70] sm:$0xff]   ;;  %v4491_v18 = vld [vmem:[%s6082_s1 + $0x68] sm:$0xff]   ;;  %s4448_s22 = smul.u32 112, %s6127_s15 }
  0x10   : > { %s4669_s28 = scalar_lea.vmem %s6081_s0, %s3726_s25  ;;  %v4488_v15 = vld [vmem:[%s6082_s1 + $0xb0] sm:$0xff]   ;;  %v4492_v20 = vld [vmem:[%s6082_s1 + $0xa8] sm:$0xff]   ;;  %v4495_v22 = vld [vmem:[%s6082_s1 + $0x60] sm:$0xff]  }
  0x11   : > { %v4675_v4 = vld [vmem:[%s4669_s28] sm:$0xff]   ;;  %v4698_v11 = vld [vmem:[%s4669_s28 + $0x8] sm:$0xff]   ;;  %v4713_v16 = vld [vmem:[%s4669_s28 + $0x10] sm:$0xff]   ;;  %s5847_s24 = scalar_lea.vmem %s6085_s4, %s4448_s22 }
  0x12   : > { %4039 = vmatpush3.bf16.msra.mxu0 %v4474_v1  ;;  %4441 = vmatpush3.bf16.msra.mxu1 %v4474_v1  ;;  %v4678_v5 = vld [vmem:[%s4669_s28 + $0x40] sm:$0xff]   ;;  %v4704_v13 = vld [vmem:[%s4669_s28 + $0x48] sm:$0xff]   ;;  %v4716_v17 = vld [vmem:[%s4669_s28 + $0x50] sm:$0xff]  }
  0x13   : > { %4040 = vmatprep.subr.bf16.mxu0 %v4475_v2  ;;  %4434 = vmatprep.subr.bf16.mxu1 %v4475_v2  ;;  %v4724_v19 = vld [vmem:[%s4669_s28 + $0x18] sm:$0xff]   ;;  %v4496_v23 = vld [vmem:[%s6082_s1 + $0xa0] sm:$0xff]   ;;  %v4756_v28 = vld [vmem:[%s4669_s28 + $0x28] sm:$0xff]  }
  0x14   : > { %4052 = vmatprep.mubr.bf16.mxu0 %v4675_v4  ;;  %4068 = vmatprep.mubr.bf16.mxu1 %v4678_v5  ;;  %v4732_v21 = vld [vmem:[%s4669_s28 + $0x58] sm:$0xff]   ;;  %v4741_v24 = vld [vmem:[%s4669_s28 + $0x20] sm:$0xff]   ;;  %v4760_v29 = vld [vmem:[%s4669_s28 + $0x68] sm:$0xff]  }
  0x15   : > { %v4744_v25 = vld [vmem:[%s4669_s28 + $0x60] sm:$0xff]   ;;  %v4499_v26 = vld [vmem:[%s6082_s1 + $0x58] sm:$0xff]   ;;  %v4503_v30 = vld [vmem:[%s6082_s1 + $0x50] sm:$0xff]  }
  0x16   : > { %4041 = vmatpush3.bf16.msra.mxu0 %v4475_v2  ;;  %4442 = vmatpush3.bf16.msra.mxu1 %v4475_v2  ;;  %v4500_v27 = vld [vmem:[%s6082_s1 + $0x98] sm:$0xff]   ;;  %v4504_v31 = vld [vmem:[%s6082_s1 + $0x90] sm:$0xff]   ;;  %v4507_v33 = vld [vmem:[%s6082_s1 + $0x48] sm:$0xff]  }
  0x17   : > { %4042 = vmatprep.subr.bf16.mxu0 %v4476_v3  ;;  %4435 = vmatprep.subr.bf16.mxu1 %v4476_v3  ;;  %v4769_v32 = vld [vmem:[%s4669_s28 + $0x30] sm:$0xff]   ;;  %v4508_v34 = vld [vmem:[%s6082_s1 + $0x88] sm:$0xff]   ;;  %v4782_v35 = vld [vmem:[%s4669_s28 + $0x38] sm:$0xff]  }
  0x18   : > { %v4509_v36 = vld [vmem:[%s6082_s1 + $0x40] sm:$0xff]   ;;  %v4511_v38 = vld [vmem:[%s6082_s1 + $0xf8] sm:$0xff]   ;;  %v4513_v40 = vld [vmem:[%s6082_s1 + $0xf0] sm:$0xff]  }
  0x19   : > { %v4510_v37 = vld [vmem:[%s6082_s1 + $0x80] sm:$0xff]   ;;  %v4512_v39 = vld [vmem:[%s6082_s1 + $0x138] sm:$0xff]   ;;  %v4514_v41 = vld [vmem:[%s6082_s1 + $0x130] sm:$0xff]  }
  0x1a   : > { %4043 = vmatpush3.bf16.msra.mxu0 %v4476_v3  ;;  %4443 = vmatpush3.bf16.msra.mxu1 %v4476_v3  ;;  %v4515_v42 = vld [vmem:[%s6082_s1 + $0xe8] sm:$0xff]   ;;  %v4517_v44 = vld [vmem:[%s6082_s1 + $0xe0] sm:$0xff]   ;;  %v4519_v46 = vld [vmem:[%s6082_s1 + $0xd8] sm:$0xff]  }
  0x1b   : > { %4044 = vmatprep.subr.bf16.mxu0 %v4477_v6  ;;  %4436 = vmatprep.subr.bf16.mxu1 %v4477_v6  ;;  %v4516_v43 = vld [vmem:[%s6082_s1 + $0x128] sm:$0xff]   ;;  %v4518_v45 = vld [vmem:[%s6082_s1 + $0x120] sm:$0xff]   ;;  %v4520_v47 = vld [vmem:[%s6082_s1 + $0x118] sm:$0xff]  }
  0x1c   : > { %v4521_v48 = vld [vmem:[%s6082_s1 + $0xd0] sm:$0xff]   ;;  %v4523_v50 = vld [vmem:[%s6082_s1 + $0xc8] sm:$0xff]   ;;  %v4525_v52 = vld [vmem:[%s6082_s1 + $0xc0] sm:$0xff]  }
  0x1d   : > { %v4522_v49 = vld [vmem:[%s6082_s1 + $0x110] sm:$0xff]   ;;  %v4524_v51 = vld [vmem:[%s6082_s1 + $0x108] sm:$0xff]   ;;  %v4526_v53 = vld [vmem:[%s6082_s1 + $0x100] sm:$0xff]  }
  0x1e   : > { %4045 = vmatpush3.bf16.msra.mxu0 %v4477_v6  ;;  %4444 = vmatpush3.bf16.msra.mxu1 %v4477_v6  ;;  %v4529_v54 = vld [vmem:[%s6082_s1 + $0x178] sm:$0xff]   ;;  %v4871_v56 = vld [vmem:[%s4669_s28 + $0x8] sm:$0xff]   ;;  %v4878_v57 = vld [vmem:[%s4669_s28 + $0x10] sm:$0xff]  }
  0x1f   : > { %4046 = vmatprep.subr.bf16.mxu0 %v4478_v7  ;;  %4437 = vmatprep.subr.bf16.mxu1 %v4478_v7  ;;  %v4530_v55 = vld [vmem:[%s6082_s1 + $0x1b8] sm:$0xff]   ;;  %v4532_v59 = vld [vmem:[%s6082_s1 + $0x170] sm:$0xff]   ;;  %v4535_v61 = vld [vmem:[%s6082_s1 + $0x168] sm:$0xff]  }
  0x20   : > { %v4881_v58 = vld [vmem:[%s4669_s28 + $0x18] sm:$0xff]   ;;  %v4534_v60 = vld [vmem:[%s6082_s1 + $0x1b0] sm:$0xff]   ;;  %v4538_v62 = vld [vmem:[%s6082_s1 + $0x1a8] sm:$0xff]  }
  0x21   : > { %v4900_v63 = vld [vmem:[%s4669_s28 + $0x20] sm:$0xff]   ;;  %v4903_v0 = vld [vmem:[%s4669_s28 + $0x28] sm:$0xff]   ;;  %v4543_v3 = vld [vmem:[%s6082_s1 + $0x158] sm:$0xff]  }
  0x22   : > { %4047 = vmatpush3.bf16.msra.mxu0 %v4478_v7  ;;  %4445 = vmatpush3.bf16.msra.mxu1 %v4478_v7  ;;  %v4539_v1 = vld [vmem:[%s6082_s1 + $0x160] sm:$0xff]   ;;  %v4925_v6 = vld [vmem:[%s4669_s28 + $0x38] sm:$0xff]   ;;  %v4547_v7 = vld [vmem:[%s6082_s1 + $0x150] sm:$0xff]  }
  0x23   : > { %4048 = vmatprep.subr.bf16.mxu0 %v4479_v8  ;;  %4438 = vmatprep.subr.bf16.mxu1 %v4479_v8  ;;  %v4541_v2 = vld [vmem:[%s6082_s1 + $0x1a0] sm:$0xff]  }
  0x26   : > { %4049 = vmatpush3.bf16.msra.mxu0 %v4479_v8  ;;  %4446 = vmatpush3.bf16.msra.mxu1 %v4479_v8  ;;  %v4548_v8 = vld [vmem:[%s6082_s1 + $0x190] sm:$0xff]  }
  0x27   : > { %4050 = vmatprep.subr.bf16.mxu0 %v4480_v9  ;;  %4439 = vmatprep.subr.bf16.mxu1 %v4480_v9 }
  0x2a   : > { %4051 = vmatpush3.bf16.msra.mxu0 %v4480_v9  ;;  %4447 = vmatpush3.bf16.msra.mxu1 %v4480_v9  ;;  %v4551_v9 = vld [vmem:[%s6082_s1 + $0x148] sm:$0xff]  }
  0x2b   : > { %4080 = vmatprep.subr.bf16.mxu1 %v4485_v10  ;;  %4124 = vmatprep.subr.bf16.mxu0 %v4486_v12 }
  0x2d   : > { %4053 = vmatmul.mubr.bf16.vlgmr.msra.gmra.mxu0 %v4698_v11  ;;  %4069 = vmatmul.mubr.bf16.vlgmr.msra.gmra.mxu1 %v4704_v13 }
  0x2e   : > { %4081 = vmatpush3.bf16.msra.mxu1 %v4485_v10  ;;  %4125 = vmatpush3.bf16.msra.mxu0 %v4486_v12  ;;  %v4552_v10 = vld [vmem:[%s6082_s1 + $0x188] sm:$0xff]  }
  0x2f   : > { %4082 = vmatprep.subr.bf16.mxu1 %v4487_v14  ;;  %4126 = vmatprep.subr.bf16.mxu0 %v4488_v15  ;;  %v4947_v12 = vld [vmem:[%s4669_s28 + $0x48] sm:$0xff]  }
  0x30   : > { %4056 = vmatprep.mubr.bf16.mxu0 %v4713_v16  ;;  %4072 = vmatprep.mubr.bf16.mxu1 %v4716_v17 }
  0x32   : > { %4083 = vmatpush3.bf16.msra.mxu1 %v4487_v14  ;;  %4127 = vmatpush3.bf16.msra.mxu0 %v4488_v15  ;;  %v4556_v14 = vld [vmem:[%s6082_s1 + $0x180] sm:$0xff]   ;;  %v4559_v15 = vld [vmem:[%s6082_s1 + $0x1f8] sm:$0xff]  }
  0x33   : > { %4084 = vmatprep.subr.bf16.mxu1 %v4491_v18  ;;  %4128 = vmatprep.subr.bf16.mxu0 %v4492_v20 }
  0x35   : > { %4057 = vmatmul.mubr.bf16.gmra.mxu0 %v4724_v19  ;;  %4073 = vmatmul.mubr.bf16.gmra.mxu1 %v4732_v21 }
  0x36   : > { %4085 = vmatpush3.bf16.msra.mxu1 %v4491_v18  ;;  %4129 = vmatpush3.bf16.msra.mxu0 %v4492_v20  ;;  %v4969_v18 = vld [vmem:[%s4669_s28 + $0x58] sm:$0xff]   ;;  %v4979_v20 = vld [vmem:[%s4669_s28 + $0x68] sm:$0xff]  }
  0x37   : > { %4086 = vmatprep.subr.bf16.mxu1 %v4495_v22  ;;  %4130 = vmatprep.subr.bf16.mxu0 %v4496_v23 }
  0x38   : > { %4060 = vmatprep.mubr.bf16.mxu0 %v4741_v24  ;;  %4076 = vmatprep.mubr.bf16.mxu1 %v4744_v25 }
  0x3a   : > { %4087 = vmatpush3.bf16.msra.mxu1 %v4495_v22  ;;  %4131 = vmatpush3.bf16.msra.mxu0 %v4496_v23  ;;  %v4989_v22 = vld [vmem:[%s4669_s28 + $0x10] sm:$0xff]   ;;  %v4996_v23 = vld [vmem:[%s4669_s28 + $0x18] sm:$0xff]  }
  0x3b   : > { %4088 = vmatprep.subr.bf16.mxu1 %v4499_v26  ;;  %4132 = vmatprep.subr.bf16.mxu0 %v4500_v27 }
  0x3d   : > { %4061 = vmatmul.mubr.bf16.gmra.mxu0 %v4756_v28  ;;  %4077 = vmatmul.mubr.bf16.gmra.mxu1 %v4760_v29 }
  0x3e   : > { %4089 = vmatpush3.bf16.msra.mxu1 %v4499_v26  ;;  %4133 = vmatpush3.bf16.msra.mxu0 %v4500_v27  ;;  %v4564_v26 = vld [vmem:[%s6082_s1 + $0x230] sm:$0xff]   ;;  %v4565_v27 = vld [vmem:[%s6082_s1 + $0x1e8] sm:$0xff]  }
  0x3f   : > { %4090 = vmatprep.subr.bf16.mxu1 %v4503_v30  ;;  %4134 = vmatprep.subr.bf16.mxu0 %v4504_v31 }
  0x40   : > { %4064 = vmatprep.mubr.bf16.mxu0 %v4769_v32  ;;  %4096 = vmatprep.mubr.bf16.mxu1 %v4675_v4 }
  0x42   : > { %4091 = vmatpush3.bf16.msra.mxu1 %v4503_v30  ;;  %4135 = vmatpush3.bf16.msra.mxu0 %v4504_v31  ;;  %v5021_v30 = vld [vmem:[%s4669_s28 + $0x30] sm:$0xff]   ;;  %v4569_v31 = vld [vmem:[%s6082_s1 + $0x1e0] sm:$0xff]  }
  0x43   : > { %4092 = vmatprep.subr.bf16.mxu1 %v4507_v33  ;;  %4136 = vmatprep.subr.bf16.mxu0 %v4508_v34 }
  0x45   : > { %4065 = vmatmul.mubr.bf16.gmra.mxu0 %v4782_v35 }
  0x46   : > { %4093 = vmatpush3.bf16.msra.mxu1 %v4507_v33  ;;  %4137 = vmatpush3.bf16.msra.mxu0 %v4508_v34  ;;  %v4573_v33 = vld [vmem:[%s6082_s1 + $0x1d8] sm:$0xff]  }
  0x47   : > { %4094 = vmatprep.subr.bf16.mxu1 %v4509_v36  ;;  %4138 = vmatprep.subr.bf16.mxu0 %v4510_v37  ;;  %v4574_v34 = vld [vmem:[%s6082_s1 + $0x218] sm:$0xff]  }
  0x48   : > { %4140 = vmatprep.mubr.bf16.mxu0 %v4675_v4  ;;  %v4544_v4 = vld [vmem:[%s6082_s1 + $0x198] sm:$0xff]  }
  0x4a   : > { %4095 = vmatpush3.bf16.msra.mxu1 %v4509_v36  ;;  %4139 = vmatpush3.bf16.msra.mxu0 %v4510_v37  ;;  %v5043_v36 = vld [vmem:[%s4669_s28 + $0x40] sm:$0xff]   ;;  %v4577_v37 = vld [vmem:[%s6082_s1 + $0x1d0] sm:$0xff]  }
  0x4b   : > { %4168 = vmatprep.subr.bf16.mxu1 %v4511_v38  ;;  %4212 = vmatprep.subr.bf16.mxu0 %v4512_v39 }
  0x4d   : > { %4097 = vmatmul.mubr.bf16.vlgmr.msra.gmra.mxu1 %v4698_v11  ;;  %4141 = vmatmul.mubr.bf16.vlgmr.msra.gmra.mxu0 %v4698_v11  ;;  %v4944_v11 = vld [vmem:[%s4669_s28 + $0x40] sm:$0xff]  }
  0x4e   : > { %4169 = vmatpush3.bf16.msra.mxu1 %v4511_v38  ;;  %4213 = vmatpush3.bf16.msra.mxu0 %v4512_v39  ;;  %v4578_v38 = vld [vmem:[%s6082_s1 + $0x210] sm:$0xff]   ;;  %v4581_v39 = vld [vmem:[%s6082_s1 + $0x1c8] sm:$0xff]  }
  0x4f   : > { %4100 = vmatprep.mubr.bf16.mxu1 %v4713_v16  ;;  %4144 = vmatprep.mubr.bf16.mxu0 %v4713_v16  ;;  %v4560_v16 = vld [vmem:[%s6082_s1 + $0x238] sm:$0xff]  }
  0x50   : > { %4170 = vmatprep.subr.bf16.mxu1 %v4513_v40  ;;  %4214 = vmatprep.subr.bf16.mxu0 %v4514_v41 }
  0x52   : > { %4171 = vmatpush3.bf16.msra.mxu1 %v4513_v40  ;;  %4215 = vmatpush3.bf16.msra.mxu0 %v4514_v41  ;;  %v4582_v40 = vld [vmem:[%s6082_s1 + $0x208] sm:$0xff]  }
  0x53   : > { %4172 = vmatprep.subr.bf16.mxu1 %v4515_v42  ;;  %4216 = vmatprep.subr.bf16.mxu0 %v4516_v43  ;;  %v5062_v41 = vld [vmem:[%s4669_s28 + $0x48] sm:$0xff]  }
  0x55   : > { %4101 = vmatmul.mubr.bf16.gmra.mxu1 %v4724_v19  ;;  %4145 = vmatmul.mubr.bf16.gmra.mxu0 %v4724_v19  ;;  %v4976_v19 = vld [vmem:[%s4669_s28 + $0x60] sm:$0xff]  }
  0x56   : > { %4104 = vmatprep.mubr.bf16.mxu1 %v4741_v24  ;;  %4148 = vmatprep.mubr.bf16.mxu0 %v4741_v24  ;;  %v4999_v24 = vld [vmem:[%s4669_s28 + $0x20] sm:$0xff]  }
  0x57   : > { %4173 = vmatpush3.bf16.msra.mxu1 %v4515_v42  ;;  %4217 = vmatpush3.bf16.msra.mxu0 %v4516_v43  ;;  %v5065_v42 = vld [vmem:[%s4669_s28 + $0x50] sm:$0xff]   ;;  %v4585_v43 = vld [vmem:[%s6082_s1 + $0x1c0] sm:$0xff]  }
  0x58   : > { %4174 = vmatprep.subr.bf16.mxu1 %v4517_v44  ;;  %4218 = vmatprep.subr.bf16.mxu0 %v4518_v45 }
  0x5b   : > { %4175 = vmatpush3.bf16.msra.mxu1 %v4517_v44  ;;  %4219 = vmatpush3.bf16.msra.mxu0 %v4518_v45  ;;  %v4586_v44 = vld [vmem:[%s6082_s1 + $0x200] sm:$0xff]   ;;  %v5078_v45 = vld [vmem:[%s4669_s28 + $0x58] sm:$0xff]  }
  0x5c   : > { %4176 = vmatprep.subr.bf16.mxu1 %v4519_v46  ;;  %4220 = vmatprep.subr.bf16.mxu0 %v4520_v47 }
  0x5d   : > { %4105 = vmatmul.mubr.bf16.gmra.mxu1 %v4756_v28  ;;  %4149 = vmatmul.mubr.bf16.gmra.mxu0 %v4756_v28  ;;  %v4568_v28 = vld [vmem:[%s6082_s1 + $0x228] sm:$0xff]  }
  0x5e   : > { %4108 = vmatprep.mubr.bf16.mxu1 %v4769_v32  ;;  %4152 = vmatprep.mubr.bf16.mxu0 %v4769_v32  ;;  %v4571_v32 = vld [vmem:[%s6082_s1 + $0x220] sm:$0xff]  }
  0x5f   : > { %4177 = vmatpush3.bf16.msra.mxu1 %v4519_v46  ;;  %4221 = vmatpush3.bf16.msra.mxu0 %v4520_v47  ;;  %v5081_v46 = vld [vmem:[%s4669_s28 + $0x60] sm:$0xff]   ;;  %v5088_v47 = vld [vmem:[%s4669_s28 + $0x68] sm:$0xff]  }
  0x60   : > { %4178 = vmatprep.subr.bf16.mxu1 %v4521_v48  ;;  %4222 = vmatprep.subr.bf16.mxu0 %v4522_v49 }
  0x63   : > { %4179 = vmatpush3.bf16.msra.mxu1 %v4521_v48  ;;  %4223 = vmatpush3.bf16.msra.mxu0 %v4522_v49  ;;  %v5091_v48 = vld [vmem:[%s4669_s28 + $0x70] sm:$0xff]   ;;  %v5098_v49 = vld [vmem:[%s4669_s28 + $0x78] sm:$0xff]  }
  0x64   : > { %4180 = vmatprep.subr.bf16.mxu1 %v4523_v50  ;;  %4224 = vmatprep.subr.bf16.mxu0 %v4524_v51 }
  0x65   : > { %4109 = vmatmul.mubr.bf16.gmra.mxu1 %v4782_v35  ;;  %4153 = vmatmul.mubr.bf16.gmra.mxu0 %v4782_v35  ;;  %v5040_v35 = vld [vmem:[%s4669_s28 + $0x38] sm:$0xff]  }
  0x66   : > { %4112 = vmatprep.mubr.bf16.mxu1 %v4678_v5  ;;  %4156 = vmatprep.mubr.bf16.mxu0 %v4678_v5  ;;  %v4922_v5 = vld [vmem:[%s4669_s28 + $0x30] sm:$0xff]  }
  0x67   : > { %4181 = vmatpush3.bf16.msra.mxu1 %v4523_v50  ;;  %4225 = vmatpush3.bf16.msra.mxu0 %v4524_v51 }
  0x68   : > { %4182 = vmatprep.subr.bf16.mxu1 %v4525_v52  ;;  %4226 = vmatprep.subr.bf16.mxu0 %v4526_v53 }
  0x6b   : > { %4183 = vmatpush3.bf16.msra.mxu1 %v4525_v52  ;;  %4227 = vmatpush3.bf16.msra.mxu0 %v4526_v53 }
  0x6c   : > { %4256 = vmatprep.subr.bf16.mxu1 %v4529_v54  ;;  %4300 = vmatprep.subr.bf16.mxu0 %v4530_v55 }
  0x6d   : > { %4113 = vmatmul.mubr.bf16.gmra.mxu1 %v4704_v13  ;;  %4157 = vmatmul.mubr.bf16.gmra.mxu0 %v4704_v13  ;;  %v4555_v13 = vld [vmem:[%s6082_s1 + $0x140] sm:$0xff]  }
  0x6e   : > { %4116 = vmatprep.mubr.bf16.mxu1 %v4716_v17  ;;  %4160 = vmatprep.mubr.bf16.mxu0 %v4716_v17  ;;  %v4966_v17 = vld [vmem:[%s4669_s28 + $0x50] sm:$0xff]  }
  0x75   : > { %4117 = vmatmul.mubr.bf16.gmra.mxu1 %v4732_v21  ;;  %4161 = vmatmul.mubr.bf16.gmra.mxu0 %v4732_v21  ;;  %v4986_v21 = vld [vmem:[%s4669_s28 + $0x70] sm:$0xff]  }
  0x76   : > { %4120 = vmatprep.mubr.bf16.mxu1 %v4744_v25  ;;  %4164 = vmatprep.mubr.bf16.mxu0 %v4744_v25  ;;  %v4562_v25 = vld [vmem:[%s6082_s1 + $0x1f0] sm:$0xff]  }
  0x7d   : > { %4121 = vmatmul.mubr.bf16.gmra.mxu1 %v4760_v29  ;;  %4165 = vmatmul.mubr.bf16.gmra.mxu0 %v4760_v29  ;;  %v5018_v29 = vld [vmem:[%s4669_s28 + $0x28] sm:$0xff]  }
  0x7e   : > { %4184 = vmatprep.mubr.bf16.mxu1 %v4871_v56  ;;  %4228 = vmatprep.mubr.bf16.mxu0 %v4871_v56 }
  0x85   : > { %4185 = vmatmul.mubr.bf16.vlgmr.msra.gmra.mxu1 %v4878_v57  ;;  %4229 = vmatmul.mubr.bf16.vlgmr.msra.gmra.mxu0 %v4878_v57 }
  0x86   : > { %4257 = vmatpush3.bf16.msra.mxu1 %v4529_v54  ;;  %4301 = vmatpush3.bf16.msra.mxu0 %v4530_v55 }
  0x87   : > { %4188 = vmatprep.mubr.bf16.mxu1 %v4881_v58  ;;  %4232 = vmatprep.mubr.bf16.mxu0 %v4881_v58 }
  0x88   : > { %4258 = vmatprep.subr.bf16.mxu1 %v4532_v59  ;;  %4302 = vmatprep.subr.bf16.mxu0 %v4534_v60 }
  0x8a   : > { %4259 = vmatpush3.bf16.msra.mxu1 %v4532_v59  ;;  %4303 = vmatpush3.bf16.msra.mxu0 %v4534_v60 }
  0x8b   : > { %4260 = vmatprep.subr.bf16.mxu1 %v4535_v61  ;;  %4304 = vmatprep.subr.bf16.mxu0 %v4538_v62 }
  0x8d   : > { %4189 = vmatmul.mubr.bf16.gmra.mxu1 %v4900_v63  ;;  %4233 = vmatmul.mubr.bf16.gmra.mxu0 %v4900_v63 }
  0x8e   : > { %4192 = vmatprep.mubr.bf16.mxu1 %v4903_v0  ;;  %4236 = vmatprep.mubr.bf16.mxu0 %v4903_v0 }
  0x8f   : > { %4261 = vmatpush3.bf16.msra.mxu1 %v4535_v61  ;;  %4305 = vmatpush3.bf16.msra.mxu0 %v4538_v62 }
  0x90   : > { %4262 = vmatprep.subr.bf16.mxu1 %v4539_v1  ;;  %4306 = vmatprep.subr.bf16.mxu0 %v4541_v2 }
  0x93   : > { %4263 = vmatpush3.bf16.msra.mxu1 %v4539_v1  ;;  %4307 = vmatpush3.bf16.msra.mxu0 %v4541_v2 }
  0x94   : > { %4264 = vmatprep.subr.bf16.mxu1 %v4543_v3  ;;  %4308 = vmatprep.subr.bf16.mxu0 %v4544_v4 }
  0x95   : > { %4193 = vmatmul.mubr.bf16.gmra.mxu1 %v4922_v5  ;;  %4237 = vmatmul.mubr.bf16.gmra.mxu0 %v4922_v5 }
  0x96   : > { %4196 = vmatprep.mubr.bf16.mxu1 %v4925_v6  ;;  %4240 = vmatprep.mubr.bf16.mxu0 %v4925_v6 }
  0x97   : > { %4265 = vmatpush3.bf16.msra.mxu1 %v4543_v3  ;;  %4309 = vmatpush3.bf16.msra.mxu0 %v4544_v4 }
  0x98   : > { %4266 = vmatprep.subr.bf16.mxu1 %v4547_v7  ;;  %4310 = vmatprep.subr.bf16.mxu0 %v4548_v8 }
  0x9b   : > { %4267 = vmatpush3.bf16.msra.mxu1 %v4547_v7  ;;  %4311 = vmatpush3.bf16.msra.mxu0 %v4548_v8 }
  0x9c   : > { %4268 = vmatprep.subr.bf16.mxu1 %v4551_v9  ;;  %4312 = vmatprep.subr.bf16.mxu0 %v4552_v10 }
  0x9d   : > { %4197 = vmatmul.mubr.bf16.gmra.mxu1 %v4944_v11  ;;  %4241 = vmatmul.mubr.bf16.gmra.mxu0 %v4944_v11 }
  0x9e   : > { %4200 = vmatprep.mubr.bf16.mxu1 %v4947_v12  ;;  %4244 = vmatprep.mubr.bf16.mxu0 %v4947_v12 }
  0x9f   : > { %4269 = vmatpush3.bf16.msra.mxu1 %v4551_v9  ;;  %4313 = vmatpush3.bf16.msra.mxu0 %v4552_v10 }
  0xa0   : > { %4270 = vmatprep.subr.bf16.mxu1 %v4555_v13  ;;  %4314 = vmatprep.subr.bf16.mxu0 %v4556_v14 }
  0xa3   : > { %4271 = vmatpush3.bf16.msra.mxu1 %v4555_v13  ;;  %4315 = vmatpush3.bf16.msra.mxu0 %v4556_v14 }
  0xa4   : > { %4344 = vmatprep.subr.bf16.mxu1 %v4559_v15  ;;  %4388 = vmatprep.subr.bf16.mxu0 %v4560_v16 }
  0xa5   : > { %4201 = vmatmul.mubr.bf16.gmra.mxu1 %v4966_v17  ;;  %4245 = vmatmul.mubr.bf16.gmra.mxu0 %v4966_v17 }
  0xa6   : > { %4204 = vmatprep.mubr.bf16.mxu1 %v4969_v18  ;;  %4248 = vmatprep.mubr.bf16.mxu0 %v4969_v18 }
  0xad   : > { %4205 = vmatmul.mubr.bf16.gmra.mxu1 %v4976_v19  ;;  %4249 = vmatmul.mubr.bf16.gmra.mxu0 %v4976_v19 }
  0xae   : > { %4208 = vmatprep.mubr.bf16.mxu1 %v4979_v20  ;;  %4252 = vmatprep.mubr.bf16.mxu0 %v4979_v20 }
  0xb5   : > { %4209 = vmatmul.mubr.bf16.gmra.mxu1 %v4986_v21  ;;  %4253 = vmatmul.mubr.bf16.gmra.mxu0 %v4986_v21 }
  0xb6   : > { %4272 = vmatprep.mubr.bf16.mxu1 %v4871_v56  ;;  %4316 = vmatprep.mubr.bf16.mxu0 %v4989_v22 }
  0xbd   : > { %4273 = vmatmul.mubr.bf16.vlgmr.msra.gmra.mxu1 %v4878_v57  ;;  %4317 = vmatmul.mubr.bf16.vlgmr.msra.gmra.mxu0 %v4996_v23 }
  0xbe   : > { %4345 = vmatpush3.bf16.msra.mxu1 %v4559_v15  ;;  %4389 = vmatpush3.bf16.msra.mxu0 %v4560_v16 }
  0xbf   : > { %4276 = vmatprep.mubr.bf16.mxu1 %v4881_v58  ;;  %4320 = vmatprep.mubr.bf16.mxu0 %v4999_v24 }
  0xc0   : > { %4346 = vmatprep.subr.bf16.mxu1 %v4562_v25  ;;  %4390 = vmatprep.subr.bf16.mxu0 %v4564_v26 }
  0xc2   : > { %4347 = vmatpush3.bf16.msra.mxu1 %v4562_v25  ;;  %4391 = vmatpush3.bf16.msra.mxu0 %v4564_v26 }
  0xc3   : > { %4348 = vmatprep.subr.bf16.mxu1 %v4565_v27  ;;  %4392 = vmatprep.subr.bf16.mxu0 %v4568_v28 }
  0xc5   : > { %4277 = vmatmul.mubr.bf16.gmra.mxu1 %v4900_v63  ;;  %4321 = vmatmul.mubr.bf16.gmra.mxu0 %v5018_v29 }
  0xc6   : > { %4280 = vmatprep.mubr.bf16.mxu1 %v4903_v0  ;;  %4324 = vmatprep.mubr.bf16.mxu0 %v5021_v30 }
  0xc7   : > { %4349 = vmatpush3.bf16.msra.mxu1 %v4565_v27  ;;  %4393 = vmatpush3.bf16.msra.mxu0 %v4568_v28 }
  0xc8   : > { %4350 = vmatprep.subr.bf16.mxu1 %v4569_v31  ;;  %4394 = vmatprep.subr.bf16.mxu0 %v4571_v32 }
  0xcb   : > { %4351 = vmatpush3.bf16.msra.mxu1 %v4569_v31  ;;  %4395 = vmatpush3.bf16.msra.mxu0 %v4571_v32 }
  0xcc   : > { %4352 = vmatprep.subr.bf16.mxu1 %v4573_v33  ;;  %4396 = vmatprep.subr.bf16.mxu0 %v4574_v34 }
  0xcd   : > { %4281 = vmatmul.mubr.bf16.gmra.mxu1 %v4922_v5  ;;  %4325 = vmatmul.mubr.bf16.gmra.mxu0 %v5040_v35 }
  0xce   : > { %4284 = vmatprep.mubr.bf16.mxu1 %v4925_v6  ;;  %4328 = vmatprep.mubr.bf16.mxu0 %v5043_v36 }
  0xcf   : > { %4353 = vmatpush3.bf16.msra.mxu1 %v4573_v33  ;;  %4397 = vmatpush3.bf16.msra.mxu0 %v4574_v34 }
  0xd0   : > { %4354 = vmatprep.subr.bf16.mxu1 %v4577_v37  ;;  %4398 = vmatprep.subr.bf16.mxu0 %v4578_v38 }
  0xd3   : > { %4355 = vmatpush3.bf16.msra.mxu1 %v4577_v37  ;;  %4399 = vmatpush3.bf16.msra.mxu0 %v4578_v38 }
  0xd4   : > { %4356 = vmatprep.subr.bf16.mxu1 %v4581_v39  ;;  %4400 = vmatprep.subr.bf16.mxu0 %v4582_v40 }
  0xd5   : > { %4285 = vmatmul.mubr.bf16.gmra.mxu1 %v4944_v11  ;;  %4329 = vmatmul.mubr.bf16.gmra.mxu0 %v5062_v41 }
  0xd6   : > { %4288 = vmatprep.mubr.bf16.mxu1 %v4947_v12  ;;  %4332 = vmatprep.mubr.bf16.mxu0 %v5065_v42  ;;  %v815_v12 = vlaneseq }
  0xd7   : > { %4357 = vmatpush3.bf16.msra.mxu1 %v4581_v39  ;;  %4401 = vmatpush3.bf16.msra.mxu0 %v4582_v40 }
  0xd8   : > { %4358 = vmatprep.subr.bf16.mxu1 %v4585_v43  ;;  %4402 = vmatprep.subr.bf16.mxu0 %v4586_v44 }
  0xdb   : > { %4359 = vmatpush3.bf16.msra.mxu1 %v4585_v43  ;;  %4403 = vmatpush3.bf16.msra.mxu0 %v4586_v44 }
  0xdd   : > { %4289 = vmatmul.mubr.bf16.gmra.mxu1 %v4966_v17  ;;  %4333 = vmatmul.mubr.bf16.gmra.mxu0 %v5078_v45  ;;  %v5174_v17 = vshrl.u32 %v815_v12, 7 }
  0xde   : > { %4292 = vmatprep.mubr.bf16.mxu1 %v4969_v18  ;;  %4336 = vmatprep.mubr.bf16.mxu0 %v5081_v46 }
  0xdf   : > { %vm817_vm0 = vcmp.lt.s32.totalorder %v5174_v17, 7  ;;  %vm1112_vm1 = vcmp.lt.s32.totalorder %v5174_v17, 6 }
  0xe5   : > { %4293 = vmatmul.mubr.bf16.gmra.mxu1 %v4976_v19  ;;  %4337 = vmatmul.mubr.bf16.gmra.mxu0 %v5088_v47 }
  0xe6   : > { %4296 = vmatprep.mubr.bf16.mxu1 %v4979_v20  ;;  %4340 = vmatprep.mubr.bf16.mxu0 %v5091_v48 }
  0xed   : > { %v5100_v50 = vpop.f32.mrf.mxu0  ;;  %v5102_v51 = vpop.f32.mrf.mxu1  ;;  %4297 = vmatmul.mubr.bf16.gmra.mxu1 %v4986_v21  ;;  %4341 = vmatmul.mubr.bf16.gmra.mxu0 %v5098_v49 }
  0xee   : > { %4360 = vmatprep.mubr.bf16.mxu1 %v4989_v22  ;;  %4404 = vmatprep.mubr.bf16.mxu0 %v4989_v22 }
  0xef   : > { %v5108_v52 = vpop.f32.mrf.mxu0  ;;  %v5110_v53 = vpop.f32.mrf.mxu1 }
  0xf1   : > { %v5112_v54 = vpop.f32.mrf.mxu0  ;;  %v5114_v55 = vpop.f32.mrf.mxu1 }
  0xf3   : > { %v5116_v56 = vpop.f32.mrf.mxu0  ;;  %v5118_v57 = vpop.f32.mrf.mxu1 }
  0xf5   : > { %v5120_v58 = vpop.f32.mrf.mxu0  ;;  %4361 = vmatmul.mubr.bf16.vlgmr.msra.gmra.mxu1 %v4996_v23  ;;  %4405 = vmatmul.mubr.bf16.vlgmr.msra.gmra.mxu0 %v4996_v23  ;;  %v5124_v59 = vpop.f32.mrf.mxu1 }
  0xf6   : > { %4364 = vmatprep.mubr.bf16.mxu1 %v4999_v24  ;;  %4408 = vmatprep.mubr.bf16.mxu0 %v4999_v24 }
  0xf7   : > { %v5128_v60 = vpop.f32.mrf.mxu0  ;;  %v5130_v61 = vpop.f32.mrf.mxu1 }
  0xf9   : > { %v5132_v62 = vpop.f32.mrf.mxu0  ;;  %v5134_v63 = vpop.f32.mrf.mxu1 }
  0xfb   : > { %v5136_v0 = vpop.f32.mrf.mxu0  ;;  %v5138_v1 = vpop.f32.mrf.mxu1 }
  0xfd   : > { %v5140_v2 = vpop.f32.mrf.mxu0  ;;  %4365 = vmatmul.mubr.bf16.gmra.mxu1 %v5018_v29  ;;  %4409 = vmatmul.mubr.bf16.gmra.mxu0 %v5018_v29  ;;  %v5148_v4 = vpop.f32.mrf.mxu1 }
  0xfe   : > { %4368 = vmatprep.mubr.bf16.mxu1 %v5021_v30  ;;  %4412 = vmatprep.mubr.bf16.mxu0 %v5021_v30 }
  0xff   : > { %v5146_v3 = vpop.f32.mrf.mxu0  ;;  %v5152_v6 = vpop.f32.mrf.mxu1 }
 0x101   : > { %v5150_v5 = vpop.f32.mrf.mxu0  ;;  %v5162_v9 = vpop.f32.mrf.mxu1 }
 0x103   : > { %v5154_v7 = vpop.f32.mrf.mxu0  ;;  %v5168_v13 = vpop.f32.mrf.mxu1 }
 0x105   : > { %v5156_v8 = vpop.f32.mrf.mxu0  ;;  %4369 = vmatmul.mubr.bf16.gmra.mxu1 %v5040_v35  ;;  %4413 = vmatmul.mubr.bf16.gmra.mxu0 %v5040_v35 }
 0x106   : > { %4372 = vmatprep.mubr.bf16.mxu1 %v5043_v36  ;;  %4416 = vmatprep.mubr.bf16.mxu0 %v5043_v36 }
 0x107   : > { %v5164_v10 = vpop.f32.mrf.mxu0 }
 0x109   : > { %v5166_v11 = vpop.f32.mrf.mxu0 }
 0x10b   : > { %v5170_v14 = vpop.f32.mrf.mxu0 }
 0x10d   : > { %v4098_v15 = vpop.f32.mrf.mxu1  ;;  %v4142_v16 = vpop.f32.mrf.mxu0  ;;  %4373 = vmatmul.mubr.bf16.gmra.mxu1 %v5062_v41  ;;  %4417 = vmatmul.mubr.bf16.gmra.mxu0 %v5062_v41 }
 0x10e   : > { %4376 = vmatprep.mubr.bf16.mxu1 %v5065_v42  ;;  %4420 = vmatprep.mubr.bf16.mxu0 %v5065_v42  ;;  %v788_v22 = vrot.slane %v4098_v15, 1  ;;  %v1085_v25 = vrot.slane %v4142_v16, 2 }
 0x10f   : > { %v676_v18 = vpop.f32.mrf.mxu1  ;;  %v973_v19 = vpop.f32.mrf.mxu0 }
 0x110   : > { %v787_v26 = vrot.slane %v676_v18, 1  ;;  %v1084_v33 = vrot.slane %v973_v19, 2 }
 0x111   : > { %v4099_v20 = vpop.f32.mrf.mxu1  ;;  %v4143_v21 = vpop.f32.mrf.mxu0 }
 0x112   : > { %v802_v23 = vrot.slane %v4099_v20, 1  ;;  %v1099_v24 = vrot.slane %v4143_v21, 2 }
 0x113   : > { %v679_v27 = vpop.f32.mrf.mxu1  ;;  %v976_v28 = vpop.f32.mrf.mxu0 }
 0x114   : > { %v819_v29 = vsel %vm817_vm0, %v788_v22, %v802_v23  ;;  %v833_v30 = vsel %vm817_vm0, %v802_v23, %v788_v22  ;;  %v801_v31 = vrot.slane %v679_v27, 1  ;;  %v1098_v32 = vrot.slane %v976_v28, 2 }
 0x115   : > { %v4102_v34 = vpop.f32.mrf.mxu1  ;;  %v4146_v35 = vpop.f32.mrf.mxu0  ;;  %4377 = vmatmul.mubr.bf16.gmra.mxu1 %v5078_v45  ;;  %4421 = vmatmul.mubr.bf16.gmra.mxu0 %v5078_v45  ;;  %v848_v36 = vadd.f32 %v5100_v50, %v819_v29  ;;  %v1114_v37 = vsel %vm1112_vm1, %v1085_v25, %v1099_v24  ;;  %v849_v38 = vadd.f32 %v5112_v54, %v833_v30 }
 0x116   : > { %v818_v39 = vsel %vm817_vm0, %v787_v26, %v801_v31  ;;  %v832_v40 = vsel %vm817_vm0, %v801_v31, %v787_v26  ;;  %4380 = vmatprep.mubr.bf16.mxu1 %v5081_v46  ;;  %4424 = vmatprep.mubr.bf16.mxu0 %v5081_v46  ;;  %v1113_v45 = vsel %vm1112_vm1, %v1084_v33, %v1098_v32  ;;  %v790_v19 = vrot.slane %v4102_v34, 1 }
 0x117   : > { %v692_v41 = vpop.f32.mrf.mxu1  ;;  %v989_v42 = vpop.f32.mrf.mxu0  ;;  %v5196_v43 = vadd.f32 %v1114_v37, %v848_v36  ;;  %v846_v44 = vadd.f32 %v818_v39, %v5108_v52  ;;  %v1128_v50 = vsel %vm1112_vm1, %v1099_v24, %v1085_v25  ;;  %v847_v12 = vadd.f32 %v832_v40, %v5116_v56 }
 0x118   : > { %v5203_v54 = vadd.f32 %v1128_v50, %v849_v38  ;;  %v1127_v46 = vsel %vm1112_vm1, %v1098_v32, %v1084_v33  ;;  %v1087_v22 = vrot.slane %v4146_v35, 2  ;;  %v789_v23 = vrot.slane %v692_v41, 1 }
 0x119   : > { %v4103_v15 = vpop.f32.mrf.mxu1  ;;  %v4147_v16 = vpop.f32.mrf.mxu0  ;;  %v5206_v18 = vadd.f32 %v1113_v45, %v846_v44  ;;  %v5210_v21 = vadd.f32 %v1127_v46, %v847_v12  ;;  %v1086_v29 = vrot.slane %v989_v42, 2 }
 0x11a   : > { %v804_v20 = vrot.slane %v4103_v15, 1  ;;  %v1101_v52 = vrot.slane %v4147_v16, 2 }
 0x11b   : > { %v695_v26 = vpop.f32.mrf.mxu1  ;;  %v992_v24 = vpop.f32.mrf.mxu0 }
 0x11c   : > { %v821_v25 = vsel %vm817_vm0, %v790_v19, %v804_v20  ;;  %v835_v56 = vsel %vm817_vm0, %v804_v20, %v790_v19  ;;  %v803_v27 = vrot.slane %v695_v26, 1  ;;  %v1100_v28 = vrot.slane %v992_v24, 2 }
 0x11d   : > { %v4106_v30 = vpop.f32.mrf.mxu1  ;;  %v4150_v31 = vpop.f32.mrf.mxu0  ;;  %4381 = vmatmul.mubr.bf16.gmra.mxu1 %v5088_v47  ;;  %4425 = vmatmul.mubr.bf16.gmra.mxu0 %v5088_v47  ;;  %v852_v32 = vadd.f32 %v5120_v58, %v821_v25  ;;  %v1116_v33 = vsel %vm1112_vm1, %v1087_v22, %v1101_v52  ;;  %v853_v34 = vadd.f32 %v5132_v62, %v835_v56 }
 0x11e   : > { %v820_v35 = vsel %vm817_vm0, %v789_v23, %v803_v27  ;;  %v834_v36 = vsel %vm817_vm0, %v803_v27, %v789_v23  ;;  %4384 = vmatprep.mubr.bf16.mxu1 %v5091_v48  ;;  %4428 = vmatprep.mubr.bf16.mxu0 %v5091_v48  ;;  %v1115_v39 = vsel %vm1112_vm1, %v1086_v29, %v1100_v28  ;;  %v792_v50 = vrot.slane %v4106_v30, 1 }
 0x11f   : > { %v708_v37 = vpop.f32.mrf.mxu1  ;;  %v1005_v38 = vpop.f32.mrf.mxu0  ;;  %v5228_v47 = vadd.f32 %v1116_v33, %v852_v32  ;;  %v850_v58 = vadd.f32 %v820_v35, %v5128_v60  ;;  %v1130_v62 = vsel %vm1112_vm1, %v1101_v52, %v1087_v22  ;;  %v851_v41 = vadd.f32 %v834_v36, %v5136_v0 }
 0x120   : > { %v5235_v40 = vadd.f32 %v1130_v62, %v853_v34  ;;  %v1129_v48 = vsel %vm1112_vm1, %v1100_v28, %v1086_v29  ;;  %v1089_v16 = vrot.slane %v4150_v31, 2  ;;  %v791_v46 = vrot.slane %v708_v37, 1 }
 0x121   : > { %v4107_v42 = vpop.f32.mrf.mxu1  ;;  %v4151_v44 = vpop.f32.mrf.mxu0  ;;  %v5238_v45 = vadd.f32 %v1115_v39, %v850_v58  ;;  %v5242_v15 = vadd.f32 %v1129_v48, %v851_v41  ;;  %v1088_v26 = vrot.slane %v1005_v38, 2 }
 0x122   : > { %v806_v12 = vrot.slane %v4107_v42, 1  ;;  %v1103_v60 = vrot.slane %v4151_v44, 2 }
 0x123   : > { %v711_v19 = vpop.f32.mrf.mxu1  ;;  %v1008_v20 = vpop.f32.mrf.mxu0 }
 0x124   : > { %v823_v52 = vsel %vm817_vm0, %v792_v50, %v806_v12  ;;  %v837_v0 = vsel %vm817_vm0, %v806_v12, %v792_v50  ;;  %v805_v22 = vrot.slane %v711_v19, 1  ;;  %v1102_v23 = vrot.slane %v1008_v20, 2 }
 0x125   : > { %v4110_v24 = vpop.f32.mrf.mxu1  ;;  %v4154_v25 = vpop.f32.mrf.mxu0  ;;  %4385 = vmatmul.mubr.bf16.gmra.mxu1 %v5098_v49  ;;  %4429 = vmatmul.mubr.bf16.gmra.mxu0 %v5098_v49  ;;  %v856_v56 = vadd.f32 %v5140_v2, %v823_v52  ;;  %v1118_v27 = vsel %vm1112_vm1, %v1089_v16, %v1103_v60  ;;  %v857_v28 = vadd.f32 %v5150_v5, %v837_v0 }
 0x126   : > { %v822_v29 = vsel %vm817_vm0, %v791_v46, %v805_v22  ;;  %v836_v30 = vsel %vm817_vm0, %v805_v22, %v791_v46  ;;  %v1117_v49 = vsel %vm1112_vm1, %v1088_v26, %v1102_v23  ;;  %v1132_v2 = vsel %vm1112_vm1, %v1103_v60, %v1089_v16 }
 0x127   : > { %v724_v31 = vpop.f32.mrf.mxu1  ;;  %v1021_v32 = vpop.f32.mrf.mxu0  ;;  %v5258_v33 = vadd.f32 %v1118_v27, %v856_v56  ;;  %v854_v34 = vadd.f32 %v822_v29, %v5146_v3  ;;  %v5265_v35 = vadd.f32 %v1132_v2, %v857_v28  ;;  %v855_v5 = vadd.f32 %v836_v30, %v5154_v7 }
 0x128   : > { %v1131_v58 = vsel %vm1112_vm1, %v1102_v23, %v1088_v26  ;;  %v794_v39 = vrot.slane %v4110_v24, 1  ;;  %v1091_v42 = vrot.slane %v4154_v25, 2  ;;  %v793_v44 = vrot.slane %v724_v31, 1 }
 0x129   : > { %v4111_v36 = vpop.f32.mrf.mxu1  ;;  %v4155_v37 = vpop.f32.mrf.mxu0  ;;  %v5268_v38 = vadd.f32 %v1117_v49, %v854_v34  ;;  %v5272_v41 = vadd.f32 %v1131_v58, %v855_v5  ;;  %v1090_v48 = vrot.slane %v1021_v32, 2 }
 0x12a   : > { %v808_v62 = vrot.slane %v4111_v36, 1  ;;  %v1105_v3 = vrot.slane %v4155_v37, 2 }
 0x12b   : > { %v727_v50 = vpop.f32.mrf.mxu1  ;;  %v1024_v12 = vpop.f32.mrf.mxu0 }
 0x12c   : > { %v825_v7 = vsel %vm817_vm0, %v794_v39, %v808_v62  ;;  %v839_v60 = vsel %vm817_vm0, %v808_v62, %v794_v39  ;;  %v807_v16 = vrot.slane %v727_v50, 1  ;;  %v1104_v46 = vrot.slane %v1024_v12, 2 }
 0x12d   : > { %v4114_v19 = vpop.f32.mrf.mxu1  ;;  %v4158_v20 = vpop.f32.mrf.mxu0  ;;  %v860_v52 = vadd.f32 %v5156_v8, %v825_v7  ;;  %v1120_v0 = vsel %vm1112_vm1, %v1091_v42, %v1105_v3  ;;  %v861_v22 = vadd.f32 %v5166_v11, %v839_v60  ;;  %v1134_v23 = vsel %vm1112_vm1, %v1105_v3, %v1091_v42 }
 0x12e   : > { %v824_v26 = vsel %vm817_vm0, %v793_v44, %v807_v16  ;;  %v838_v24 = vsel %vm817_vm0, %v807_v16, %v793_v44  ;;  %v1119_v28 = vsel %vm1112_vm1, %v1090_v48, %v1104_v46  ;;  %v1133_v30 = vsel %vm1112_vm1, %v1104_v46, %v1090_v48 }
 0x12f   : > { %v740_v25 = vpop.f32.mrf.mxu1  ;;  %v1037_v56 = vpop.f32.mrf.mxu0  ;;  %v5288_v27 = vadd.f32 %v1120_v0, %v860_v52  ;;  %v858_v8 = vadd.f32 %v824_v26, %v5164_v10  ;;  %v5293_v29 = vadd.f32 %v1134_v23, %v861_v22  ;;  %v859_v11 = vadd.f32 %v838_v24, %v5170_v14 }
 0x130   : > { %v796_v49 = vrot.slane %v4114_v19, 1  ;;  %v1093_v10 = vrot.slane %v4158_v20, 2  ;;  %v795_v37 = vrot.slane %v740_v25, 1  ;;  %v1092_v58 = vrot.slane %v1037_v56, 2 }
 0x131   : > { %v4115_v31 = vpop.f32.mrf.mxu1  ;;  %v4159_v32 = vpop.f32.mrf.mxu0  ;;  %v5298_v34 = vadd.f32 %v1119_v28, %v858_v8  ;;  %v5300_v36 = vadd.f32 %v1133_v30, %v859_v11 }
 0x132   : > { %v810_v2 = vrot.slane %v4115_v31, 1  ;;  %v1107_v5 = vrot.slane %v4159_v32, 2 }
 0x133   : > { %v743_v39 = vpop.f32.mrf.mxu1  ;;  %v1040_v62 = vpop.f32.mrf.mxu0 }
 0x134   : > { %v827_v14 = vsel %vm817_vm0, %v796_v49, %v810_v2  ;;  %v841_v3 = vsel %vm817_vm0, %v810_v2, %v796_v49  ;;  %v809_v42 = vrot.slane %v743_v39, 1  ;;  %v1106_v44 = vrot.slane %v1040_v62, 2 }
 0x135   : > { %v4118_v48 = vpop.f32.mrf.mxu1  ;;  %v4162_v50 = vpop.f32.mrf.mxu0  ;;  %v864_v12 = vadd.f32 %v5102_v51, %v827_v14  ;;  %v1122_v7 = vsel %vm1112_vm1, %v1093_v10, %v1107_v5  ;;  %v865_v60 = vadd.f32 %v5114_v55, %v841_v3  ;;  %v1136_v16 = vsel %vm1112_vm1, %v1107_v5, %v1093_v10 }
 0x136   : > { %v826_v46 = vsel %vm817_vm0, %v795_v37, %v809_v42  ;;  %v840_v19 = vsel %vm817_vm0, %v809_v42, %v795_v37  ;;  %v1121_v22 = vsel %vm1112_vm1, %v1092_v58, %v1106_v44  ;;  %v1135_v26 = vsel %vm1112_vm1, %v1106_v44, %v1092_v58 }
 0x137   : > { %v756_v20 = vpop.f32.mrf.mxu1  ;;  %v1053_v52 = vpop.f32.mrf.mxu0  ;;  %v5316_v0 = vadd.f32 %v1122_v7, %v864_v12  ;;  %v862_v51 = vadd.f32 %v826_v46, %v5110_v53  ;;  %v5321_v23 = vadd.f32 %v1136_v16, %v865_v60  ;;  %v863_v55 = vadd.f32 %v840_v19, %v5118_v57 }
 0x138   : > { %v798_v8 = vrot.slane %v4118_v48, 1  ;;  %v1095_v53 = vrot.slane %v4162_v50, 2  ;;  %v797_v31 = vrot.slane %v756_v20, 1  ;;  %v1094_v32 = vrot.slane %v1053_v52, 2 }
 0x139   : > { %v4119_v24 = vpop.f32.mrf.mxu1  ;;  %v4163_v25 = vpop.f32.mrf.mxu0  ;;  %v5326_v56 = vadd.f32 %v1121_v22, %v862_v51  ;;  %v5328_v30 = vadd.f32 %v1135_v26, %v863_v55 }
 0x13a   : > { %v812_v28 = vrot.slane %v4119_v24, 1  ;;  %v1109_v11 = vrot.slane %v4163_v25, 2 }
 0x13b   : > { %v759_v49 = vpop.f32.mrf.mxu1  ;;  %v1056_v2 = vpop.f32.mrf.mxu0 }
 0x13c   : > { %v829_v57 = vsel %vm817_vm0, %v798_v8, %v812_v28  ;;  %v843_v5 = vsel %vm817_vm0, %v812_v28, %v798_v8  ;;  %v811_v10 = vrot.slane %v759_v49, 1  ;;  %v1108_v37 = vrot.slane %v1056_v2, 2 }
 0x13d   : > { %v4122_v58 = vpop.f32.mrf.mxu1  ;;  %v4166_v39 = vpop.f32.mrf.mxu0  ;;  %v868_v62 = vadd.f32 %v5124_v59, %v829_v57  ;;  %v1124_v14 = vsel %vm1112_vm1, %v1095_v53, %v1109_v11  ;;  %v869_v3 = vadd.f32 %v5134_v63, %v843_v5  ;;  %v1138_v42 = vsel %vm1112_vm1, %v1109_v11, %v1095_v53 }
 0x13e   : > { %v828_v44 = vsel %vm817_vm0, %v797_v31, %v811_v10  ;;  %v842_v48 = vsel %vm817_vm0, %v811_v10, %v797_v31  ;;  %v1123_v60 = vsel %vm1112_vm1, %v1094_v32, %v1108_v37  ;;  %v1137_v46 = vsel %vm1112_vm1, %v1108_v37, %v1094_v32 }
 0x13f   : > { %v772_v50 = vpop.f32.mrf.mxu1  ;;  %v1069_v12 = vpop.f32.mrf.mxu0  ;;  %v5344_v7 = vadd.f32 %v1124_v14, %v868_v62  ;;  %v866_v59 = vadd.f32 %v828_v44, %v5130_v61  ;;  %v5349_v16 = vadd.f32 %v1138_v42, %v869_v3  ;;  %v867_v63 = vadd.f32 %v842_v48, %v5138_v1 }
 0x140   : > { %v800_v51 = vrot.slane %v4122_v58, 1  ;;  %v1097_v61 = vrot.slane %v4166_v39, 2  ;;  %v799_v24 = vrot.slane %v772_v50, 1  ;;  %v1096_v25 = vrot.slane %v1069_v12, 2 }
 0x141   : > { %v4123_v19 = vpop.f32.mrf.mxu1  ;;  %v4167_v20 = vpop.f32.mrf.mxu0  ;;  %v5354_v52 = vadd.f32 %v1123_v60, %v866_v59  ;;  %v5356_v26 = vadd.f32 %v1137_v46, %v867_v63 }
 0x142   : > { %v814_v22 = vrot.slane %v4123_v19, 1  ;;  %v1111_v55 = vrot.slane %v4167_v20, 2 }
 0x143   : > { %v775_v8 = vpop.f32.mrf.mxu1  ;;  %v1072_v28 = vpop.f32.mrf.mxu0 }
 0x144   : > { %v831_v1 = vsel %vm817_vm0, %v800_v51, %v814_v22  ;;  %v845_v11 = vsel %vm817_vm0, %v814_v22, %v800_v51  ;;  %v813_v53 = vrot.slane %v775_v8, 1  ;;  %v1110_v31 = vrot.slane %v1072_v28, 2 }
 0x145   : > { %v4186_v32 = vpop.f32.mrf.mxu1  ;;  %v4230_v49 = vpop.f32.mrf.mxu0  ;;  %v872_v2 = vadd.f32 %v5148_v4, %v831_v1  ;;  %v1126_v57 = vsel %vm1112_vm1, %v1097_v61, %v1111_v55  ;;  %v873_v5 = vadd.f32 %v5162_v9, %v845_v11  ;;  %v1140_v10 = vsel %vm1112_vm1, %v1111_v55, %v1097_v61 }
 0x146   : > { %v830_v37 = vsel %vm817_vm0, %v799_v24, %v813_v53  ;;  %v844_v58 = vsel %vm817_vm0, %v813_v53, %v799_v24  ;;  %v1497_v39 = vadd.f32 %v4186_v32, %v5196_v43  ;;  %v1125_v9 = vsel %vm1112_vm1, %v1096_v25, %v1110_v31 }
 0x147   : > { %v1384_v62 = vpop.f32.mrf.mxu1  ;;  %v1622_v14 = vpop.f32.mrf.mxu0  ;;  %v5373_v3 = vadd.f32 %v1126_v57, %v872_v2  ;;  %v870_v4 = vadd.f32 %v830_v37, %v5152_v6  ;;  %v5378_v42 = vadd.f32 %v1140_v10, %v873_v5  ;;  %v871_v48 = vadd.f32 %v844_v58, %v5168_v13 }
 0x148   : > { %v1495_v44 = vadd.f32 %v1384_v62, %v5206_v18  ;;  %v1139_v50 = vsel %vm1112_vm1, %v1110_v31, %v1096_v25  ;;  %v1734_v60 = vrot.slane %v4230_v49, 1  ;;  %v1733_v19 = vrot.slane %v1622_v14, 1 }
 0x149   : > { %v4187_v12 = vpop.f32.mrf.mxu1  ;;  %v4231_v43 = vpop.f32.mrf.mxu0  ;;  %v5384_v59 = vadd.f32 %v1125_v9, %v870_v4  ;;  %v5387_v46 = vadd.f32 %v1139_v50, %v871_v48 }
 0x14a   : > { %v1498_v63 = vadd.f32 %v4187_v12, %v5203_v54  ;;  %v1748_v6 = vrot.slane %v4231_v43, 1 }
 0x14b   : > { %v1387_v20 = vpop.f32.mrf.mxu1  ;;  %v1625_v51 = vpop.f32.mrf.mxu0 }
 0x14c   : > { %v1762_v18 = vsel %vm817_vm0, %v1734_v60, %v1748_v6  ;;  %v1776_v13 = vsel %vm817_vm0, %v1748_v6, %v1734_v60  ;;  %v1496_v22 = vadd.f32 %v1387_v20, %v5210_v21  ;;  %v1747_v55 = vrot.slane %v1625_v51, 1 }
 0x14d   : > { %v5394_v61 = vadd.f32 %v1762_v18, %v1497_v39  ;;  %v4190_v24 = vpop.f32.mrf.mxu1  ;;  %v4234_v25 = vpop.f32.mrf.mxu0  ;;  %v5396_v54 = vadd.f32 %v1776_v13, %v1498_v63 }
 0x14e   : > { %v1761_v8 = vsel %vm817_vm0, %v1733_v19, %v1747_v55  ;;  %v1775_v28 = vsel %vm817_vm0, %v1747_v55, %v1733_v19  ;;  %v1501_v1 = vadd.f32 %v4190_v24, %v5228_v47  ;;  %v1736_v57 = vrot.slane %v4234_v25, 1 }
 0x14f   : > { %v5403_v11 = vadd.f32 %v1761_v8, %v1495_v44  ;;  %v1400_v53 = vpop.f32.mrf.mxu1  ;;  %v1638_v31 = vpop.f32.mrf.mxu0  ;;  %v5405_v21 = vadd.f32 %v1775_v28, %v1496_v22 }
 0x150   : > { %v1499_v32 = vadd.f32 %v1400_v53, %v5238_v45  ;;  %v1735_v37 = vrot.slane %v1638_v31, 1 }
 0x151   : > { %v4191_v49 = vpop.f32.mrf.mxu1  ;;  %v4235_v2 = vpop.f32.mrf.mxu0 }
 0x152   : > { %v1502_v5 = vadd.f32 %v4191_v49, %v5235_v40  ;;  %v1750_v10 = vrot.slane %v4235_v2, 1 }
 0x153   : > { %v1403_v58 = vpop.f32.mrf.mxu1  ;;  %v1641_v39 = vpop.f32.mrf.mxu0 }
 0x154   : > { %v1764_v47 = vsel %vm817_vm0, %v1736_v57, %v1750_v10  ;;  %v1778_v62 = vsel %vm817_vm0, %v1750_v10, %v1736_v57  ;;  %v1500_v14 = vadd.f32 %v1403_v58, %v5242_v15  ;;  %v1749_v4 = vrot.slane %v1641_v39, 1 }
 0x155   : > { %v5414_v9 = vadd.f32 %v1764_v47, %v1501_v1  ;;  %v4194_v45 = vpop.f32.mrf.mxu1  ;;  %v4238_v44 = vpop.f32.mrf.mxu0  ;;  %v5416_v48 = vadd.f32 %v1778_v62, %v1502_v5 }
 0x156   : > { %v1763_v40 = vsel %vm817_vm0, %v1735_v37, %v1749_v4  ;;  %v1777_v50 = vsel %vm817_vm0, %v1749_v4, %v1735_v37  ;;  %v1505_v12 = vadd.f32 %v4194_v45, %v5258_v33  ;;  %v1738_v51 = vrot.slane %v4238_v44, 1 }
 0x157   : > { %v5423_v43 = vadd.f32 %v1763_v40, %v1499_v32  ;;  %v1416_v60 = vpop.f32.mrf.mxu1  ;;  %v1654_v63 = vpop.f32.mrf.mxu0  ;;  %v5425_v15 = vadd.f32 %v1777_v50, %v1500_v14 }
 0x158   : > { %v1503_v6 = vadd.f32 %v1416_v60, %v5268_v38  ;;  %v1737_v22 = vrot.slane %v1654_v63, 1 }
 0x159   : > { %v4195_v19 = vpop.f32.mrf.mxu1  ;;  %v4239_v20 = vpop.f32.mrf.mxu0 }
 0x15a   : > { %v1506_v18 = vadd.f32 %v4195_v19, %v5265_v35  ;;  %v1752_v13 = vrot.slane %v4239_v20, 1 }
 0x15b   : > { %v1419_v55 = vpop.f32.mrf.mxu1  ;;  %v1657_v24 = vpop.f32.mrf.mxu0 }
 0x15c   : > { %v1766_v33 = vsel %vm817_vm0, %v1738_v51, %v1752_v13  ;;  %v1780_v25 = vsel %vm817_vm0, %v1752_v13, %v1738_v51  ;;  %v1504_v8 = vadd.f32 %v1419_v55, %v5272_v41  ;;  %v1751_v28 = vrot.slane %v1657_v24, 1 }
 0x15d   : > { %v5434_v1 = vadd.f32 %v1766_v33, %v1505_v12  ;;  %v4198_v38 = vpop.f32.mrf.mxu1  ;;  %v4242_v53 = vpop.f32.mrf.mxu0  ;;  %v5436_v31 = vadd.f32 %v1780_v25, %v1506_v18 }
 0x15e   : > { %v1765_v35 = vsel %vm817_vm0, %v1737_v22, %v1751_v28  ;;  %v1779_v32 = vsel %vm817_vm0, %v1751_v28, %v1737_v22  ;;  %v1509_v49 = vadd.f32 %v4198_v38, %v5288_v27  ;;  %v1740_v39 = vrot.slane %v4242_v53, 1 }
 0x15f   : > { %v5443_v2 = vadd.f32 %v1765_v35, %v1503_v6  ;;  %v1432_v57 = vpop.f32.mrf.mxu1  ;;  %v1670_v5 = vpop.f32.mrf.mxu0  ;;  %v5445_v41 = vadd.f32 %v1779_v32, %v1504_v8 }
 0x160   : > { %v1507_v10 = vadd.f32 %v1432_v57, %v5298_v34  ;;  %v1739_v14 = vrot.slane %v1670_v5, 1 }
 0x161   : > { %v4199_v37 = vpop.f32.mrf.mxu1  ;;  %v4243_v58 = vpop.f32.mrf.mxu0 }
 0x162   : > { %v1510_v47 = vadd.f32 %v4199_v37, %v5293_v29  ;;  %v1754_v62 = vrot.slane %v4243_v58, 1 }
 0x163   : > { %v1435_v4 = vpop.f32.mrf.mxu1  ;;  %v1673_v45 = vpop.f32.mrf.mxu0 }
 0x164   : > { %v1768_v27 = vsel %vm817_vm0, %v1740_v39, %v1754_v62  ;;  %v1782_v44 = vsel %vm817_vm0, %v1754_v62, %v1740_v39  ;;  %v1508_v40 = vadd.f32 %v1435_v4, %v5300_v36  ;;  %v1753_v50 = vrot.slane %v1673_v45, 1 }
 0x165   : > { %v5454_v12 = vadd.f32 %v1768_v27, %v1509_v49  ;;  %v4202_v34 = vpop.f32.mrf.mxu1  ;;  %v4246_v60 = vpop.f32.mrf.mxu0  ;;  %v5456_v63 = vadd.f32 %v1782_v44, %v1510_v47 }
 0x166   : > { %v1767_v29 = vsel %vm817_vm0, %v1739_v14, %v1753_v50  ;;  %v1781_v6 = vsel %vm817_vm0, %v1753_v50, %v1739_v14  ;;  %v1513_v19 = vadd.f32 %v4202_v34, %v5316_v0  ;;  %v1742_v24 = vrot.slane %v4246_v60, 1 }
 0x167   : > { %v5463_v20 = vadd.f32 %v1767_v29, %v1507_v10  ;;  %v1448_v51 = vpop.f32.mrf.mxu1  ;;  %v1686_v18 = vpop.f32.mrf.mxu0  ;;  %v5465_v36 = vadd.f32 %v1781_v6, %v1508_v40 }
 0x168   : > { %v1511_v13 = vadd.f32 %v1448_v51, %v5326_v56  ;;  %v1741_v8 = vrot.slane %v1686_v18, 1 }
 0x169   : > { %v4203_v22 = vpop.f32.mrf.mxu1  ;;  %v4247_v55 = vpop.f32.mrf.mxu0 }
 0x16a   : > { %v1514_v33 = vadd.f32 %v4203_v22, %v5321_v23  ;;  %v1756_v25 = vrot.slane %v4247_v55, 1 }
 0x16b   : > { %v1451_v28 = vpop.f32.mrf.mxu1  ;;  %v1689_v38 = vpop.f32.mrf.mxu0 }
 0x16c   : > { %v1770_v0 = vsel %vm817_vm0, %v1742_v24, %v1756_v25  ;;  %v1784_v53 = vsel %vm817_vm0, %v1756_v25, %v1742_v24  ;;  %v1512_v35 = vadd.f32 %v1451_v28, %v5328_v30  ;;  %v1755_v32 = vrot.slane %v1689_v38, 1 }
 0x16d   : > { %v5474_v49 = vadd.f32 %v1770_v0, %v1513_v19  ;;  %v4206_v56 = vpop.f32.mrf.mxu1  ;;  %v4250_v57 = vpop.f32.mrf.mxu0  ;;  %v5476_v5 = vadd.f32 %v1784_v53, %v1514_v33 }
 0x16e   : > { %v1769_v23 = vsel %vm817_vm0, %v1741_v8, %v1755_v32  ;;  %v1783_v10 = vsel %vm817_vm0, %v1755_v32, %v1741_v8  ;;  %v1517_v37 = vadd.f32 %v4206_v56, %v5344_v7  ;;  %v1744_v45 = vrot.slane %v4250_v57, 1 }
 0x16f   : > { %6090 = vst [vmem:[#allocation2_spill] sm:$0xff] %v5476_v5  ;;  %v5483_v58 = vadd.f32 %v1769_v23, %v1511_v13  ;;  %v1464_v39 = vpop.f32.mrf.mxu1  ;;  %v1702_v47 = vpop.f32.mrf.mxu0  ;;  %v5485_v30 = vadd.f32 %v1783_v10, %v1512_v35 }
 0x170   : > { %v1515_v62 = vadd.f32 %v1464_v39, %v5354_v52  ;;  %v1743_v40 = vrot.slane %v1702_v47, 1 }
 0x171   : > { %6091 = vst [vmem:[#allocation3_spill] sm:$0xff] %v5485_v30  ;;  %v4207_v14 = vpop.f32.mrf.mxu1  ;;  %v4251_v4 = vpop.f32.mrf.mxu0 }
 0x172   : > { %v1518_v27 = vadd.f32 %v4207_v14, %v5349_v16  ;;  %v1758_v44 = vrot.slane %v4251_v4, 1 }
 0x173   : > { %v1467_v50 = vpop.f32.mrf.mxu1  ;;  %v1705_v34 = vpop.f32.mrf.mxu0 }
 0x174   : > { %v1772_v7 = vsel %vm817_vm0, %v1744_v45, %v1758_v44  ;;  %v1786_v60 = vsel %vm817_vm0, %v1758_v44, %v1744_v45  ;;  %v1516_v29 = vadd.f32 %v1467_v50, %v5356_v26  ;;  %v1757_v6 = vrot.slane %v1705_v34, 1 }
 0x175   : > { %v5494_v19 = vadd.f32 %v1772_v7, %v1517_v37  ;;  %v4210_v52 = vpop.f32.mrf.mxu1  ;;  %v4254_v51 = vpop.f32.mrf.mxu0  ;;  %v5496_v18 = vadd.f32 %v1786_v60, %v1518_v27 }
 0x176   : > { %v1771_v16 = vsel %vm817_vm0, %v1743_v40, %v1757_v6  ;;  %v1785_v13 = vsel %vm817_vm0, %v1757_v6, %v1743_v40  ;;  %v1521_v22 = vadd.f32 %v4210_v52, %v5373_v3  ;;  %v1746_v38 = vrot.slane %v4254_v51, 1 }
 0x177   : > { %v5503_v55 = vadd.f32 %v1771_v16, %v1515_v62  ;;  %v1480_v24 = vpop.f32.mrf.mxu1  ;;  %v1718_v33 = vpop.f32.mrf.mxu0  ;;  %v5505_v26 = vadd.f32 %v1785_v13, %v1516_v29 }
 0x178   : > { %v1519_v25 = vadd.f32 %v1480_v24, %v5384_v59  ;;  %v1745_v35 = vrot.slane %v1718_v33, 1 }
 0x179   : > { %v4211_v8 = vpop.f32.mrf.mxu1  ;;  %v4255_v28 = vpop.f32.mrf.mxu0 }
 0x17a   : > { %v1522_v0 = vadd.f32 %v4211_v8, %v5378_v42  ;;  %v1760_v53 = vrot.slane %v4255_v28, 1 }
 0x17b   : > { %v1483_v32 = vpop.f32.mrf.mxu1  ;;  %v1721_v56 = vpop.f32.mrf.mxu0 }
 0x17c   : > { %v1774_v3 = vsel %vm817_vm0, %v1746_v38, %v1760_v53  ;;  %v1788_v57 = vsel %vm817_vm0, %v1760_v53, %v1746_v38  ;;  %v1520_v23 = vadd.f32 %v1483_v32, %v5387_v46  ;;  %v1759_v10 = vrot.slane %v1721_v56, 1 }
 0x17d   : > { %v5514_v37 = vadd.f32 %v1774_v3, %v1521_v22  ;;  %v4274_v59 = vpop.f32.mrf.mxu1  ;;  %v5516_v39 = vpop.f32.mrf.mxu0  ;;  %v5518_v47 = vadd.f32 %v1788_v57, %v1522_v0 }
 0x17e   : > { %v1773_v42 = vsel %vm817_vm0, %v1745_v35, %v1759_v10  ;;  %v1787_v62 = vsel %vm817_vm0, %v1759_v10, %v1745_v35 }
 0x17f   : > { %v5524_v14 = vadd.f32 %v1773_v42, %v1519_v25  ;;  %v1916_v4 = vpop.f32.mrf.mxu1  ;;  %v5526_v45 = vpop.f32.mrf.mxu0  ;;  %v5528_v46 = vadd.f32 %v1787_v62, %v1520_v23 }
 0x181   : > { %6092 = vst [vmem:[#allocation4_spill] sm:$0xff] %v5524_v14  ;;  %6093 = vst [vmem:[#allocation5_spill] sm:$0xff] %v5528_v46  ;;  %v4275_v27 = vpop.f32.mrf.mxu1  ;;  %v5530_v44 = vpop.f32.mrf.mxu0 }
 0x182   : > { %v2042_v57 = vrot.slane %v4275_v27, 2 }
 0x183   : > { %v1919_v40 = vpop.f32.mrf.mxu1  ;;  %v5532_v50 = vpop.f32.mrf.mxu0 }
 0x184   : > { %v2041_v42 = vrot.slane %v1919_v40, 2 }
 0x185   : > { %v5534_v34 = vpop.f32.mrf.mxu1  ;;  %v5536_v7 = vpop.f32.mrf.mxu0 }
 0x187   : > { %v5538_v60 = vpop.f32.mrf.mxu1  ;;  %v5540_v29 = vpop.f32.mrf.mxu0 }
 0x188   : > { %6094 = vst [vmem:[#allocation6_spill] sm:$0xff] %v5540_v29 }
 0x189   : > { %v4279_v6 = vpop.f32.mrf.mxu1  ;;  %v5542_v52 = vpop.f32.mrf.mxu0 }
 0x18a   : > { %v2044_v40 = vrot.slane %v4279_v6, 2 }
 0x18b   : > { %v5544_v51 = vpop.f32.mrf.mxu1  ;;  %v5546_v16 = vpop.f32.mrf.mxu0 }
 0x18d   : > { %v5548_v13 = vpop.f32.mrf.mxu1  ;;  %v5550_v22 = vpop.f32.mrf.mxu0 }
 0x18e   : > { %6095 = vst [vmem:[#allocation7_spill] sm:$0xff] %v5550_v22  ;;  %v2028_v22 = vrot.slane %v4274_v59, 2 }
 0x18f   : > { %v5552_v24 = vpop.f32.mrf.mxu1  ;;  %v5554_v33 = vpop.f32.mrf.mxu0 }
 0x190   : > { %6096 = vst [vmem:[#allocation8_spill] sm:$0xff] %v5554_v33  ;;  %v2070_v46 = vsel %vm1112_vm1, %v2042_v57, %v2028_v22 }
 0x191   : > { %v5556_v25 = vpop.f32.mrf.mxu1  ;;  %v5558_v8 = vpop.f32.mrf.mxu0 }
 0x192   : > { %6097 = vst [vmem:[#allocation9_spill] sm:$0xff] %v5558_v8 }
 0x193   : > { %v5560_v28 = vpop.f32.mrf.mxu1  ;;  %v5562_v38 = vpop.f32.mrf.mxu0 }
 0x194   : > { %6098 = vst [vmem:[#allocation10_spill] sm:$0xff] %v5562_v38  ;;  %v2027_v38 = vrot.slane %v1916_v4, 2 }
 0x195   : > { %v5564_v0 = vpop.f32.mrf.mxu1  ;;  %v5566_v53 = vpop.f32.mrf.mxu0 }
 0x196   : > { %6099 = vst [vmem:[#allocation11_spill] sm:$0xff] %v5566_v53  ;;  %v2055_v4 = vsel %vm1112_vm1, %v2027_v38, %v2041_v42  ;;  %v2069_v14 = vsel %vm1112_vm1, %v2041_v42, %v2027_v38 }
 0x197   : > { %v5568_v35 = vpop.f32.mrf.mxu1  ;;  %v2374_v32 = vpop.f32.mrf.mxu0  ;;  %v2083_v5 = vadd.f32 %v2055_v4, %v5403_v11  ;;  %v2084_v38 = vadd.f32 %v2069_v14, %v5405_v21 }
 0x198   : > { %v6087_v62 = vrot.slane %v5568_v35, 2 }
 0x199   : > { %v5570_v56 = vpop.f32.mrf.mxu1  ;;  %v5572_v3 = vpop.f32.mrf.mxu0 }
 0x19a   : > { %6100 = vst [vmem:[#allocation12_spill] sm:$0xff] %v5572_v3 }
 0x19b   : > { %v5574_v23 = vpop.f32.mrf.mxu1  ;;  %v5576_v10 = vpop.f32.mrf.mxu0 }
 0x19c   : > { %6101 = vst [vmem:[#allocation13_spill] sm:$0xff] %v5576_v10  ;;  %v6086_v33 = vrot.slane %v5574_v23, 2  ;;  %v2056_v10 = vsel %vm1112_vm1, %v2028_v22, %v2042_v57  ;;  %v2086_v57 = vadd.f32 %v2070_v46, %v5396_v54 }
 0x19d   : > { %v5580_v29 = vpop.f32.mrf.mxu1  ;;  %v4334_v53 = vpop.f32.mrf.mxu0 }
 0x19e   : > { %v2061_v27 = vsel %vm1112_vm1, %v6087_v62, %v6086_v33  ;;  %v2030_v33 = vrot.slane %v5534_v34, 2  ;;  %v5638_v4 = vadd.f32 %v5530_v44, %v2086_v57  ;;  %v5653_v44 = vadd.f32 %v5526_v45, %v2083_v5 }
 0x19f   : > { %v2095_v3 = vadd.f32 %v2061_v27, %v5463_v20  ;;  %v5591_v8 = vpop.f32.mrf.mxu1  ;;  %v2390_v59 = vpop.f32.mrf.mxu0  ;;  %v2085_v20 = vadd.f32 %v2056_v10, %v5394_v61  ;;  %v6089_v27 = vrot.slane %v5580_v29, 2  ;;  %v2031_v45 = vrot.slane %v5552_v24, 2 }
 0x1a0   : > { %v2072_v34 = vsel %vm1112_vm1, %v2044_v40, %v2030_v33  ;;  %v2035_v61 = vrot.slane %v5591_v8, 2 }
 0x1a1   : > { %v5600_v62 = vpop.f32.mrf.mxu1  ;;  %v5602_v30 = vpop.f32.mrf.mxu0  ;;  %v5604_v6 = vadd.f32 %v2374_v32, %v2095_v3  ;;  %v2043_v32 = vrot.slane %v5544_v51, 2  ;;  %v2029_v3 = vrot.slane %v5538_v60, 2  ;;  %v2058_v51 = vsel %vm1112_vm1, %v2030_v33, %v2044_v40 }
 0x1a2   : > { %6102 = vst [vmem:[#allocation14_spill] sm:$0xff] %v5602_v30  ;;  %v6088_v22 = vrot.slane %v5600_v62, 2  ;;  %v5645_v33 = vadd.f32 %v5532_v50, %v2084_v38  ;;  %v2032_v38 = vrot.slane %v5548_v13, 2 }
 0x1a3   : > { %6103 = vst [vmem:[#allocation15_spill] sm:$0xff] %v5604_v6  ;;  %v5614_v42 = vpop.f32.mrf.mxu1  ;;  %v5616_v30 = vpop.f32.mrf.mxu0  ;;  %v2071_v40 = vsel %vm1112_vm1, %v2043_v32, %v2029_v3  ;;  %v5650_v6 = vadd.f32 %v5516_v39, %v2085_v20  ;;  %v2045_v39 = vrot.slane %v5560_v28, 2 }
 0x1a4   : > { %v2064_v54 = vsel %vm1112_vm1, %v6089_v27, %v6088_v22  ;;  %v2049_v11 = vrot.slane %v5614_v42, 2  ;;  %v2090_v22 = vadd.f32 %v2072_v34, %v5416_v48  ;;  %v2089_v48 = vadd.f32 %v2058_v51, %v5414_v9 }
 0x1a5   : > { %v2101_v21 = vadd.f32 %v2064_v54, %v5474_v49  ;;  %v4294_v14 = vpop.f32.mrf.mxu1  ;;  %v4338_v46 = vpop.f32.mrf.mxu0  ;;  %v2088_v9 = vadd.f32 %v2071_v40, %v5425_v15 }
 0x1a6   : > { %v2063_v10 = vsel %vm1112_vm1, %v2035_v61, %v2049_v11  ;;  %v2038_v20 = vrot.slane %v4294_v14, 2  ;;  %v5666_v5 = vadd.f32 %v5542_v52, %v2090_v22 }
 0x1a7   : > { %v2099_v49 = vadd.f32 %v2063_v10, %v5483_v58  ;;  %v1996_v54 = vpop.f32.mrf.mxu1  ;;  %v2406_v27 = vpop.f32.mrf.mxu0  ;;  %v5642_v60 = vadd.f32 %v4334_v53, %v2101_v21  ;;  %v2057_v58 = vsel %vm1112_vm1, %v2029_v3, %v2043_v32  ;;  %v2046_v53 = vrot.slane %v5556_v25, 2 }
 0x1a8   : > { %v2048_v25 = vrot.slane %v5570_v56, 2  ;;  %v2059_v10 = vsel %vm1112_vm1, %v2031_v45, %v2045_v39 }
 0x1a9   : > { %v4295_v57 = vpop.f32.mrf.mxu1  ;;  %v5659_v34 = vpop.f32.mrf.mxu0  ;;  %v5661_v50 = vadd.f32 %v2390_v59, %v2099_v49  ;;  %v2037_v59 = vrot.slane %v1996_v54, 2  ;;  %v2060_v52 = vsel %vm1112_vm1, %v2032_v38, %v2046_v53  ;;  %v2074_v15 = vsel %vm1112_vm1, %v2046_v53, %v2032_v38 }
 0x1aa   : > { %v2052_v21 = vrot.slane %v4295_v57, 2  ;;  %v2034_v49 = vrot.slane %v5564_v0, 2  ;;  %v2087_v53 = vadd.f32 %v2057_v58, %v5423_v43  ;;  %v2073_v0 = vsel %vm1112_vm1, %v2045_v39, %v2031_v45 }
 0x1ab   : > { %v1999_v32 = vpop.f32.mrf.mxu1  ;;  %v5671_v3 = vpop.f32.mrf.mxu0  ;;  %v5707_v43 = vadd.f32 %v5536_v7, %v2089_v48  ;;  %v2091_v58 = vadd.f32 %v2059_v10, %v5443_v2  ;;  %v6104_v39 = vrot.slane %v5568_v35, 2  ;;  %v6106_v45 = vrot.slane %v5580_v29, 2 }
 0x1ac   : > { %v2066_v13 = vsel %vm1112_vm1, %v2038_v20, %v2052_v21  ;;  %v2080_v28 = vsel %vm1112_vm1, %v2052_v21, %v2038_v20  ;;  %v2051_v14 = vrot.slane %v1999_v32, 2  ;;  %v5700_v21 = vadd.f32 %v5546_v16, %v2088_v9 }
 0x1ad   : > { %v2105_v24 = vadd.f32 %v2066_v13, %v5494_v19  ;;  %v5683_v56 = vadd.f32 %v2080_v28, %v5496_v18  ;;  %v4298_v22 = vpop.f32.mrf.mxu1  ;;  %v4342_v51 = vpop.f32.mrf.mxu0  ;;  %v2062_v32 = vsel %vm1112_vm1, %v2034_v49, %v2048_v25  ;;  %v2076_v16 = vsel %vm1112_vm1, %v2048_v25, %v2034_v49 }
 0x1ae   : > { %v2065_v54 = vsel %vm1112_vm1, %v2037_v59, %v2051_v14  ;;  %v2079_v40 = vsel %vm1112_vm1, %v2051_v14, %v2037_v59  ;;  %v6105_v9 = vrot.slane %v5574_v23, 2  ;;  %v2040_v48 = vrot.slane %v4298_v22, 2  ;;  %v6109_v22 = vld [vmem:[#allocation3_spill] sm:$0xff] }
 0x1af   : > { %v2103_v19 = vadd.f32 %v2065_v54, %v5503_v55  ;;  %v5695_v18 = vadd.f32 %v2079_v40, %v5505_v26  ;;  %v2012_v57 = vpop.f32.mrf.mxu1  ;;  %v2422_v38 = vpop.f32.mrf.mxu0  ;;  %v5697_v20 = vadd.f32 %v4338_v46, %v2105_v24  ;;  %v2093_v55 = vadd.f32 %v2060_v52, %v5434_v1 }
 0x1b0   : > { %v2094_v26 = vadd.f32 %v2074_v15, %v5436_v31  ;;  %v2075_v7 = vsel %vm1112_vm1, %v6105_v9, %v6104_v39  ;;  %v2092_v31 = vadd.f32 %v2073_v0, %v5445_v41  ;;  %v2097_v2 = vadd.f32 %v2062_v32, %v5454_v12  ;;  %v6112_v32 = vld [vmem:[#allocation9_spill] sm:$0xff]  ;;  %v6114_v9 = vld [vmem:[#allocation6_spill] sm:$0xff] }
 0x1b1   : > { %v4299_v46 = vpop.f32.mrf.mxu1  ;;  %v4343_v59 = vpop.f32.mrf.mxu0  ;;  %v5712_v13 = vadd.f32 %v2406_v27, %v2103_v19  ;;  %v6107_v27 = vrot.slane %v5600_v62, 2  ;;  %v2077_v35 = vsel %vm1112_vm1, %v2049_v11, %v2035_v61  ;;  %v2039_v14 = vrot.slane %v2012_v57, 2  ;;  %v6108_v11 = vld [vmem:[#allocation2_spill] sm:$0xff]  ;;  %v6111_v19 = vld [vmem:[#allocation5_spill] sm:$0xff] }
 0x1b2   : > { %v2054_v1 = vrot.slane %v4299_v46, 2  ;;  %v2098_v62 = vadd.f32 %v2076_v16, %v5456_v63  ;;  %v2096_v52 = vadd.f32 %v2075_v7, %v5465_v36  ;;  %v2100_v10 = vadd.f32 %v2077_v35, %v6109_v22  ;;  %v6110_v63 = vld [vmem:[#allocation4_spill] sm:$0xff]  ;;  %v6113_v16 = vld [vmem:[#allocation10_spill] sm:$0xff] }
 0x1b3   : > { %v2078_v25 = vsel %vm1112_vm1, %v6107_v27, %v6106_v45  ;;  %v2015_v23 = vpop.f32.mrf.mxu1  ;;  %v2425_v28 = vpop.f32.mrf.mxu0  ;;  %v5757_v46 = vadd.f32 %v6112_v32, %v2094_v26  ;;  %v5760_v39 = vadd.f32 %v6113_v16, %v2092_v31  ;;  %v5763_v7 = vadd.f32 %v6114_v9, %v2087_v53  ;;  %v6117_v35 = vld [vmem:[#allocation8_spill] sm:$0xff]  ;;  %v6118_v53 = vld [vmem:[#allocation11_spill] sm:$0xff] }
 0x1b4   : > { %v2068_v41 = vsel %vm1112_vm1, %v2040_v48, %v2054_v1  ;;  %v2082_v12 = vsel %vm1112_vm1, %v2054_v1, %v2040_v48  ;;  %v2053_v29 = vrot.slane %v2015_v23, 2  ;;  %v2102_v24 = vadd.f32 %v2078_v25, %v6108_v11  ;;  %v6115_v48 = vld [vmem:[#allocation7_spill] sm:$0xff]  ;;  %v6116_v1 = vld [vmem:[#allocation12_spill] sm:$0xff] }
 0x1b5   : > { %v2109_v8 = vadd.f32 %v2068_v41, %v5514_v37  ;;  %v2110_v42 = vadd.f32 %v2082_v12, %v5518_v47  ;;  %v4362_v15 = vpop.f32.mrf.mxu1  ;;  %v4406_v61 = vpop.f32.mrf.mxu0  ;;  %v5769_v45 = vadd.f32 %v6116_v1, %v2098_v62  ;;  %v5774_v23 = vadd.f32 %v6117_v35, %v2091_v58  ;;  %v6120_v62 = vld [vmem:[#allocation14_spill] sm:$0xff] }
 0x1b6   : > { %v2067_v49 = vsel %vm1112_vm1, %v2039_v14, %v2053_v29  ;;  %v2081_v54 = vsel %vm1112_vm1, %v2053_v29, %v2039_v14  ;;  %v2676_v31 = vrot.slane %v4362_v15, 1  ;;  %v5779_v12 = vadd.f32 %v6118_v53, %v2097_v2 }
 0x1b7   : > { %v5750_v40 = vadd.f32 %v4343_v59, %v2110_v42  ;;  %v2107_v36 = vadd.f32 %v2067_v49, %v6110_v63  ;;  %v2108_v37 = vadd.f32 %v2081_v54, %v6111_v19  ;;  %v2564_v57 = vpop.f32.mrf.mxu1  ;;  %v2858_v47 = vpop.f32.mrf.mxu0  ;;  %v5754_v0 = vadd.f32 %v4342_v51, %v2109_v8 }
 0x1b8   : > { %v5766_v59 = vadd.f32 %v6115_v48, %v2093_v55  ;;  %v6119_v55 = vld [vmem:[#allocation13_spill] sm:$0xff]  ;;  %v5785_v8 = vadd.f32 %v6120_v62, %v2102_v24  ;;  %v5792_v58 = vadd.f32 %v5659_v34, %v5683_v56  ;;  %v2970_v15 = vrot.slane %v4406_v61, 2 }
 0x1b9   : > { %v5771_v27 = vadd.f32 %v2425_v28, %v2108_v37  ;;  %v4363_v25 = vpop.f32.mrf.mxu1  ;;  %v4407_v51 = vpop.f32.mrf.mxu0  ;;  %v5776_v26 = vadd.f32 %v2422_v38, %v2107_v36  ;;  %v5782_v29 = vadd.f32 %v6119_v55, %v2096_v52  ;;  %v5788_v28 = vadd.f32 %v5616_v30, %v2100_v10 }
 0x1ba   : > { %v2690_v14 = vrot.slane %v4363_v25, 1  ;;  %v2984_v41 = vrot.slane %v4407_v51, 2  ;;  %v2675_v11 = vrot.slane %v2564_v57, 1  ;;  %v5802_v34 = vadd.f32 %v5671_v3, %v5695_v18  ;;  %v5822_v57 = vld [vmem:[%s6084_s3] ss:$0 sm:$0xff] }
 0x1bb   : > { %v2567_v38 = vpop.f32.mrf.mxu1  ;;  %v2861_v42 = vpop.f32.mrf.mxu0  ;;  %v2969_v56 = vrot.slane %v2858_v47, 2 }
 0x1bc   : > { %v2704_v2 = vsel %vm817_vm0, %v2676_v31, %v2690_v14  ;;  %v2718_v52 = vsel %vm817_vm0, %v2690_v14, %v2676_v31  ;;  %v2689_v30 = vrot.slane %v2567_v38, 1  ;;  %v2983_v10 = vrot.slane %v2861_v42, 2 }
 0x1bd   : > { %v2733_v24 = vadd.f32 %v2704_v2, %v5650_v6  ;;  %v2734_v22 = vadd.f32 %v2718_v52, %v5638_v4  ;;  %v4366_v49 = vpop.f32.mrf.mxu1  ;;  %v4410_v54 = vpop.f32.mrf.mxu0  ;;  %v2998_v61 = vsel %vm1112_vm1, %v2970_v15, %v2984_v41  ;;  %v3012_v63 = vsel %vm1112_vm1, %v2984_v41, %v2970_v15  ;;  %v5811_v6 = vld [vmem:[%s6083_s2] ss:$0 sm:$0xff] }
 0x1be   : > { %v2703_v19 = vsel %vm817_vm0, %v2675_v11, %v2689_v30  ;;  %v2717_v3 = vsel %vm817_vm0, %v2689_v30, %v2675_v11  ;;  %v2678_v16 = vrot.slane %v4366_v49, 1  ;;  %v2972_v9 = vrot.slane %v4410_v54, 2 }
 0x1bf   : > { %v3027_v4 = vadd.f32 %v2998_v61, %v2733_v24  ;;  %v3028_v36 = vadd.f32 %v3012_v63, %v2734_v22  ;;  %v2580_v18 = vpop.f32.mrf.mxu1  ;;  %v5817_v37 = vpop.f32.mrf.mxu0  ;;  %v2731_v47 = vadd.f32 %v2703_v19, %v5653_v44  ;;  %v2732_v32 = vadd.f32 %v2717_v3, %v5645_v33 }
 0x1c0   : > { %v2997_v25 = vsel %vm1112_vm1, %v2969_v56, %v2983_v10  ;;  %v3011_v51 = vsel %vm1112_vm1, %v2983_v10, %v2969_v56  ;;  %v2677_v62 = vrot.slane %v2580_v18, 1  ;;  %v2971_v38 = vrot.slane %v5817_v37, 2 }
 0x1c1   : > { %v3062_v48 = vmul.f32 %v5811_v6, %v3027_v4  ;;  %v3063_v1 = vmul.f32 %v5811_v6, %v3028_v36  ;;  %v4367_v35 = vpop.f32.mrf.mxu1  ;;  %v4411_v31 = vpop.f32.mrf.mxu0  ;;  %v3025_v14 = vadd.f32 %v2997_v25, %v2731_v47  ;;  %v3026_v41 = vadd.f32 %v3011_v51, %v2732_v32 }
 0x1c2   : > { %v2692_v44 = vrot.slane %v4367_v35, 1  ;;  %v2986_v53 = vrot.slane %v4411_v31, 2 }
 0x1c3   : > { %v3097_v33 = vadd.f32 %v5822_v57, %v3062_v48  ;;  %v3098_v55 = vadd.f32 %v5822_v57, %v3063_v1  ;;  %v2583_v42 = vpop.f32.mrf.mxu1  ;;  %v2877_v15 = vpop.f32.mrf.mxu0  ;;  %v3060_v11 = vmul.f32 %v5811_v6, %v3025_v14  ;;  %v3061_v2 = vmul.f32 %v5811_v6, %v3026_v41 }
 0x1c4   : > { %v2706_v52 = vsel %vm817_vm0, %v2678_v16, %v2692_v44  ;;  %v2720_v24 = vsel %vm817_vm0, %v2692_v44, %v2678_v16  ;;  %v3000_v4 = vsel %vm1112_vm1, %v2972_v9, %v2986_v53  ;;  %v2691_v3 = vrot.slane %v2583_v42, 1 }
 0x1c5   : > { %v3125_v22 = vmax.f32 %v3097_v33, 0.0  ;;  %v3126_v30 = vmax.f32 %v3098_v55, 0.0  ;;  %v2737_v10 = vadd.f32 %v2706_v52, %v5707_v43  ;;  %v2738_v49 = vadd.f32 %v2720_v24, %v5666_v5  ;;  %v4370_v54 = vpop.f32.mrf.mxu1  ;;  %v4414_v56 = vpop.f32.mrf.mxu0 }
 0x1c6   : > { %v3095_v61 = vadd.f32 %v5822_v57, %v3060_v11  ;;  %v3096_v63 = vadd.f32 %v5822_v57, %v3061_v2  ;;  %v3014_v43 = vsel %vm1112_vm1, %v2986_v53, %v2972_v9  ;;  %v2985_v16 = vrot.slane %v2877_v15, 2 }
 0x1c7   : > { %v3763_v36 = vpack.c.bf16 %v3126_v30, %v3125_v22  ;;  %v3031_v5 = vadd.f32 %v3000_v4, %v2737_v10  ;;  %v3032_v19 = vadd.f32 %v3014_v43, %v2738_v49  ;;  %v2596_v18 = vpop.f32.mrf.mxu1  ;;  %v2890_v37 = vpop.f32.mrf.mxu0  ;;  %v2680_v48 = vrot.slane %v4370_v54, 1 }
 0x1c8   : > { %v3123_v47 = vmax.f32 %v3095_v61, 0.0  ;;  %v3124_v32 = vmax.f32 %v3096_v63, 0.0  ;;  %v2705_v51 = vsel %vm817_vm0, %v2677_v62, %v2691_v3  ;;  %v2719_v9 = vsel %vm817_vm0, %v2691_v3, %v2677_v62 }
 0x1c9   : > { %3825 = vst [vmem:[%s5847_s24 + $0x8] sm:$0xff] %v3763_v36   ;;  %v3066_v1 = vmul.f32 %v5811_v6, %v3031_v5  ;;  %v3067_v25 = vmul.f32 %v5811_v6, %v3032_v19  ;;  %v4371_v35 = vpop.f32.mrf.mxu1  ;;  %v4415_v31 = vpop.f32.mrf.mxu0  ;;  %v2735_v41 = vadd.f32 %v2705_v51, %v5763_v7  ;;  %v2736_v44 = vadd.f32 %v2719_v9, %v5700_v21 }
 0x1ca   : > { %v3758_v14 = vpack.c.bf16 %v3124_v32, %v3123_v47  ;;  %v2999_v53 = vsel %vm1112_vm1, %v2971_v38, %v2985_v16  ;;  %v3013_v42 = vsel %vm1112_vm1, %v2985_v16, %v2971_v38  ;;  %v2974_v15 = vrot.slane %v4414_v56, 2 }
 0x1cb   : > { %v3101_v33 = vadd.f32 %v5822_v57, %v3066_v1  ;;  %v3102_v55 = vadd.f32 %v5822_v57, %v3067_v25  ;;  %v2599_v11 = vpop.f32.mrf.mxu1  ;;  %v2893_v62 = vpop.f32.mrf.mxu0  ;;  %v3029_v2 = vadd.f32 %v2999_v53, %v2735_v41  ;;  %v3030_v52 = vadd.f32 %v3013_v42, %v2736_v44 }
 0x1cc   : > { %3759 = vst [vmem:[%s5847_s24] sm:$0xff] %v3758_v14   ;;  %v2679_v24 = vrot.slane %v2596_v18, 1  ;;  %v2973_v7 = vrot.slane %v2890_v37, 2  ;;  %v2694_v30 = vrot.slane %v4371_v35, 1  ;;  %v2988_v10 = vrot.slane %v4415_v31, 2 }
 0x1cd   : > { %v3129_v22 = vmax.f32 %v3101_v33, 0.0  ;;  %v3130_v21 = vmax.f32 %v3102_v55, 0.0  ;;  %v4374_v49 = vpop.f32.mrf.mxu1  ;;  %v5871_v54 = vpop.f32.mrf.mxu0  ;;  %v3064_v61 = vmul.f32 %v5811_v6, %v3029_v2  ;;  %v3065_v38 = vmul.f32 %v5811_v6, %v3030_v52 }
 0x1ce   : > { %v2693_v56 = vrot.slane %v2599_v11, 1  ;;  %v2987_v63 = vrot.slane %v2893_v62, 2  ;;  %v2708_v43 = vsel %vm817_vm0, %v2680_v48, %v2694_v30  ;;  %v2722_v36 = vsel %vm817_vm0, %v2694_v30, %v2680_v48 }
 0x1cf   : > { %v3773_v4 = vpack.c.bf16 %v3130_v21, %v3129_v22  ;;  %v3002_v5 = vsel %vm1112_vm1, %v2974_v15, %v2988_v10  ;;  %v5881_v19 = vpop.f32.mrf.mxu1  ;;  %v5883_v3 = vpop.f32.mrf.mxu0  ;;  %v3099_v18 = vadd.f32 %v5822_v57, %v3064_v61  ;;  %v3100_v37 = vadd.f32 %v5822_v57, %v3065_v38 }
 0x1d0   : > { %v2741_v47 = vadd.f32 %v2708_v43, %v5766_v59  ;;  %v2742_v32 = vadd.f32 %v2722_v36, %v5757_v46  ;;  %v3016_v16 = vsel %vm1112_vm1, %v2988_v10, %v2974_v15  ;;  %v2707_v48 = vsel %vm817_vm0, %v2679_v24, %v2693_v56 }
 0x1d1   : > { %3827 = vst [vmem:[%s5847_s24 + $0x18] sm:$0xff] %v3773_v4   ;;  %v2721_v1 = vsel %vm817_vm0, %v2693_v56, %v2679_v24  ;;  %v3001_v25 = vsel %vm1112_vm1, %v2973_v7, %v2987_v63  ;;  %v4375_v51 = vpop.f32.mrf.mxu1  ;;  %v4419_v9 = vpop.f32.mrf.mxu0  ;;  %v3127_v35 = vmax.f32 %v3099_v18, 0.0  ;;  %v3128_v31 = vmax.f32 %v3100_v37, 0.0 }
 0x1d2   : > { %v3035_v59 = vadd.f32 %v3002_v5, %v2741_v47  ;;  %v3036_v14 = vadd.f32 %v3016_v16, %v2742_v32  ;;  %v2739_v46 = vadd.f32 %v2707_v48, %v5774_v23  ;;  %v2740_v41 = vadd.f32 %v2721_v1, %v5760_v39 }
 0x1d3   : > { %v3015_v44 = vsel %vm1112_vm1, %v2987_v63, %v2973_v7  ;;  %v2682_v53 = vrot.slane %v4374_v49, 1  ;;  %v2615_v33 = vpop.f32.mrf.mxu1  ;;  %v2909_v55 = vpop.f32.mrf.mxu0  ;;  %v3768_v42 = vpack.c.bf16 %v3128_v31, %v3127_v35  ;;  %v2976_v62 = vrot.slane %v5871_v54, 2 }
 0x1d4   : > { %v3070_v15 = vmul.f32 %v5811_v6, %v3035_v59  ;;  %v3071_v11 = vmul.f32 %v5811_v6, %v3036_v14  ;;  %v3033_v2 = vadd.f32 %v3001_v25, %v2739_v46  ;;  %v3034_v52 = vadd.f32 %v3015_v44, %v2740_v41  ;;  %v6121_v14 = vld [vmem:[#allocation15_spill] sm:$0xff] }
 0x1d5   : > { %v2681_v23 = vrot.slane %v5881_v19, 1  ;;  %v2975_v24 = vrot.slane %v5883_v3, 2  ;;  %v5907_v39 = vpop.f32.mrf.mxu1  ;;  %v5909_v22 = vpop.f32.mrf.mxu0  ;;  %3826 = vst [vmem:[%s5847_s24 + $0x10] sm:$0xff] %v3768_v42   ;;  %v2696_v30 = vrot.slane %v4375_v51, 1  ;;  %v2990_v10 = vrot.slane %v4419_v9, 2 }
 0x1d6   : > { %v3105_v7 = vadd.f32 %v5822_v57, %v3070_v15  ;;  %v3106_v21 = vadd.f32 %v5822_v57, %v3071_v11  ;;  %v3068_v49 = vmul.f32 %v5811_v6, %v3033_v2  ;;  %v3069_v54 = vmul.f32 %v5811_v6, %v3034_v52 }
 0x1d7   : > { %v2695_v61 = vrot.slane %v2615_v33, 1  ;;  %v2989_v38 = vrot.slane %v2909_v55, 2  ;;  %v5916_v56 = vpop.f32.mrf.mxu1  ;;  %v5918_v63 = vpop.f32.mrf.mxu0  ;;  %v2710_v36 = vsel %vm817_vm0, %v2682_v53, %v2696_v30  ;;  %v2724_v5 = vsel %vm817_vm0, %v2696_v30, %v2682_v53 }
 0x1d8   : > { %v3133_v4 = vmax.f32 %v3105_v7, 0.0  ;;  %v3134_v43 = vmax.f32 %v3106_v21, 0.0  ;;  %v3103_v19 = vadd.f32 %v5822_v57, %v3068_v49  ;;  %v3104_v3 = vadd.f32 %v5822_v57, %v3069_v54 }
 0x1d9   : > { %v2745_v18 = vadd.f32 %v2710_v36, %v5779_v12  ;;  %v2746_v37 = vadd.f32 %v2724_v5, %v5769_v45  ;;  %v4379_v47 = vpop.f32.mrf.mxu1  ;;  %v4423_v32 = vpop.f32.mrf.mxu0  ;;  %v3004_v48 = vsel %vm1112_vm1, %v2976_v62, %v2990_v10  ;;  %v3018_v1 = vsel %vm1112_vm1, %v2990_v10, %v2976_v62 }
 0x1da   : > { %v3783_v16 = vpack.c.bf16 %v3134_v43, %v3133_v4  ;;  %v2709_v25 = vsel %vm817_vm0, %v2681_v23, %v2695_v61  ;;  %v3131_v51 = vmax.f32 %v3103_v19, 0.0  ;;  %v3132_v9 = vmax.f32 %v3104_v3, 0.0 }
 0x1db   : > { %v3039_v35 = vadd.f32 %v3004_v48, %v2745_v18  ;;  %v3040_v31 = vadd.f32 %v3018_v1, %v2746_v37  ;;  %v2631_v59 = vpop.f32.mrf.mxu1  ;;  %v2925_v12 = vpop.f32.mrf.mxu0  ;;  %v2723_v45 = vsel %vm817_vm0, %v2695_v61, %v2681_v23  ;;  %v2743_v46 = vadd.f32 %v2709_v25, %v6121_v14 }
 0x1dc   : > { %3829 = vst [vmem:[%s5847_s24 + $0x28] sm:$0xff] %v3783_v16   ;;  %v3003_v41 = vsel %vm1112_vm1, %v2975_v24, %v2989_v38  ;;  %v3017_v44 = vsel %vm1112_vm1, %v2989_v38, %v2975_v24  ;;  %v3778_v53 = vpack.c.bf16 %v3132_v9, %v3131_v51  ;;  %v2744_v42 = vadd.f32 %v2723_v45, %v5782_v29 }
 0x1dd   : > { %v3074_v33 = vmul.f32 %v5811_v6, %v3039_v35  ;;  %v3075_v55 = vmul.f32 %v5811_v6, %v3040_v31  ;;  %v5945_v15 = vpop.f32.mrf.mxu1  ;;  %v5947_v11 = vpop.f32.mrf.mxu0  ;;  %v3037_v62 = vadd.f32 %v3003_v41, %v2743_v46  ;;  %v2684_v2 = vrot.slane %v5907_v39, 1 }
 0x1de   : > { %v2978_v52 = vrot.slane %v5909_v22, 2  ;;  %v2683_v23 = vrot.slane %v5916_v56, 1  ;;  %3828 = vst [vmem:[%s5847_s24 + $0x20] sm:$0xff] %v3778_v53   ;;  %v3038_v21 = vadd.f32 %v3017_v44, %v2744_v42  ;;  %v2977_v30 = vrot.slane %v5918_v63, 2 }
 0x1df   : > { %v3109_v24 = vadd.f32 %v5822_v57, %v3074_v33  ;;  %v3110_v7 = vadd.f32 %v5822_v57, %v3075_v55  ;;  %v5956_v29 = vpop.f32.mrf.mxu1  ;;  %v5958_v10 = vpop.f32.mrf.mxu0  ;;  %v3072_v49 = vmul.f32 %v5811_v6, %v3037_v62  ;;  %v2698_v54 = vrot.slane %v4379_v47, 1 }
 0x1e0   : > { %v2992_v39 = vrot.slane %v4423_v32, 2  ;;  %v2697_v61 = vrot.slane %v2631_v59, 1  ;;  %v3073_v56 = vmul.f32 %v5811_v6, %v3038_v21  ;;  %v2991_v4 = vrot.slane %v2925_v12, 2 }
 0x1e1   : > { %v3137_v22 = vmax.f32 %v3109_v24, 0.0  ;;  %v3138_v38 = vmax.f32 %v3110_v7, 0.0  ;;  %v4383_v43 = vpop.f32.mrf.mxu1  ;;  %v4427_v36 = vpop.f32.mrf.mxu0  ;;  %v3107_v5 = vadd.f32 %v5822_v57, %v3072_v49  ;;  %v2712_v63 = vsel %vm817_vm0, %v2684_v2, %v2698_v54 }
 0x1e2   : > { %v2726_v19 = vsel %vm817_vm0, %v2698_v54, %v2684_v2  ;;  %v3006_v3 = vsel %vm1112_vm1, %v2978_v52, %v2992_v39  ;;  %v3108_v37 = vadd.f32 %v5822_v57, %v3073_v56  ;;  %v2749_v47 = vadd.f32 %v2712_v63, %v5642_v60 }
 0x1e3   : > { %v3793_v18 = vpack.c.bf16 %v3138_v38, %v3137_v22  ;;  %v2750_v32 = vadd.f32 %v2726_v19, %v5785_v8  ;;  %v2647_v16 = vpop.f32.mrf.mxu1  ;;  %v3135_v48 = vmax.f32 %v3107_v5, 0.0  ;;  %v3020_v1 = vsel %vm1112_vm1, %v2992_v39, %v2978_v52  ;;  %v2941_v9 = vpop.f32.mrf.mxu0 }
 0x1e4   : > { %v2711_v25 = vsel %vm817_vm0, %v2683_v23, %v2697_v61  ;;  %v2725_v51 = vsel %vm817_vm0, %v2697_v61, %v2683_v23  ;;  %v3136_v35 = vmax.f32 %v3108_v37, 0.0  ;;  %v3043_v31 = vadd.f32 %v3006_v3, %v2749_v47 }
 0x1e5   : > { %3831 = vst [vmem:[%s5847_s24 + $0x38] sm:$0xff] %v3793_v18   ;;  %v3044_v59 = vadd.f32 %v3020_v1, %v2750_v32  ;;  %v2747_v60 = vadd.f32 %v2711_v25, %v5661_v50  ;;  %v5980_v8 = vpop.f32.mrf.mxu1  ;;  %v2748_v12 = vadd.f32 %v2725_v51, %v5788_v28  ;;  %v3005_v45 = vsel %vm1112_vm1, %v2977_v30, %v2991_v4  ;;  %v5993_v62 = vpop.f32.mrf.mxu0 }
 0x1e6   : > { %v3019_v14 = vsel %vm1112_vm1, %v2991_v4, %v2977_v30  ;;  %v2686_v46 = vrot.slane %v5945_v15, 1  ;;  %v3788_v41 = vpack.c.bf16 %v3136_v35, %v3135_v48  ;;  %v3078_v44 = vmul.f32 %v5811_v6, %v3043_v31 }
 0x1e7   : > { %v3079_v53 = vmul.f32 %v5811_v6, %v3044_v59  ;;  %v3041_v33 = vadd.f32 %v3005_v45, %v2747_v60  ;;  %v3042_v55 = vadd.f32 %v3019_v14, %v2748_v12  ;;  %v2980_v50 = vrot.slane %v5947_v11, 2  ;;  %v5999_v24 = vpop.f32.mrf.mxu1  ;;  %v6011_v56 = vpop.f32.mrf.mxu0 }
 0x1e8   : > { %v2685_v42 = vrot.slane %v5956_v29, 1  ;;  %v2979_v28 = vrot.slane %v5958_v10, 2  ;;  %3830 = vst [vmem:[%s5847_s24 + $0x30] sm:$0xff] %v3788_v41   ;;  %v3113_v2 = vadd.f32 %v5822_v57, %v3078_v44  ;;  %v2700_v23 = vrot.slane %v4383_v43, 1 }
 0x1e9   : > { %v3114_v15 = vadd.f32 %v5822_v57, %v3079_v53  ;;  %v3076_v52 = vmul.f32 %v5811_v6, %v3041_v33  ;;  %v3077_v7 = vmul.f32 %v5811_v6, %v3042_v55  ;;  %v2994_v21 = vrot.slane %v4427_v36, 2  ;;  %v4387_v63 = vpop.f32.mrf.mxu1  ;;  %v4431_v51 = vpop.f32.mrf.mxu0 }
 0x1ea   : > { %v2699_v11 = vrot.slane %v2647_v16, 1  ;;  %v2993_v30 = vrot.slane %v2941_v9, 2  ;;  %v3141_v29 = vmax.f32 %v3113_v2, 0.0  ;;  %v2714_v54 = vsel %vm817_vm0, %v2686_v46, %v2700_v23 }
 0x1eb   : > { %v3142_v49 = vmax.f32 %v3114_v15, 0.0  ;;  %v3111_v10 = vadd.f32 %v5822_v57, %v3076_v52  ;;  %v3112_v39 = vadd.f32 %v5822_v57, %v3077_v7  ;;  %v2728_v61 = vsel %vm817_vm0, %v2700_v23, %v2686_v46  ;;  %v2663_v59 = vpop.f32.mrf.mxu1  ;;  %v2957_v2 = vpop.f32.mrf.mxu0 }
 0x1ec   : > { %v2753_v22 = vadd.f32 %v2714_v54, %v5697_v20  ;;  %v3008_v38 = vsel %vm1112_vm1, %v2980_v50, %v2994_v21  ;;  %v2754_v36 = vadd.f32 %v2728_v61, %v5792_v58  ;;  %v3022_v5 = vsel %vm1112_vm1, %v2994_v21, %v2980_v50 }
 0x1ed   : > { %v3803_v4 = vpack.c.bf16 %v3142_v49, %v3141_v29  ;;  %v3139_v43 = vmax.f32 %v3111_v10, 0.0  ;;  %v3140_v19 = vmax.f32 %v3112_v39, 0.0  ;;  %v2713_v18 = vsel %vm817_vm0, %v2685_v42, %v2699_v11 }
 0x1ee   : > { %v3047_v3 = vadd.f32 %v3008_v38, %v2753_v22  ;;  %v2727_v20 = vsel %vm817_vm0, %v2699_v11, %v2685_v42  ;;  %v3048_v37 = vadd.f32 %v3022_v5, %v2754_v36  ;;  %v2751_v47 = vadd.f32 %v2713_v18, %v5712_v13 }
 0x1ef   : > { %3833 = vst [vmem:[%s5847_s24 + $0x48] sm:$0xff] %v3803_v4   ;;  %v2752_v32 = vadd.f32 %v2727_v20, %v5802_v34  ;;  %v3007_v58 = vsel %vm1112_vm1, %v2979_v28, %v2993_v30  ;;  %v3798_v16 = vpack.c.bf16 %v3140_v19, %v3139_v43  ;;  %v3021_v1 = vsel %vm1112_vm1, %v2993_v30, %v2979_v28 }
 0x1f0   : > { %v3082_v48 = vmul.f32 %v5811_v6, %v3047_v3  ;;  %v2688_v25 = vrot.slane %v5980_v8, 1  ;;  %v3083_v9 = vmul.f32 %v5811_v6, %v3048_v37  ;;  %v3045_v35 = vadd.f32 %v3007_v58, %v2751_v47 }
 0x1f1   : > { %v3046_v31 = vadd.f32 %v3021_v1, %v2752_v32  ;;  %v2982_v13 = vrot.slane %v5993_v62, 2  ;;  %3832 = vst [vmem:[%s5847_s24 + $0x40] sm:$0xff] %v3798_v16   ;;  %v2687_v60 = vrot.slane %v5999_v24, 1  ;;  %v2981_v12 = vrot.slane %v6011_v56, 2 }
 0x1f2   : > { %v3117_v34 = vadd.f32 %v5822_v57, %v3082_v48  ;;  %v2702_v45 = vrot.slane %v4387_v63, 1  ;;  %v3118_v14 = vadd.f32 %v5822_v57, %v3083_v9  ;;  %v3080_v8 = vmul.f32 %v5811_v6, %v3045_v35 }
 0x1f3   : > { %v3081_v46 = vmul.f32 %v5811_v6, %v3046_v31  ;;  %v2996_v41 = vrot.slane %v4431_v51, 2  ;;  %v2701_v55 = vrot.slane %v2663_v59, 1  ;;  %v2995_v49 = vrot.slane %v2957_v2, 2 }
 0x1f4   : > { %v3145_v44 = vmax.f32 %v3117_v34, 0.0  ;;  %v2716_v53 = vsel %vm817_vm0, %v2688_v25, %v2702_v45  ;;  %v2730_v33 = vsel %vm817_vm0, %v2702_v45, %v2688_v25  ;;  %v3146_v50 = vmax.f32 %v3118_v14, 0.0 }
 0x1f5   : > { %v3115_v42 = vadd.f32 %v5822_v57, %v3080_v8  ;;  %v3116_v28 = vadd.f32 %v5822_v57, %v3081_v46  ;;  %v2757_v62 = vadd.f32 %v2716_v53, %v5754_v0  ;;  %v2758_v15 = vadd.f32 %v2730_v33, %v5750_v40 }
 0x1f6   : > { %v3010_v52 = vsel %vm1112_vm1, %v2982_v13, %v2996_v41  ;;  %v3024_v23 = vsel %vm1112_vm1, %v2996_v41, %v2982_v13  ;;  %v2715_v24 = vsel %vm817_vm0, %v2687_v60, %v2701_v55  ;;  %v3813_v7 = vpack.c.bf16 %v3146_v50, %v3145_v44 }
 0x1f7   : > { %v3143_v21 = vmax.f32 %v3115_v42, 0.0  ;;  %v3144_v11 = vmax.f32 %v3116_v28, 0.0  ;;  %v3051_v30 = vadd.f32 %v3010_v52, %v2757_v62  ;;  %v3052_v29 = vadd.f32 %v3024_v23, %v2758_v15 }
 0x1f8   : > { %v2729_v0 = vsel %vm817_vm0, %v2701_v55, %v2687_v60  ;;  %v2755_v40 = vadd.f32 %v2715_v24, %v5776_v26  ;;  %3835 = vst [vmem:[%s5847_s24 + $0x58] sm:$0xff] %v3813_v7   ;;  %v3009_v22 = vsel %vm1112_vm1, %v2981_v12, %v2995_v49  ;;  %v3023_v38 = vsel %vm1112_vm1, %v2995_v49, %v2981_v12 }
 0x1f9   : > { %v3808_v10 = vpack.c.bf16 %v3144_v11, %v3143_v21  ;;  %v3086_v54 = vmul.f32 %v5811_v6, %v3051_v30  ;;  %v2756_v39 = vadd.f32 %v2729_v0, %v5771_v27  ;;  %v3087_v61 = vmul.f32 %v5811_v6, %v3052_v29 }
 0x1fa   : > { %v3049_v56 = vadd.f32 %v3009_v22, %v2755_v40 }
 0x1fb   : > { %3834 = vst [vmem:[%s5847_s24 + $0x50] sm:$0xff] %v3808_v10   ;;  %v3121_v26 = vadd.f32 %v5822_v57, %v3086_v54  ;;  %v3050_v4 = vadd.f32 %v3023_v38, %v2756_v39  ;;  %v3122_v43 = vadd.f32 %v5822_v57, %v3087_v61 }
 0x1fc   : > { %v3084_v27 = vmul.f32 %v5811_v6, %v3049_v56 }
 0x1fd   : > { %v3149_v36 = vmax.f32 %v3121_v26, 0.0  ;;  %v3085_v5 = vmul.f32 %v5811_v6, %v3050_v4  ;;  %v3150_v63 = vmax.f32 %v3122_v43, 0.0 }
 0x1fe   : > { %v3119_v19 = vadd.f32 %v5822_v57, %v3084_v27 }
 0x1ff   : > { %v3120_v17 = vadd.f32 %v5822_v57, %v3085_v5  ;;  %v3823_v3 = vpack.c.bf16 %v3150_v63, %v3149_v36 }
 0x200   : > { %v3147_v18 = vmax.f32 %v3119_v19, 0.0 }
 0x201   : > { %v3148_v20 = vmax.f32 %v3120_v17, 0.0  ;;  %3837 = vst [vmem:[%s5847_s24 + $0x68] sm:$0xff] %v3823_v3  }
 0x203   : > { %v3818_v37 = vpack.c.bf16 %v3148_v20, %v3147_v18 }
 0x205   : > { %3836 = vst [vmem:[%s5847_s24 + $0x60] sm:$0xff] %v3818_v37  }
 0x206 PF: > { %s14_s17 = sadd.s32 1, %s4609_s17   ;;  %s6122_s15 = smov %s4605_s16 }
 0x207   : > { %p11_p5 = scmp.ge.s32.totalorder %s14_s17, 4   ;;  %s6123_s16 = smov %s6125_s18 }
 0x209   :  { %13 = sbr.rel (!%p11_p5) target bundleno = 2 (0x2), region = 77 }

// kernel: depthwise_xcorr_forward.5
= control target key start
LH: loop header
LB: loop body
LE: loop exit
PB: predicated region body
PF: predicated region fallthrough
CT: control target
= control target key end

     0   :  { %s4321_s24 = smov 0   ;;  %s4323_s25 = smov 0   ;;  %s7671_s0 = inlined_call_operand.vmem [shape: bf16[2,14,16,128], index: 0, kind: input, shape index: {}]   ;;  %s7672_s1 = inlined_call_operand.vmem [shape: bf16[2,6,8,128], index: 1, kind: input, shape index: {}]   ;;  %s7673_s2 = inlined_call_operand.vmem [shape: bf16[128,128], index: 2, kind: input, shape index: {}]   ;;  %s7674_s3 = inlined_call_operand.vmem [shape: f32[1,128], index: 3, kind: input, shape index: {}]   ;;  %s7675_s4 = inlined_call_operand.vmem [shape: f32[1,128], index: 4, kind: input, shape index: {}]   ;;  %s7676_s5 = inlined_call_operand.vmem [shape: bf16[128,128], index: 5, kind: input, shape index: {}]   ;;  %s7677_s6 = inlined_call_operand.vmem [shape: f32[1,128], index: 6, kind: input, shape index: {}]   ;;  %s7678_s7 = inlined_call_operand.vmem [shape: f32[2,9,16,128], index: 7, kind: output, shape index: {}]  }
   0x1   :  { %s4325_s26 = smov 0  }
   0x2 LB: > { %s29_s27 = sadd.s32 1, %s4273_s25  ;;  %p3683_p0 = scmp.ge.s32.totalorder %s4277_s26, 1  ;;  %s4277_s26 = sphi %s4325_s26, %s17_s26   ;;  %s4273_s25 = sphi %s4323_s25, %s8813_s25   ;;  %s4269_s24 = sphi %s4321_s24, %s8812_s24  }
   0x3   : > { %p31_p1 = scmp.ge.s32.totalorder %s29_s27, 2  ;;  %p261_p2 = scmp.lt.s32.totalorder %s4277_s26, 3 }
   0x5   : > { %s8815_s27 = smov (%p31_p1, %s29_s27), 0  ;;  %p262_p3 = pnand %p3683_p0, %p261_p2 }
   0x7   : > { %265 = sbr.rel (%p262_p3) target bundleno = 907 (0x38b), region = 48 }
   0xc   : > { %v4239_v0 = vld [vmem:[%s7673_s2 + $0x38] sm:$0xff]   ;;  %v367_v1 = vlaneseq  ;;  %v7679_v2 = vmov 0.0   ;;  %v4240_v3 = vld [vmem:[%s7673_s2 + $0x30] sm:$0xff]   ;;  %vm4280_vm0 = vmmov 0   ;;  %p303_p4 = scmp.lt.s32.totalorder %s4269_s24, 1  ;;  %v4241_v5 = vld [vmem:[%s7673_s2 + $0x28] sm:$0xff]  }
   0xd   : > { %4106 = vmatprep.subr.bf16.mxu0 %v7679_v2  ;;  %4158 = vmatprep.subr.bf16.mxu1 %v7679_v2  ;;  %v4242_v12 = vld [vmem:[%s7673_s2 + $0x20] sm:$0xff]   ;;  %v4243_v26 = vld [vmem:[%s7673_s2 + $0x18] sm:$0xff]   ;;  %v4244_v47 = vld [vmem:[%s7673_s2 + $0x10] sm:$0xff]  }
   0xe   : > { %4107 = vmatpush3.bf16.msra.mxu0 %v4239_v0  ;;  %4122 = vmatprep.mubr.msk.bf16.mxu0 %vm4280_vm0, %v7679_v2  ;;  %s8817_s24 = smov (!%p303_p4, %s4269_s24), 1  ;;  %v4354_v4 = vshrl.u32 %v367_v1, 7  ;;  %v4245_v0 = vld [vmem:[%s7673_s2 + $0x8] sm:$0xff]  }
   0xf   : > { %4108 = vmatprep.subr.bf16.mxu0 %v7679_v2  ;;  %4174 = vmatprep.mubr.msk.bf16.mxu1 %vm4280_vm0, %v7679_v2  ;;  %s4210_s11 = smul.u32 112, %s8817_s24 }
  0x10   : > { %8164 = vst [vmem:[#allocation2_spill] sm:$0xff] %v4354_v4  ;;  %s4211_s12 = smul.u32 24, %s8817_s24  ;;  %v4368_v6 = vsub.s32 0, %v4354_v4  ;;  %vm427_vm1 = vcmp.lt.s32.totalorder %v4354_v4, 7  ;;  %v4372_v7 = vsub.s32 1, %v4354_v4  ;;  %vm504_vm2 = vcmp.lt.s32.totalorder %v4354_v4, 6 }
  0x11   : > { %s4365_s15 = scalar_lea.vmem %s7671_s0, %s4210_s11  ;;  %v4382_v9 = vsub.s32 2, %v4354_v4  ;;  %vm581_vm3 = vcmp.lt.s32.totalorder %v4354_v4, 5  ;;  %v4386_v10 = vsub.s32 3, %v4354_v4  ;;  %vm658_vm4 = vcmp.lt.s32.totalorder %v4354_v4, 4  ;;  %s4212_s11 = smul.u32 144, %s8817_s24 }
  0x12   : > { %4109 = vmatpush3.bf16.msra.mxu0 %v4240_v3  ;;  %s4378_s18 = scalar_lea.vmem %s7672_s1, %s4211_s12  ;;  %v3804_v8 = vld [vmem:[%s4365_s15] sm:$0xff]   ;;  %v4027_v11 = vld [vmem:[%s4365_s15 + $0x8] sm:$0xff]   ;;  %v4395_v16 = vsub.s32 4, %v4354_v4  ;;  %v4398_v17 = vsub.s32 5, %v4354_v4  ;;  %vm735_vm5 = vcmp.lt.s32.totalorder %v4354_v4, 3 }
  0x13   : > { %4110 = vmatprep.subr.bf16.mxu0 %v7679_v2  ;;  %v326_v13 = vld [vmem:[%s4378_s18] sm:$0xff]   ;;  %v3805_v14 = vunpack.c.l.bf16 %v3804_v8  ;;  %v3806_v15 = vunpack.c.h.bf16 %v3804_v8  ;;  %v4404_v20 = vunpack.c.l.bf16 %v4027_v11  ;;  %v4406_v21 = vunpack.c.h.bf16 %v4027_v11  ;;  %s7620_s17 = scalar_lea.vmem %s7678_s7, %s4212_s11 }
  0x14   : > { %v327_v18 = vunpack.c.l.bf16 %v326_v13  ;;  %v4402_v19 = vunpack.c.h.bf16 %v326_v13 }
  0x15   : > { %v407_v22 = vrot.slane %v3805_v14, 1  ;;  %v416_v23 = vrot.slane %v3806_v15, 1  ;;  %v486_v24 = vrot.slane %v3805_v14, 2  ;;  %v495_v25 = vrot.slane %v3806_v15, 2 }
  0x16   : > { %4111 = vmatpush3.bf16.msra.mxu0 %v4241_v5  ;;  %v4412_v27 = vrot.slane %v327_v18, %v4368_v6  ;;  %v4415_v28 = vrot.slane %v327_v18, %v4372_v7  ;;  %v4418_v29 = vrot.slane %v327_v18, %v4382_v9  ;;  %v563_v30 = vrot.slane %v3805_v14, 3 }
  0x17   : > { %4112 = vmatprep.subr.bf16.mxu0 %v7679_v2  ;;  %v428_v31 = vsel %vm427_vm1, %v407_v22, %v416_v23  ;;  %v437_v32 = vsel %vm427_vm1, %v416_v23, %v407_v22  ;;  %v505_v33 = vsel %vm504_vm2, %v486_v24, %v495_v25  ;;  %v514_v34 = vsel %vm504_vm2, %v495_v25, %v486_v24 }
  0x18   : > { %8165 = vst [vmem:[#allocation3_spill] sm:$0xff] %v4412_v27  ;;  %8166 = vst [vmem:[#allocation4_spill] sm:$0xff] %v4415_v28  ;;  %v371_v35 = vmul.f32 %v3805_v14, %v4412_v27  ;;  %v372_v36 = vmul.f32 %v3806_v15, %v4412_v27  ;;  %v450_v37 = vmul.f32 %v4415_v28, %v428_v31  ;;  %v572_v41 = vrot.slane %v3806_v15, 3  ;;  %v4246_v31 = vld [vmem:[%s7673_s2] sm:$0xff]  }
  0x19   : > { %8167 = vst [vmem:[#allocation5_spill] sm:$0xff] %v4418_v29  ;;  %v451_v38 = vmul.f32 %v4415_v28, %v437_v32  ;;  %v527_v39 = vmul.f32 %v4418_v29, %v505_v33  ;;  %v528_v40 = vmul.f32 %v4418_v29, %v514_v34  ;;  %v4436_v42 = vrot.slane %v327_v18, %v4386_v10 }
  0x1a   : > { %4113 = vmatpush3.bf16.msra.mxu0 %v4242_v12  ;;  %v468_v43 = vadd.f32 %v450_v37, %v371_v35  ;;  %v640_v45 = vrot.slane %v3805_v14, 4  ;;  %v649_v46 = vrot.slane %v3806_v15, 4  ;;  %v582_v48 = vsel %vm581_vm3, %v563_v30, %v572_v41 }
  0x1b   : > { %4114 = vmatprep.subr.bf16.mxu0 %v7679_v2  ;;  %8168 = vst [vmem:[#allocation6_spill] sm:$0xff] %v4436_v42  ;;  %v469_v44 = vadd.f32 %v451_v38, %v372_v36  ;;  %v591_v49 = vsel %vm581_vm3, %v572_v41, %v563_v30  ;;  %v4446_v50 = vrot.slane %v327_v18, %v4395_v16  ;;  %v717_v51 = vrot.slane %v3805_v14, 5 }
  0x1c   : > { %v545_v52 = vadd.f32 %v527_v39, %v468_v43  ;;  %v604_v54 = vmul.f32 %v4436_v42, %v582_v48  ;;  %v605_v55 = vmul.f32 %v4436_v42, %v591_v49  ;;  %v659_v56 = vsel %vm658_vm4, %v640_v45, %v649_v46 }
  0x1d   : > { %8169 = vst [vmem:[#allocation7_spill] sm:$0xff] %v4446_v50  ;;  %v546_v53 = vadd.f32 %v528_v40, %v469_v44  ;;  %v668_v57 = vsel %vm658_vm4, %v649_v46, %v640_v45  ;;  %v726_v58 = vrot.slane %v3806_v15, 5  ;;  %v4456_v59 = vrot.slane %v327_v18, %v4398_v17 }
  0x1e   : > { %4115 = vmatpush3.bf16.msra.mxu0 %v4243_v26  ;;  %v622_v60 = vadd.f32 %v604_v54, %v545_v52  ;;  %v681_v62 = vmul.f32 %v4446_v50, %v659_v56  ;;  %v682_v63 = vmul.f32 %v4446_v50, %v668_v57  ;;  %v4469_v5 = vrot.slane %v4402_v19, %v4368_v6 }
  0x1f   : > { %4116 = vmatprep.subr.bf16.mxu0 %v7679_v2  ;;  %8170 = vst [vmem:[#allocation8_spill] sm:$0xff] %v4456_v59  ;;  %v623_v61 = vadd.f32 %v605_v55, %v546_v53  ;;  %v736_v1 = vsel %vm735_vm5, %v717_v51, %v726_v58  ;;  %v745_v3 = vsel %vm735_vm5, %v726_v58, %v717_v51  ;;  %v877_v8 = vrot.slane %v4404_v20, 1  ;;  %v3706_v58 = vld [vmem:[%s4378_s18 + $0x8] sm:$0xff]  }
  0x20   : > { %8171 = vst [vmem:[#allocation9_spill] sm:$0xff] %v4469_v5  ;;  %v699_v11 = vadd.f32 %v681_v62, %v622_v60  ;;  %v758_v13 = vmul.f32 %v4456_v59, %v736_v1  ;;  %v759_v14 = vmul.f32 %v4456_v59, %v745_v3  ;;  %v841_v15 = vmul.f32 %v4404_v20, %v4469_v5  ;;  %v4036_v60 = vld [vmem:[%s4365_s15 + $0x10] sm:$0xff]  }
  0x21   : > { %v700_v12 = vadd.f32 %v682_v63, %v623_v61  ;;  %v842_v18 = vmul.f32 %v4406_v21, %v4469_v5  ;;  %v886_v22 = vrot.slane %v4406_v21, 1  ;;  %v4482_v23 = vrot.slane %v4402_v19, %v4372_v7 }
  0x22   : > { %4117 = vmatpush3.bf16.msra.mxu0 %v4244_v47  ;;  %v776_v24 = vadd.f32 %v758_v13, %v699_v11  ;;  %v953_v26 = vrot.slane %v4404_v20, 2  ;;  %v962_v30 = vrot.slane %v4406_v21, 2  ;;  %v4499_v34 = vrot.slane %v4402_v19, %v4382_v9 }
  0x23   : > { %4118 = vmatprep.subr.bf16.mxu0 %v7679_v2  ;;  %8172 = vst [vmem:[#allocation10_spill] sm:$0xff] %v4482_v23  ;;  %v777_v25 = vadd.f32 %v759_v14, %v700_v12  ;;  %v4491_v32 = vsel %vm427_vm1, %v877_v8, %v886_v22  ;;  %v4495_v33 = vsel %vm427_vm1, %v886_v22, %v877_v8  ;;  %v1029_v35 = vrot.slane %v4404_v20, 3 }
  0x24   : > { %8173 = vst [vmem:[#allocation11_spill] sm:$0xff] %v4499_v34  ;;  %v859_v36 = vadd.f32 %v841_v15, %v776_v24  ;;  %v917_v38 = vmul.f32 %v4482_v23, %v4491_v32  ;;  %v918_v39 = vmul.f32 %v4482_v23, %v4495_v33  ;;  %v4509_v40 = vsel %vm504_vm2, %v953_v26, %v962_v30 }
  0x25   : > { %v860_v37 = vadd.f32 %v842_v18, %v777_v25  ;;  %v4513_v41 = vsel %vm504_vm2, %v962_v30, %v953_v26  ;;  %v1038_v43 = vrot.slane %v4406_v21, 3  ;;  %v4518_v44 = vrot.slane %v4402_v19, %v4386_v10 }
  0x26   : > { %4119 = vmatpush3.bf16.msra.mxu0 %v4245_v0  ;;  %v935_v45 = vadd.f32 %v917_v38, %v859_v36  ;;  %v993_v47 = vmul.f32 %v4499_v34, %v4509_v40  ;;  %v994_v48 = vmul.f32 %v4499_v34, %v4513_v41  ;;  %v1105_v52 = vrot.slane %v4404_v20, 4 }
  0x27   : > { %4120 = vmatprep.subr.bf16.mxu0 %v7679_v2  ;;  %8174 = vst [vmem:[#allocation12_spill] sm:$0xff] %v4518_v44  ;;  %v936_v46 = vadd.f32 %v918_v39, %v860_v37  ;;  %v4526_v49 = vsel %vm581_vm3, %v1029_v35, %v1038_v43  ;;  %v4530_v51 = vsel %vm581_vm3, %v1038_v43, %v1029_v35  ;;  %v1114_v53 = vrot.slane %v4406_v21, 4 }
  0x28   : > { %v1011_v54 = vadd.f32 %v993_v47, %v935_v45  ;;  %v1069_v56 = vmul.f32 %v4518_v44, %v4526_v49  ;;  %v1070_v57 = vmul.f32 %v4518_v44, %v4530_v51  ;;  %v4550_v63 = vrot.slane %v4402_v19, %v4395_v16 }
  0x29   : > { %v1012_v55 = vadd.f32 %v994_v48, %v936_v46  ;;  %v4542_v61 = vsel %vm658_vm4, %v1105_v52, %v1114_v53  ;;  %v4546_v62 = vsel %vm658_vm4, %v1114_v53, %v1105_v52  ;;  %v1181_v0 = vrot.slane %v4404_v20, 5 }
  0x2a   : > { %4121 = vmatpush3.bf16.msra.mxu0 %v4246_v31  ;;  %8175 = vst [vmem:[#allocation13_spill] sm:$0xff] %v4550_v63  ;;  %v1087_v1 = vadd.f32 %v1069_v56, %v1011_v54  ;;  %v1190_v8 = vrot.slane %v4406_v21, 5  ;;  %v4556_v11 = vrot.slane %v4402_v19, %v4398_v17  ;;  %v1145_v12 = vmul.f32 %v4550_v63, %v4542_v61 }
  0x2b   : > { %v1088_v3 = vadd.f32 %v1070_v57, %v1012_v55  ;;  %v1146_v13 = vmul.f32 %v4550_v63, %v4546_v62  ;;  %v1259_v14 = vunpack.c.l.bf16 %v3706_v58  ;;  %v4562_v15 = vunpack.c.l.bf16 %v4036_v60 }
  0x2c   : > { %8176 = vst [vmem:[#allocation14_spill] sm:$0xff] %v4556_v11  ;;  %v4566_v18 = vsel %vm735_vm5, %v1181_v0, %v1190_v8  ;;  %v4570_v22 = vsel %vm735_vm5, %v1190_v8, %v1181_v0  ;;  %v4572_v24 = vunpack.c.h.bf16 %v4036_v60  ;;  %v4574_v19 = vunpack.c.h.bf16 %v3706_v58 }
  0x2d   : > { %v1163_v25 = vadd.f32 %v1145_v12, %v1087_v1  ;;  %v1164_v26 = vadd.f32 %v1146_v13, %v1088_v3  ;;  %v1221_v30 = vmul.f32 %v4556_v11, %v4566_v18  ;;  %v1222_v31 = vmul.f32 %v4556_v11, %v4570_v22 }
  0x2e   : > { %v4581_v35 = vrot.slane %v1259_v14, %v4368_v6  ;;  %v1340_v36 = vrot.slane %v4562_v15, 1  ;;  %v1349_v37 = vrot.slane %v4572_v24, 1  ;;  %v4586_v38 = vrot.slane %v1259_v14, %v4372_v7 }
  0x2f   : > { %v1239_v39 = vadd.f32 %v1221_v30, %v1163_v25  ;;  %v1240_v43 = vadd.f32 %v1222_v31, %v1164_v26  ;;  %v1416_v45 = vrot.slane %v4562_v15, 2  ;;  %v1425_v46 = vrot.slane %v4572_v24, 2 }
  0x30   : > { %8177 = vst [vmem:[#allocation15_spill] sm:$0xff] %v4581_v35  ;;  %8178 = vst [vmem:[#allocation16_spill] sm:$0xff] %v4586_v38  ;;  %v1304_v47 = vmul.f32 %v4562_v15, %v4581_v35  ;;  %v1305_v48 = vmul.f32 %v4572_v24, %v4581_v35  ;;  %v4596_v52 = vsel %vm427_vm1, %v1340_v36, %v1349_v37  ;;  %v1492_v1 = vrot.slane %v4562_v15, 3 }
  0x31   : > { %v4600_v53 = vsel %vm427_vm1, %v1349_v37, %v1340_v36  ;;  %v1380_v54 = vmul.f32 %v4586_v38, %v4596_v52  ;;  %v4608_v56 = vsel %vm504_vm2, %v1416_v45, %v1425_v46  ;;  %v4612_v57 = vsel %vm504_vm2, %v1425_v46, %v1416_v45  ;;  %v4045_v45 = vld [vmem:[%s4365_s15 + $0x18] sm:$0xff]  }
  0x32   : > { %v1381_v55 = vmul.f32 %v4586_v38, %v4600_v53  ;;  %v1322_v58 = vadd.f32 %v1304_v47, %v1239_v39  ;;  %v1323_v60 = vadd.f32 %v1305_v48, %v1240_v43  ;;  %v4615_v0 = vrot.slane %v1259_v14, %v4382_v9 }
  0x33   : > { %v1501_v3 = vrot.slane %v4572_v24, 3  ;;  %v4620_v8 = vrot.slane %v1259_v14, %v4386_v10  ;;  %v1568_v12 = vrot.slane %v4562_v15, 4  ;;  %v1577_v13 = vrot.slane %v4572_v24, 4 }
  0x34   : > { %8179 = vst [vmem:[#allocation17_spill] sm:$0xff] %v4615_v0  ;;  %v1398_v25 = vadd.f32 %v1380_v54, %v1322_v58  ;;  %v1399_v26 = vadd.f32 %v1381_v55, %v1323_v60  ;;  %v1456_v30 = vmul.f32 %v4615_v0, %v4608_v56  ;;  %v1457_v31 = vmul.f32 %v4615_v0, %v4612_v57 }
  0x35   : > { %8180 = vst [vmem:[#allocation18_spill] sm:$0xff] %v4620_v8  ;;  %v4630_v36 = vsel %vm581_vm3, %v1492_v1, %v1501_v3  ;;  %v4634_v37 = vsel %vm581_vm3, %v1501_v3, %v1492_v1  ;;  %v4638_v39 = vsel %vm658_vm4, %v1568_v12, %v1577_v13  ;;  %v4642_v43 = vsel %vm658_vm4, %v1577_v13, %v1568_v12 }
  0x36   : > { %8181 = vst [vmem:[#allocation19_spill] sm:$0xff] %v4634_v37  ;;  %8182 = vst [vmem:[#allocation20_spill] sm:$0xff] %v4638_v39  ;;  %v1474_v46 = vadd.f32 %v1456_v30, %v1398_v25  ;;  %v1475_v47 = vadd.f32 %v1457_v31, %v1399_v26  ;;  %v1532_v48 = vmul.f32 %v4620_v8, %v4630_v36  ;;  %v1644_v58 = vrot.slane %v4562_v15, 5 }
  0x37   : > { %8183 = vst [vmem:[#allocation21_spill] sm:$0xff] %v4642_v43  ;;  %v1533_v54 = vmul.f32 %v4620_v8, %v4634_v37  ;;  %v4650_v55 = vrot.slane %v1259_v14, %v4395_v16  ;;  %v1653_v60 = vrot.slane %v4572_v24, 5  ;;  %v4655_v1 = vrot.slane %v1259_v14, %v4398_v17 }
  0x38   : > { %v1550_v3 = vadd.f32 %v1532_v48, %v1474_v46  ;;  %v4657_v13 = vunpack.c.l.bf16 %v4045_v45  ;;  %v4659_v25 = vunpack.c.h.bf16 %v4045_v45 }
  0x39   : > { %8184 = vst [vmem:[#allocation22_spill] sm:$0xff] %v4650_v55  ;;  %8185 = vst [vmem:[#allocation23_spill] sm:$0xff] %v4655_v1  ;;  %v1551_v12 = vadd.f32 %v1533_v54, %v1475_v47  ;;  %v1608_v26 = vmul.f32 %v4650_v55, %v4638_v39  ;;  %v1609_v30 = vmul.f32 %v4650_v55, %v4642_v43 }
  0x3a   : > { %8186 = vst [vmem:[#allocation24_spill] sm:$0xff] %v4657_v13  ;;  %8187 = vst [vmem:[#allocation25_spill] sm:$0xff] %v4659_v25  ;;  %v4667_v31 = vsel %vm735_vm5, %v1644_v58, %v1653_v60  ;;  %v4671_v14 = vsel %vm735_vm5, %v1653_v60, %v1644_v58  ;;  %v4679_v47 = vrot.slane %v4574_v19, %v4368_v6  ;;  %v1803_v48 = vrot.slane %v4657_v13, 1 }
  0x3b   : > { %8188 = vst [vmem:[#allocation26_spill] sm:$0xff] %v4667_v31  ;;  %8189 = vst [vmem:[#allocation27_spill] sm:$0xff] %v4671_v14  ;;  %v1684_v46 = vmul.f32 %v4655_v1, %v4667_v31  ;;  %v1685_v45 = vmul.f32 %v4655_v1, %v4671_v14  ;;  %v1626_v54 = vadd.f32 %v1608_v26, %v1550_v3  ;;  %v1812_v55 = vrot.slane %v4659_v25, 1 }
  0x3c   : > { %8190 = vst [vmem:[#allocation28_spill] sm:$0xff] %v4679_v47  ;;  %v1627_v2 = vadd.f32 %v1609_v30, %v1551_v12  ;;  %v4685_v58 = vrot.slane %v4574_v19, %v4372_v7  ;;  %v1767_v60 = vmul.f32 %v4657_v13, %v4679_v47  ;;  %v1768_v1 = vmul.f32 %v4659_v25, %v4679_v47 }
  0x3d   : > { %v1879_v8 = vrot.slane %v4657_v13, 2  ;;  %v1888_v0 = vrot.slane %v4659_v25, 2  ;;  %v1702_v38 = vadd.f32 %v1684_v46, %v1626_v54  ;;  %v4695_v3 = vsel %vm427_vm1, %v1803_v48, %v1812_v55 }
  0x3e   : > { %8191 = vst [vmem:[#allocation29_spill] sm:$0xff] %v4685_v58  ;;  %v1703_v35 = vadd.f32 %v1685_v45, %v1627_v2  ;;  %8192 = vst [vmem:[#allocation30_spill] sm:$0xff] %v4695_v3  ;;  %v4699_v12 = vsel %vm427_vm1, %v1812_v55, %v1803_v48  ;;  %v1843_v26 = vmul.f32 %v4685_v58, %v4695_v3  ;;  %v1955_v48 = vrot.slane %v4657_v13, 3 }
  0x3f   : > { %8193 = vst [vmem:[#allocation31_spill] sm:$0xff] %v4699_v12  ;;  %v1844_v30 = vmul.f32 %v4685_v58, %v4699_v12  ;;  %v4707_v47 = vsel %vm504_vm2, %v1879_v8, %v1888_v0  ;;  %v4711_v2 = vsel %vm504_vm2, %v1888_v0, %v1879_v8  ;;  %v1785_v46 = vadd.f32 %v1767_v60, %v1702_v38 }
  0x40   : > { %8194 = vst [vmem:[#allocation32_spill] sm:$0xff] %v4707_v47  ;;  %8195 = vst [vmem:[#allocation33_spill] sm:$0xff] %v4711_v2  ;;  %v1786_v45 = vadd.f32 %v1768_v1, %v1703_v35  ;;  %v4715_v55 = vrot.slane %v4574_v19, %v4382_v9  ;;  %v1964_v54 = vrot.slane %v4659_v25, 3  ;;  %v4721_v58 = vrot.slane %v4574_v19, %v4386_v10 }
  0x41   : > { %v2031_v12 = vrot.slane %v4657_v13, 4  ;;  %v2040_v0 = vrot.slane %v4659_v25, 4  ;;  %v1861_v38 = vadd.f32 %v1843_v26, %v1785_v46  ;;  %v4054_v46 = vld [vmem:[%s4365_s15 + $0x20] sm:$0xff]  }
  0x42   : > { %8196 = vst [vmem:[#allocation34_spill] sm:$0xff] %v4715_v55  ;;  %8197 = vst [vmem:[#allocation35_spill] sm:$0xff] %v4721_v58  ;;  %v1862_v8 = vadd.f32 %v1844_v30, %v1786_v45  ;;  %v1919_v35 = vmul.f32 %v4715_v55, %v4707_v47  ;;  %v1920_v1 = vmul.f32 %v4715_v55, %v4711_v2  ;;  %v4746_v30 = vld [vmem:[%s4378_s18 + $0x10] sm:$0xff]   ;;  %v2107_v47 = vrot.slane %v4657_v13, 5 }
  0x43   : > { %v4731_v60 = vsel %vm581_vm3, %v1955_v48, %v1964_v54  ;;  %v4735_v3 = vsel %vm581_vm3, %v1964_v54, %v1955_v48  ;;  %v4739_v14 = vsel %vm658_vm4, %v2031_v12, %v2040_v0  ;;  %v4743_v26 = vsel %vm658_vm4, %v2040_v0, %v2031_v12 }
  0x44   : > { %8198 = vst [vmem:[#allocation36_spill] sm:$0xff] %v4731_v60  ;;  %8199 = vst [vmem:[#allocation37_spill] sm:$0xff] %v4735_v3  ;;  %v1937_v45 = vadd.f32 %v1919_v35, %v1861_v38  ;;  %v1938_v55 = vadd.f32 %v1920_v1, %v1862_v8  ;;  %v1995_v2 = vmul.f32 %v4721_v58, %v4731_v60  ;;  %v2116_v12 = vrot.slane %v4659_v25, 5 }
  0x45   : > { %8200 = vst [vmem:[#allocation38_spill] sm:$0xff] %v4739_v14  ;;  %8201 = vst [vmem:[#allocation39_spill] sm:$0xff] %v4743_v26  ;;  %v1996_v48 = vmul.f32 %v4721_v58, %v4735_v3  ;;  %v4755_v54 = vrot.slane %v4574_v19, %v4395_v16  ;;  %v4761_v0 = vrot.slane %v4574_v19, %v4398_v17  ;;  %v2185_v35 = vunpack.c.l.bf16 %v4746_v30 }
  0x46   : > { %v2013_v38 = vadd.f32 %v1995_v2, %v1937_v45  ;;  %v4764_v1 = vunpack.c.l.bf16 %v4054_v46  ;;  %v4772_v60 = vsel %vm735_vm5, %v2107_v47, %v2116_v12  ;;  %v4776_v19 = vsel %vm735_vm5, %v2116_v12, %v2107_v47 }
  0x47   : > { %8202 = vst [vmem:[#allocation40_spill] sm:$0xff] %v4755_v54  ;;  %8203 = vst [vmem:[#allocation41_spill] sm:$0xff] %v4761_v0  ;;  %v2014_v8 = vadd.f32 %v1996_v48, %v1938_v55  ;;  %v2071_v58 = vmul.f32 %v4755_v54, %v4739_v14  ;;  %v2072_v3 = vmul.f32 %v4755_v54, %v4743_v26  ;;  %v4782_v45 = vunpack.c.h.bf16 %v4054_v46 }
  0x48   : > { %8204 = vst [vmem:[#allocation42_spill] sm:$0xff] %v4764_v1  ;;  %8205 = vst [vmem:[#allocation43_spill] sm:$0xff] %v4772_v60  ;;  %v2147_v2 = vmul.f32 %v4761_v0, %v4772_v60  ;;  %v2148_v55 = vmul.f32 %v4761_v0, %v4776_v19  ;;  %v4785_v48 = vrot.slane %v2185_v35, %v4368_v6  ;;  %v2266_v14 = vrot.slane %v4764_v1, 1 }
  0x49   : > { %8206 = vst [vmem:[#allocation44_spill] sm:$0xff] %v4776_v19  ;;  %8207 = vst [vmem:[#allocation45_spill] sm:$0xff] %v4782_v45  ;;  %v2089_v54 = vadd.f32 %v2071_v58, %v2013_v38  ;;  %v2090_v26 = vadd.f32 %v2072_v3, %v2014_v8  ;;  %v4789_v25 = vrot.slane %v2185_v35, %v4372_v7  ;;  %v2275_v0 = vrot.slane %v4782_v45, 1 }
  0x4a   : > { %8208 = vst [vmem:[#allocation46_spill] sm:$0xff] %v4785_v48  ;;  %v2230_v47 = vmul.f32 %v4764_v1, %v4785_v48  ;;  %v2231_v12 = vmul.f32 %v4782_v45, %v4785_v48  ;;  %v2342_v46 = vrot.slane %v4764_v1, 2  ;;  %v2351_v58 = vrot.slane %v4782_v45, 2 }
  0x4b   : > { %8209 = vst [vmem:[#allocation47_spill] sm:$0xff] %v4789_v25  ;;  %v2165_v19 = vadd.f32 %v2147_v2, %v2089_v54  ;;  %v2166_v60 = vadd.f32 %v2148_v55, %v2090_v26  ;;  %v4799_v3 = vrot.slane %v2185_v35, %v4382_v9  ;;  %v4803_v38 = vsel %vm427_vm1, %v2266_v14, %v2275_v0 }
  0x4c   : > { %8211 = vst [vmem:[#allocation49_spill] sm:$0xff] %v4803_v38  ;;  %v4807_v8 = vsel %vm427_vm1, %v2275_v0, %v2266_v14  ;;  %v2418_v48 = vrot.slane %v4764_v1, 3  ;;  %v2427_v13 = vrot.slane %v4782_v45, 3  ;;  %v2306_v26 = vmul.f32 %v4789_v25, %v4803_v38 }
  0x4d   : > { %8210 = vst [vmem:[#allocation48_spill] sm:$0xff] %v4799_v3  ;;  %8212 = vst [vmem:[#allocation50_spill] sm:$0xff] %v4807_v8  ;;  %v2248_v31 = vadd.f32 %v2230_v47, %v2165_v19  ;;  %v2249_v54 = vadd.f32 %v2231_v12, %v2166_v60  ;;  %v2307_v2 = vmul.f32 %v4789_v25, %v4807_v8  ;;  %v2503_v8 = vrot.slane %v4782_v45, 4 }
  0x4e   : > { %v4817_v55 = vsel %vm504_vm2, %v2342_v46, %v2351_v58  ;;  %v4821_v14 = vsel %vm504_vm2, %v2351_v58, %v2342_v46  ;;  %v4825_v0 = vsel %vm581_vm3, %v2418_v48, %v2427_v13  ;;  %v4829_v60 = vsel %vm581_vm3, %v2427_v13, %v2418_v48 }
  0x4f   : > { %8213 = vst [vmem:[#allocation51_spill] sm:$0xff] %v4817_v55  ;;  %8214 = vst [vmem:[#allocation52_spill] sm:$0xff] %v4821_v14  ;;  %v2324_v19 = vadd.f32 %v2306_v26, %v2248_v31  ;;  %v2325_v47 = vadd.f32 %v2307_v2, %v2249_v54  ;;  %v2382_v12 = vmul.f32 %v4799_v3, %v4817_v55  ;;  %v2494_v58 = vrot.slane %v4764_v1, 4 }
  0x50   : > { %8215 = vst [vmem:[#allocation53_spill] sm:$0xff] %v4825_v0  ;;  %8216 = vst [vmem:[#allocation54_spill] sm:$0xff] %v4829_v60  ;;  %v2383_v25 = vmul.f32 %v4799_v3, %v4821_v14  ;;  %v4836_v46 = vrot.slane %v2185_v35, %v4386_v10  ;;  %v4841_v38 = vrot.slane %v2185_v35, %v4395_v16  ;;  %v2570_v48 = vrot.slane %v4764_v1, 5 }
  0x51   : > { %v2400_v13 = vadd.f32 %v2382_v12, %v2324_v19  ;;  %v2579_v54 = vrot.slane %v4782_v45, 5  ;;  %v4851_v3 = vsel %vm658_vm4, %v2494_v58, %v2503_v8  ;;  %v4855_v14 = vsel %vm658_vm4, %v2503_v8, %v2494_v58  ;;  %v4063_v19 = vld [vmem:[%s4365_s15 + $0x28] sm:$0xff]  }
  0x52   : > { %8217 = vst [vmem:[#allocation55_spill] sm:$0xff] %v4836_v46  ;;  %8218 = vst [vmem:[#allocation56_spill] sm:$0xff] %v4841_v38  ;;  %v2401_v31 = vadd.f32 %v2383_v25, %v2325_v47  ;;  %v2458_v26 = vmul.f32 %v4836_v46, %v4825_v0  ;;  %v2459_v2 = vmul.f32 %v4836_v46, %v4829_v60  ;;  %v2648_v58 = vunpack.c.h.bf16 %v4746_v30 }
  0x53   : > { %8219 = vst [vmem:[#allocation57_spill] sm:$0xff] %v4851_v3  ;;  %8220 = vst [vmem:[#allocation58_spill] sm:$0xff] %v4855_v14  ;;  %v2534_v25 = vmul.f32 %v4841_v38, %v4851_v3  ;;  %v2535_v47 = vmul.f32 %v4841_v38, %v4855_v14  ;;  %v4864_v12 = vsel %vm735_vm5, %v2570_v48, %v2579_v54  ;;  %v4874_v55 = vunpack.c.l.bf16 %v4063_v19 }
  0x54   : > { %8221 = vst [vmem:[#allocation59_spill] sm:$0xff] %v4864_v12  ;;  %v4868_v46 = vsel %vm735_vm5, %v2579_v54, %v2570_v48  ;;  %v2476_v60 = vadd.f32 %v2458_v26, %v2400_v13  ;;  %v2477_v0 = vadd.f32 %v2459_v2, %v2401_v31  ;;  %v4871_v8 = vrot.slane %v2185_v35, %v4398_v17 }
  0x55   : > { %8222 = vst [vmem:[#allocation60_spill] sm:$0xff] %v4868_v46  ;;  %v4876_v3 = vunpack.c.h.bf16 %v4063_v19  ;;  %v373_v38 = vmul.f32 %v4404_v20, %v4412_v27  ;;  %v374_v14 = vmul.f32 %v4406_v21, %v4412_v27  ;;  %v4887_v30 = vrot.slane %v2648_v58, %v4368_v6 }
  0x56   : > { %8223 = vst [vmem:[#allocation61_spill] sm:$0xff] %v4871_v8  ;;  %v2552_v45 = vadd.f32 %v2534_v25, %v2476_v60  ;;  %v2553_v48 = vadd.f32 %v2535_v47, %v2477_v0  ;;  %v2610_v13 = vmul.f32 %v4871_v8, %v4864_v12  ;;  %v2611_v35 = vmul.f32 %v4871_v8, %v4868_v46 }
  0x57   : > { %8224 = vst [vmem:[#allocation62_spill] sm:$0xff] %v4887_v30  ;;  %v2729_v31 = vrot.slane %v4874_v55, 1  ;;  %v2738_v54 = vrot.slane %v4876_v3, 1  ;;  %v4892_v20 = vrot.slane %v2648_v58, %v4372_v7  ;;  %v2805_v0 = vrot.slane %v4874_v55, 2 }
  0x58   : > { %v2628_v26 = vadd.f32 %v2610_v13, %v2552_v45  ;;  %v2629_v21 = vadd.f32 %v2611_v35, %v2553_v48  ;;  %v2814_v60 = vrot.slane %v4876_v3, 2  ;;  %v2693_v2 = vmul.f32 %v4874_v55, %v4887_v30 }
  0x59   : > { %8225 = vst [vmem:[#allocation63_spill] sm:$0xff] %v4892_v20  ;;  %v2694_v6 = vmul.f32 %v4876_v3, %v4887_v30  ;;  %v4902_v19 = vsel %vm427_vm1, %v2729_v31, %v2738_v54  ;;  %v4906_v7 = vsel %vm427_vm1, %v2738_v54, %v2729_v31  ;;  %v4921_v30 = vrot.slane %v2648_v58, %v4382_v9 }
  0x5a   : > { %8226 = vst [vmem:[#allocation64_spill] sm:$0xff] %v4902_v19  ;;  %8227 = vst [vmem:[#allocation65_spill] sm:$0xff] %v4906_v7  ;;  %v2769_v45 = vmul.f32 %v4892_v20, %v4902_v19  ;;  %v2770_v25 = vmul.f32 %v4892_v20, %v4906_v7  ;;  %v4914_v47 = vsel %vm504_vm2, %v2805_v0, %v2814_v60  ;;  %v2881_v31 = vrot.slane %v4874_v55, 3 }
  0x5b   : > { %8228 = vst [vmem:[#allocation66_spill] sm:$0xff] %v4914_v47  ;;  %v4918_v48 = vsel %vm504_vm2, %v2814_v60, %v2805_v0  ;;  %v2711_v13 = vadd.f32 %v2693_v2, %v2628_v26  ;;  %v2712_v35 = vadd.f32 %v2694_v6, %v2629_v21  ;;  %8230 = vst [vmem:[#allocation68_spill] sm:$0xff] %v4921_v30  ;;  %v2890_v54 = vrot.slane %v4876_v3, 3 }
  0x5c   : > { %8229 = vst [vmem:[#allocation67_spill] sm:$0xff] %v4918_v48  ;;  %v4926_v27 = vrot.slane %v2648_v58, %v4386_v10  ;;  %v2957_v20 = vrot.slane %v4874_v55, 4  ;;  %v2966_v8 = vrot.slane %v4876_v3, 4  ;;  %v2845_v26 = vmul.f32 %v4921_v30, %v4914_v47 }
  0x5d   : > { %v2787_v7 = vadd.f32 %v2769_v45, %v2711_v13  ;;  %v2788_v19 = vadd.f32 %v2770_v25, %v2712_v35  ;;  %v2846_v9 = vmul.f32 %v4921_v30, %v4918_v48  ;;  %v4936_v21 = vsel %vm581_vm3, %v2881_v31, %v2890_v54 }
  0x5e   : > { %8231 = vst [vmem:[#allocation69_spill] sm:$0xff] %v4926_v27  ;;  %v4940_v10 = vsel %vm581_vm3, %v2890_v54, %v2881_v31  ;;  %v4944_v0 = vsel %vm658_vm4, %v2957_v20, %v2966_v8  ;;  %v4948_v60 = vsel %vm658_vm4, %v2966_v8, %v2957_v20  ;;  %v2921_v45 = vmul.f32 %v4926_v27, %v4936_v21 }
  0x5f   : > { %8232 = vst [vmem:[#allocation70_spill] sm:$0xff] %v4940_v10  ;;  %8233 = vst [vmem:[#allocation71_spill] sm:$0xff] %v4944_v0  ;;  %v2863_v2 = vadd.f32 %v2845_v26, %v2787_v7  ;;  %v2864_v6 = vadd.f32 %v2846_v9, %v2788_v19  ;;  %v2922_v25 = vmul.f32 %v4926_v27, %v4940_v10  ;;  %v3033_v35 = vrot.slane %v4874_v55, 5 }
  0x60   : > { %v4955_v13 = vrot.slane %v2648_v58, %v4395_v16  ;;  %v3042_v31 = vrot.slane %v4876_v3, 5  ;;  %v4960_v54 = vrot.slane %v2648_v58, %v4398_v17  ;;  %v452_v19 = vmul.f32 %v4491_v32, %v4415_v28 }
  0x61   : > { %v2939_v8 = vadd.f32 %v2921_v45, %v2863_v2  ;;  %v2940_v20 = vadd.f32 %v2922_v25, %v2864_v6  ;;  %v453_v7 = vmul.f32 %v4495_v33, %v4415_v28  ;;  %v529_v25 = vmul.f32 %v4509_v40, %v4418_v29 }
  0x62   : > { %8234 = vst [vmem:[#allocation72_spill] sm:$0xff] %v4955_v13  ;;  %8235 = vst [vmem:[#allocation73_spill] sm:$0xff] %v4960_v54  ;;  %v2997_v26 = vmul.f32 %v4955_v13, %v4944_v0  ;;  %v2998_v16 = vmul.f32 %v4955_v13, %v4948_v60  ;;  %v4972_v9 = vsel %vm735_vm5, %v3033_v35, %v3042_v31 }
  0x63   : > { %8236 = vst [vmem:[#allocation74_spill] sm:$0xff] %v4972_v9  ;;  %v4976_v17 = vsel %vm735_vm5, %v3042_v31, %v3033_v35  ;;  %v3073_v32 = vmul.f32 %v4960_v54, %v4972_v9  ;;  %v470_v58 = vadd.f32 %v452_v19, %v373_v38  ;;  %v471_v2 = vadd.f32 %v453_v7, %v374_v14 }
  0x64   : > { %8237 = vst [vmem:[#allocation75_spill] sm:$0xff] %v4976_v17  ;;  %v3074_v33 = vmul.f32 %v4960_v54, %v4976_v17  ;;  %v3015_v6 = vadd.f32 %v2997_v26, %v2939_v8  ;;  %v3016_v45 = vadd.f32 %v2998_v16, %v2940_v20  ;;  %v530_v28 = vmul.f32 %v4513_v41, %v4418_v29 }
  0x65   : > { %v606_v35 = vmul.f32 %v4526_v49, %v4436_v42  ;;  %v607_v31 = vmul.f32 %v4530_v51, %v4436_v42  ;;  %v683_v13 = vmul.f32 %v4542_v61, %v4446_v50  ;;  %v684_v38 = vmul.f32 %v4546_v62, %v4446_v50 }
  0x66   : > { %v3091_v14 = vadd.f32 %v3073_v32, %v3015_v6  ;;  %v3092_v8 = vadd.f32 %v3074_v33, %v3016_v45  ;;  %v547_v20 = vadd.f32 %v529_v25, %v470_v58  ;;  %v548_v19 = vadd.f32 %v530_v28, %v471_v2  ;;  %v8239_v25 = vld [vmem:[#allocation26_spill] sm:$0xff] }
  0x67   : > { %v760_v40 = vmul.f32 %v4566_v18, %v4456_v59  ;;  %v761_v41 = vmul.f32 %v4570_v22, %v4456_v59  ;;  %v843_v49 = vmul.f32 %v4562_v15, %v4469_v5  ;;  %v844_v51 = vmul.f32 %v4572_v24, %v4469_v5  ;;  %v8248_v5 = vld [vmem:[#allocation32_spill] sm:$0xff] }
  0x68   : > { %v3109_v61 = vpack.c.bf16 %v3092_v8, %v3091_v14  ;;  %v624_v7 = vadd.f32 %v606_v35, %v547_v20  ;;  %v625_v26 = vadd.f32 %v607_v31, %v548_v19  ;;  %v919_v62 = vmul.f32 %v4596_v52, %v4482_v23  ;;  %v8240_v31 = vld [vmem:[#allocation27_spill] sm:$0xff] }
  0x69   : > { %v920_v28 = vmul.f32 %v4600_v53, %v4482_v23  ;;  %v995_v18 = vmul.f32 %v4608_v56, %v4499_v34  ;;  %v996_v22 = vmul.f32 %v4612_v57, %v4499_v34  ;;  %v1071_v16 = vmul.f32 %v4630_v36, %v4518_v44  ;;  %v8246_v34 = vld [vmem:[#allocation31_spill] sm:$0xff]  ;;  %v8247_v23 = vld [vmem:[#allocation17_spill] sm:$0xff] }
  0x6a   : > { %4123 = vmatmul.mubr.bf16.vlgmr.msra.gmra.mxu0 %v3109_v61  ;;  %v701_v32 = vadd.f32 %v683_v13, %v624_v7  ;;  %v702_v33 = vadd.f32 %v684_v38, %v625_v26  ;;  %v1072_v58 = vmul.f32 %v4634_v37, %v4518_v44  ;;  %v1147_v2 = vmul.f32 %v4638_v39, %v4550_v63  ;;  %v8241_v13 = vld [vmem:[#allocation15_spill] sm:$0xff]  ;;  %v8242_v38 = vld [vmem:[#allocation24_spill] sm:$0xff]  ;;  %v8243_v61 = vld [vmem:[#allocation25_spill] sm:$0xff] }
  0x6b   : > { %v8238_v6 = vmov 0.0   ;;  %v1148_v45 = vmul.f32 %v4642_v43, %v4550_v63  ;;  %v1223_v35 = vmul.f32 %v8239_v25, %v4556_v11  ;;  %v1224_v14 = vmul.f32 %v8240_v31, %v4556_v11  ;;  %v8244_v26 = vld [vmem:[#allocation16_spill] sm:$0xff]  ;;  %v8245_v44 = vld [vmem:[#allocation30_spill] sm:$0xff]  ;;  %v8249_v11 = vld [vmem:[#allocation33_spill] sm:$0xff] }
  0x6c   : > { %4126 = vmatprep.mubr.msk.bf16.mxu0 %vm4280_vm0, %v8238_v6  ;;  %v1306_v8 = vmul.f32 %v8242_v38, %v8241_v13  ;;  %v778_v20 = vadd.f32 %v760_v40, %v701_v32  ;;  %v779_v19 = vadd.f32 %v761_v41, %v702_v33  ;;  %v1307_v7 = vmul.f32 %v8243_v61, %v8241_v13  ;;  %v8250_v38 = vld [vmem:[#allocation18_spill] sm:$0xff]  ;;  %v8251_v40 = vld [vmem:[#allocation36_spill] sm:$0xff]  ;;  %v8252_v13 = vld [vmem:[#allocation37_spill] sm:$0xff] }
  0x6d   : > { %v1382_v6 = vmul.f32 %v8245_v44, %v8244_v26  ;;  %v1383_v63 = vmul.f32 %v8246_v34, %v8244_v26  ;;  %v5034_v25 = vmul.f32 %v8248_v5, %v8247_v23  ;;  %v5038_v31 = vmul.f32 %v8249_v11, %v8247_v23  ;;  %v8253_v61 = vld [vmem:[#allocation22_spill] sm:$0xff]  ;;  %v8255_v5 = vld [vmem:[#allocation39_spill] sm:$0xff] }
  0x6e   : > { %v5042_v41 = vmul.f32 %v8251_v40, %v8250_v38  ;;  %v861_v32 = vadd.f32 %v843_v49, %v778_v20  ;;  %v862_v33 = vadd.f32 %v844_v51, %v779_v19  ;;  %v5046_v44 = vmul.f32 %v8252_v13, %v8250_v38  ;;  %v8254_v26 = vld [vmem:[#allocation38_spill] sm:$0xff]  ;;  %v8256_v23 = vld [vmem:[#allocation23_spill] sm:$0xff]  ;;  %v8258_v40 = vld [vmem:[#allocation44_spill] sm:$0xff] }
  0x6f   : > { %v5050_v34 = vmul.f32 %v8254_v26, %v8253_v61  ;;  %v5054_v59 = vmul.f32 %v8255_v5, %v8253_v61  ;;  %v8257_v11 = vld [vmem:[#allocation43_spill] sm:$0xff]  ;;  %v5062_v49 = vmul.f32 %v8258_v40, %v8256_v23  ;;  %v8259_v51 = vld [vmem:[#allocation28_spill] sm:$0xff]  ;;  %v8260_v26 = vld [vmem:[#allocation45_spill] sm:$0xff] }
  0x70   : > { %v5058_v43 = vmul.f32 %v8257_v11, %v8256_v23  ;;  %v5066_v20 = vmul.f32 %v4764_v1, %v8259_v51  ;;  %v937_v19 = vadd.f32 %v919_v62, %v861_v32  ;;  %v938_v38 = vadd.f32 %v920_v28, %v862_v33  ;;  %v8261_v61 = vld [vmem:[#allocation29_spill] sm:$0xff]  ;;  %v8264_v11 = vld [vmem:[#allocation50_spill] sm:$0xff]  ;;  %v8267_v40 = vld [vmem:[#allocation51_spill] sm:$0xff] }
  0x71   : > { %v5070_v13 = vmul.f32 %v8260_v26, %v8259_v51  ;;  %v8262_v5 = vld [vmem:[#allocation49_spill] sm:$0xff]  ;;  %v5078_v50 = vmul.f32 %v8264_v11, %v8261_v61  ;;  %v8266_v23 = vld [vmem:[#allocation34_spill] sm:$0xff]  ;;  %v8269_v62 = vld [vmem:[#allocation52_spill] sm:$0xff] }
  0x72   : > { %v5074_v39 = vmul.f32 %v8262_v5, %v8261_v61  ;;  %v5082_v37 = vmul.f32 %v8267_v40, %v8266_v23  ;;  %v5086_v28 = vmul.f32 %v8269_v62, %v8266_v23  ;;  %v8270_v32 = vld [vmem:[#allocation35_spill] sm:$0xff]  ;;  %v8271_v33 = vld [vmem:[#allocation53_spill] sm:$0xff]  ;;  %v1013_v26 = vadd.f32 %v995_v18, %v937_v19  ;;  %v8272_v1 = vld [vmem:[#allocation54_spill] sm:$0xff] }
  0x73   : > { %8265 = vst [vmem:[#allocation77_spill] sm:$0xff] %v5078_v50  ;;  %v5090_v51 = vmul.f32 %v8271_v33, %v8270_v32  ;;  %v1014_v5 = vadd.f32 %v996_v22, %v938_v38  ;;  %v8273_v61 = vld [vmem:[#allocation40_spill] sm:$0xff]  ;;  %v8274_v11 = vld [vmem:[#allocation57_spill] sm:$0xff]  ;;  %v8275_v40 = vld [vmem:[#allocation58_spill] sm:$0xff] }
  0x74   : > { %8263 = vst [vmem:[#allocation76_spill] sm:$0xff] %v5074_v39  ;;  %8268 = vst [vmem:[#allocation78_spill] sm:$0xff] %v5082_v37  ;;  %v5094_v39 = vmul.f32 %v8272_v1, %v8270_v32  ;;  %v5098_v50 = vmul.f32 %v8274_v11, %v8273_v61  ;;  %v5102_v37 = vmul.f32 %v8275_v40, %v8273_v61  ;;  %v8276_v23 = vld [vmem:[#allocation41_spill] sm:$0xff]  ;;  %v8278_v22 = vld [vmem:[#allocation46_spill] sm:$0xff] }
  0x75   : > { %v5106_v62 = vmul.f32 %v4864_v12, %v8276_v23  ;;  %v5110_v18 = vmul.f32 %v4868_v46, %v8276_v23  ;;  %v5114_v38 = vmul.f32 %v4874_v55, %v8278_v22  ;;  %v1089_v19 = vadd.f32 %v1071_v16, %v1013_v26  ;;  %v8279_v61 = vld [vmem:[#allocation47_spill] sm:$0xff]  ;;  %v8280_v40 = vld [vmem:[#allocation64_spill] sm:$0xff]  ;;  %v8281_v33 = vld [vmem:[#allocation65_spill] sm:$0xff] }
  0x76   : > { %v1090_v32 = vadd.f32 %v1072_v58, %v1014_v5  ;;  %v5118_v11 = vmul.f32 %v4876_v3, %v8278_v22  ;;  %v5122_v1 = vmul.f32 %v8280_v40, %v8279_v61  ;;  %v4064_v12 = vld [vmem:[%s4365_s15 + $0x30] sm:$0xff]   ;;  %v8283_v16 = vld [vmem:[#allocation55_spill] sm:$0xff] }
  0x77   : > { %8277 = vst [vmem:[#allocation79_spill] sm:$0xff] %v5106_v62  ;;  %v5127_v62 = vmul.f32 %v8281_v33, %v8279_v61  ;;  %v8282_v23 = vld [vmem:[#allocation48_spill] sm:$0xff]  ;;  %v5139_v58 = vmul.f32 %v4936_v21, %v8283_v16  ;;  %v1165_v26 = vadd.f32 %v1147_v2, %v1089_v19  ;;  %v5143_v40 = vmul.f32 %v4940_v10, %v8283_v16  ;;  %v8291_v10 = vld [vmem:[#allocation62_spill] sm:$0xff] }
  0x78   : > { %v5131_v46 = vmul.f32 %v4914_v47, %v8282_v23  ;;  %v5135_v5 = vmul.f32 %v4918_v48, %v8282_v23  ;;  %v1166_v22 = vadd.f32 %v1148_v45, %v1090_v32  ;;  %v8284_v61 = vld [vmem:[#allocation56_spill] sm:$0xff]  ;;  %v8287_v23 = vld [vmem:[#allocation61_spill] sm:$0xff]  ;;  %v5161_v45 = vunpack.c.l.bf16 %v4064_v12 }
  0x79   : > { %v5147_v33 = vmul.f32 %v4944_v0, %v8284_v61  ;;  %v5151_v47 = vmul.f32 %v4948_v60, %v8284_v61  ;;  %v5155_v48 = vmul.f32 %v4972_v9, %v8287_v23  ;;  %v5159_v2 = vmul.f32 %v4976_v17, %v8287_v23  ;;  %v8290_v0 = vld [vmem:[#allocation3_spill] sm:$0xff] }
  0x7a   : > { %v1241_v32 = vadd.f32 %v1223_v35, %v1165_v26  ;;  %v1242_v19 = vadd.f32 %v1224_v14, %v1166_v22  ;;  %v5163_v16 = vunpack.c.h.bf16 %v4064_v12  ;;  %v5169_v61 = vmul.f32 %v5161_v45, %v8291_v10 }
  0x7b   : > { %8285 = vst [vmem:[#allocation80_spill] sm:$0xff] %v5147_v33  ;;  %8286 = vst [vmem:[#allocation81_spill] sm:$0xff] %v5151_v47  ;;  %v375_v33 = vmul.f32 %v4562_v15, %v8290_v0  ;;  %v2730_v47 = vrot.slane %v5161_v45, 1  ;;  %v2882_v23 = vrot.slane %v5161_v45, 3  ;;  %v2958_v22 = vrot.slane %v5161_v45, 4 }
  0x7c   : > { %8288 = vst [vmem:[#allocation82_spill] sm:$0xff] %v5155_v48  ;;  %8289 = vst [vmem:[#allocation83_spill] sm:$0xff] %v5159_v2  ;;  %v2806_v48 = vrot.slane %v5161_v45, 2  ;;  %v1324_v2 = vadd.f32 %v1306_v8, %v1241_v32  ;;  %v1325_v17 = vadd.f32 %v1307_v7, %v1242_v19  ;;  %v5176_v35 = vmul.f32 %v5163_v16, %v8291_v10  ;;  %v8293_v32 = vld [vmem:[#allocation63_spill] sm:$0xff] }
  0x7d   : > { %8292 = vst [vmem:[#allocation84_spill] sm:$0xff] %v5169_v61  ;;  %v2739_v12 = vrot.slane %v5163_v16, 1  ;;  %v2815_v15 = vrot.slane %v5163_v16, 2  ;;  %v2891_v14 = vrot.slane %v5163_v16, 3  ;;  %v2967_v26 = vrot.slane %v5163_v16, 4 }
  0x7e   : > { %v1400_v61 = vadd.f32 %v1382_v6, %v1324_v2  ;;  %v1401_v9 = vadd.f32 %v1383_v63, %v1325_v17 }
  0x7f   : > { %v5185_v8 = vsel %vm427_vm1, %v2730_v47, %v2739_v12  ;;  %v5189_v7 = vsel %vm427_vm1, %v2739_v12, %v2730_v47  ;;  %v5201_v6 = vsel %vm504_vm2, %v2806_v48, %v2815_v15  ;;  %v5205_v63 = vsel %vm504_vm2, %v2815_v15, %v2806_v48 }
  0x80   : > { %v5193_v19 = vmul.f32 %v8293_v32, %v5185_v8  ;;  %v5197_v10 = vmul.f32 %v8293_v32, %v5189_v7  ;;  %8294 = vst [vmem:[#allocation85_spill] sm:$0xff] %v5201_v6  ;;  %v1476_v17 = vadd.f32 %v5034_v25, %v1400_v61  ;;  %v1477_v47 = vadd.f32 %v5038_v31, %v1401_v9 }
  0x81   : > { %v5211_v2 = vmul.f32 %v4921_v30, %v5201_v6  ;;  %v5215_v12 = vmul.f32 %v4921_v30, %v5205_v63  ;;  %v5219_v32 = vsel %vm581_vm3, %v2882_v23, %v2891_v14  ;;  %v5223_v48 = vsel %vm581_vm3, %v2891_v14, %v2882_v23  ;;  %v8300_v14 = vld [vmem:[#allocation72_spill] sm:$0xff] }
  0x82   : > { %8296 = vst [vmem:[#allocation87_spill] sm:$0xff] %v5219_v32  ;;  %v5227_v25 = vsel %vm658_vm4, %v2958_v22, %v2967_v26  ;;  %v5231_v9 = vsel %vm658_vm4, %v2967_v26, %v2958_v22  ;;  %v1552_v31 = vadd.f32 %v5042_v41, %v1476_v17  ;;  %v1553_v61 = vadd.f32 %v5046_v44, %v1477_v47 }
  0x83   : > { %8295 = vst [vmem:[#allocation86_spill] sm:$0xff] %v5215_v12  ;;  %8297 = vst [vmem:[#allocation88_spill] sm:$0xff] %v5231_v9  ;;  %v5237_v15 = vmul.f32 %v4926_v27, %v5219_v32  ;;  %v5241_v23 = vmul.f32 %v4926_v27, %v5223_v48  ;;  %v5245_v30 = vmul.f32 %v8300_v14, %v5227_v25  ;;  %v3034_v41 = vrot.slane %v5161_v45, 5  ;;  %v8303_v27 = vld [vmem:[#allocation4_spill] sm:$0xff] }
  0x84   : > { %v5249_v22 = vmul.f32 %v8300_v14, %v5231_v9  ;;  %v3043_v44 = vrot.slane %v5163_v16, 5  ;;  %v1628_v26 = vadd.f32 %v5050_v34, %v1552_v31  ;;  %v1629_v17 = vadd.f32 %v5054_v59, %v1553_v61 }
  0x85   : > { %8298 = vst [vmem:[#allocation89_spill] sm:$0xff] %v5237_v15  ;;  %8299 = vst [vmem:[#allocation90_spill] sm:$0xff] %v5241_v23  ;;  %v376_v47 = vmul.f32 %v4572_v24, %v8290_v0  ;;  %v454_v23 = vmul.f32 %v4596_v52, %v8303_v27  ;;  %v531_v59 = vmul.f32 %v4608_v56, %v4418_v29 }
  0x86   : > { %8301 = vst [vmem:[#allocation91_spill] sm:$0xff] %v5245_v30  ;;  %8302 = vst [vmem:[#allocation92_spill] sm:$0xff] %v5249_v22  ;;  %v5261_v30 = vsel %vm735_vm5, %v3034_v41, %v3043_v44  ;;  %v5265_v14 = vsel %vm735_vm5, %v3043_v44, %v3034_v41  ;;  %v455_v22 = vmul.f32 %v4600_v53, %v8303_v27  ;;  %v8308_v44 = vld [vmem:[#allocation19_spill] sm:$0xff]  ;;  %v8310_v27 = vld [vmem:[#allocation20_spill] sm:$0xff] }
  0x87   : > { %8304 = vst [vmem:[#allocation93_spill] sm:$0xff] %v5261_v30  ;;  %8305 = vst [vmem:[#allocation94_spill] sm:$0xff] %v5265_v14  ;;  %v1704_v34 = vadd.f32 %v5058_v43, %v1628_v26  ;;  %v1705_v24 = vadd.f32 %v5062_v49, %v1629_v17  ;;  %v5275_v52 = vmul.f32 %v4960_v54, %v5261_v30  ;;  %v8309_v17 = vld [vmem:[#allocation7_spill] sm:$0xff] }
  0x88   : > { %v5279_v31 = vmul.f32 %v4960_v54, %v5265_v14  ;;  %v472_v61 = vadd.f32 %v454_v23, %v375_v33  ;;  %v473_v41 = vadd.f32 %v455_v22, %v376_v47  ;;  %v532_v53 = vmul.f32 %v4612_v57, %v4418_v29  ;;  %v8311_v33 = vld [vmem:[#allocation21_spill] sm:$0xff]  ;;  %v8312_v22 = vld [vmem:[#allocation8_spill] sm:$0xff]  ;;  %v8313_v57 = vld [vmem:[#allocation26_spill] sm:$0xff] }
  0x89   : > { %8306 = vst [vmem:[#allocation95_spill] sm:$0xff] %v5275_v52  ;;  %v608_v56 = vmul.f32 %v4630_v36, %v4436_v42  ;;  %v1787_v43 = vadd.f32 %v5066_v20, %v1704_v34  ;;  %v1788_v49 = vadd.f32 %v5070_v13, %v1705_v24  ;;  %v609_v26 = vmul.f32 %v8308_v44, %v4436_v42  ;;  %v8314_v29 = vld [vmem:[#allocation76_spill] sm:$0xff]  ;;  %v8315_v52 = vld [vmem:[#allocation77_spill] sm:$0xff]  ;;  %v8316_v13 = vld [vmem:[#allocation27_spill] sm:$0xff] }
  0x8a   : > { %8307 = vst [vmem:[#allocation96_spill] sm:$0xff] %v5279_v31  ;;  %v685_v0 = vmul.f32 %v8310_v27, %v8309_v17  ;;  %v549_v54 = vadd.f32 %v531_v59, %v472_v61  ;;  %v550_v31 = vadd.f32 %v532_v53, %v473_v41  ;;  %v686_v23 = vmul.f32 %v8311_v33, %v8309_v17  ;;  %v8317_v24 = vld [vmem:[#allocation9_spill] sm:$0xff]  ;;  %v8318_v44 = vld [vmem:[#allocation24_spill] sm:$0xff]  ;;  %v8320_v41 = vld [vmem:[#allocation10_spill] sm:$0xff] }
  0x8b   : > { %v762_v47 = vmul.f32 %v8313_v57, %v8312_v22  ;;  %v1863_v36 = vadd.f32 %v8314_v29, %v1787_v43  ;;  %v1864_v20 = vadd.f32 %v8315_v52, %v1788_v49  ;;  %v763_v34 = vmul.f32 %v8316_v13, %v8312_v22  ;;  %v8319_v59 = vld [vmem:[#allocation25_spill] sm:$0xff]  ;;  %v8321_v53 = vld [vmem:[#allocation30_spill] sm:$0xff]  ;;  %v8323_v52 = vld [vmem:[#allocation31_spill] sm:$0xff] }
  0x8c   : > { %v845_v42 = vmul.f32 %v8318_v44, %v8317_v24  ;;  %v626_v4 = vadd.f32 %v608_v56, %v549_v54  ;;  %v627_v27 = vadd.f32 %v609_v26, %v550_v31  ;;  %v846_v61 = vmul.f32 %v8319_v59, %v8317_v24  ;;  %v8322_v17 = vld [vmem:[#allocation78_spill] sm:$0xff]  ;;  %v8324_v49 = vld [vmem:[#allocation11_spill] sm:$0xff]  ;;  %v8325_v13 = vld [vmem:[#allocation32_spill] sm:$0xff] }
  0x8d   : > { %v921_v33 = vmul.f32 %v8321_v53, %v8320_v41  ;;  %v1939_v57 = vadd.f32 %v8322_v17, %v1863_v36  ;;  %v1940_v29 = vadd.f32 %v5086_v28, %v1864_v20  ;;  %v922_v43 = vmul.f32 %v8323_v52, %v8320_v41  ;;  %v8326_v54 = vld [vmem:[#allocation33_spill] sm:$0xff]  ;;  %v8327_v56 = vld [vmem:[#allocation12_spill] sm:$0xff]  ;;  %v8331_v52 = vld [vmem:[#allocation38_spill] sm:$0xff] }
  0x8e   : > { %v997_v22 = vmul.f32 %v8325_v13, %v8324_v49  ;;  %v703_v15 = vadd.f32 %v685_v0, %v626_v4  ;;  %v704_v44 = vadd.f32 %v686_v23, %v627_v27  ;;  %v998_v31 = vmul.f32 %v8326_v54, %v8324_v49  ;;  %v8328_v26 = vld [vmem:[#allocation36_spill] sm:$0xff]  ;;  %v8329_v28 = vld [vmem:[#allocation37_spill] sm:$0xff]  ;;  %v8332_v4 = vld [vmem:[#allocation39_spill] sm:$0xff] }
  0x8f   : > { %v1073_v59 = vmul.f32 %v8328_v26, %v8327_v56  ;;  %v2015_v53 = vadd.f32 %v5090_v51, %v1939_v57  ;;  %v2016_v17 = vadd.f32 %v5094_v39, %v1940_v29  ;;  %v1074_v36 = vmul.f32 %v8329_v28, %v8327_v56  ;;  %v8330_v20 = vld [vmem:[#allocation13_spill] sm:$0xff]  ;;  %v8333_v23 = vld [vmem:[#allocation14_spill] sm:$0xff]  ;;  %v8334_v27 = vld [vmem:[#allocation43_spill] sm:$0xff] }
  0x90   : > { %v1149_v41 = vmul.f32 %v8331_v52, %v8330_v20  ;;  %v780_v24 = vadd.f32 %v762_v47, %v703_v15  ;;  %v781_v13 = vadd.f32 %v763_v34, %v704_v44  ;;  %v1150_v0 = vmul.f32 %v8332_v4, %v8330_v20  ;;  %v8335_v39 = vld [vmem:[#allocation44_spill] sm:$0xff]  ;;  %v8336_v29 = vld [vmem:[#allocation15_spill] sm:$0xff]  ;;  %v8337_v28 = vld [vmem:[#allocation42_spill] sm:$0xff] }
  0x91   : > { %v1225_v54 = vmul.f32 %v8334_v27, %v8333_v23  ;;  %v2091_v26 = vadd.f32 %v5098_v50, %v2015_v53  ;;  %v2092_v51 = vadd.f32 %v5102_v37, %v2016_v17  ;;  %v1226_v57 = vmul.f32 %v8335_v39, %v8333_v23  ;;  %v8338_v15 = vld [vmem:[#allocation45_spill] sm:$0xff]  ;;  %v8339_v34 = vld [vmem:[#allocation16_spill] sm:$0xff]  ;;  %v8341_v20 = vld [vmem:[#allocation79_spill] sm:$0xff] }
  0x92   : > { %v1308_v56 = vmul.f32 %v8337_v28, %v8336_v29  ;;  %v863_v49 = vadd.f32 %v845_v42, %v780_v24  ;;  %v864_v52 = vadd.f32 %v846_v61, %v781_v13  ;;  %v1309_v47 = vmul.f32 %v8338_v15, %v8336_v29  ;;  %v8340_v44 = vld [vmem:[#allocation49_spill] sm:$0xff]  ;;  %v8342_v37 = vld [vmem:[#allocation50_spill] sm:$0xff]  ;;  %v8344_v39 = vld [vmem:[#allocation51_spill] sm:$0xff] }
  0x93   : > { %v1384_v4 = vmul.f32 %v8340_v44, %v8339_v34  ;;  %v2167_v27 = vadd.f32 %v8341_v20, %v2091_v26  ;;  %v2168_v50 = vadd.f32 %v5110_v18, %v2092_v51  ;;  %v1385_v53 = vmul.f32 %v8342_v37, %v8339_v34  ;;  %v8343_v17 = vld [vmem:[#allocation17_spill] sm:$0xff]  ;;  %v8345_v42 = vld [vmem:[#allocation52_spill] sm:$0xff]  ;;  %v8346_v61 = vld [vmem:[#allocation18_spill] sm:$0xff] }
  0x94   : > { %v1460_v23 = vmul.f32 %v8344_v39, %v8343_v17  ;;  %v939_v12 = vadd.f32 %v921_v33, %v863_v49  ;;  %v940_v28 = vadd.f32 %v922_v43, %v864_v52  ;;  %v1461_v24 = vmul.f32 %v8345_v42, %v8343_v17  ;;  %v8347_v13 = vld [vmem:[#allocation53_spill] sm:$0xff]  ;;  %v8348_v18 = vld [vmem:[#allocation54_spill] sm:$0xff]  ;;  %v8352_v39 = vld [vmem:[#allocation23_spill] sm:$0xff] }
  0x95   : > { %v5345_v15 = vmul.f32 %v8347_v13, %v8346_v61  ;;  %v2250_v44 = vadd.f32 %v5114_v38, %v2167_v27  ;;  %v2251_v20 = vadd.f32 %v5118_v11, %v2168_v50  ;;  %v1537_v26 = vmul.f32 %v8348_v18, %v8346_v61  ;;  %v8349_v51 = vld [vmem:[#allocation22_spill] sm:$0xff]  ;;  %v8350_v37 = vld [vmem:[#allocation57_spill] sm:$0xff]  ;;  %v8353_v42 = vld [vmem:[#allocation59_spill] sm:$0xff] }
  0x96   : > { %v5353_v34 = vmul.f32 %v8350_v37, %v8349_v51  ;;  %v1015_v33 = vadd.f32 %v997_v22, %v939_v12  ;;  %v1016_v43 = vadd.f32 %v998_v31, %v940_v28  ;;  %v8351_v49 = vld [vmem:[#allocation58_spill] sm:$0xff]  ;;  %v5361_v13 = vmul.f32 %v8353_v42, %v8352_v39  ;;  %v8354_v27 = vld [vmem:[#allocation60_spill] sm:$0xff]  ;;  %v8356_v37 = vld [vmem:[#allocation29_spill] sm:$0xff] }
  0x97   : > { %v5357_v52 = vmul.f32 %v8351_v49, %v8349_v51  ;;  %v2326_v38 = vadd.f32 %v5122_v1, %v2250_v44  ;;  %v2327_v11 = vadd.f32 %v5127_v62, %v2251_v20  ;;  %v5367_v50 = vmul.f32 %v8354_v27, %v8352_v39  ;;  %v8355_v18 = vld [vmem:[#allocation28_spill] sm:$0xff]  ;;  %v8358_v44 = vld [vmem:[#allocation65_spill] sm:$0xff]  ;;  %v8360_v27 = vld [vmem:[#allocation66_spill] sm:$0xff] }
  0x98   : > { %v5371_v12 = vmul.f32 %v4874_v55, %v8355_v18  ;;  %v1091_v22 = vadd.f32 %v1073_v59, %v1015_v33  ;;  %v1092_v31 = vadd.f32 %v1074_v36, %v1016_v43  ;;  %v5375_v28 = vmul.f32 %v4876_v3, %v8355_v18  ;;  %v8357_v49 = vld [vmem:[#allocation64_spill] sm:$0xff]  ;;  %v8359_v55 = vld [vmem:[#allocation34_spill] sm:$0xff]  ;;  %v8361_v3 = vld [vmem:[#allocation67_spill] sm:$0xff] }
  0x99   : > { %v5379_v42 = vmul.f32 %v8357_v49, %v8356_v37  ;;  %v2402_v1 = vadd.f32 %v5131_v46, %v2326_v38  ;;  %v2403_v62 = vadd.f32 %v5135_v5, %v2327_v11  ;;  %v5385_v20 = vmul.f32 %v8358_v44, %v8356_v37  ;;  %v8362_v49 = vld [vmem:[#allocation35_spill] sm:$0xff]  ;;  %v8363_v38 = vld [vmem:[#allocation70_spill] sm:$0xff]  ;;  %v8364_v44 = vld [vmem:[#allocation40_spill] sm:$0xff] }
  0x9a   : > { %v5389_v59 = vmul.f32 %v8360_v27, %v8359_v55  ;;  %v1167_v36 = vadd.f32 %v1149_v41, %v1091_v22  ;;  %v1168_v33 = vadd.f32 %v1150_v0, %v1092_v31  ;;  %v5393_v43 = vmul.f32 %v8361_v3, %v8359_v55  ;;  %v8365_v27 = vld [vmem:[#allocation71_spill] sm:$0xff]  ;;  %v8367_v3 = vld [vmem:[#allocation74_spill] sm:$0xff] }
  0x9b   : > { %v5397_v18 = vmul.f32 %v4936_v21, %v8362_v49  ;;  %v2478_v46 = vadd.f32 %v5139_v58, %v2402_v1  ;;  %v2479_v5 = vadd.f32 %v5143_v40, %v2403_v62  ;;  %v5403_v11 = vmul.f32 %v8363_v38, %v8362_v49  ;;  %v8366_v21 = vld [vmem:[#allocation41_spill] sm:$0xff]  ;;  %v8368_v58 = vld [vmem:[#allocation80_spill] sm:$0xff]  ;;  %v8370_v38 = vld [vmem:[#allocation75_spill] sm:$0xff] }
  0x9c   : > { %v5407_v41 = vmul.f32 %v8365_v27, %v8364_v44  ;;  %v1243_v0 = vadd.f32 %v1225_v54, %v1167_v36  ;;  %v1244_v22 = vadd.f32 %v1226_v57, %v1168_v33  ;;  %v5411_v31 = vmul.f32 %v4948_v60, %v8364_v44  ;;  %v8369_v1 = vld [vmem:[#allocation81_spill] sm:$0xff]  ;;  %v8371_v27 = vld [vmem:[#allocation46_spill] sm:$0xff]  ;;  %v8372_v33 = vld [vmem:[#allocation47_spill] sm:$0xff] }
  0x9d   : > { %v5415_v55 = vmul.f32 %v8367_v3, %v8366_v21  ;;  %v2554_v40 = vadd.f32 %v8368_v58, %v2478_v46  ;;  %v2555_v62 = vadd.f32 %v8369_v1, %v2479_v5  ;;  %v5421_v49 = vmul.f32 %v8370_v38, %v8366_v21  ;;  %v8373_v5 = vld [vmem:[#allocation82_spill] sm:$0xff]  ;;  %v8374_v58 = vld [vmem:[#allocation83_spill] sm:$0xff]  ;;  %v8375_v21 = vld [vmem:[#allocation48_spill] sm:$0xff] }
  0x9e   : > { %v5425_v54 = vmul.f32 %v5161_v45, %v8371_v27  ;;  %v1326_v57 = vadd.f32 %v1308_v56, %v1243_v0  ;;  %v1327_v60 = vadd.f32 %v1309_v47, %v1244_v22  ;;  %v5429_v36 = vmul.f32 %v5163_v16, %v8371_v27  ;;  %v8376_v27 = vld [vmem:[#allocation55_spill] sm:$0xff] }
  0x9f   : > { %v5433_v46 = vmul.f32 %v5185_v8, %v8372_v33  ;;  %v2630_v3 = vadd.f32 %v8373_v5, %v2554_v40  ;;  %v2631_v1 = vadd.f32 %v8374_v58, %v2555_v62  ;;  %v5439_v38 = vmul.f32 %v5189_v7, %v8372_v33  ;;  %v4065_v40 = vld [vmem:[%s4365_s15 + $0x38] sm:$0xff]   ;;  %v8377_v62 = vld [vmem:[#allocation84_spill] sm:$0xff] }
  0xa0   : > { %v5443_v56 = vmul.f32 %v5201_v6, %v8375_v21  ;;  %v1402_v47 = vadd.f32 %v1384_v4, %v1326_v57  ;;  %v1403_v0 = vadd.f32 %v1385_v53, %v1327_v60  ;;  %v5447_v22 = vmul.f32 %v5205_v63, %v8375_v21  ;;  %v8378_v6 = vld [vmem:[#allocation56_spill] sm:$0xff]  ;;  %v5465_v53 = vld [vmem:[%s4365_s15 + $0x18] sm:$0xff]  }
  0xa1   : > { %v5451_v44 = vmul.f32 %v5219_v32, %v8376_v27  ;;  %v2713_v5 = vadd.f32 %v8377_v62, %v2630_v3  ;;  %v2714_v58 = vadd.f32 %v5176_v35, %v2631_v1  ;;  %v5458_v33 = vmul.f32 %v5223_v48, %v8376_v27  ;;  %v8379_v32 = vld [vmem:[#allocation61_spill] sm:$0xff] }
  0xa2   : > { %v5462_v4 = vmul.f32 %v5227_v25, %v8378_v6  ;;  %v1478_v57 = vadd.f32 %v1460_v23, %v1402_v47  ;;  %v1479_v60 = vadd.f32 %v1461_v24, %v1403_v0  ;;  %v5469_v21 = vmul.f32 %v5231_v9, %v8378_v6 }
  0xa3   : > { %v5473_v3 = vmul.f32 %v5261_v30, %v8379_v32  ;;  %v2789_v35 = vadd.f32 %v5193_v19, %v2713_v5  ;;  %v2790_v1 = vadd.f32 %v5197_v10, %v2714_v58  ;;  %v5479_v62 = vmul.f32 %v5265_v14, %v8379_v32  ;;  %v8382_v30 = vld [vmem:[#allocation86_spill] sm:$0xff] }
  0xa4   : > { %v5481_v27 = vunpack.c.l.bf16 %v4065_v40  ;;  %v1554_v23 = vadd.f32 %v5345_v15, %v1478_v57  ;;  %v1555_v24 = vadd.f32 %v1537_v26, %v1479_v60  ;;  %v5484_v47 = vunpack.c.h.bf16 %v4065_v40  ;;  %v8383_v5 = vld [vmem:[#allocation62_spill] sm:$0xff]  ;;  %v8384_v57 = vld [vmem:[#allocation89_spill] sm:$0xff] }
  0xa5   : > { %v5487_v0 = vunpack.c.l.bf16 %v5465_v53  ;;  %v2865_v6 = vadd.f32 %v5211_v2, %v2789_v35  ;;  %v2866_v19 = vadd.f32 %v8382_v30, %v2790_v1  ;;  %v8385_v60 = vld [vmem:[#allocation90_spill] sm:$0xff] }
  0xa6   : > { %8380 = vst [vmem:[#allocation19_spill] sm:$0xff] %v5481_v27  ;;  %8381 = vst [vmem:[#allocation20_spill] sm:$0xff] %v5484_v47  ;;  %v5493_v10 = vmul.f32 %v5481_v27, %v8383_v5  ;;  %v2731_v58 = vrot.slane %v5481_v27, 1  ;;  %v1630_v32 = vadd.f32 %v5353_v34, %v1554_v23  ;;  %v1631_v15 = vadd.f32 %v5357_v52, %v1555_v24 }
  0xa7   : > { %v5500_v26 = vmul.f32 %v5484_v47, %v8383_v5  ;;  %v2740_v40 = vrot.slane %v5484_v47, 1  ;;  %v2941_v2 = vadd.f32 %v8384_v57, %v2865_v6  ;;  %v2942_v30 = vadd.f32 %v8385_v60, %v2866_v19  ;;  %v8389_v5 = vld [vmem:[#allocation91_spill] sm:$0xff]  ;;  %v8390_v57 = vld [vmem:[#allocation92_spill] sm:$0xff] }
  0xa8   : > { %v2807_v35 = vrot.slane %v5481_v27, 2  ;;  %v2816_v1 = vrot.slane %v5484_v47, 2  ;;  %v1706_v14 = vadd.f32 %v5361_v13, %v1630_v32  ;;  %v1707_v34 = vadd.f32 %v5367_v50, %v1631_v15  ;;  %v8391_v60 = vld [vmem:[#allocation63_spill] sm:$0xff] }
  0xa9   : > { %v5511_v52 = vsel %vm427_vm1, %v2731_v58, %v2740_v40  ;;  %v5515_v24 = vsel %vm427_vm1, %v2740_v40, %v2731_v58  ;;  %v3017_v6 = vadd.f32 %v8389_v5, %v2941_v2  ;;  %v3018_v19 = vadd.f32 %v8390_v57, %v2942_v30  ;;  %v8394_v15 = vld [vmem:[#allocation95_spill] sm:$0xff]  ;;  %v8395_v2 = vld [vmem:[#allocation96_spill] sm:$0xff] }
  0xaa   : > { %8387 = vst [vmem:[#allocation21_spill] sm:$0xff] %v5511_v52  ;;  %8388 = vst [vmem:[#allocation26_spill] sm:$0xff] %v5515_v24  ;;  %v5521_v9 = vmul.f32 %v8391_v60, %v5511_v52  ;;  %v5525_v32 = vmul.f32 %v8391_v60, %v5515_v24  ;;  %v1789_v13 = vadd.f32 %v5371_v12, %v1706_v14  ;;  %v8396_v57 = vld [vmem:[#allocation68_spill] sm:$0xff] }
  0xab   : > { %v1790_v50 = vadd.f32 %v5375_v28, %v1707_v34  ;;  %v5531_v58 = vsel %vm504_vm2, %v2807_v35, %v2816_v1  ;;  %v5535_v5 = vsel %vm504_vm2, %v2816_v1, %v2807_v35  ;;  %v3093_v40 = vadd.f32 %v8394_v15, %v3017_v6 }
  0xac   : > { %8392 = vst [vmem:[#allocation76_spill] sm:$0xff] %v5531_v58  ;;  %8393 = vst [vmem:[#allocation77_spill] sm:$0xff] %v5535_v5  ;;  %v3094_v30 = vadd.f32 %v8395_v2, %v3018_v19  ;;  %v5541_v60 = vmul.f32 %v8396_v57, %v5531_v58  ;;  %v5545_v14 = vmul.f32 %v8396_v57, %v5535_v5  ;;  %v2883_v34 = vrot.slane %v5481_v27, 3 }
  0xad   : > { %v1865_v12 = vadd.f32 %v5379_v42, %v1789_v13  ;;  %v1866_v28 = vadd.f32 %v5385_v20, %v1790_v50  ;;  %v2892_v35 = vrot.slane %v5484_v47, 3  ;;  %v2959_v6 = vrot.slane %v5481_v27, 4  ;;  %v8399_v13 = vld [vmem:[#allocation69_spill] sm:$0xff] }
  0xae   : > { %v3110_v1 = vpack.c.bf16 %v3094_v30, %v3093_v40  ;;  %v2968_v19 = vrot.slane %v5484_v47, 4  ;;  %v3035_v15 = vrot.slane %v5481_v27, 5  ;;  %v8402_v30 = vmov 0.0  }
  0xaf   : > { %v1941_v2 = vadd.f32 %v5389_v59, %v1865_v12  ;;  %v1942_v57 = vadd.f32 %v5393_v43, %v1866_v28  ;;  %v5558_v42 = vsel %vm581_vm3, %v2883_v34, %v2892_v35  ;;  %v5562_v20 = vsel %vm581_vm3, %v2892_v35, %v2883_v34  ;;  %v8403_v34 = vld [vmem:[#allocation72_spill] sm:$0xff] }
  0xb0   : > { %8397 = vst [vmem:[#allocation27_spill] sm:$0xff] %v5558_v42  ;;  %8398 = vst [vmem:[#allocation24_spill] sm:$0xff] %v5562_v20  ;;  %4127 = vmatmul.mubr.bf16.gmra.mxu0 %v3110_v1  ;;  %v5566_v50 = vmul.f32 %v8399_v13, %v5558_v42  ;;  %v5570_v40 = vmul.f32 %v8399_v13, %v5562_v20  ;;  %v5574_v59 = vsel %vm658_vm4, %v2959_v6, %v2968_v19 }
  0xb1   : > { %8400 = vst [vmem:[#allocation25_spill] sm:$0xff] %v5574_v59  ;;  %v5578_v43 = vsel %vm658_vm4, %v2968_v19, %v2959_v6  ;;  %4130 = vmatprep.mubr.msk.bf16.mxu0 %vm4280_vm0, %v8402_v30  ;;  %v2017_v12 = vadd.f32 %v5397_v18, %v1941_v2  ;;  %v2018_v28 = vadd.f32 %v5403_v11, %v1942_v57  ;;  %v3044_v13 = vrot.slane %v5484_v47, 5  ;;  %v8404_v19 = vld [vmem:[#allocation3_spill] sm:$0xff] }
  0xb2   : > { %8401 = vst [vmem:[#allocation30_spill] sm:$0xff] %v5578_v43  ;;  %v5586_v35 = vmul.f32 %v8403_v34, %v5574_v59  ;;  %v5590_v1 = vmul.f32 %v8403_v34, %v5578_v43  ;;  %v3818_v6 = vunpack.c.h.bf16 %v5465_v53  ;;  %v377_v20 = vmul.f32 %v5487_v0, %v8404_v19 }
  0xb3   : > { %v410_v42 = vrot.slane %v5487_v0, 1  ;;  %v2093_v18 = vadd.f32 %v5407_v41, %v2017_v12  ;;  %v2094_v11 = vadd.f32 %v5411_v31, %v2018_v28  ;;  %v489_v57 = vrot.slane %v5487_v0, 2  ;;  %v8407_v31 = vld [vmem:[#allocation73_spill] sm:$0xff] }
  0xb4   : > { %v566_v2 = vrot.slane %v5487_v0, 3  ;;  %v5603_v34 = vsel %vm735_vm5, %v3035_v15, %v3044_v13  ;;  %v5607_v53 = vsel %vm735_vm5, %v3044_v13, %v3035_v15  ;;  %v378_v43 = vmul.f32 %v3818_v6, %v8404_v19 }
  0xb5   : > { %8405 = vst [vmem:[#allocation78_spill] sm:$0xff] %v5603_v34  ;;  %8406 = vst [vmem:[#allocation31_spill] sm:$0xff] %v5607_v53  ;;  %v419_v59 = vrot.slane %v3818_v6, 1  ;;  %v2169_v5 = vadd.f32 %v5415_v55, %v2093_v18  ;;  %v2170_v41 = vadd.f32 %v5421_v49, %v2094_v11  ;;  %v5614_v12 = vmul.f32 %v8407_v31, %v5603_v34  ;;  %v8408_v18 = vld [vmem:[#allocation4_spill] sm:$0xff] }
  0xb6   : > { %v5618_v28 = vmul.f32 %v8407_v31, %v5607_v53  ;;  %v498_v13 = vrot.slane %v3818_v6, 2  ;;  %v575_v19 = vrot.slane %v3818_v6, 3 }
  0xb7   : > { %v431_v58 = vsel %vm427_vm1, %v410_v42, %v419_v59  ;;  %v440_v15 = vsel %vm427_vm1, %v419_v59, %v410_v42  ;;  %v2252_v55 = vadd.f32 %v5425_v54, %v2169_v5  ;;  %v2253_v49 = vadd.f32 %v5429_v36, %v2170_v41  ;;  %v8409_v59 = vld [vmem:[#allocation5_spill] sm:$0xff] }
  0xb8   : > { %v456_v11 = vmul.f32 %v8408_v18, %v431_v58  ;;  %v457_v34 = vmul.f32 %v8408_v18, %v440_v15  ;;  %v508_v31 = vsel %vm504_vm2, %v489_v57, %v498_v13  ;;  %v517_v53 = vsel %vm504_vm2, %v498_v13, %v489_v57  ;;  %v8410_v18 = vld [vmem:[#allocation6_spill] sm:$0xff] }
  0xb9   : > { %v585_v24 = vsel %vm581_vm3, %v566_v2, %v575_v19  ;;  %v594_v42 = vsel %vm581_vm3, %v575_v19, %v566_v2  ;;  %v2328_v54 = vadd.f32 %v5433_v46, %v2252_v55  ;;  %v2329_v36 = vadd.f32 %v5439_v38, %v2253_v49  ;;  %v8411_v55 = vld [vmem:[#allocation7_spill] sm:$0xff] }
  0xba   : > { %v474_v5 = vadd.f32 %v456_v11, %v377_v20  ;;  %v475_v58 = vadd.f32 %v457_v34, %v378_v43  ;;  %v533_v41 = vmul.f32 %v8409_v59, %v508_v31  ;;  %v534_v15 = vmul.f32 %v8409_v59, %v517_v53 }
  0xbb   : > { %v610_v52 = vmul.f32 %v8410_v18, %v585_v24  ;;  %v611_v57 = vmul.f32 %v8410_v18, %v594_v42  ;;  %v2404_v13 = vadd.f32 %v5443_v56, %v2328_v54  ;;  %v2405_v47 = vadd.f32 %v5447_v22, %v2329_v36  ;;  %v4030_v42 = vld [vmem:[%s4365_s15 + $0x20] sm:$0xff]  }
  0xbc   : > { %v643_v19 = vrot.slane %v5487_v0, 4  ;;  %v652_v46 = vrot.slane %v3818_v6, 4  ;;  %v551_v2 = vadd.f32 %v533_v41, %v474_v5  ;;  %v552_v38 = vadd.f32 %v534_v15, %v475_v58 }
  0xbd   : > { %v720_v20 = vrot.slane %v5487_v0, 5  ;;  %v729_v43 = vrot.slane %v3818_v6, 5  ;;  %v2480_v34 = vadd.f32 %v5451_v44, %v2404_v13  ;;  %v2481_v24 = vadd.f32 %v5458_v33, %v2405_v47  ;;  %v4039_v47 = vld [vmem:[%s4365_s15 + $0x28] sm:$0xff]  }
  0xbe   : > { %v662_v53 = vsel %vm658_vm4, %v643_v19, %v652_v46  ;;  %v671_v56 = vsel %vm658_vm4, %v652_v46, %v643_v19  ;;  %v628_v22 = vadd.f32 %v610_v52, %v551_v2  ;;  %v629_v31 = vadd.f32 %v611_v57, %v552_v38  ;;  %v8412_v52 = vld [vmem:[#allocation8_spill] sm:$0xff] }
  0xbf   : > { %v687_v49 = vmul.f32 %v8411_v55, %v662_v53  ;;  %v688_v11 = vmul.f32 %v8411_v55, %v671_v56  ;;  %v2556_v0 = vadd.f32 %v5462_v4, %v2480_v34  ;;  %v2557_v6 = vadd.f32 %v5469_v21, %v2481_v24 }
  0xc0   : > { %v739_v44 = vsel %vm735_vm5, %v720_v20, %v729_v43  ;;  %v748_v33 = vsel %vm735_vm5, %v729_v43, %v720_v20  ;;  %v5666_v4 = vunpack.c.l.bf16 %v4030_v42  ;;  %v5668_v21 = vunpack.c.h.bf16 %v4030_v42  ;;  %v8413_v20 = vld [vmem:[#allocation9_spill] sm:$0xff] }
  0xc1   : > { %v705_v54 = vadd.f32 %v687_v49, %v628_v22  ;;  %v706_v36 = vadd.f32 %v688_v11, %v629_v31  ;;  %v764_v5 = vmul.f32 %v8412_v52, %v739_v44  ;;  %v765_v58 = vmul.f32 %v8412_v52, %v748_v33  ;;  %v8415_v33 = vld [vmem:[#allocation11_spill] sm:$0xff] }
  0xc2   : > { %v2632_v41 = vadd.f32 %v5473_v3, %v2556_v0  ;;  %v2633_v15 = vadd.f32 %v5479_v62, %v2557_v6  ;;  %v5670_v19 = vunpack.c.l.bf16 %v4039_v47  ;;  %v5672_v46 = vunpack.c.h.bf16 %v4039_v47  ;;  %v8414_v0 = vld [vmem:[#allocation10_spill] sm:$0xff] }
  0xc3   : > { %v782_v57 = vadd.f32 %v764_v5, %v705_v54  ;;  %v783_v13 = vadd.f32 %v765_v58, %v706_v36  ;;  %v847_v43 = vmul.f32 %v5666_v4, %v8413_v20  ;;  %v848_v3 = vmul.f32 %v5668_v21, %v8413_v20 }
  0xc4   : > { %v2715_v2 = vadd.f32 %v5493_v10, %v2632_v41  ;;  %v2716_v38 = vadd.f32 %v5500_v26, %v2633_v15  ;;  %v880_v62 = vrot.slane %v5666_v4, 1  ;;  %v889_v34 = vrot.slane %v5668_v21, 1 }
  0xc5   : > { %v956_v24 = vrot.slane %v5666_v4, 2  ;;  %v965_v53 = vrot.slane %v5668_v21, 2  ;;  %v865_v22 = vadd.f32 %v847_v43, %v782_v57  ;;  %v866_v26 = vadd.f32 %v848_v3, %v783_v13  ;;  %v8416_v3 = vld [vmem:[#allocation12_spill] sm:$0xff] }
  0xc6   : > { %v2791_v56 = vadd.f32 %v5521_v9, %v2715_v2  ;;  %v2792_v10 = vadd.f32 %v5525_v32, %v2716_v38  ;;  %v5688_v31 = vsel %vm427_vm1, %v880_v62, %v889_v34  ;;  %v5692_v49 = vsel %vm427_vm1, %v889_v34, %v880_v62 }
  0xc7   : > { %v5696_v11 = vsel %vm504_vm2, %v956_v24, %v965_v53  ;;  %v5700_v42 = vsel %vm504_vm2, %v965_v53, %v956_v24  ;;  %v923_v6 = vmul.f32 %v8414_v0, %v5688_v31  ;;  %v924_v44 = vmul.f32 %v8414_v0, %v5692_v49 }
  0xc8   : > { %v2867_v9 = vadd.f32 %v5541_v60, %v2791_v56  ;;  %v2868_v32 = vadd.f32 %v5545_v14, %v2792_v10  ;;  %v999_v47 = vmul.f32 %v8415_v33, %v5696_v11  ;;  %v1000_v54 = vmul.f32 %v8415_v33, %v5700_v42  ;;  %v8417_v56 = vld [vmem:[#allocation13_spill] sm:$0xff] }
  0xc9   : > { %v1032_v36 = vrot.slane %v5666_v4, 3  ;;  %v1041_v5 = vrot.slane %v5668_v21, 3  ;;  %v941_v58 = vadd.f32 %v923_v6, %v865_v22  ;;  %v942_v41 = vadd.f32 %v924_v44, %v866_v26 }
  0xca   : > { %v2943_v60 = vadd.f32 %v5566_v50, %v2867_v9  ;;  %v2944_v14 = vadd.f32 %v5570_v40, %v2868_v32  ;;  %v1108_v13 = vrot.slane %v5666_v4, 4  ;;  %v1117_v2 = vrot.slane %v5668_v21, 4 }
  0xcb   : > { %v5718_v15 = vsel %vm581_vm3, %v1032_v36, %v1041_v5  ;;  %v5722_v57 = vsel %vm581_vm3, %v1041_v5, %v1032_v36  ;;  %v1017_v43 = vadd.f32 %v999_v47, %v941_v58  ;;  %v1018_v40 = vadd.f32 %v1000_v54, %v942_v41 }
  0xcc   : > { %v3019_v38 = vadd.f32 %v5586_v35, %v2943_v60  ;;  %v3020_v50 = vadd.f32 %v5590_v1, %v2944_v14  ;;  %v1075_v62 = vmul.f32 %v8416_v3, %v5718_v15  ;;  %v1076_v34 = vmul.f32 %v8416_v3, %v5722_v57  ;;  %v8418_v14 = vld [vmem:[#allocation14_spill] sm:$0xff] }
  0xcd   : > { %v5734_v24 = vsel %vm658_vm4, %v1108_v13, %v1117_v2  ;;  %v5738_v53 = vsel %vm658_vm4, %v1117_v2, %v1108_v13  ;;  %v1184_v32 = vrot.slane %v5666_v4, 5  ;;  %v1193_v6 = vrot.slane %v5668_v21, 5 }
  0xce   : > { %v3095_v35 = vadd.f32 %v5614_v12, %v3019_v38  ;;  %v3096_v1 = vadd.f32 %v5618_v28, %v3020_v50  ;;  %v1151_v10 = vmul.f32 %v8417_v56, %v5734_v24  ;;  %v1152_v22 = vmul.f32 %v8417_v56, %v5738_v53  ;;  %v8449_v56 = vld [vmem:[#allocation25_spill] sm:$0xff] }
  0xcf   : > { %v1093_v26 = vadd.f32 %v1075_v62, %v1017_v43  ;;  %v1094_v9 = vadd.f32 %v1076_v34, %v1018_v40  ;;  %v1310_v47 = vmul.f32 %v5670_v19, %v8336_v29  ;;  %v1311_v12 = vmul.f32 %v5672_v46, %v8336_v29  ;;  %v8433_v29 = vld [vmem:[#allocation88_spill] sm:$0xff] }
  0xd0   : > { %v3111_v44 = vpack.c.bf16 %v3096_v1, %v3095_v35  ;;  %v1343_v28 = vrot.slane %v5670_v19, 1  ;;  %v5755_v5 = vsel %vm735_vm5, %v1184_v32, %v1193_v6  ;;  %v5759_v60 = vsel %vm735_vm5, %v1193_v6, %v1184_v32 }
  0xd1   : > { %v1169_v54 = vadd.f32 %v1151_v10, %v1093_v26  ;;  %v1170_v36 = vadd.f32 %v1152_v22, %v1094_v9  ;;  %v1227_v58 = vmul.f32 %v8418_v14, %v5755_v5  ;;  %v1228_v41 = vmul.f32 %v8418_v14, %v5759_v60  ;;  %v8419_v10 = vld [vmem:[#allocation16_spill] sm:$0xff] }
  0xd2   : > { %4131 = vmatmul.mubr.bf16.gmra.mxu0 %v3111_v44  ;;  %v1352_v13 = vrot.slane %v5672_v46, 1  ;;  %v1419_v2 = vrot.slane %v5670_v19, 2  ;;  %v1428_v38 = vrot.slane %v5672_v46, 2  ;;  %v1495_v50 = vrot.slane %v5670_v19, 3 }
  0xd3   : > { %4134 = vmatprep.mubr.msk.bf16.mxu0 %vm4280_vm0, %v8402_v30  ;;  %v1504_v43 = vrot.slane %v5672_v46, 3  ;;  %v1571_v40 = vrot.slane %v5670_v19, 4  ;;  %v1245_v62 = vadd.f32 %v1227_v58, %v1169_v54  ;;  %v1246_v34 = vadd.f32 %v1228_v41, %v1170_v36 }
  0xd4   : > { %v5775_v35 = vsel %vm427_vm1, %v1343_v28, %v1352_v13  ;;  %v5779_v1 = vsel %vm427_vm1, %v1352_v13, %v1343_v28  ;;  %v5787_v9 = vsel %vm504_vm2, %v1419_v2, %v1428_v38  ;;  %v5791_v32 = vsel %vm504_vm2, %v1428_v38, %v1419_v2 }
  0xd5   : > { %v1386_v22 = vmul.f32 %v8419_v10, %v5775_v35  ;;  %v1387_v26 = vmul.f32 %v8419_v10, %v5779_v1  ;;  %8420 = vst [vmem:[#allocation32_spill] sm:$0xff] %v5791_v32  ;;  %v1328_v6 = vadd.f32 %v1310_v47, %v1245_v62  ;;  %v1329_v44 = vadd.f32 %v1311_v12, %v1246_v34 }
  0xd6   : > { %v1462_v28 = vmul.f32 %v8343_v17, %v5787_v9  ;;  %v1463_v54 = vmul.f32 %v8343_v17, %v5791_v32  ;;  %v5799_v36 = vsel %vm581_vm3, %v1495_v50, %v1504_v43  ;;  %v5803_v58 = vsel %vm581_vm3, %v1504_v43, %v1495_v50  ;;  %v8430_v17 = vld [vmem:[#allocation35_spill] sm:$0xff] }
  0xd7   : > { %8421 = vst [vmem:[#allocation33_spill] sm:$0xff] %v5799_v36  ;;  %8422 = vst [vmem:[#allocation36_spill] sm:$0xff] %v5803_v58  ;;  %v1580_v41 = vrot.slane %v5672_v46, 4  ;;  %v1647_v13 = vrot.slane %v5670_v19, 5  ;;  %v1404_v47 = vadd.f32 %v1386_v22, %v1328_v6  ;;  %v1405_v12 = vadd.f32 %v1387_v26, %v1329_v44 }
  0xd8   : > { %v1538_v2 = vmul.f32 %v8346_v61, %v5799_v36  ;;  %v1539_v38 = vmul.f32 %v8346_v61, %v5803_v58  ;;  %v1656_v43 = vrot.slane %v5672_v46, 5  ;;  %v1849_v61 = vmul.f32 %v5185_v8, %v8356_v37 }
  0xd9   : > { %v5813_v62 = vsel %vm658_vm4, %v1571_v40, %v1580_v41  ;;  %v5817_v50 = vsel %vm658_vm4, %v1580_v41, %v1571_v40  ;;  %v1480_v34 = vadd.f32 %v1462_v28, %v1404_v47  ;;  %v1481_v30 = vadd.f32 %v1463_v54, %v1405_v12  ;;  %v8427_v47 = vld [vmem:[#allocation28_spill] sm:$0xff] }
  0xda   : > { %8423 = vst [vmem:[#allocation37_spill] sm:$0xff] %v5813_v62  ;;  %8424 = vst [vmem:[#allocation38_spill] sm:$0xff] %v5817_v50  ;;  %v1614_v22 = vmul.f32 %v8349_v51, %v5813_v62  ;;  %v1615_v26 = vmul.f32 %v8349_v51, %v5817_v50  ;;  %v5826_v6 = vsel %vm735_vm5, %v1647_v13, %v1656_v43  ;;  %v8445_v50 = vld [vmem:[#allocation55_spill] sm:$0xff] }
  0xdb   : > { %8425 = vst [vmem:[#allocation39_spill] sm:$0xff] %v5826_v6  ;;  %v5830_v44 = vsel %vm735_vm5, %v1656_v43, %v1647_v13  ;;  %v1556_v40 = vadd.f32 %v1538_v2, %v1480_v34  ;;  %v1557_v41 = vadd.f32 %v1539_v38, %v1481_v30  ;;  %v1690_v28 = vmul.f32 %v8352_v39, %v5826_v6  ;;  %v8428_v38 = vld [vmem:[#allocation34_spill] sm:$0xff]  ;;  %v8429_v43 = vld [vmem:[#allocation85_spill] sm:$0xff]  ;;  %v8439_v6 = vld [vmem:[#allocation47_spill] sm:$0xff] }
  0xdc   : > { %8426 = vst [vmem:[#allocation43_spill] sm:$0xff] %v5830_v44  ;;  %v1691_v54 = vmul.f32 %v8352_v39, %v5830_v44  ;;  %v1773_v12 = vmul.f32 %v5161_v45, %v8427_v47  ;;  %v1774_v51 = vmul.f32 %v5163_v16, %v8427_v47  ;;  %v1850_v13 = vmul.f32 %v5189_v7, %v8356_v37  ;;  %v8431_v45 = vld [vmem:[#allocation87_spill] sm:$0xff]  ;;  %v8432_v47 = vld [vmem:[#allocation40_spill] sm:$0xff]  ;;  %v8436_v37 = vld [vmem:[#allocation94_spill] sm:$0xff] }
  0xdd   : > { %v1632_v30 = vadd.f32 %v1614_v22, %v1556_v40  ;;  %v1633_v2 = vadd.f32 %v1615_v26, %v1557_v41  ;;  %v1925_v34 = vmul.f32 %v8429_v43, %v8428_v38  ;;  %v1926_v39 = vmul.f32 %v5205_v63, %v8428_v38  ;;  %v8434_v40 = vld [vmem:[#allocation41_spill] sm:$0xff]  ;;  %v4066_v38 = vld [vmem:[%s4365_s15 + $0x40] sm:$0xff]   ;;  %v8446_v62 = vld [vmem:[#allocation27_spill] sm:$0xff] }
  0xde   : > { %v2001_v10 = vmul.f32 %v8431_v45, %v8430_v17  ;;  %v2002_v16 = vmul.f32 %v5223_v48, %v8430_v17  ;;  %v2077_v8 = vmul.f32 %v5227_v25, %v8432_v47  ;;  %v2078_v7 = vmul.f32 %v8433_v29, %v8432_v47  ;;  %v8435_v41 = vld [vmem:[#allocation93_spill] sm:$0xff]  ;;  %v8437_v44 = vld [vmem:[#allocation46_spill] sm:$0xff]  ;;  %v8438_v48 = vld [vmem:[#allocation20_spill] sm:$0xff] }
  0xdf   : > { %v1708_v22 = vadd.f32 %v1690_v28, %v1632_v30  ;;  %v1709_v26 = vadd.f32 %v1691_v54, %v1633_v2  ;;  %v2153_v43 = vmul.f32 %v8435_v41, %v8434_v40  ;;  %v2154_v63 = vmul.f32 %v8436_v37, %v8434_v40  ;;  %v8440_v25 = vld [vmem:[#allocation21_spill] sm:$0xff]  ;;  %v8441_v29 = vld [vmem:[#allocation26_spill] sm:$0xff]  ;;  %v8442_v2 = vld [vmem:[#allocation48_spill] sm:$0xff] }
  0xe0   : > { %v2236_v45 = vmul.f32 %v5481_v27, %v8437_v44  ;;  %v2237_v17 = vmul.f32 %v8438_v48, %v8437_v44  ;;  %v2312_v14 = vmul.f32 %v8440_v25, %v8439_v6  ;;  %v2313_v28 = vmul.f32 %v8441_v29, %v8439_v6  ;;  %v8443_v41 = vld [vmem:[#allocation76_spill] sm:$0xff]  ;;  %v8444_v37 = vld [vmem:[#allocation77_spill] sm:$0xff]  ;;  %v8456_v29 = vld [vmem:[#allocation3_spill] sm:$0xff] }
  0xe1   : > { %v1791_v54 = vadd.f32 %v1773_v12, %v1708_v22  ;;  %v1792_v30 = vadd.f32 %v1774_v51, %v1709_v26  ;;  %v2388_v47 = vmul.f32 %v8443_v41, %v8442_v2  ;;  %v2389_v40 = vmul.f32 %v8444_v37, %v8442_v2  ;;  %v8447_v44 = vld [vmem:[#allocation24_spill] sm:$0xff]  ;;  %v8451_v26 = vld [vmem:[#allocation30_spill] sm:$0xff] }
  0xe2   : > { %v5875_v27 = vmul.f32 %v8446_v62, %v8445_v50  ;;  %v5879_v48 = vmul.f32 %v8447_v44, %v8445_v50  ;;  %v8448_v25 = vld [vmem:[#allocation56_spill] sm:$0xff]  ;;  %v5885_v12 = vunpack.c.l.bf16 %v4066_v38  ;;  %v5891_v2 = vunpack.c.h.bf16 %v4066_v38  ;;  %v8453_v62 = vld [vmem:[#allocation61_spill] sm:$0xff]  ;;  %v8454_v37 = vld [vmem:[#allocation78_spill] sm:$0xff] }
  0xe3   : > { %v5883_v58 = vmul.f32 %v8449_v56, %v8448_v25  ;;  %v1867_v51 = vadd.f32 %v1849_v61, %v1791_v54  ;;  %v1868_v22 = vadd.f32 %v1850_v13, %v1792_v30  ;;  %v5889_v6 = vmul.f32 %v8451_v26, %v8448_v25  ;;  %v8455_v50 = vld [vmem:[#allocation31_spill] sm:$0xff] }
  0xe4   : > { %8450 = vst [vmem:[#allocation44_spill] sm:$0xff] %v5885_v12  ;;  %8452 = vst [vmem:[#allocation42_spill] sm:$0xff] %v5891_v2  ;;  %v5895_v41 = vmul.f32 %v8454_v37, %v8453_v62  ;;  %v5899_v44 = vmul.f32 %v8455_v50, %v8453_v62  ;;  %v2732_v56 = vrot.slane %v5885_v12, 1  ;;  %v379_v61 = vmul.f32 %v5666_v4, %v8456_v29  ;;  %v8458_v4 = vld [vmem:[#allocation62_spill] sm:$0xff] }
  0xe5   : > { %v1943_v13 = vadd.f32 %v1925_v34, %v1867_v51  ;;  %v1944_v54 = vadd.f32 %v1926_v39, %v1868_v22  ;;  %v2741_v30 = vrot.slane %v5891_v2, 1  ;;  %v2808_v38 = vrot.slane %v5885_v12, 2 }
  0xe6   : > { %v2817_v25 = vrot.slane %v5891_v2, 2  ;;  %v2884_v37 = vrot.slane %v5885_v12, 3  ;;  %v2893_v26 = vrot.slane %v5891_v2, 3  ;;  %v2960_v62 = vrot.slane %v5885_v12, 4 }
  0xe7   : > { %v2019_v50 = vadd.f32 %v2001_v10, %v1943_v13  ;;  %v2020_v36 = vadd.f32 %v2002_v16, %v1944_v54  ;;  %v5912_v3 = vsel %vm427_vm1, %v2732_v56, %v2741_v30  ;;  %v2969_v39 = vrot.slane %v5891_v2, 4  ;;  %v8461_v10 = vld [vmem:[#allocation63_spill] sm:$0xff] }
  0xe8   : > { %8457 = vst [vmem:[#allocation45_spill] sm:$0xff] %v5912_v3  ;;  %v5917_v34 = vmul.f32 %v5885_v12, %v8458_v4  ;;  %v5921_v51 = vmul.f32 %v5891_v2, %v8458_v4  ;;  %v5925_v22 = vsel %vm427_vm1, %v2741_v30, %v2732_v56  ;;  %v5929_v16 = vmul.f32 %v8461_v10, %v5912_v3  ;;  %v8464_v56 = vld [vmem:[#allocation68_spill] sm:$0xff] }
  0xe9   : > { %8460 = vst [vmem:[#allocation79_spill] sm:$0xff] %v5925_v22  ;;  %v2095_v13 = vadd.f32 %v2077_v8, %v2019_v50  ;;  %v2096_v54 = vadd.f32 %v2078_v7, %v2020_v36  ;;  %v5933_v32 = vsel %vm504_vm2, %v2808_v38, %v2817_v25  ;;  %v5941_v4 = vmul.f32 %v8461_v10, %v5925_v22  ;;  %v8468_v10 = vld [vmem:[#allocation69_spill] sm:$0xff]  ;;  %v8471_v22 = vld [vmem:[#allocation72_spill] sm:$0xff] }
  0xea   : > { %8459 = vst [vmem:[#allocation49_spill] sm:$0xff] %v5917_v34  ;;  %8462 = vst [vmem:[#allocation50_spill] sm:$0xff] %v5933_v32  ;;  %v5937_v34 = vsel %vm504_vm2, %v2817_v25, %v2808_v38  ;;  %v5945_v30 = vmul.f32 %v8464_v56, %v5933_v32  ;;  %v5953_v36 = vsel %vm581_vm3, %v2884_v37, %v2893_v26 }
  0xeb   : > { %8463 = vst [vmem:[#allocation51_spill] sm:$0xff] %v5937_v34  ;;  %v5949_v50 = vmul.f32 %v8464_v56, %v5937_v34  ;;  %8465 = vst [vmem:[#allocation52_spill] sm:$0xff] %v5953_v36  ;;  %v2171_v8 = vadd.f32 %v2153_v43, %v2095_v13  ;;  %v2172_v7 = vadd.f32 %v2154_v63, %v2096_v54  ;;  %v3036_v34 = vrot.slane %v5885_v12, 5 }
  0xec   : > { %v5957_v25 = vsel %vm581_vm3, %v2893_v26, %v2884_v37  ;;  %v5961_v38 = vsel %vm658_vm4, %v2960_v62, %v2969_v39  ;;  %v5965_v32 = vmul.f32 %v8468_v10, %v5953_v36  ;;  %v5969_v56 = vsel %vm658_vm4, %v2969_v39, %v2960_v62  ;;  %v8470_v26 = vld [vmem:[#allocation4_spill] sm:$0xff] }
  0xed   : > { %8466 = vst [vmem:[#allocation53_spill] sm:$0xff] %v5957_v25  ;;  %8467 = vst [vmem:[#allocation54_spill] sm:$0xff] %v5961_v38  ;;  %v3045_v43 = vrot.slane %v5891_v2, 5  ;;  %v2254_v63 = vadd.f32 %v2236_v45, %v2171_v8  ;;  %v2255_v13 = vadd.f32 %v2237_v17, %v2172_v7  ;;  %v380_v37 = vmul.f32 %v5668_v21, %v8456_v29 }
  0xee   : > { %8469 = vst [vmem:[#allocation57_spill] sm:$0xff] %v5969_v56  ;;  %v458_v54 = vmul.f32 %v5688_v31, %v8470_v26  ;;  %v5979_v36 = vmul.f32 %v8468_v10, %v5957_v25  ;;  %v5983_v62 = vmul.f32 %v8471_v22, %v5961_v38  ;;  %v459_v39 = vmul.f32 %v5692_v49, %v8470_v26 }
  0xef   : > { %v535_v17 = vmul.f32 %v5696_v11, %v8409_v59  ;;  %v2330_v45 = vadd.f32 %v2312_v14, %v2254_v63  ;;  %v2331_v8 = vadd.f32 %v2313_v28, %v2255_v13  ;;  %v5991_v21 = vmul.f32 %v8471_v22, %v5969_v56 }
  0xf0   : > { %v5995_v31 = vsel %vm735_vm5, %v3036_v34, %v3045_v43  ;;  %v476_v7 = vadd.f32 %v458_v54, %v379_v61  ;;  %v477_v10 = vadd.f32 %v459_v39, %v380_v37  ;;  %v536_v29 = vmul.f32 %v5700_v42, %v8409_v59 }
  0xf1   : > { %8472 = vst [vmem:[#allocation58_spill] sm:$0xff] %v5995_v31  ;;  %v612_v49 = vmul.f32 %v5718_v15, %v8410_v18  ;;  %v2406_v26 = vadd.f32 %v2388_v47, %v2330_v45  ;;  %v2407_v11 = vadd.f32 %v2389_v40, %v2331_v8  ;;  %v6003_v14 = vsel %vm735_vm5, %v3045_v43, %v3036_v34  ;;  %v8474_v47 = vld [vmem:[#allocation73_spill] sm:$0xff]  ;;  %v8475_v45 = vld [vmem:[#allocation32_spill] sm:$0xff] }
  0xf2   : > { %8473 = vst [vmem:[#allocation59_spill] sm:$0xff] %v6003_v14  ;;  %v613_v28 = vmul.f32 %v5722_v57, %v8410_v18  ;;  %v553_v63 = vadd.f32 %v535_v17, %v476_v7  ;;  %v554_v13 = vadd.f32 %v536_v29, %v477_v10  ;;  %v689_v61 = vmul.f32 %v5734_v24, %v8411_v55  ;;  %v4040_v17 = vld [vmem:[%s4365_s15 + $0x30] sm:$0xff]  }
  0xf3   : > { %v690_v42 = vmul.f32 %v5738_v53, %v8411_v55  ;;  %v2482_v37 = vadd.f32 %v5875_v27, %v2406_v26  ;;  %v2483_v15 = vadd.f32 %v5879_v48, %v2407_v11  ;;  %v6015_v40 = vmul.f32 %v8474_v47, %v5995_v31  ;;  %v8476_v11 = vld [vmem:[#allocation12_spill] sm:$0xff] }
  0xf4   : > { %v6019_v57 = vmul.f32 %v8474_v47, %v6003_v14  ;;  %v630_v29 = vadd.f32 %v612_v49, %v553_v63  ;;  %v631_v34 = vadd.f32 %v613_v28, %v554_v13  ;;  %v766_v24 = vmul.f32 %v5755_v5, %v8412_v52  ;;  %v8477_v28 = vld [vmem:[#allocation33_spill] sm:$0xff]  ;;  %v8478_v13 = vld [vmem:[#allocation36_spill] sm:$0xff] }
  0xf5   : > { %v767_v53 = vmul.f32 %v5759_v60, %v8412_v52  ;;  %v2558_v27 = vadd.f32 %v5883_v58, %v2482_v37  ;;  %v2559_v48 = vadd.f32 %v5889_v6, %v2483_v15  ;;  %v849_v10 = vmul.f32 %v5670_v19, %v8413_v20  ;;  %v8480_v15 = vld [vmem:[#allocation13_spill] sm:$0xff] }
  0xf6   : > { %v850_v43 = vmul.f32 %v5672_v46, %v8413_v20  ;;  %v707_v26 = vadd.f32 %v689_v61, %v630_v29  ;;  %v708_v54 = vadd.f32 %v690_v42, %v631_v34  ;;  %v925_v39 = vmul.f32 %v5775_v35, %v8414_v0  ;;  %v8479_v42 = vld [vmem:[#allocation49_spill] sm:$0xff]  ;;  %v8485_v20 = vld [vmem:[#allocation43_spill] sm:$0xff] }
  0xf7   : > { %v926_v5 = vmul.f32 %v5779_v1, %v8414_v0  ;;  %v2634_v60 = vadd.f32 %v5895_v41, %v2558_v27  ;;  %v2635_v58 = vadd.f32 %v5899_v44, %v2559_v48  ;;  %v1001_v6 = vmul.f32 %v5787_v9, %v8415_v33  ;;  %v8481_v44 = vld [vmem:[#allocation37_spill] sm:$0xff] }
  0xf8   : > { %v1002_v8 = vmul.f32 %v8475_v45, %v8415_v33  ;;  %v784_v7 = vadd.f32 %v766_v24, %v707_v26  ;;  %v785_v49 = vadd.f32 %v767_v53, %v708_v54  ;;  %v1077_v63 = vmul.f32 %v8477_v28, %v8476_v11  ;;  %v8482_v24 = vld [vmem:[#allocation38_spill] sm:$0xff] }
  0xf9   : > { %v1078_v61 = vmul.f32 %v8478_v13, %v8476_v11  ;;  %v2717_v37 = vadd.f32 %v8479_v42, %v2634_v60  ;;  %v2718_v41 = vadd.f32 %v5921_v51, %v2635_v58  ;;  %v1153_v29 = vmul.f32 %v8481_v44, %v8480_v15  ;;  %v8483_v33 = vld [vmem:[#allocation14_spill] sm:$0xff]  ;;  %v8484_v60 = vld [vmem:[#allocation39_spill] sm:$0xff] }
  0xfa   : > { %v6050_v34 = vunpack.c.l.bf16 %v4040_v17  ;;  %v867_v27 = vadd.f32 %v849_v10, %v784_v7  ;;  %v868_v48 = vadd.f32 %v850_v43, %v785_v49  ;;  %v1154_v53 = vmul.f32 %v8482_v24, %v8480_v15 }
  0xfb   : > { %v6054_v26 = vunpack.c.h.bf16 %v4040_v17  ;;  %v2793_v54 = vadd.f32 %v5929_v16, %v2717_v37  ;;  %v2794_v11 = vadd.f32 %v5941_v4, %v2718_v41  ;;  %v1229_v42 = vmul.f32 %v8484_v60, %v8483_v33  ;;  %v8486_v41 = vld [vmem:[#allocation15_spill] sm:$0xff] }
  0xfc   : > { %v1344_v51 = vrot.slane %v6050_v34, 1  ;;  %v943_v58 = vadd.f32 %v925_v39, %v867_v27  ;;  %v944_v0 = vadd.f32 %v926_v5, %v868_v48  ;;  %v1230_v10 = vmul.f32 %v8485_v20, %v8483_v33  ;;  %v8487_v39 = vld [vmem:[#allocation28_spill] sm:$0xff]  ;;  %v8488_v5 = vld [vmem:[#allocation19_spill] sm:$0xff] }
  0xfd   : > { %v1353_v43 = vrot.slane %v6054_v26, 1  ;;  %v2869_v7 = vadd.f32 %v5945_v30, %v2793_v54  ;;  %v2870_v17 = vadd.f32 %v5949_v50, %v2794_v11  ;;  %v1420_v16 = vrot.slane %v6050_v34, 2  ;;  %v8489_v11 = vld [vmem:[#allocation16_spill] sm:$0xff] }
  0xfe   : > { %v1429_v4 = vrot.slane %v6054_v26, 2  ;;  %v1019_v49 = vadd.f32 %v1001_v6, %v943_v58  ;;  %v1020_v37 = vadd.f32 %v1002_v8, %v944_v0  ;;  %v1312_v15 = vmul.f32 %v6050_v34, %v8486_v41 }
  0xff   : > { %v6072_v27 = vmul.f32 %v8488_v5, %v8487_v39  ;;  %v2945_v48 = vadd.f32 %v5965_v32, %v2869_v7  ;;  %v2946_v33 = vadd.f32 %v5979_v36, %v2870_v17  ;;  %v1313_v30 = vmul.f32 %v6054_v26, %v8486_v41  ;;  %v8507_v41 = vld [vmem:[#allocation23_spill] sm:$0xff] }
 0x100   : > { %v6080_v50 = vsel %vm427_vm1, %v1344_v51, %v1353_v43  ;;  %v1095_v6 = vadd.f32 %v1077_v63, %v1019_v49  ;;  %v1096_v0 = vadd.f32 %v1078_v61, %v1020_v37  ;;  %v6084_v8 = vsel %vm427_vm1, %v1353_v43, %v1344_v51 }
 0x101   : > { %v1388_v54 = vmul.f32 %v8489_v11, %v6080_v50  ;;  %v3021_v32 = vadd.f32 %v5983_v62, %v2945_v48  ;;  %v3022_v36 = vadd.f32 %v5991_v21, %v2946_v33  ;;  %v1389_v58 = vmul.f32 %v8489_v11, %v6084_v8 }
 0x102   : > { %v6094_v7 = vsel %vm504_vm2, %v1420_v16, %v1429_v4  ;;  %v1171_v63 = vadd.f32 %v1153_v29, %v1095_v6  ;;  %v1172_v61 = vadd.f32 %v1154_v53, %v1096_v0  ;;  %v1496_v17 = vrot.slane %v6050_v34, 3  ;;  %v8491_v29 = vld [vmem:[#allocation17_spill] sm:$0xff] }
 0x103   : > { %v1505_v51 = vrot.slane %v6054_v26, 3  ;;  %v3097_v43 = vadd.f32 %v6015_v40, %v3021_v32  ;;  %v3098_v49 = vadd.f32 %v6019_v57, %v3022_v36  ;;  %v1572_v62 = vrot.slane %v6050_v34, 4 }
 0x104   : > { %v1581_v33 = vrot.slane %v6054_v26, 4  ;;  %v1247_v21 = vadd.f32 %v1229_v42, %v1171_v63  ;;  %v1248_v37 = vadd.f32 %v1230_v10, %v1172_v61  ;;  %v6104_v5 = vsel %vm504_vm2, %v1429_v4, %v1420_v16  ;;  %v8494_v16 = vld [vmem:[#allocation18_spill] sm:$0xff] }
 0x105   : > { %8490 = vst [vmem:[#allocation60_spill] sm:$0xff] %v6104_v5  ;;  %v1464_v53 = vmul.f32 %v8491_v29, %v6094_v7  ;;  %v3112_v48 = vpack.c.bf16 %v3098_v49, %v3097_v43  ;;  %v1465_v6 = vmul.f32 %v8491_v29, %v6104_v5  ;;  %v6112_v40 = vsel %vm581_vm3, %v1496_v17, %v1505_v51  ;;  %v8506_v29 = vld [vmem:[#allocation76_spill] sm:$0xff]  ;;  %v8516_v5 = vld [vmem:[#allocation78_spill] sm:$0xff] }
 0x106   : > { %8492 = vst [vmem:[#allocation64_spill] sm:$0xff] %v6112_v40  ;;  %v6116_v57 = vsel %vm581_vm3, %v1505_v51, %v1496_v17  ;;  %v1330_v42 = vadd.f32 %v1312_v15, %v1247_v21  ;;  %v1331_v10 = vadd.f32 %v1313_v30, %v1248_v37  ;;  %v1540_v4 = vmul.f32 %v8494_v16, %v6112_v40  ;;  %v8498_v51 = vld [vmem:[#allocation22_spill] sm:$0xff]  ;;  %v8501_v37 = vld [vmem:[#allocation29_spill] sm:$0xff] }
 0x107   : > { %8493 = vst [vmem:[#allocation65_spill] sm:$0xff] %v6116_v57  ;;  %v1541_v0 = vmul.f32 %v8494_v16, %v6116_v57  ;;  %4135 = vmatmul.mubr.bf16.gmra.mxu0 %v3112_v48  ;;  %v6124_v32 = vsel %vm658_vm4, %v1572_v62, %v1581_v33  ;;  %v6128_v36 = vsel %vm658_vm4, %v1581_v33, %v1572_v62  ;;  %v1648_v63 = vrot.slane %v6050_v34, 5  ;;  %v8500_v62 = vld [vmem:[#allocation20_spill] sm:$0xff]  ;;  %v8502_v48 = vld [vmem:[#allocation21_spill] sm:$0xff] }
 0x108   : > { %8495 = vst [vmem:[#allocation66_spill] sm:$0xff] %v6124_v32  ;;  %8496 = vst [vmem:[#allocation67_spill] sm:$0xff] %v6128_v36  ;;  %v1657_v15 = vrot.slane %v6054_v26, 5  ;;  %v8497_v30 = vmov 0.0   ;;  %v1406_v61 = vadd.f32 %v1388_v54, %v1330_v42  ;;  %v1407_v17 = vadd.f32 %v1389_v58, %v1331_v10  ;;  %v8515_v40 = vld [vmem:[#allocation41_spill] sm:$0xff] }
 0x109   : > { %4138 = vmatprep.mubr.msk.bf16.mxu0 %vm4280_vm0, %v8497_v30  ;;  %v1616_v43 = vmul.f32 %v8498_v51, %v6124_v32  ;;  %v1617_v49 = vmul.f32 %v8498_v51, %v6128_v36  ;;  %v1776_v33 = vmul.f32 %v8500_v62, %v8487_v39  ;;  %v1851_v16 = vmul.f32 %v8502_v48, %v8501_v37  ;;  %v8503_v30 = vld [vmem:[#allocation26_spill] sm:$0xff]  ;;  %v8508_v48 = vld [vmem:[#allocation77_spill] sm:$0xff] }
 0x10a   : > { %v6140_v21 = vsel %vm735_vm5, %v1648_v63, %v1657_v15  ;;  %v1852_v54 = vmul.f32 %v8503_v30, %v8501_v37  ;;  %v1482_v58 = vadd.f32 %v1464_v53, %v1406_v61  ;;  %v1483_v42 = vadd.f32 %v1465_v6, %v1407_v17  ;;  %v8505_v51 = vld [vmem:[#allocation34_spill] sm:$0xff]  ;;  %v8509_v30 = vld [vmem:[#allocation35_spill] sm:$0xff]  ;;  %v8512_v37 = vld [vmem:[#allocation40_spill] sm:$0xff] }
 0x10b   : > { %8499 = vst [vmem:[#allocation70_spill] sm:$0xff] %v6140_v21  ;;  %v6150_v10 = vsel %vm735_vm5, %v1657_v15, %v1648_v63  ;;  %v1927_v11 = vmul.f32 %v8506_v29, %v8505_v51  ;;  %v1692_v36 = vmul.f32 %v8507_v41, %v6140_v21  ;;  %v1928_v39 = vmul.f32 %v8508_v48, %v8505_v51  ;;  %v8510_v53 = vld [vmem:[#allocation27_spill] sm:$0xff]  ;;  %v8511_v63 = vld [vmem:[#allocation24_spill] sm:$0xff]  ;;  %v8513_v29 = vld [vmem:[#allocation25_spill] sm:$0xff] }
 0x10c   : > { %8504 = vst [vmem:[#allocation71_spill] sm:$0xff] %v6150_v10  ;;  %v1693_v62 = vmul.f32 %v8507_v41, %v6150_v10  ;;  %v2003_v6 = vmul.f32 %v8510_v53, %v8509_v30  ;;  %v1558_v61 = vadd.f32 %v1540_v4, %v1482_v58  ;;  %v1559_v17 = vadd.f32 %v1541_v0, %v1483_v42  ;;  %v8514_v21 = vld [vmem:[#allocation30_spill] sm:$0xff]  ;;  %v8517_v10 = vld [vmem:[#allocation31_spill] sm:$0xff] }
 0x10d   : > { %v2004_v15 = vmul.f32 %v8511_v63, %v8509_v30  ;;  %v2079_v32 = vmul.f32 %v8513_v29, %v8512_v37  ;;  %v2080_v57 = vmul.f32 %v8514_v21, %v8512_v37  ;;  %v2155_v41 = vmul.f32 %v8516_v5, %v8515_v40  ;;  %v8518_v51 = vld [vmem:[#allocation46_spill] sm:$0xff]  ;;  %v8519_v42 = vld [vmem:[#allocation47_spill] sm:$0xff] }
 0x10e   : > { %v2156_v48 = vmul.f32 %v8517_v10, %v8515_v40  ;;  %v6174_v53 = vmul.f32 %v5885_v12, %v8518_v51  ;;  %v1634_v4 = vadd.f32 %v1616_v43, %v1558_v61  ;;  %v1635_v0 = vadd.f32 %v1617_v49, %v1559_v17  ;;  %v4067_v21 = vld [vmem:[%s4365_s15 + $0x48] sm:$0xff]   ;;  %v8521_v10 = vld [vmem:[#allocation48_spill] sm:$0xff]  ;;  %v8522_v40 = vld [vmem:[#allocation50_spill] sm:$0xff] }
 0x10f   : > { %v6178_v58 = vmul.f32 %v5891_v2, %v8518_v51  ;;  %v6182_v63 = vmul.f32 %v5912_v3, %v8519_v42  ;;  %v8520_v5 = vld [vmem:[#allocation79_spill] sm:$0xff]  ;;  %v6191_v37 = vmul.f32 %v8522_v40, %v8521_v10  ;;  %v8525_v17 = vld [vmem:[#allocation52_spill] sm:$0xff] }
 0x110   : > { %v6187_v29 = vmul.f32 %v8520_v5, %v8519_v42  ;;  %v8523_v43 = vld [vmem:[#allocation51_spill] sm:$0xff]  ;;  %v1710_v30 = vadd.f32 %v1692_v36, %v1634_v4  ;;  %v1711_v3 = vadd.f32 %v1693_v62, %v1635_v0  ;;  %v8526_v42 = vld [vmem:[#allocation56_spill] sm:$0xff]  ;;  %v6219_v36 = vunpack.c.h.bf16 %v4067_v21 }
 0x111   : > { %v6195_v49 = vmul.f32 %v8523_v43, %v8521_v10  ;;  %v8524_v61 = vld [vmem:[#allocation55_spill] sm:$0xff]  ;;  %v6207_v5 = vmul.f32 %v5961_v38, %v8526_v42  ;;  %v6211_v40 = vmul.f32 %v5969_v56, %v8526_v42  ;;  %v8527_v10 = vld [vmem:[#allocation61_spill] sm:$0xff] }
 0x112   : > { %v6199_v51 = vmul.f32 %v8525_v17, %v8524_v61  ;;  %v6203_v2 = vmul.f32 %v5957_v25, %v8524_v61  ;;  %v6215_v43 = vmul.f32 %v5995_v31, %v8527_v10  ;;  %v6217_v17 = vunpack.c.l.bf16 %v4067_v21  ;;  %8529 = vst [vmem:[#allocation80_spill] sm:$0xff] %v6219_v36  ;;  %v8531_v61 = vld [vmem:[#allocation3_spill] sm:$0xff]  ;;  %v8532_v25 = vld [vmem:[#allocation4_spill] sm:$0xff] }
 0x113   : > { %v1793_v62 = vadd.f32 %v6072_v27, %v1710_v30  ;;  %v1794_v4 = vadd.f32 %v1776_v33, %v1711_v3  ;;  %v6224_v0 = vmul.f32 %v6003_v14, %v8527_v10  ;;  %v381_v38 = vmul.f32 %v5670_v19, %v8531_v61  ;;  %v8533_v30 = vld [vmem:[#allocation62_spill] sm:$0xff] }
 0x114   : > { %8528 = vst [vmem:[#allocation74_spill] sm:$0xff] %v6217_v17  ;;  %v2733_v42 = vrot.slane %v6217_v17, 1  ;;  %v2742_v56 = vrot.slane %v6219_v36, 1  ;;  %v382_v31 = vmul.f32 %v5672_v46, %v8531_v61  ;;  %v460_v21 = vmul.f32 %v5775_v35, %v8532_v25 }
 0x115   : > { %8530 = vst [vmem:[#allocation81_spill] sm:$0xff] %v6224_v0  ;;  %v1869_v12 = vadd.f32 %v1851_v16, %v1793_v62  ;;  %v1870_v27 = vadd.f32 %v1852_v54, %v1794_v4  ;;  %v2809_v3 = vrot.slane %v6217_v17, 2  ;;  %v2818_v33 = vrot.slane %v6219_v36, 2  ;;  %v8536_v62 = vld [vmem:[#allocation63_spill] sm:$0xff] }
 0x116   : > { %v6238_v10 = vmul.f32 %v6217_v17, %v8533_v30  ;;  %v2885_v19 = vrot.slane %v6217_v17, 3  ;;  %v2894_v14 = vrot.slane %v6219_v36, 3  ;;  %v461_v46 = vmul.f32 %v5779_v1, %v8532_v25 }
 0x117   : > { %v1945_v61 = vadd.f32 %v1927_v11, %v1869_v12  ;;  %v1946_v0 = vadd.f32 %v1928_v39, %v1870_v27  ;;  %v6246_v35 = vsel %vm427_vm1, %v2733_v42, %v2742_v56  ;;  %v6250_v16 = vsel %vm427_vm1, %v2742_v56, %v2733_v42  ;;  %v8540_v27 = vld [vmem:[#allocation68_spill] sm:$0xff] }
 0x118   : > { %8534 = vst [vmem:[#allocation75_spill] sm:$0xff] %v6246_v35  ;;  %8535 = vst [vmem:[#allocation82_spill] sm:$0xff] %v6250_v16  ;;  %v6254_v54 = vmul.f32 %v6219_v36, %v8533_v30  ;;  %v6258_v4 = vmul.f32 %v8536_v62, %v6246_v35  ;;  %v6262_v1 = vmul.f32 %v8536_v62, %v6250_v16  ;;  %v2961_v25 = vrot.slane %v6217_v17, 4 }
 0x119   : > { %v6266_v12 = vsel %vm504_vm2, %v2809_v3, %v2818_v33  ;;  %v2021_v39 = vadd.f32 %v2003_v6, %v1945_v61  ;;  %v2022_v11 = vadd.f32 %v2004_v15, %v1946_v0  ;;  %v6270_v56 = vsel %vm504_vm2, %v2818_v33, %v2809_v3 }
 0x11a   : > { %8537 = vst [vmem:[#allocation83_spill] sm:$0xff] %v6266_v12  ;;  %8538 = vst [vmem:[#allocation84_spill] sm:$0xff] %v6270_v56  ;;  %v6274_v42 = vsel %vm581_vm3, %v2885_v19, %v2894_v14  ;;  %v6278_v30 = vmul.f32 %v8540_v27, %v6266_v12  ;;  %v6282_v62 = vsel %vm581_vm3, %v2894_v14, %v2885_v19  ;;  %v2970_v6 = vrot.slane %v6219_v36, 4  ;;  %v8543_v12 = vld [vmem:[#allocation69_spill] sm:$0xff] }
 0x11b   : > { %8539 = vst [vmem:[#allocation86_spill] sm:$0xff] %v6274_v42  ;;  %8542 = vst [vmem:[#allocation90_spill] sm:$0xff] %v6282_v62  ;;  %v2097_v15 = vadd.f32 %v2079_v32, %v2021_v39  ;;  %v2098_v61 = vadd.f32 %v2080_v57, %v2022_v11  ;;  %v3037_v0 = vrot.slane %v6217_v17, 5  ;;  %v3046_v3 = vrot.slane %v6219_v36, 5 }
 0x11c   : > { %8541 = vst [vmem:[#allocation89_spill] sm:$0xff] %v6278_v30  ;;  %v6290_v33 = vmul.f32 %v8540_v27, %v6270_v56  ;;  %v6294_v16 = vmul.f32 %v8543_v12, %v6274_v42  ;;  %v478_v14 = vadd.f32 %v460_v21, %v381_v38  ;;  %v479_v19 = vadd.f32 %v461_v46, %v382_v31 }
 0x11d   : > { %v2173_v35 = vadd.f32 %v2155_v41, %v2097_v15  ;;  %v2174_v30 = vadd.f32 %v2156_v48, %v2098_v61  ;;  %v6298_v32 = vmul.f32 %v8543_v12, %v6282_v62  ;;  %v6302_v57 = vsel %vm658_vm4, %v2961_v25, %v2970_v6 }
 0x11e   : > { %8544 = vst [vmem:[#allocation2_spill] sm:$0xff] %v6302_v57  ;;  %v6306_v39 = vsel %vm658_vm4, %v2970_v6, %v2961_v25  ;;  %v6310_v11 = vmul.f32 %v8471_v22, %v6302_v57  ;;  %v537_v38 = vmul.f32 %v5787_v9, %v8409_v59  ;;  %v538_v31 = vmul.f32 %v8475_v45, %v8409_v59 }
 0x11f   : > { %8545 = vst [vmem:[#allocation91_spill] sm:$0xff] %v6306_v39  ;;  %v2256_v41 = vadd.f32 %v6174_v53, %v2173_v35  ;;  %v2257_v48 = vadd.f32 %v6178_v58, %v2174_v30  ;;  %v6320_v21 = vmul.f32 %v8471_v22, %v6306_v39  ;;  %v6324_v25 = vsel %vm735_vm5, %v3037_v0, %v3046_v3 }
 0x120   : > { %8546 = vst [vmem:[#allocation92_spill] sm:$0xff] %v6324_v25  ;;  %v555_v46 = vadd.f32 %v537_v38, %v478_v14  ;;  %v556_v6 = vadd.f32 %v538_v31, %v479_v19  ;;  %v614_v9 = vmul.f32 %v8477_v28, %v8410_v18  ;;  %v615_v45 = vmul.f32 %v8478_v13, %v8410_v18  ;;  %v8548_v38 = vld [vmem:[#allocation9_spill] sm:$0xff] }
 0x121   : > { %v2332_v53 = vadd.f32 %v6182_v63, %v2256_v41  ;;  %v2333_v58 = vadd.f32 %v6187_v29, %v2257_v48  ;;  %v691_v30 = vmul.f32 %v8481_v44, %v8411_v55  ;;  %v692_v35 = vmul.f32 %v8482_v24, %v8411_v55 }
 0x122   : > { %v632_v15 = vadd.f32 %v614_v9, %v555_v46  ;;  %v633_v61 = vadd.f32 %v615_v45, %v556_v6  ;;  %v768_v14 = vmul.f32 %v8484_v60, %v8412_v52  ;;  %v769_v28 = vmul.f32 %v8485_v20, %v8412_v52  ;;  %v8550_v6 = vld [vmem:[#allocation11_spill] sm:$0xff]  ;;  %v4041_v45 = vld [vmem:[%s4365_s15 + $0x38] sm:$0xff]  }
 0x123   : > { %v2408_v13 = vadd.f32 %v6191_v37, %v2332_v53  ;;  %v2409_v63 = vadd.f32 %v6195_v49, %v2333_v58  ;;  %v6344_v29 = vsel %vm735_vm5, %v3046_v3, %v3037_v0  ;;  %v6348_v44 = vmul.f32 %v8474_v47, %v6324_v25  ;;  %v8549_v3 = vld [vmem:[#allocation10_spill] sm:$0xff]  ;;  %v8551_v53 = vld [vmem:[#allocation60_spill] sm:$0xff] }
 0x124   : > { %8547 = vst [vmem:[#allocation95_spill] sm:$0xff] %v6344_v29  ;;  %v709_v24 = vadd.f32 %v691_v30, %v632_v15  ;;  %v710_v19 = vadd.f32 %v692_v35, %v633_v61  ;;  %v851_v60 = vmul.f32 %v6050_v34, %v8548_v38  ;;  %v852_v20 = vmul.f32 %v6054_v26, %v8548_v38  ;;  %v8552_v30 = vld [vmem:[#allocation12_spill] sm:$0xff]  ;;  %v8558_v38 = vld [vmem:[#allocation67_spill] sm:$0xff] }
 0x125   : > { %v2484_v37 = vadd.f32 %v6199_v51, %v2408_v13  ;;  %v2485_v49 = vadd.f32 %v6203_v2, %v2409_v63  ;;  %v6358_v0 = vmul.f32 %v8474_v47, %v6344_v29  ;;  %v927_v31 = vmul.f32 %v6080_v50, %v8549_v3  ;;  %v8553_v35 = vld [vmem:[#allocation64_spill] sm:$0xff]  ;;  %v8555_v63 = vld [vmem:[#allocation13_spill] sm:$0xff] }
 0x126   : > { %v786_v41 = vadd.f32 %v768_v14, %v709_v24  ;;  %v787_v48 = vadd.f32 %v769_v28, %v710_v19  ;;  %v928_v46 = vmul.f32 %v6084_v8, %v8549_v3  ;;  %v1003_v9 = vmul.f32 %v6094_v7, %v8550_v6  ;;  %v8554_v28 = vld [vmem:[#allocation65_spill] sm:$0xff]  ;;  %v8556_v24 = vld [vmem:[#allocation66_spill] sm:$0xff] }
 0x127   : > { %v2560_v51 = vadd.f32 %v6207_v5, %v2484_v37  ;;  %v2561_v2 = vadd.f32 %v6211_v40, %v2485_v49  ;;  %v1004_v58 = vmul.f32 %v8551_v53, %v8550_v6  ;;  %v1079_v15 = vmul.f32 %v8553_v35, %v8552_v30  ;;  %v8557_v47 = vld [vmem:[#allocation81_spill] sm:$0xff] }
 0x128   : > { %v869_v61 = vadd.f32 %v851_v60, %v786_v41  ;;  %v870_v14 = vadd.f32 %v852_v20, %v787_v48  ;;  %v1080_v13 = vmul.f32 %v8554_v28, %v8552_v30  ;;  %v1155_v19 = vmul.f32 %v8556_v24, %v8555_v63  ;;  %v8559_v20 = vld [vmem:[#allocation14_spill] sm:$0xff] }
 0x129   : > { %v2636_v3 = vadd.f32 %v6215_v43, %v2560_v51  ;;  %v2637_v5 = vadd.f32 %v8557_v47, %v2561_v2  ;;  %v6379_v37 = vunpack.c.l.bf16 %v4041_v45  ;;  %v6381_v40 = vunpack.c.h.bf16 %v4041_v45  ;;  %v8560_v41 = vld [vmem:[#allocation70_spill] sm:$0xff]  ;;  %v8561_v43 = vld [vmem:[#allocation71_spill] sm:$0xff] }
 0x12a   : > { %v945_v49 = vadd.f32 %v927_v31, %v869_v61  ;;  %v946_v6 = vadd.f32 %v928_v46, %v870_v14  ;;  %v1156_v60 = vmul.f32 %v8558_v38, %v8555_v63  ;;  %v1231_v48 = vmul.f32 %v8560_v41, %v8559_v20  ;;  %v8562_v47 = vld [vmem:[#allocation15_spill] sm:$0xff]  ;;  %v8593_v63 = vld [vmem:[#allocation46_spill] sm:$0xff] }
 0x12b   : > { %v2719_v30 = vadd.f32 %v6238_v10, %v2636_v3  ;;  %v2720_v52 = vadd.f32 %v6254_v54, %v2637_v5  ;;  %v1232_v51 = vmul.f32 %v8561_v43, %v8559_v20  ;;  %v1314_v2 = vmul.f32 %v6379_v37, %v8562_v47 }
 0x12c   : > { %v1021_v45 = vadd.f32 %v1003_v9, %v945_v49  ;;  %v1022_v24 = vadd.f32 %v1004_v58, %v946_v6  ;;  %v1345_v31 = vrot.slane %v6379_v37, 1  ;;  %v1354_v46 = vrot.slane %v6381_v40, 1  ;;  %v8563_v9 = vld [vmem:[#allocation89_spill] sm:$0xff] }
 0x12d   : > { %v2795_v61 = vadd.f32 %v6258_v4, %v2719_v30  ;;  %v2796_v14 = vadd.f32 %v6262_v1, %v2720_v52  ;;  %v1421_v10 = vrot.slane %v6379_v37, 2  ;;  %v1430_v54 = vrot.slane %v6381_v40, 2  ;;  %v8564_v4 = vld [vmem:[#allocation16_spill] sm:$0xff] }
 0x12e   : > { %v1097_v3 = vadd.f32 %v1079_v15, %v1021_v45  ;;  %v1098_v5 = vadd.f32 %v1080_v13, %v1022_v24  ;;  %v1315_v20 = vmul.f32 %v6381_v40, %v8562_v47  ;;  %v6403_v6 = vsel %vm427_vm1, %v1345_v31, %v1354_v46 }
 0x12f   : > { %v2871_v58 = vadd.f32 %v8563_v9, %v2795_v61  ;;  %v2872_v49 = vadd.f32 %v6290_v33, %v2796_v14  ;;  %v6409_v52 = vsel %vm427_vm1, %v1354_v46, %v1345_v31  ;;  %v1390_v1 = vmul.f32 %v8564_v4, %v6403_v6  ;;  %v8565_v46 = vld [vmem:[#allocation17_spill] sm:$0xff] }
 0x130   : > { %v1173_v30 = vadd.f32 %v1155_v19, %v1097_v3  ;;  %v1174_v15 = vadd.f32 %v1156_v60, %v1098_v5  ;;  %v1391_v13 = vmul.f32 %v8564_v4, %v6409_v52  ;;  %v6417_v24 = vsel %vm504_vm2, %v1421_v10, %v1430_v54  ;;  %v8585_v4 = vld [vmem:[#allocation52_spill] sm:$0xff] }
 0x131   : > { %v2947_v45 = vadd.f32 %v6294_v16, %v2871_v58  ;;  %v2948_v33 = vadd.f32 %v6298_v32, %v2872_v49  ;;  %v6423_v31 = vsel %vm504_vm2, %v1430_v54, %v1421_v10  ;;  %v1466_v61 = vmul.f32 %v8565_v46, %v6417_v24 }
 0x132   : > { %v1249_v19 = vadd.f32 %v1231_v48, %v1173_v30  ;;  %v1250_v60 = vadd.f32 %v1232_v51, %v1174_v15  ;;  %v1497_v14 = vrot.slane %v6379_v37, 3  ;;  %v1506_v3 = vrot.slane %v6381_v40, 3 }
 0x133   : > { %v3023_v5 = vadd.f32 %v6310_v11, %v2947_v45  ;;  %v3024_v9 = vadd.f32 %v6320_v21, %v2948_v33  ;;  %v1573_v16 = vrot.slane %v6379_v37, 4  ;;  %v1582_v32 = vrot.slane %v6381_v40, 4  ;;  %v8567_v21 = vld [vmem:[#allocation18_spill] sm:$0xff] }
 0x134   : > { %v1332_v58 = vadd.f32 %v1314_v2, %v1249_v19  ;;  %v1333_v10 = vadd.f32 %v1315_v20, %v1250_v60  ;;  %v1467_v54 = vmul.f32 %v8565_v46, %v6423_v31  ;;  %v6437_v48 = vsel %vm581_vm3, %v1497_v14, %v1506_v3  ;;  %v8584_v46 = vld [vmem:[#allocation35_spill] sm:$0xff] }
 0x135   : > { %v3099_v51 = vadd.f32 %v6348_v44, %v3023_v5  ;;  %v3100_v49 = vadd.f32 %v6358_v0, %v3024_v9  ;;  %v6443_v11 = vsel %vm581_vm3, %v1506_v3, %v1497_v14  ;;  %v1542_v30 = vmul.f32 %v8567_v21, %v6437_v48  ;;  %v8570_v0 = vld [vmem:[#allocation22_spill] sm:$0xff]  ;;  %v8571_v5 = vld [vmem:[#allocation28_spill] sm:$0xff] }
 0x136   : > { %8566 = vst [vmem:[#allocation96_spill] sm:$0xff] %v6443_v11  ;;  %v1408_v2 = vadd.f32 %v1390_v1, %v1332_v58  ;;  %v1409_v20 = vadd.f32 %v1391_v13, %v1333_v10  ;;  %v1543_v15 = vmul.f32 %v8567_v21, %v6443_v11  ;;  %v6451_v45 = vsel %vm658_vm4, %v1573_v16, %v1582_v32  ;;  %v8572_v9 = vld [vmem:[#allocation44_spill] sm:$0xff]  ;;  %v8573_v10 = vld [vmem:[#allocation42_spill] sm:$0xff] }
 0x137   : > { %8568 = vst [vmem:[#allocation5_spill] sm:$0xff] %v6451_v45  ;;  %v3113_v33 = vpack.c.bf16 %v3100_v49, %v3099_v51  ;;  %v6455_v44 = vsel %vm658_vm4, %v1582_v32, %v1573_v16  ;;  %v1618_v19 = vmul.f32 %v8570_v0, %v6451_v45  ;;  %v1649_v60 = vrot.slane %v6379_v37, 5  ;;  %v8582_v21 = vld [vmem:[#allocation50_spill] sm:$0xff]  ;;  %v8589_v45 = vld [vmem:[#allocation57_spill] sm:$0xff] }
 0x138   : > { %8569 = vst [vmem:[#allocation6_spill] sm:$0xff] %v6455_v44  ;;  %v1484_v14 = vadd.f32 %v1466_v61, %v1408_v2  ;;  %v1485_v1 = vadd.f32 %v1467_v54, %v1409_v20  ;;  %v1619_v13 = vmul.f32 %v8570_v0, %v6455_v44  ;;  %v1658_v3 = vrot.slane %v6381_v40, 5  ;;  %v8577_v2 = vld [vmem:[#allocation23_spill] sm:$0xff]  ;;  %v8588_v44 = vld [vmem:[#allocation54_spill] sm:$0xff] }
 0x139   : > { %4139 = vmatmul.mubr.bf16.gmra.mxu0 %v3113_v33  ;;  %v1777_v58 = vmul.f32 %v8572_v9, %v8571_v5  ;;  %v1778_v16 = vmul.f32 %v8573_v10, %v8571_v5  ;;  %v8574_v32 = vmov 0.0   ;;  %v8578_v9 = vld [vmem:[#allocation29_spill] sm:$0xff]  ;;  %v2005_v47 = vmul.f32 %v8585_v4, %v8584_v46 }
 0x13a   : > { %4142 = vmatprep.mubr.msk.bf16.mxu0 %vm4280_vm0, %v8574_v32  ;;  %v1560_v51 = vadd.f32 %v1542_v30, %v1484_v14  ;;  %v1561_v49 = vadd.f32 %v1543_v15, %v1485_v1  ;;  %v6471_v61 = vsel %vm735_vm5, %v1649_v60, %v1658_v3  ;;  %v6475_v54 = vsel %vm735_vm5, %v1658_v3, %v1649_v60  ;;  %v8579_v10 = vld [vmem:[#allocation45_spill] sm:$0xff]  ;;  %v8580_v30 = vld [vmem:[#allocation79_spill] sm:$0xff]  ;;  %v8581_v32 = vld [vmem:[#allocation34_spill] sm:$0xff] }
 0x13b   : > { %8575 = vst [vmem:[#allocation85_spill] sm:$0xff] %v6471_v61  ;;  %8576 = vst [vmem:[#allocation87_spill] sm:$0xff] %v6475_v54  ;;  %v1694_v20 = vmul.f32 %v8577_v2, %v6471_v61  ;;  %v1695_v33 = vmul.f32 %v8577_v2, %v6475_v54  ;;  %v1853_v0 = vmul.f32 %v8579_v10, %v8578_v9  ;;  %v8583_v60 = vld [vmem:[#allocation51_spill] sm:$0xff]  ;;  %v8586_v61 = vld [vmem:[#allocation53_spill] sm:$0xff] }
 0x13c   : > { %v1854_v15 = vmul.f32 %v8580_v30, %v8578_v9  ;;  %v1636_v14 = vadd.f32 %v1618_v19, %v1560_v51  ;;  %v1637_v1 = vadd.f32 %v1619_v13, %v1561_v49  ;;  %v1929_v5 = vmul.f32 %v8582_v21, %v8581_v32  ;;  %v8587_v54 = vld [vmem:[#allocation40_spill] sm:$0xff]  ;;  %v8590_v51 = vld [vmem:[#allocation41_spill] sm:$0xff]  ;;  %v8591_v49 = vld [vmem:[#allocation58_spill] sm:$0xff] }
 0x13d   : > { %v1930_v3 = vmul.f32 %v8583_v60, %v8581_v32  ;;  %v2006_v2 = vmul.f32 %v8586_v61, %v8584_v46  ;;  %v2081_v10 = vmul.f32 %v8588_v44, %v8587_v54  ;;  %v2082_v30 = vmul.f32 %v8589_v45, %v8587_v54  ;;  %v8592_v9 = vld [vmem:[#allocation59_spill] sm:$0xff]  ;;  %v4068_v32 = vld [vmem:[%s4365_s15 + $0x50] sm:$0xff]   ;;  %v8596_v45 = vld [vmem:[#allocation82_spill] sm:$0xff] }
 0x13e   : > { %v1712_v19 = vadd.f32 %v1694_v20, %v1636_v14  ;;  %v1713_v13 = vadd.f32 %v1695_v33, %v1637_v1  ;;  %v2157_v21 = vmul.f32 %v8591_v49, %v8590_v51  ;;  %v2158_v60 = vmul.f32 %v8592_v9, %v8590_v51  ;;  %v8594_v46 = vld [vmem:[#allocation47_spill] sm:$0xff]  ;;  %v8597_v1 = vld [vmem:[#allocation48_spill] sm:$0xff] }
 0x13f   : > { %v2240_v4 = vmul.f32 %v6217_v17, %v8593_v63  ;;  %v2241_v61 = vmul.f32 %v6219_v36, %v8593_v63  ;;  %v8595_v44 = vld [vmem:[#allocation75_spill] sm:$0xff]  ;;  %v2317_v20 = vmul.f32 %v8596_v45, %v8594_v46  ;;  %v2393_v9 = vmul.f32 %v6270_v56, %v8597_v1 }
 0x140   : > { %v2316_v11 = vmul.f32 %v8595_v44, %v8594_v46  ;;  %v1795_v33 = vadd.f32 %v1777_v58, %v1712_v19  ;;  %v1796_v14 = vadd.f32 %v1778_v16, %v1713_v13  ;;  %v8598_v49 = vld [vmem:[#allocation83_spill] sm:$0xff]  ;;  %v6522_v44 = vunpack.c.l.bf16 %v4068_v32  ;;  %v8602_v19 = vld [vmem:[#allocation56_spill] sm:$0xff]  ;;  %v8603_v46 = vld [vmem:[#allocation61_spill] sm:$0xff] }
 0x141   : > { %v2392_v54 = vmul.f32 %v8598_v49, %v8597_v1  ;;  %v8599_v51 = vld [vmem:[#allocation55_spill] sm:$0xff]  ;;  %v6524_v36 = vunpack.c.h.bf16 %v4068_v32  ;;  %v6528_v13 = vmul.f32 %v6302_v57, %v8602_v19  ;;  %v6532_v1 = vmul.f32 %v6306_v39, %v8602_v19 }
 0x142   : > { %v6516_v17 = vmul.f32 %v6274_v42, %v8599_v51  ;;  %v6520_v63 = vmul.f32 %v6282_v62, %v8599_v51  ;;  %8600 = vst [vmem:[#allocation88_spill] sm:$0xff] %v6522_v44  ;;  %v1871_v58 = vadd.f32 %v1853_v0, %v1795_v33  ;;  %v1872_v16 = vadd.f32 %v1854_v15, %v1796_v14 }
 0x143   : > { %8601 = vst [vmem:[#allocation93_spill] sm:$0xff] %v6524_v36  ;;  %v6536_v42 = vmul.f32 %v6324_v25, %v8603_v46  ;;  %v6540_v51 = vmul.f32 %v6344_v29, %v8603_v46  ;;  %v2734_v32 = vrot.slane %v6522_v44, 1  ;;  %v2743_v0 = vrot.slane %v6524_v36, 1  ;;  %v8604_v25 = vld [vmem:[#allocation3_spill] sm:$0xff] }
 0x144   : > { %v1947_v15 = vadd.f32 %v1929_v5, %v1871_v58  ;;  %v1948_v33 = vadd.f32 %v1930_v3, %v1872_v16  ;;  %v2810_v14 = vrot.slane %v6522_v44, 2  ;;  %v2819_v57 = vrot.slane %v6524_v36, 2  ;;  %v8606_v3 = vld [vmem:[#allocation4_spill] sm:$0xff]  ;;  %v8607_v16 = vld [vmem:[#allocation62_spill] sm:$0xff] }
 0x145   : > { %v2886_v19 = vrot.slane %v6522_v44, 3  ;;  %v2895_v39 = vrot.slane %v6524_v36, 3  ;;  %v383_v62 = vmul.f32 %v6050_v34, %v8604_v25  ;;  %v384_v46 = vmul.f32 %v6054_v26, %v8604_v25  ;;  %v8609_v26 = vld [vmem:[#allocation63_spill] sm:$0xff] }
 0x146   : > { %v2023_v29 = vadd.f32 %v2005_v47, %v1947_v15  ;;  %v2024_v56 = vadd.f32 %v2006_v2, %v1948_v33  ;;  %v6554_v5 = vsel %vm427_vm1, %v2734_v32, %v2743_v0  ;;  %v462_v58 = vmul.f32 %v6080_v50, %v8606_v3 }
 0x147   : > { %8605 = vst [vmem:[#allocation94_spill] sm:$0xff] %v6554_v5  ;;  %v6560_v49 = vmul.f32 %v6522_v44, %v8607_v16  ;;  %v6564_v45 = vmul.f32 %v6524_v36, %v8607_v16  ;;  %v6568_v34 = vsel %vm427_vm1, %v2743_v0, %v2734_v32  ;;  %v6572_v47 = vmul.f32 %v8609_v26, %v6554_v5 }
 0x148   : > { %8608 = vst [vmem:[#allocation72_spill] sm:$0xff] %v6568_v34  ;;  %v2099_v2 = vadd.f32 %v2081_v10, %v2023_v29  ;;  %v2100_v15 = vadd.f32 %v2082_v30, %v2024_v56  ;;  %v6576_v50 = vmul.f32 %v8609_v26, %v6568_v34  ;;  %v6580_v33 = vsel %vm504_vm2, %v2810_v14, %v2819_v57 }
 0x149   : > { %8610 = vst [vmem:[#allocation32_spill] sm:$0xff] %v6580_v33  ;;  %v6584_v16 = vsel %vm504_vm2, %v2819_v57, %v2810_v14  ;;  %v6588_v32 = vsel %vm581_vm3, %v2886_v19, %v2895_v39  ;;  %v2962_v0 = vrot.slane %v6522_v44, 4  ;;  %v2971_v56 = vrot.slane %v6524_v36, 4 }
 0x14a   : > { %8611 = vst [vmem:[#allocation33_spill] sm:$0xff] %v6584_v16  ;;  %8612 = vst [vmem:[#allocation36_spill] sm:$0xff] %v6588_v32  ;;  %v2175_v29 = vadd.f32 %v2157_v21, %v2099_v2  ;;  %v2176_v10 = vadd.f32 %v2158_v60, %v2100_v15  ;;  %v6594_v30 = vmul.f32 %v8540_v27, %v6580_v33 }
 0x14b   : > { %v6598_v26 = vsel %vm581_vm3, %v2895_v39, %v2886_v19  ;;  %v6602_v57 = vmul.f32 %v8540_v27, %v6584_v16  ;;  %v6606_v14 = vmul.f32 %v8543_v12, %v6588_v32  ;;  %v463_v21 = vmul.f32 %v6084_v8, %v8606_v3 }
 0x14c   : > { %8613 = vst [vmem:[#allocation49_spill] sm:$0xff] %v6598_v26  ;;  %v480_v60 = vadd.f32 %v462_v58, %v383_v62  ;;  %v2258_v2 = vadd.f32 %v2240_v4, %v2175_v29  ;;  %v2259_v15 = vadd.f32 %v2241_v61, %v2176_v10  ;;  %v6612_v25 = vmul.f32 %v8543_v12, %v6598_v26 }
 0x14d   : > { %v3038_v39 = vrot.slane %v6522_v44, 5  ;;  %v6617_v19 = vsel %vm658_vm4, %v2962_v0, %v2971_v56  ;;  %v3047_v27 = vrot.slane %v6524_v36, 5  ;;  %v481_v32 = vadd.f32 %v463_v21, %v384_v46 }
 0x14e   : > { %8614 = vst [vmem:[#allocation37_spill] sm:$0xff] %v6617_v19  ;;  %v539_v16 = vmul.f32 %v6094_v7, %v8409_v59  ;;  %v2334_v8 = vadd.f32 %v2316_v11, %v2258_v2  ;;  %v2335_v62 = vadd.f32 %v2317_v20, %v2259_v15  ;;  %v6624_v4 = vsel %vm658_vm4, %v2971_v56, %v2962_v0  ;;  %v8616_v56 = vld [vmem:[#allocation66_spill] sm:$0xff] }
 0x14f   : > { %8615 = vst [vmem:[#allocation38_spill] sm:$0xff] %v6624_v4  ;;  %v6628_v61 = vmul.f32 %v8471_v22, %v6617_v19  ;;  %v540_v58 = vmul.f32 %v8551_v53, %v8409_v59  ;;  %v616_v46 = vmul.f32 %v8553_v35, %v8410_v18  ;;  %v617_v7 = vmul.f32 %v8554_v28, %v8410_v18 }
 0x150   : > { %v557_v29 = vadd.f32 %v539_v16, %v480_v60  ;;  %v2410_v11 = vadd.f32 %v2392_v54, %v2334_v8  ;;  %v2411_v20 = vadd.f32 %v2393_v9, %v2335_v62  ;;  %v6638_v0 = vmul.f32 %v8471_v22, %v6624_v4  ;;  %v8617_v16 = vld [vmem:[#allocation8_spill] sm:$0xff]  ;;  %v8620_v8 = vld [vmem:[#allocation9_spill] sm:$0xff] }
 0x151   : > { %v693_v10 = vmul.f32 %v8616_v56, %v8411_v55  ;;  %v558_v21 = vadd.f32 %v540_v58, %v481_v32  ;;  %v694_v53 = vmul.f32 %v8558_v38, %v8411_v55  ;;  %v770_v35 = vmul.f32 %v8560_v41, %v8617_v16  ;;  %v8621_v62 = vld [vmem:[#allocation73_spill] sm:$0xff]  ;;  %v8623_v56 = vld [vmem:[#allocation11_spill] sm:$0xff] }
 0x152   : > { %v634_v2 = vadd.f32 %v616_v46, %v557_v29  ;;  %v2486_v60 = vadd.f32 %v6516_v17, %v2410_v11  ;;  %v2487_v28 = vadd.f32 %v6520_v63, %v2411_v20  ;;  %v6650_v54 = vsel %vm735_vm5, %v3038_v39, %v3047_v27  ;;  %v4042_v11 = vld [vmem:[%s4365_s15 + $0x40] sm:$0xff]  }
 0x153   : > { %8618 = vst [vmem:[#allocation39_spill] sm:$0xff] %v6650_v54  ;;  %v6654_v9 = vsel %vm735_vm5, %v3047_v27, %v3038_v39  ;;  %v635_v32 = vadd.f32 %v617_v7, %v558_v21  ;;  %v771_v38 = vmul.f32 %v8561_v43, %v8617_v16  ;;  %v853_v41 = vmul.f32 %v6379_v37, %v8620_v8  ;;  %v8622_v7 = vld [vmem:[#allocation10_spill] sm:$0xff] }
 0x154   : > { %8619 = vst [vmem:[#allocation43_spill] sm:$0xff] %v6654_v9  ;;  %v711_v15 = vadd.f32 %v693_v10, %v634_v2  ;;  %v2562_v17 = vadd.f32 %v6528_v13, %v2486_v60  ;;  %v2563_v63 = vadd.f32 %v6532_v1, %v2487_v28  ;;  %v3083_v58 = vmul.f32 %v8621_v62, %v6650_v54 }
 0x155   : > { %v3084_v29 = vmul.f32 %v8621_v62, %v6654_v9  ;;  %v712_v27 = vadd.f32 %v694_v53, %v635_v32  ;;  %v854_v46 = vmul.f32 %v6381_v40, %v8620_v8  ;;  %v929_v43 = vmul.f32 %v6403_v6, %v8622_v7 }
 0x156   : > { %v788_v39 = vadd.f32 %v770_v35, %v711_v15  ;;  %v2638_v20 = vadd.f32 %v6536_v42, %v2562_v17  ;;  %v2639_v13 = vadd.f32 %v6540_v51, %v2563_v63  ;;  %v930_v1 = vmul.f32 %v6409_v52, %v8622_v7  ;;  %v8624_v35 = vld [vmem:[#allocation12_spill] sm:$0xff] }
 0x157   : > { %v1005_v10 = vmul.f32 %v6417_v24, %v8623_v56  ;;  %v789_v21 = vadd.f32 %v771_v38, %v712_v27  ;;  %v1006_v53 = vmul.f32 %v6423_v31, %v8623_v56  ;;  %v1081_v60 = vmul.f32 %v6437_v48, %v8624_v35  ;;  %v8625_v63 = vld [vmem:[#allocation96_spill] sm:$0xff]  ;;  %v8627_v27 = vld [vmem:[#allocation5_spill] sm:$0xff] }
 0x158   : > { %v871_v2 = vadd.f32 %v853_v41, %v788_v39  ;;  %v2721_v28 = vadd.f32 %v6560_v49, %v2638_v20  ;;  %v2722_v42 = vadd.f32 %v6564_v45, %v2639_v13  ;;  %v6683_v32 = vunpack.c.l.bf16 %v4042_v11  ;;  %v8626_v41 = vld [vmem:[#allocation13_spill] sm:$0xff]  ;;  %v8628_v49 = vld [vmem:[#allocation6_spill] sm:$0xff] }
 0x159   : > { %v6685_v51 = vunpack.c.h.bf16 %v4042_v11  ;;  %v872_v15 = vadd.f32 %v854_v46, %v789_v21  ;;  %v1082_v38 = vmul.f32 %v8625_v63, %v8624_v35  ;;  %v1157_v39 = vmul.f32 %v8627_v27, %v8626_v41  ;;  %v8629_v45 = vld [vmem:[#allocation14_spill] sm:$0xff]  ;;  %v8630_v13 = vld [vmem:[#allocation85_spill] sm:$0xff] }
 0x15a   : > { %v947_v17 = vadd.f32 %v929_v43, %v871_v2  ;;  %v2797_v56 = vadd.f32 %v6572_v47, %v2721_v28  ;;  %v2798_v7 = vadd.f32 %v6576_v50, %v2722_v42  ;;  %v1158_v20 = vmul.f32 %v8628_v49, %v8626_v41  ;;  %v8631_v41 = vld [vmem:[#allocation87_spill] sm:$0xff] }
 0x15b   : > { %v1233_v8 = vmul.f32 %v8630_v13, %v8629_v45  ;;  %v948_v11 = vadd.f32 %v930_v1, %v872_v15  ;;  %v1346_v46 = vrot.slane %v6683_v32, 1  ;;  %v1355_v43 = vrot.slane %v6685_v51, 1  ;;  %v8632_v13 = vld [vmem:[#allocation15_spill] sm:$0xff] }
 0x15c   : > { %v1023_v62 = vadd.f32 %v1005_v10, %v947_v17  ;;  %v2873_v21 = vadd.f32 %v6594_v30, %v2797_v56  ;;  %v2874_v2 = vadd.f32 %v6602_v57, %v2798_v7  ;;  %v1422_v47 = vrot.slane %v6683_v32, 2 }
 0x15d   : > { %v1431_v50 = vrot.slane %v6685_v51, 2  ;;  %v1024_v28 = vadd.f32 %v1006_v53, %v948_v11  ;;  %v1234_v35 = vmul.f32 %v8631_v41, %v8629_v45  ;;  %v1316_v1 = vmul.f32 %v6683_v32, %v8632_v13  ;;  %v8634_v53 = vld [vmem:[#allocation16_spill] sm:$0xff] }
 0x15e   : > { %v1099_v42 = vadd.f32 %v1081_v60, %v1023_v62  ;;  %v2949_v10 = vadd.f32 %v6606_v14, %v2873_v21  ;;  %v2950_v15 = vadd.f32 %v6612_v25, %v2874_v2  ;;  %v1317_v30 = vmul.f32 %v6685_v51, %v8632_v13  ;;  %v8652_v13 = vld [vmem:[#allocation82_spill] sm:$0xff] }
 0x15f   : > { %v6713_v57 = vsel %vm427_vm1, %v1346_v46, %v1355_v43  ;;  %v1100_v7 = vadd.f32 %v1082_v38, %v1024_v28  ;;  %v6717_v62 = vsel %vm427_vm1, %v1355_v43, %v1346_v46  ;;  %v6727_v11 = vsel %vm504_vm2, %v1422_v47, %v1431_v50 }
 0x160   : > { %v1175_v56 = vadd.f32 %v1157_v39, %v1099_v42  ;;  %8633 = vst [vmem:[#allocation19_spill] sm:$0xff] %v6717_v62  ;;  %v1392_v60 = vmul.f32 %v8634_v53, %v6713_v57  ;;  %v3025_v14 = vadd.f32 %v6628_v61, %v2949_v10  ;;  %v3026_v25 = vadd.f32 %v6638_v0, %v2950_v15  ;;  %v8637_v15 = vld [vmem:[#allocation17_spill] sm:$0xff] }
 0x161   : > { %v1393_v17 = vmul.f32 %v8634_v53, %v6717_v62  ;;  %8635 = vst [vmem:[#allocation20_spill] sm:$0xff] %v6727_v11  ;;  %v1176_v38 = vadd.f32 %v1158_v20, %v1100_v7  ;;  %v1498_v21 = vrot.slane %v6683_v32, 3  ;;  %v1507_v46 = vrot.slane %v6685_v51, 3  ;;  %v8649_v53 = vld [vmem:[#allocation29_spill] sm:$0xff]  ;;  %v8663_v62 = vld [vmem:[#allocation92_spill] sm:$0xff] }
 0x162   : > { %v1251_v39 = vadd.f32 %v1233_v8, %v1175_v56  ;;  %v3101_v43 = vadd.f32 %v3083_v58, %v3025_v14  ;;  %v3102_v2 = vadd.f32 %v3084_v29, %v3026_v25  ;;  %v1574_v28 = vrot.slane %v6683_v32, 4  ;;  %v8639_v29 = vld [vmem:[#allocation28_spill] sm:$0xff]  ;;  %v8640_v56 = vld [vmem:[#allocation74_spill] sm:$0xff] }
 0x163   : > { %v1583_v61 = vrot.slane %v6685_v51, 4  ;;  %v1252_v0 = vadd.f32 %v1234_v35, %v1176_v38  ;;  %v6735_v10 = vsel %vm504_vm2, %v1431_v50, %v1422_v47  ;;  %v1468_v20 = vmul.f32 %v8637_v15, %v6727_v11  ;;  %v8642_v50 = vld [vmem:[#allocation18_spill] sm:$0xff]  ;;  %v8662_v11 = vld [vmem:[#allocation41_spill] sm:$0xff] }
 0x164   : > { %v1334_v42 = vadd.f32 %v1316_v1, %v1251_v39  ;;  %8636 = vst [vmem:[#allocation21_spill] sm:$0xff] %v6735_v10  ;;  %v3114_v8 = vpack.c.bf16 %v3102_v2, %v3101_v43  ;;  %v1469_v7 = vmul.f32 %v8637_v15, %v6735_v10  ;;  %v6743_v58 = vsel %vm581_vm3, %v1498_v21, %v1507_v46  ;;  %v8661_v10 = vld [vmem:[#allocation91_spill] sm:$0xff] }
 0x165   : > { %8638 = vst [vmem:[#allocation26_spill] sm:$0xff] %v6743_v58  ;;  %v1779_v14 = vmul.f32 %v8640_v56, %v8639_v29  ;;  %v1335_v35 = vadd.f32 %v1317_v30, %v1252_v0  ;;  %v6749_v47 = vsel %vm581_vm3, %v1507_v46, %v1498_v21  ;;  %v1544_v25 = vmul.f32 %v8642_v50, %v6743_v58  ;;  %v8646_v0 = vld [vmem:[#allocation22_spill] sm:$0xff]  ;;  %v8659_v58 = vld [vmem:[#allocation40_spill] sm:$0xff] }
 0x166   : > { %v1410_v1 = vadd.f32 %v1392_v60, %v1334_v42  ;;  %8641 = vst [vmem:[#allocation76_spill] sm:$0xff] %v6749_v47  ;;  %4143 = vmatmul.mubr.bf16.gmra.mxu0 %v3114_v8  ;;  %v1545_v38 = vmul.f32 %v8642_v50, %v6749_v47  ;;  %v6757_v39 = vsel %vm658_vm4, %v1574_v28, %v1583_v61  ;;  %v1650_v43 = vrot.slane %v6683_v32, 5  ;;  %v8648_v50 = vld [vmem:[#allocation80_spill] sm:$0xff] }
 0x167   : > { %8643 = vst [vmem:[#allocation77_spill] sm:$0xff] %v6757_v39  ;;  %v1659_v30 = vrot.slane %v6685_v51, 5  ;;  %v8644_v60 = vmov 0.0   ;;  %v1411_v21 = vadd.f32 %v1393_v17, %v1335_v35  ;;  %v6765_v2 = vsel %vm658_vm4, %v1583_v61, %v1574_v28  ;;  %v8650_v17 = vld [vmem:[#allocation75_spill] sm:$0xff] }
 0x168   : > { %4146 = vmatprep.mubr.msk.bf16.mxu0 %vm4280_vm0, %v8644_v60  ;;  %v1486_v46 = vadd.f32 %v1468_v20, %v1410_v1  ;;  %8645 = vst [vmem:[#allocation27_spill] sm:$0xff] %v6765_v2  ;;  %v1620_v42 = vmul.f32 %v8646_v0, %v6757_v39  ;;  %v1621_v8 = vmul.f32 %v8646_v0, %v6765_v2  ;;  %v8651_v61 = vld [vmem:[#allocation23_spill] sm:$0xff]  ;;  %v8653_v2 = vld [vmem:[#allocation34_spill] sm:$0xff] }
 0x169   : > { %v6773_v56 = vsel %vm735_vm5, %v1650_v43, %v1659_v30  ;;  %v1780_v15 = vmul.f32 %v8648_v50, %v8639_v29  ;;  %v1855_v20 = vmul.f32 %v8650_v17, %v8649_v53  ;;  %v1487_v35 = vadd.f32 %v1469_v7, %v1411_v21  ;;  %v8654_v39 = vld [vmem:[#allocation83_spill] sm:$0xff]  ;;  %v8655_v50 = vld [vmem:[#allocation84_spill] sm:$0xff]  ;;  %v8657_v7 = vld [vmem:[#allocation86_spill] sm:$0xff] }
 0x16a   : > { %8647 = vst [vmem:[#allocation24_spill] sm:$0xff] %v6773_v56  ;;  %v1562_v28 = vadd.f32 %v1544_v25, %v1486_v46  ;;  %v1696_v1 = vmul.f32 %v8651_v61, %v6773_v56  ;;  %v1856_v45 = vmul.f32 %v8652_v13, %v8649_v53  ;;  %v6785_v0 = vsel %vm735_vm5, %v1659_v30, %v1650_v43  ;;  %v8656_v17 = vld [vmem:[#allocation35_spill] sm:$0xff]  ;;  %v8658_v13 = vld [vmem:[#allocation90_spill] sm:$0xff] }
 0x16b   : > { %v1931_v47 = vmul.f32 %v8654_v39, %v8653_v2  ;;  %v1932_v29 = vmul.f32 %v8655_v50, %v8653_v2  ;;  %v2007_v21 = vmul.f32 %v8657_v7, %v8656_v17  ;;  %v1563_v25 = vadd.f32 %v1545_v38, %v1487_v35  ;;  %v8660_v43 = vld [vmem:[#allocation2_spill] sm:$0xff]  ;;  %v8664_v2 = vld [vmem:[#allocation95_spill] sm:$0xff]  ;;  %v4069_v38 = vld [vmem:[%s4365_s15 + $0x58] sm:$0xff]  }
 0x16c   : > { %v1638_v46 = vadd.f32 %v1620_v42, %v1562_v28  ;;  %v1697_v56 = vmul.f32 %v8651_v61, %v6785_v0  ;;  %v2008_v53 = vmul.f32 %v8658_v13, %v8656_v17  ;;  %v2083_v30 = vmul.f32 %v8660_v43, %v8659_v58  ;;  %v8665_v28 = vld [vmem:[#allocation46_spill] sm:$0xff]  ;;  %v8666_v43 = vld [vmem:[#allocation47_spill] sm:$0xff] }
 0x16d   : > { %v2084_v39 = vmul.f32 %v8661_v10, %v8659_v58  ;;  %v2159_v50 = vmul.f32 %v8663_v62, %v8662_v11  ;;  %v6805_v7 = vmul.f32 %v8664_v2, %v8662_v11  ;;  %v1639_v42 = vadd.f32 %v1621_v8, %v1563_v25  ;;  %v8667_v2 = vld [vmem:[#allocation48_spill] sm:$0xff] }
 0x16e   : > { %v1714_v35 = vadd.f32 %v1696_v1, %v1638_v46  ;;  %v6810_v61 = vmul.f32 %v6522_v44, %v8665_v28  ;;  %v6814_v13 = vmul.f32 %v6524_v36, %v8665_v28  ;;  %v6818_v10 = vmul.f32 %v6554_v5, %v8666_v43  ;;  %v8668_v1 = vld [vmem:[#allocation33_spill] sm:$0xff]  ;;  %v8669_v28 = vld [vmem:[#allocation55_spill] sm:$0xff]  ;;  %v8670_v58 = vld [vmem:[#allocation36_spill] sm:$0xff] }
 0x16f   : > { %v6822_v62 = vmul.f32 %v6568_v34, %v8666_v43  ;;  %v6826_v8 = vmul.f32 %v6580_v33, %v8667_v2  ;;  %v6830_v25 = vmul.f32 %v8668_v1, %v8667_v2  ;;  %v1715_v46 = vadd.f32 %v1697_v56, %v1639_v42  ;;  %v8671_v34 = vld [vmem:[#allocation56_spill] sm:$0xff] }
 0x170   : > { %v1797_v11 = vadd.f32 %v1779_v14, %v1714_v35  ;;  %v6834_v17 = vmul.f32 %v8670_v58, %v8669_v28  ;;  %v6836_v5 = vunpack.c.l.bf16 %v4069_v38  ;;  %v6840_v43 = vmul.f32 %v6598_v26, %v8669_v28  ;;  %v8672_v35 = vld [vmem:[#allocation61_spill] sm:$0xff] }
 0x171   : > { %v6844_v33 = vmul.f32 %v6617_v19, %v8671_v34  ;;  %v6848_v2 = vmul.f32 %v6624_v4, %v8671_v34  ;;  %v6850_v56 = vunpack.c.h.bf16 %v4069_v38  ;;  %v1798_v14 = vadd.f32 %v1780_v15, %v1715_v46  ;;  %v8673_v15 = vld [vmem:[#allocation3_spill] sm:$0xff]  ;;  %v8674_v46 = vld [vmem:[#allocation62_spill] sm:$0xff] }
 0x172   : > { %v1873_v42 = vadd.f32 %v1855_v20, %v1797_v11  ;;  %v6854_v58 = vmul.f32 %v6650_v54, %v8672_v35  ;;  %v2735_v1 = vrot.slane %v6836_v5, 1  ;;  %v6859_v28 = vmul.f32 %v6654_v9, %v8672_v35 }
 0x173   : > { %v2744_v19 = vrot.slane %v6850_v56, 1  ;;  %v2811_v26 = vrot.slane %v6836_v5, 2  ;;  %v2820_v34 = vrot.slane %v6850_v56, 2  ;;  %v1874_v38 = vadd.f32 %v1856_v45, %v1798_v14 }
 0x174   : > { %v1949_v4 = vadd.f32 %v1931_v47, %v1873_v42  ;;  %v385_v11 = vmul.f32 %v6379_v37, %v8673_v15  ;;  %v386_v20 = vmul.f32 %v6381_v40, %v8673_v15  ;;  %v6870_v54 = vmul.f32 %v6836_v5, %v8674_v46  ;;  %v4247_v37 = vld [vmem:[%s7676_s5 + $0x38] sm:$0xff]   ;;  %v6882_v47 = vpop.f32.mrf.mxu0 }
 0x175   : > { %v6874_v35 = vmul.f32 %v6850_v56, %v8674_v46  ;;  %v2887_v9 = vrot.slane %v6836_v5, 3  ;;  %v464_v45 = vmul.f32 %v6403_v6, %v8606_v3  ;;  %8675 = vst [vmem:[#allocation25_spill] sm:$0xff] %v6882_v47  ;;  %v1950_v40 = vadd.f32 %v1932_v29, %v1874_v38  ;;  %v8678_v6 = vld [vmem:[#allocation63_spill] sm:$0xff]  ;;  %4159 = vmatpush3.bf16.msra.mxu1 %v4247_v37  ;;  %v4248_v29 = vld [vmem:[%s7676_s5 + $0x30] sm:$0xff]  }
 0x176   : > { %v2025_v14 = vadd.f32 %v2007_v21, %v1949_v4  ;;  %v6886_v42 = vsel %vm427_vm1, %v2735_v1, %v2744_v19  ;;  %v2896_v46 = vrot.slane %v6850_v56, 3  ;;  %v6891_v15 = vsel %vm427_vm1, %v2744_v19, %v2735_v1  ;;  %v4124_v21 = vpop.f32.mrf.mxu0  ;;  %v8681_v47 = vld [vmem:[#allocation68_spill] sm:$0xff]  ;;  %4160 = vmatprep.subr.bf16.mxu1 %v8644_v60 }
 0x177   : > { %8676 = vst [vmem:[#allocation30_spill] sm:$0xff] %v6886_v42  ;;  %8677 = vst [vmem:[#allocation78_spill] sm:$0xff] %v6891_v15  ;;  %v6895_v36 = vmul.f32 %v8678_v6, %v6886_v42  ;;  %v6899_v44 = vsel %vm504_vm2, %v2811_v26, %v2820_v34  ;;  %v6903_v4 = vsel %vm504_vm2, %v2820_v34, %v2811_v26  ;;  %v2963_v34 = vrot.slane %v6836_v5, 4 }
 0x178   : > { %8679 = vst [vmem:[#allocation31_spill] sm:$0xff] %v6899_v44  ;;  %8680 = vst [vmem:[#allocation60_spill] sm:$0xff] %v6903_v4  ;;  %v2026_v19 = vadd.f32 %v2008_v53, %v1950_v40  ;;  %v2101_v1 = vadd.f32 %v2083_v30, %v2025_v14  ;;  %v6910_v38 = vmul.f32 %v8678_v6, %v6891_v15  ;;  %v2972_v26 = vrot.slane %v6850_v56, 4  ;;  %v6921_v53 = vpop.f32.mrf.mxu0 }
 0x179   : > { %v6914_v42 = vmul.f32 %v8681_v47, %v6899_v44  ;;  %v3039_v37 = vrot.slane %v6836_v5, 5  ;;  %v3048_v21 = vrot.slane %v6850_v56, 5  ;;  %8682 = vst [vmem:[#allocation64_spill] sm:$0xff] %v6921_v53  ;;  %v6925_v14 = vsel %vm581_vm3, %v2887_v9, %v2896_v46  ;;  %4161 = vmatpush3.bf16.msra.mxu1 %v4248_v29 }
 0x17a   : > { %v2102_v30 = vadd.f32 %v2084_v39, %v2026_v19  ;;  %v2177_v40 = vadd.f32 %v2159_v50, %v2101_v1  ;;  %8683 = vst [vmem:[#allocation65_spill] sm:$0xff] %v6925_v14  ;;  %v465_v6 = vmul.f32 %v6409_v52, %v8606_v3  ;;  %v6931_v44 = vmul.f32 %v8681_v47, %v6903_v4  ;;  %v4249_v50 = vld [vmem:[%s7676_s5 + $0x28] sm:$0xff]   ;;  %v4125_v19 = vpop.f32.mrf.mxu0 }
 0x17b   : > { %v6935_v15 = vsel %vm581_vm3, %v2896_v46, %v2887_v9  ;;  %v6939_v53 = vmul.f32 %v8543_v12, %v6925_v14  ;;  %v482_v39 = vadd.f32 %v464_v45, %v385_v11  ;;  %v6952_v9 = vsel %vm658_vm4, %v2963_v34, %v2972_v26  ;;  %4162 = vmatprep.subr.bf16.mxu1 %v8644_v60 }
 0x17c   : > { %8684 = vst [vmem:[#allocation81_spill] sm:$0xff] %v6935_v15  ;;  %v2178_v52 = vadd.f32 %v6805_v7, %v2102_v30  ;;  %v2260_v1 = vadd.f32 %v6810_v61, %v2177_v40  ;;  %v6948_v47 = vmul.f32 %v8543_v12, %v6935_v15  ;;  %8685 = vst [vmem:[#allocation67_spill] sm:$0xff] %v6952_v9  ;;  %v6965_v45 = vpop.f32.mrf.mxu0 }
 0x17d   : > { %v6957_v11 = vsel %vm658_vm4, %v2972_v26, %v2963_v34  ;;  %v6961_v46 = vsel %vm735_vm5, %v3039_v37, %v3048_v21  ;;  %v483_v7 = vadd.f32 %v465_v6, %v386_v20  ;;  %v541_v61 = vmul.f32 %v6417_v24, %v8409_v59  ;;  %8688 = vst [vmem:[#allocation89_spill] sm:$0xff] %v6965_v45 }
 0x17e   : > { %8686 = vst [vmem:[#allocation70_spill] sm:$0xff] %v6957_v11  ;;  %8687 = vst [vmem:[#allocation71_spill] sm:$0xff] %v6961_v46  ;;  %v2261_v29 = vadd.f32 %v6814_v13, %v2178_v52  ;;  %v2336_v30 = vadd.f32 %v6818_v10, %v2260_v1  ;;  %v542_v40 = vmul.f32 %v6423_v31, %v8409_v59  ;;  %4163 = vmatpush3.bf16.msra.mxu1 %v4249_v50  ;;  %v4250_v13 = vld [vmem:[%s7676_s5 + $0x20] sm:$0xff]   ;;  %v4128_v31 = vpop.f32.mrf.mxu0 }
 0x17f   : > { %v618_v34 = vmul.f32 %v6437_v48, %v8410_v18  ;;  %v6975_v26 = vsel %vm735_vm5, %v3048_v21, %v3039_v37  ;;  %v559_v20 = vadd.f32 %v541_v61, %v482_v39  ;;  %v619_v24 = vmul.f32 %v8625_v63, %v8410_v18  ;;  %4164 = vmatprep.subr.bf16.mxu1 %v8644_v60  ;;  %v8690_v39 = vld [vmem:[#allocation85_spill] sm:$0xff] }
 0x180   : > { %8689 = vst [vmem:[#allocation44_spill] sm:$0xff] %v6975_v26  ;;  %v695_v6 = vmul.f32 %v8627_v27, %v8411_v55  ;;  %v2337_v10 = vadd.f32 %v6822_v62, %v2261_v29  ;;  %v2412_v48 = vadd.f32 %v6826_v8, %v2336_v30  ;;  %v560_v19 = vadd.f32 %v542_v40, %v483_v7  ;;  %v6999_v50 = vpop.f32.mrf.mxu0  ;;  %v8692_v7 = vld [vmem:[#allocation73_spill] sm:$0xff] }
 0x181   : > { %v696_v37 = vmul.f32 %v8628_v49, %v8411_v55  ;;  %v6991_v63 = vmul.f32 %v8471_v22, %v6952_v9  ;;  %v6995_v27 = vmul.f32 %v8471_v22, %v6957_v11  ;;  %v636_v21 = vadd.f32 %v618_v34, %v559_v20  ;;  %8691 = vst [vmem:[#allocation42_spill] sm:$0xff] %v6999_v50  ;;  %v8693_v40 = vld [vmem:[#allocation9_spill] sm:$0xff]  ;;  %v8699_v50 = vld [vmem:[#allocation12_spill] sm:$0xff] }
 0x182   : > { %v772_v62 = vmul.f32 %v8690_v39, %v8617_v16  ;;  %v2413_v8 = vadd.f32 %v6830_v25, %v2337_v10  ;;  %v2488_v49 = vadd.f32 %v6834_v17, %v2412_v48  ;;  %v637_v52 = vadd.f32 %v619_v24, %v560_v19  ;;  %4165 = vmatpush3.bf16.msra.mxu1 %v4250_v13  ;;  %v4251_v17 = vld [vmem:[%s7676_s5 + $0x18] sm:$0xff]   ;;  %v4129_v25 = vpop.f32.mrf.mxu0  ;;  %v4043_v10 = vld [vmem:[%s4365_s15 + $0x48] sm:$0xff]   ;;  %v8694_v48 = vld [vmem:[#allocation10_spill] sm:$0xff] }
 0x183   : > { %v773_v1 = vmul.f32 %v8631_v41, %v8617_v16  ;;  %v7007_v61 = vmul.f32 %v8692_v7, %v6961_v46  ;;  %v7011_v29 = vmul.f32 %v8692_v7, %v6975_v26  ;;  %v713_v30 = vadd.f32 %v695_v6, %v636_v21  ;;  %4166 = vmatprep.subr.bf16.mxu1 %v8644_v60  ;;  %v8695_v19 = vld [vmem:[#allocation19_spill] sm:$0xff]  ;;  %v8697_v25 = vld [vmem:[#allocation20_spill] sm:$0xff] }
 0x184   : > { %v855_v34 = vmul.f32 %v6683_v32, %v8693_v40  ;;  %v2489_v41 = vadd.f32 %v6840_v43, %v2413_v8  ;;  %v2564_v20 = vadd.f32 %v6844_v33, %v2488_v49  ;;  %v714_v24 = vadd.f32 %v696_v37, %v637_v52  ;;  %v8696_v39 = vld [vmem:[#allocation11_spill] sm:$0xff]  ;;  %v8698_v8 = vld [vmem:[#allocation21_spill] sm:$0xff] }
 0x185   : > { %v856_v31 = vmul.f32 %v6685_v51, %v8693_v40  ;;  %v790_v6 = vadd.f32 %v772_v62, %v713_v30  ;;  %v931_v13 = vmul.f32 %v6713_v57, %v8694_v48  ;;  %v932_v21 = vmul.f32 %v8695_v19, %v8694_v48  ;;  %v8700_v62 = vld [vmem:[#allocation26_spill] sm:$0xff]  ;;  %v4252_v48 = vld [vmem:[%s7676_s5 + $0x10] sm:$0xff]  }
 0x186   : > { %v1007_v45 = vmul.f32 %v8697_v25, %v8696_v39  ;;  %v2565_v43 = vadd.f32 %v6848_v2, %v2489_v41  ;;  %v2640_v33 = vadd.f32 %v6854_v58, %v2564_v20  ;;  %v791_v37 = vadd.f32 %v773_v1, %v714_v24  ;;  %4167 = vmatpush3.bf16.msra.mxu1 %v4251_v17  ;;  %v8701_v41 = vld [vmem:[#allocation76_spill] sm:$0xff]  ;;  %v8702_v24 = vld [vmem:[#allocation13_spill] sm:$0xff]  ;;  %v8704_v17 = vld [vmem:[#allocation27_spill] sm:$0xff] }
 0x187   : > { %v1008_v49 = vmul.f32 %v8698_v8, %v8696_v39  ;;  %v873_v52 = vadd.f32 %v855_v34, %v790_v6  ;;  %v1083_v30 = vmul.f32 %v8700_v62, %v8699_v50  ;;  %v7036_v40 = vunpack.c.l.bf16 %v4043_v10  ;;  %4168 = vmatprep.subr.bf16.mxu1 %v8644_v60  ;;  %v8703_v6 = vld [vmem:[#allocation77_spill] sm:$0xff] }
 0x188   : > { %v7038_v7 = vunpack.c.h.bf16 %v4043_v10  ;;  %v2641_v2 = vadd.f32 %v6859_v28, %v2565_v43  ;;  %v2723_v58 = vadd.f32 %v6870_v54, %v2640_v33  ;;  %v874_v1 = vadd.f32 %v856_v31, %v791_v37  ;;  %v8705_v33 = vld [vmem:[#allocation14_spill] sm:$0xff]  ;;  %v8706_v37 = vld [vmem:[#allocation24_spill] sm:$0xff] }
 0x189   : > { %v1084_v34 = vmul.f32 %v8701_v41, %v8699_v50  ;;  %v949_v20 = vadd.f32 %v931_v13, %v873_v52  ;;  %v1159_v10 = vmul.f32 %v8703_v6, %v8702_v24  ;;  %v1160_v39 = vmul.f32 %v8704_v17, %v8702_v24  ;;  %v4253_v24 = vld [vmem:[%s7676_s5 + $0x8] sm:$0xff]  }
 0x18a   : > { %v1347_v16 = vrot.slane %v7036_v40, 1  ;;  %v2724_v55 = vadd.f32 %v6874_v35, %v2641_v2  ;;  %v2799_v28 = vadd.f32 %v6895_v36, %v2723_v58  ;;  %v950_v54 = vadd.f32 %v932_v21, %v874_v1  ;;  %4169 = vmatpush3.bf16.msra.mxu1 %v4252_v48  ;;  %v8707_v58 = vld [vmem:[#allocation15_spill] sm:$0xff] }
 0x18b   : > { %v1356_v31 = vrot.slane %v7038_v7, 1  ;;  %v1025_v43 = vadd.f32 %v1007_v45, %v949_v20  ;;  %v1235_v50 = vmul.f32 %v8706_v37, %v8705_v33  ;;  %v1236_v13 = vmul.f32 %v6785_v0, %v8705_v33  ;;  %4170 = vmatprep.subr.bf16.mxu1 %v8644_v60 }
 0x18c   : > { %v1423_v52 = vrot.slane %v7036_v40, 2  ;;  %v2800_v35 = vadd.f32 %v6910_v38, %v2724_v55  ;;  %v2875_v36 = vadd.f32 %v6914_v42, %v2799_v28  ;;  %v1026_v21 = vadd.f32 %v1008_v49, %v950_v54  ;;  %v8708_v28 = vld [vmem:[#allocation16_spill] sm:$0xff] }
 0x18d   : > { %v1432_v45 = vrot.slane %v7038_v7, 2  ;;  %v1101_v2 = vadd.f32 %v1083_v30, %v1025_v43  ;;  %v1318_v1 = vmul.f32 %v7036_v40, %v8707_v58  ;;  %v1319_v48 = vmul.f32 %v7038_v7, %v8707_v58 }
 0x18e   : > { %v1499_v20 = vrot.slane %v7036_v40, 3  ;;  %v2876_v33 = vadd.f32 %v6931_v44, %v2800_v35  ;;  %v2951_v55 = vadd.f32 %v6939_v53, %v2875_v36  ;;  %v1102_v38 = vadd.f32 %v1084_v34, %v1026_v21  ;;  %4171 = vmatpush3.bf16.msra.mxu1 %v4253_v24  ;;  %v4254_v44 = vld [vmem:[%s7676_s5] sm:$0xff]   ;;  %v8710_v36 = vld [vmem:[#allocation17_spill] sm:$0xff] }
 0x18f   : > { %v7077_v42 = vsel %vm427_vm1, %v1347_v16, %v1356_v31  ;;  %v1177_v49 = vadd.f32 %v1159_v10, %v1101_v2  ;;  %v7081_v30 = vsel %vm427_vm1, %v1356_v31, %v1347_v16  ;;  %v1508_v43 = vrot.slane %v7038_v7, 3  ;;  %4172 = vmatprep.subr.bf16.mxu1 %v8644_v60 }
 0x190   : > { %v1394_v54 = vmul.f32 %v8708_v28, %v7077_v42  ;;  %v2952_v53 = vadd.f32 %v6948_v47, %v2876_v33  ;;  %v3027_v34 = vadd.f32 %v6991_v63, %v2951_v55  ;;  %v1178_v35 = vadd.f32 %v1160_v39, %v1102_v38 }
 0x191   : > { %v7093_v10 = vsel %vm504_vm2, %v1423_v52, %v1432_v45  ;;  %v1253_v16 = vadd.f32 %v1235_v50, %v1177_v49  ;;  %v1395_v31 = vmul.f32 %v8708_v28, %v7081_v30  ;;  %v7100_v24 = vsel %vm504_vm2, %v1432_v45, %v1423_v52 }
 0x192   : > { %8709 = vst [vmem:[#allocation45_spill] sm:$0xff] %v7100_v24  ;;  %v1470_v47 = vmul.f32 %v8710_v36, %v7093_v10  ;;  %v3028_v63 = vadd.f32 %v6995_v27, %v2952_v53  ;;  %v3103_v39 = vadd.f32 %v7007_v61, %v3027_v34  ;;  %v1254_v33 = vadd.f32 %v1236_v13, %v1178_v35  ;;  %v7114_v45 = vpop.f32.mrf.mxu0  ;;  %v8714_v53 = vld [vmem:[#allocation18_spill] sm:$0xff]  ;;  %v8715_v35 = vld [vmem:[#allocation28_spill] sm:$0xff] }
 0x193   : > { %v1575_v21 = vrot.slane %v7036_v40, 4  ;;  %v1336_v2 = vadd.f32 %v1318_v1, %v1253_v16  ;;  %v1471_v50 = vmul.f32 %v8710_v36, %v7100_v24  ;;  %v7111_v55 = vsel %vm581_vm3, %v1499_v20, %v1508_v43  ;;  %4173 = vmatpush3.bf16.msra.mxu1 %v4254_v44  ;;  %8712 = vst [vmem:[#allocation50_spill] sm:$0xff] %v7114_v45  ;;  %v8716_v16 = vld [vmem:[#allocation88_spill] sm:$0xff] }
 0x194   : > { %8711 = vst [vmem:[#allocation79_spill] sm:$0xff] %v7111_v55  ;;  %v1584_v52 = vrot.slane %v7038_v7, 4  ;;  %v3104_v27 = vadd.f32 %v7011_v29, %v3028_v63  ;;  %v1337_v38 = vadd.f32 %v1319_v48, %v1254_v33  ;;  %v1651_v61 = vrot.slane %v7036_v40, 5  ;;  %v4132_v36 = vpop.f32.mrf.mxu0  ;;  %v8720_v33 = vld [vmem:[#allocation93_spill] sm:$0xff] }
 0x195   : > { %v1660_v13 = vrot.slane %v7038_v7, 5  ;;  %v1412_v1 = vadd.f32 %v1394_v54, %v1336_v2  ;;  %v7121_v49 = vsel %vm581_vm3, %v1508_v43, %v1499_v20  ;;  %v1546_v34 = vmul.f32 %v8714_v53, %v7111_v55  ;;  %v8719_v43 = vld [vmem:[#allocation22_spill] sm:$0xff]  ;;  %v8745_v55 = vld [vmem:[#allocation31_spill] sm:$0xff] }
 0x196   : > { %8713 = vst [vmem:[#allocation51_spill] sm:$0xff] %v7121_v49  ;;  %v1781_v44 = vmul.f32 %v8716_v16, %v8715_v35  ;;  %v3115_v45 = vpack.c.bf16 %v3104_v27, %v3103_v39  ;;  %v1413_v28 = vadd.f32 %v1395_v31, %v1337_v38  ;;  %v1547_v29 = vmul.f32 %v8714_v53, %v7121_v49  ;;  %v7141_v39 = vpop.f32.mrf.mxu0  ;;  %v8723_v27 = vld [vmem:[#allocation29_spill] sm:$0xff]  ;;  %v8732_v53 = vld [vmem:[#allocation36_spill] sm:$0xff]  ;;  %v8739_v49 = vld [vmem:[#allocation43_spill] sm:$0xff] }
 0x197   : > { %v7131_v48 = vsel %vm658_vm4, %v1575_v21, %v1584_v52  ;;  %v1488_v54 = vadd.f32 %v1470_v47, %v1412_v1  ;;  %v7135_v20 = vsel %vm658_vm4, %v1584_v52, %v1575_v21  ;;  %v1782_v36 = vmul.f32 %v8720_v33, %v8715_v35  ;;  %8721 = vst [vmem:[#allocation54_spill] sm:$0xff] %v7141_v39  ;;  %v8724_v21 = vld [vmem:[#allocation94_spill] sm:$0xff] }
 0x198   : > { %8717 = vst [vmem:[#allocation52_spill] sm:$0xff] %v7131_v48  ;;  %8718 = vst [vmem:[#allocation53_spill] sm:$0xff] %v7135_v20  ;;  %v1622_v63 = vmul.f32 %v8719_v43, %v7131_v48  ;;  %4147 = vmatmul.mubr.bf16.gmra.mxu0 %v3115_v45  ;;  %v1489_v31 = vadd.f32 %v1471_v50, %v1413_v28  ;;  %v1623_v2 = vmul.f32 %v8719_v43, %v7135_v20  ;;  %v8726_v28 = vld [vmem:[#allocation23_spill] sm:$0xff]  ;;  %v8727_v45 = vld [vmem:[#allocation72_spill] sm:$0xff]  ;;  %v4133_v33 = vpop.f32.mrf.mxu0 }
 0x199   : > { %v7147_v47 = vsel %vm735_vm5, %v1651_v61, %v1660_v13  ;;  %v1857_v52 = vmul.f32 %v8724_v21, %v8723_v27  ;;  %4150 = vmatprep.mubr.msk.bf16.mxu0 %vm4280_vm0, %v8644_v60  ;;  %v1564_v38 = vadd.f32 %v1546_v34, %v1488_v54  ;;  %v7155_v1 = vsel %vm735_vm5, %v1660_v13, %v1651_v61  ;;  %v8728_v35 = vld [vmem:[#allocation34_spill] sm:$0xff]  ;;  %v8729_v43 = vld [vmem:[#allocation32_spill] sm:$0xff]  ;;  %v8730_v34 = vld [vmem:[#allocation33_spill] sm:$0xff] }
 0x19a   : > { %8722 = vst [vmem:[#allocation57_spill] sm:$0xff] %v7147_v47  ;;  %8725 = vst [vmem:[#allocation58_spill] sm:$0xff] %v7155_v1  ;;  %v1698_v50 = vmul.f32 %v8726_v28, %v7147_v47  ;;  %v1858_v16 = vmul.f32 %v8727_v45, %v8723_v27  ;;  %v1565_v39 = vadd.f32 %v1547_v29, %v1489_v31  ;;  %v8731_v13 = vld [vmem:[#allocation35_spill] sm:$0xff]  ;;  %v8733_v47 = vld [vmem:[#allocation49_spill] sm:$0xff] }
 0x19b   : > { %v1699_v21 = vmul.f32 %v8726_v28, %v7155_v1  ;;  %v1933_v60 = vmul.f32 %v8729_v43, %v8728_v35  ;;  %v1934_v54 = vmul.f32 %v8730_v34, %v8728_v35  ;;  %v1640_v61 = vadd.f32 %v1622_v63, %v1564_v38  ;;  %v8734_v48 = vld [vmem:[#allocation40_spill] sm:$0xff]  ;;  %v8735_v45 = vld [vmem:[#allocation37_spill] sm:$0xff]  ;;  %v8736_v31 = vld [vmem:[#allocation38_spill] sm:$0xff] }
 0x19c   : > { %v2009_v58 = vmul.f32 %v8732_v53, %v8731_v13  ;;  %v2010_v20 = vmul.f32 %v8733_v47, %v8731_v13  ;;  %v2085_v33 = vmul.f32 %v8735_v45, %v8734_v48  ;;  %v1641_v29 = vadd.f32 %v1623_v2, %v1565_v39  ;;  %v8737_v28 = vld [vmem:[#allocation41_spill] sm:$0xff]  ;;  %v8738_v1 = vld [vmem:[#allocation39_spill] sm:$0xff]  ;;  %v4070_v63 = vld [vmem:[%s4365_s15 + $0x60] sm:$0xff]  }
 0x19d   : > { %v2086_v27 = vmul.f32 %v8736_v31, %v8734_v48  ;;  %v2161_v43 = vmul.f32 %v8738_v1, %v8737_v28  ;;  %v2162_v34 = vmul.f32 %v8739_v49, %v8737_v28  ;;  %v1716_v38 = vadd.f32 %v1698_v50, %v1640_v61  ;;  %v8740_v35 = vld [vmem:[#allocation46_spill] sm:$0xff]  ;;  %v8741_v13 = vld [vmem:[#allocation47_spill] sm:$0xff]  ;;  %v8744_v1 = vld [vmem:[#allocation48_spill] sm:$0xff] }
 0x19e   : > { %v2244_v53 = vmul.f32 %v6836_v5, %v8740_v35  ;;  %v2245_v47 = vmul.f32 %v6850_v56, %v8740_v35  ;;  %v8742_v45 = vld [vmem:[#allocation30_spill] sm:$0xff]  ;;  %v1717_v2 = vadd.f32 %v1699_v21, %v1641_v29  ;;  %v7192_v24 = vmul.f32 %v8745_v55, %v8744_v1  ;;  %v8746_v61 = vld [vmem:[#allocation55_spill] sm:$0xff]  ;;  %v8747_v55 = vld [vmem:[#allocation56_spill] sm:$0xff] }
 0x19f   : > { %v2320_v39 = vmul.f32 %v8742_v45, %v8741_v13  ;;  %v8743_v31 = vld [vmem:[#allocation78_spill] sm:$0xff]  ;;  %v7196_v49 = vmul.f32 %v6903_v4, %v8744_v1  ;;  %v1799_v50 = vadd.f32 %v1781_v44, %v1716_v38  ;;  %v7200_v35 = vmul.f32 %v6925_v14, %v8746_v61  ;;  %v8748_v1 = vld [vmem:[#allocation61_spill] sm:$0xff] }
 0x1a0   : > { %v7188_v48 = vmul.f32 %v8743_v31, %v8741_v13  ;;  %v7202_v28 = vunpack.c.l.bf16 %v4070_v63  ;;  %v7204_v21 = vunpack.c.h.bf16 %v4070_v63  ;;  %v1800_v29 = vadd.f32 %v1782_v36, %v1717_v2 }
 0x1a1   : > { %v7208_v13 = vmul.f32 %v6935_v15, %v8746_v61  ;;  %v7212_v31 = vmul.f32 %v6952_v9, %v8747_v55  ;;  %v7216_v44 = vmul.f32 %v6957_v11, %v8747_v55  ;;  %v1875_v38 = vadd.f32 %v1857_v52, %v1799_v50  ;;  %v8749_v11 = vld [vmem:[#allocation3_spill] sm:$0xff] }
 0x1a2   : > { %v7220_v14 = vmul.f32 %v6961_v46, %v8748_v1  ;;  %v7224_v36 = vmul.f32 %v6975_v26, %v8748_v1  ;;  %v2736_v63 = vrot.slane %v7202_v28, 1  ;;  %v1876_v2 = vadd.f32 %v1858_v16, %v1800_v29  ;;  %v8750_v46 = vld [vmem:[#allocation62_spill] sm:$0xff] }
 0x1a3   : > { %v2745_v61 = vrot.slane %v7204_v21, 1  ;;  %v2812_v9 = vrot.slane %v7202_v28, 2  ;;  %v2821_v15 = vrot.slane %v7204_v21, 2  ;;  %v1951_v55 = vadd.f32 %v1933_v60, %v1875_v38 }
 0x1a4   : > { %v387_v52 = vmul.f32 %v6683_v32, %v8749_v11  ;;  %v388_v50 = vmul.f32 %v6685_v51, %v8749_v11  ;;  %v466_v1 = vmul.f32 %v6713_v57, %v8606_v3  ;;  %v1952_v26 = vadd.f32 %v1934_v54, %v1876_v2  ;;  %v8752_v54 = vld [vmem:[#allocation63_spill] sm:$0xff] }
 0x1a5   : > { %v7238_v16 = vmul.f32 %v7202_v28, %v8750_v46  ;;  %v2888_v29 = vrot.slane %v7202_v28, 3  ;;  %v2897_v4 = vrot.slane %v7204_v21, 3  ;;  %v2027_v45 = vadd.f32 %v2009_v58, %v1951_v55 }
 0x1a6   : > { %v7244_v60 = vmul.f32 %v7204_v21, %v8750_v46  ;;  %v7248_v32 = vsel %vm427_vm1, %v2736_v63, %v2745_v61  ;;  %v2964_v51 = vrot.slane %v7202_v28, 4  ;;  %v2028_v57 = vadd.f32 %v2010_v20, %v1952_v26 }
 0x1a7   : > { %8751 = vst [vmem:[#allocation59_spill] sm:$0xff] %v7248_v32  ;;  %v7253_v11 = vsel %vm427_vm1, %v2745_v61, %v2736_v63  ;;  %v7257_v38 = vmul.f32 %v8752_v54, %v7248_v32  ;;  %v7261_v58 = vsel %vm504_vm2, %v2812_v9, %v2821_v15  ;;  %v2103_v55 = vadd.f32 %v2085_v33, %v2027_v45  ;;  %v8753_v63 = vld [vmem:[#allocation68_spill] sm:$0xff] }
 0x1a8   : > { %v7265_v2 = vmul.f32 %v8752_v54, %v7253_v11  ;;  %v7269_v26 = vsel %vm504_vm2, %v2821_v15, %v2812_v9  ;;  %v2973_v20 = vrot.slane %v7204_v21, 4  ;;  %v2104_v61 = vadd.f32 %v2086_v27, %v2028_v57 }
 0x1a9   : > { %v7274_v46 = vmul.f32 %v8753_v63, %v7261_v58  ;;  %v7278_v32 = vmul.f32 %v8753_v63, %v7269_v26  ;;  %v7282_v33 = vsel %vm581_vm3, %v2888_v29, %v2897_v4  ;;  %v2179_v45 = vadd.f32 %v2161_v43, %v2103_v55 }
 0x1aa   : > { %8754 = vst [vmem:[#allocation4_spill] sm:$0xff] %v7282_v33  ;;  %v7286_v15 = vsel %vm581_vm3, %v2897_v4, %v2888_v29  ;;  %v7290_v9 = vmul.f32 %v8543_v12, %v7282_v33  ;;  %v467_v27 = vmul.f32 %v8695_v19, %v8606_v3  ;;  %v2180_v57 = vadd.f32 %v2162_v34, %v2104_v61 }
 0x1ab   : > { %v7296_v63 = vmul.f32 %v8543_v12, %v7286_v15  ;;  %v3040_v54 = vrot.slane %v7202_v28, 5  ;;  %v3049_v43 = vrot.slane %v7204_v21, 5  ;;  %v2262_v55 = vadd.f32 %v2244_v53, %v2179_v45 }
 0x1ac   : > { %v7302_v4 = vsel %vm658_vm4, %v2964_v51, %v2973_v20  ;;  %v7306_v29 = vsel %vm658_vm4, %v2973_v20, %v2964_v51  ;;  %v484_v33 = vadd.f32 %v466_v1, %v387_v52  ;;  %v2263_v3 = vadd.f32 %v2245_v47, %v2180_v57  ;;  %v8756_v20 = vld [vmem:[#allocation8_spill] sm:$0xff] }
 0x1ad   : > { %v7310_v19 = vmul.f32 %v8471_v22, %v7302_v4  ;;  %v485_v34 = vadd.f32 %v467_v27, %v388_v50  ;;  %v543_v61 = vmul.f32 %v8697_v25, %v8409_v59  ;;  %v2338_v12 = vadd.f32 %v2320_v39, %v2262_v55  ;;  %v8755_v50 = vld [vmem:[#allocation7_spill] sm:$0xff] }
 0x1ae   : > { %v544_v53 = vmul.f32 %v8698_v8, %v8409_v59  ;;  %v620_v45 = vmul.f32 %v8700_v62, %v8410_v18  ;;  %v621_v51 = vmul.f32 %v8701_v41, %v8410_v18  ;;  %v2339_v47 = vadd.f32 %v7188_v48, %v2263_v3 }
 0x1af   : > { %v7323_v1 = vmul.f32 %v8471_v22, %v7306_v29  ;;  %v561_v52 = vadd.f32 %v543_v61, %v484_v33  ;;  %v697_v25 = vmul.f32 %v8703_v6, %v8755_v50  ;;  %v2414_v39 = vadd.f32 %v7192_v24, %v2338_v12  ;;  %v8757_v24 = vld [vmem:[#allocation73_spill] sm:$0xff] }
 0x1b0   : > { %v7330_v59 = vsel %vm735_vm5, %v3040_v54, %v3049_v43  ;;  %v562_v8 = vadd.f32 %v544_v53, %v485_v34  ;;  %v698_v18 = vmul.f32 %v8704_v17, %v8755_v50  ;;  %v2415_v62 = vadd.f32 %v7196_v49, %v2339_v47  ;;  %v8759_v34 = vld [vmem:[#allocation10_spill] sm:$0xff] }
 0x1b1   : > { %v7337_v41 = vsel %vm735_vm5, %v3049_v43, %v3040_v54  ;;  %v638_v48 = vadd.f32 %v620_v45, %v561_v52  ;;  %v774_v6 = vmul.f32 %v8706_v37, %v8756_v20  ;;  %v2490_v12 = vadd.f32 %v7200_v35, %v2414_v39  ;;  %v8758_v43 = vld [vmem:[#allocation9_spill] sm:$0xff] }
 0x1b2   : > { %v7344_v33 = vmul.f32 %v8757_v24, %v7330_v59  ;;  %v639_v27 = vadd.f32 %v621_v51, %v562_v8  ;;  %v775_v17 = vmul.f32 %v6785_v0, %v8756_v20  ;;  %v2491_v49 = vadd.f32 %v7208_v13, %v2415_v62  ;;  %v4044_v0 = vld [vmem:[%s4365_s15 + $0x50] sm:$0xff]   ;;  %v8760_v51 = vld [vmem:[#allocation11_spill] sm:$0xff]  ;;  %v8761_v52 = vld [vmem:[#allocation45_spill] sm:$0xff] }
 0x1b3   : > { %v7351_v54 = vmul.f32 %v8757_v24, %v7337_v41  ;;  %v715_v57 = vadd.f32 %v697_v25, %v638_v48  ;;  %v857_v37 = vmul.f32 %v7036_v40, %v8758_v43  ;;  %v2566_v35 = vadd.f32 %v7212_v31, %v2490_v12  ;;  %v8763_v25 = vld [vmem:[#allocation79_spill] sm:$0xff]  ;;  %v8765_v48 = vld [vmem:[#allocation13_spill] sm:$0xff]  ;;  %v8766_v20 = vld [vmem:[#allocation52_spill] sm:$0xff] }
 0x1b4   : > { %v716_v55 = vadd.f32 %v698_v18, %v639_v27  ;;  %v858_v3 = vmul.f32 %v7038_v7, %v8758_v43  ;;  %v933_v61 = vmul.f32 %v7077_v42, %v8759_v34  ;;  %v2567_v13 = vadd.f32 %v7216_v44, %v2491_v49  ;;  %v8762_v7 = vld [vmem:[#allocation12_spill] sm:$0xff]  ;;  %v8768_v49 = vld [vmem:[#allocation14_spill] sm:$0xff] }
 0x1b5   : > { %v792_v53 = vadd.f32 %v774_v6, %v715_v57  ;;  %v934_v45 = vmul.f32 %v7081_v30, %v8759_v34  ;;  %v1009_v47 = vmul.f32 %v7093_v10, %v8760_v51  ;;  %v2642_v40 = vadd.f32 %v7220_v14, %v2566_v35  ;;  %v8764_v10 = vld [vmem:[#allocation51_spill] sm:$0xff]  ;;  %v8769_v57 = vld [vmem:[#allocation57_spill] sm:$0xff] }
 0x1b6   : > { %v793_v31 = vadd.f32 %v775_v17, %v716_v55  ;;  %v1010_v50 = vmul.f32 %v8761_v52, %v8760_v51  ;;  %v1085_v39 = vmul.f32 %v8763_v25, %v8762_v7  ;;  %v2643_v42 = vadd.f32 %v7224_v36, %v2567_v13  ;;  %v8767_v17 = vld [vmem:[#allocation53_spill] sm:$0xff] }
 0x1b7   : > { %v875_v8 = vadd.f32 %v857_v37, %v792_v53  ;;  %v7372_v44 = vunpack.c.l.bf16 %v4044_v0  ;;  %v7374_v18 = vunpack.c.h.bf16 %v4044_v0  ;;  %v2725_v30 = vadd.f32 %v7238_v16, %v2642_v40  ;;  %v8770_v53 = vld [vmem:[#allocation58_spill] sm:$0xff] }
 0x1b8   : > { %v876_v62 = vadd.f32 %v858_v3, %v793_v31  ;;  %v1086_v14 = vmul.f32 %v8764_v10, %v8762_v7  ;;  %v1161_v6 = vmul.f32 %v8766_v20, %v8765_v48  ;;  %v2726_v12 = vadd.f32 %v7244_v60, %v2643_v42  ;;  %v8771_v31 = vld [vmem:[#allocation15_spill] sm:$0xff] }
 0x1b9   : > { %v951_v27 = vadd.f32 %v933_v61, %v875_v8  ;;  %v1162_v36 = vmul.f32 %v8767_v17, %v8765_v48  ;;  %v1237_v43 = vmul.f32 %v8769_v57, %v8768_v49  ;;  %v2801_v37 = vadd.f32 %v7257_v38, %v2725_v30 }
 0x1ba   : > { %v952_v35 = vadd.f32 %v934_v45, %v876_v62  ;;  %v1348_v16 = vrot.slane %v7372_v44, 1  ;;  %v1357_v55 = vrot.slane %v7374_v18, 1  ;;  %v2802_v3 = vadd.f32 %v7265_v2, %v2726_v12 }
 0x1bb   : > { %v1027_v34 = vadd.f32 %v1009_v47, %v951_v27  ;;  %v1424_v0 = vrot.slane %v7372_v44, 2  ;;  %v1433_v60 = vrot.slane %v7374_v18, 2  ;;  %v2877_v61 = vadd.f32 %v7274_v46, %v2801_v37 }
 0x1bc   : > { %v1028_v13 = vadd.f32 %v1010_v50, %v952_v35  ;;  %v1238_v51 = vmul.f32 %v8770_v53, %v8768_v49  ;;  %v1366_v38 = vsel %vm427_vm1, %v1348_v16, %v1357_v55  ;;  %v2878_v45 = vadd.f32 %v7278_v32, %v2802_v3  ;;  %v8772_v50 = vld [vmem:[#allocation16_spill] sm:$0xff]  ;;  %v8773_v49 = vld [vmem:[#allocation17_spill] sm:$0xff]  ;;  %v8774_v3 = vld [vmem:[#allocation18_spill] sm:$0xff] }
 0x1bd   : > { %v1103_v40 = vadd.f32 %v1085_v39, %v1027_v34  ;;  %v1320_v2 = vmul.f32 %v7372_v44, %v8771_v31  ;;  %v1321_v47 = vmul.f32 %v7374_v18, %v8771_v31  ;;  %v2953_v52 = vadd.f32 %v7290_v9, %v2877_v61  ;;  %v8775_v53 = vld [vmem:[#allocation22_spill] sm:$0xff] }
 0x1be   : > { %v1104_v7 = vadd.f32 %v1086_v14, %v1028_v13  ;;  %v1375_v46 = vsel %vm427_vm1, %v1357_v55, %v1348_v16  ;;  %v1396_v25 = vmul.f32 %v8772_v50, %v1366_v38  ;;  %v2954_v42 = vadd.f32 %v7296_v63, %v2878_v45 }
 0x1bf   : > { %v1179_v8 = vadd.f32 %v1161_v6, %v1103_v40  ;;  %v1442_v32 = vsel %vm504_vm2, %v1424_v0, %v1433_v60  ;;  %v1451_v39 = vsel %vm504_vm2, %v1433_v60, %v1424_v0  ;;  %v3029_v30 = vadd.f32 %v7310_v19, %v2953_v52 }
 0x1c0   : > { %v1180_v62 = vadd.f32 %v1162_v36, %v1104_v7  ;;  %v1500_v9 = vrot.slane %v7372_v44, 3  ;;  %v1509_v10 = vrot.slane %v7374_v18, 3  ;;  %v3030_v14 = vadd.f32 %v7323_v1, %v2954_v42 }
 0x1c1   : > { %v1255_v48 = vadd.f32 %v1237_v43, %v1179_v8  ;;  %v1576_v20 = vrot.slane %v7372_v44, 4  ;;  %v1585_v63 = vrot.slane %v7374_v18, 4  ;;  %v3105_v6 = vadd.f32 %v7344_v33, %v3029_v30 }
 0x1c2   : > { %v1256_v12 = vadd.f32 %v1238_v51, %v1180_v62  ;;  %v1397_v27 = vmul.f32 %v8772_v50, %v1375_v46  ;;  %v1518_v19 = vsel %vm581_vm3, %v1500_v9, %v1509_v10  ;;  %v3106_v17 = vadd.f32 %v7351_v54, %v3030_v14  ;;  %v8779_v62 = vld [vmem:[#allocation29_spill] sm:$0xff] }
 0x1c3   : > { %v1338_v36 = vadd.f32 %v1320_v2, %v1255_v48  ;;  %v1472_v57 = vmul.f32 %v8773_v49, %v1442_v32  ;;  %v1527_v1 = vsel %vm581_vm3, %v1509_v10, %v1500_v9  ;;  %v1473_v37 = vmul.f32 %v8773_v49, %v1451_v39  ;;  %v8780_v9 = vld [vmem:[#allocation30_spill] sm:$0xff] }
 0x1c4   : > { %v1339_v43 = vadd.f32 %v1321_v47, %v1256_v12  ;;  %v1594_v33 = vsel %vm658_vm4, %v1576_v20, %v1585_v63  ;;  %v1652_v35 = vrot.slane %v7372_v44, 5  ;;  %v3116_v16 = vpack.c.bf16 %v3106_v17, %v3105_v6  ;;  %v8777_v47 = vld [vmem:[#allocation23_spill] sm:$0xff]  ;;  %v8781_v48 = vld [vmem:[#allocation78_spill] sm:$0xff]  ;;  %v8784_v17 = vld [vmem:[#allocation60_spill] sm:$0xff] }
 0x1c5   : > { %v1414_v55 = vadd.f32 %v1396_v25, %v1338_v36  ;;  %v1548_v34 = vmul.f32 %v8774_v3, %v1518_v19  ;;  %v1603_v54 = vsel %vm658_vm4, %v1585_v63, %v1576_v20  ;;  %v1549_v60 = vmul.f32 %v8774_v3, %v1527_v1  ;;  %v8778_v25 = vld [vmem:[#allocation28_spill] sm:$0xff]  ;;  %v8782_v12 = vld [vmem:[#allocation34_spill] sm:$0xff]  ;;  %v8786_v1 = vld [vmem:[#allocation65_spill] sm:$0xff] }
 0x1c6   : > { %v1415_v0 = vadd.f32 %v1397_v27, %v1339_v43  ;;  %v1661_v61 = vrot.slane %v7374_v18, 5  ;;  %4151 = vmatmul.mubr.bf16.gmra.mxu0 %v3116_v16  ;;  %v1624_v51 = vmul.f32 %v8775_v53, %v1594_v33  ;;  %v8776_v38 = vmov 0.0   ;;  %v8783_v27 = vld [vmem:[#allocation31_spill] sm:$0xff]  ;;  %v8787_v33 = vld [vmem:[#allocation81_spill] sm:$0xff] }
 0x1c7   : > { %v1490_v13 = vadd.f32 %v1472_v57, %v1414_v55  ;;  %4154 = vmatprep.mubr.msk.bf16.mxu0 %vm4280_vm0, %v8776_v38  ;;  %v1625_v45 = vmul.f32 %v8775_v53, %v1603_v54  ;;  %v7444_v46 = vpop.f32.mrf.mxu0  ;;  %v1783_v42 = vmul.f32 %v6836_v5, %v8778_v25  ;;  %v1784_v32 = vmul.f32 %v6850_v56, %v8778_v25  ;;  %v8785_v57 = vld [vmem:[#allocation35_spill] sm:$0xff]  ;;  %v8788_v55 = vld [vmem:[#allocation40_spill] sm:$0xff]  ;;  %v7469_v54 = vld [vmem:[%s7674_s3] ss:$0 sm:$0xff] }
 0x1c8   : > { %v1491_v44 = vadd.f32 %v1473_v37, %v1415_v0  ;;  %v1670_v40 = vsel %vm735_vm5, %v1652_v35, %v1661_v61  ;;  %v1679_v31 = vsel %vm735_vm5, %v1661_v61, %v1652_v35  ;;  %v1859_v10 = vmul.f32 %v8780_v9, %v8779_v62  ;;  %v8789_v3 = vld [vmem:[#allocation67_spill] sm:$0xff]  ;;  %v8798_v9 = vld [vmem:[#allocation48_spill] sm:$0xff] }
 0x1c9   : > { %v1566_v2 = vadd.f32 %v1548_v34, %v1490_v13  ;;  %v1700_v52 = vmul.f32 %v8777_v47, %v1670_v40  ;;  %v1701_v7 = vmul.f32 %v8777_v47, %v1679_v31  ;;  %v4136_v39 = vpop.f32.mrf.mxu0  ;;  %v1860_v20 = vmul.f32 %v8781_v48, %v8779_v62  ;;  %v4071_v13 = vld [vmem:[%s4365_s15 + $0x68] sm:$0xff]   ;;  %v8793_v40 = vld [vmem:[#allocation44_spill] sm:$0xff]  ;;  %v8794_v47 = vld [vmem:[#allocation46_spill] sm:$0xff] }
 0x1ca   : > { %v1567_v18 = vadd.f32 %v1549_v60, %v1491_v44  ;;  %v1935_v5 = vmul.f32 %v8783_v27, %v8782_v12  ;;  %v1936_v56 = vmul.f32 %v8784_v17, %v8782_v12  ;;  %v2011_v43 = vmul.f32 %v8786_v1, %v8785_v57  ;;  %v8790_v60 = vld [vmem:[#allocation70_spill] sm:$0xff]  ;;  %v8792_v44 = vld [vmem:[#allocation71_spill] sm:$0xff]  ;;  %v8801_v27 = vld [vmem:[#allocation4_spill] sm:$0xff] }
 0x1cb   : > { %v1642_v50 = vadd.f32 %v1624_v51, %v1566_v2  ;;  %v7454_v63 = vpop.f32.mrf.mxu0  ;;  %v2012_v35 = vmul.f32 %v8787_v33, %v8785_v57  ;;  %v2087_v34 = vmul.f32 %v8789_v3, %v8788_v55  ;;  %v2088_v61 = vmul.f32 %v8790_v60, %v8788_v55  ;;  %v8791_v51 = vld [vmem:[#allocation41_spill] sm:$0xff]  ;;  %v7493_v62 = vld [vmem:[%s7675_s4] ss:$0 sm:$0xff]  ;;  %v8800_v12 = vld [vmem:[#allocation55_spill] sm:$0xff] }
 0x1cc   : > { %v1643_v8 = vadd.f32 %v1625_v45, %v1567_v18  ;;  %v2163_v45 = vmul.f32 %v8792_v44, %v8791_v51  ;;  %v2164_v31 = vmul.f32 %v8793_v40, %v8791_v51  ;;  %v2247_v18 = vmul.f32 %v7204_v21, %v8794_v47  ;;  %v8804_v33 = vld [vmem:[#allocation61_spill] sm:$0xff] }
 0x1cd   : > { %v1718_v30 = vadd.f32 %v1700_v52, %v1642_v50  ;;  %v4137_v36 = vpop.f32.mrf.mxu0  ;;  %v2246_v52 = vmul.f32 %v7202_v28, %v8794_v47  ;;  %v7486_v39 = vunpack.c.l.bf16 %v4071_v13  ;;  %v2627_v3 = vmul.f32 %v7337_v41, %v8804_v33 }
 0x1ce   : > { %v1719_v14 = vadd.f32 %v1701_v7, %v1643_v8  ;;  %v8795_v7 = vld [vmem:[#allocation25_spill] sm:$0xff]  ;;  %v8797_v8 = vld [vmem:[#allocation59_spill] sm:$0xff] }
 0x1cf   : > { %v1801_v6 = vadd.f32 %v1783_v42, %v1718_v30  ;;  %v3294_v50 = vmul.f32 %v7469_v54, %v8795_v7  ;;  %v8796_v42 = vld [vmem:[#allocation47_spill] sm:$0xff]  ;;  %v7488_v30 = vunpack.c.h.bf16 %v4071_v13  ;;  %v2965_v7 = vrot.slane %v7486_v39, 4 }
 0x1d0   : > { %v1802_v19 = vadd.f32 %v1784_v32, %v1719_v14  ;;  %v2322_v32 = vmul.f32 %v8797_v8, %v8796_v42  ;;  %v2323_v21 = vmul.f32 %v7253_v11, %v8796_v42  ;;  %v8799_v14 = vld [vmem:[#allocation64_spill] sm:$0xff]  ;;  %v8807_v8 = vld [vmem:[#allocation54_spill] sm:$0xff] }
 0x1d1   : > { %v1877_v49 = vadd.f32 %v1859_v10, %v1801_v6  ;;  %v2398_v10 = vmul.f32 %v7261_v58, %v8798_v9  ;;  %v3295_v48 = vmul.f32 %v7469_v54, %v8799_v14  ;;  %v2399_v6 = vmul.f32 %v7269_v26, %v8798_v9  ;;  %v8803_v58 = vld [vmem:[#allocation42_spill] sm:$0xff] }
 0x1d2   : > { %v1878_v37 = vadd.f32 %v1860_v20, %v1802_v19  ;;  %v2475_v19 = vmul.f32 %v7286_v15, %v8800_v12  ;;  %v3319_v36 = vadd.f32 %v7493_v62, %v3294_v50  ;;  %v2737_v26 = vrot.slane %v7486_v39, 1 }
 0x1d3   : > { %v1953_v16 = vadd.f32 %v1935_v5, %v1877_v49  ;;  %v2474_v5 = vmul.f32 %v8801_v27, %v8800_v12  ;;  %v3297_v49 = vmul.f32 %v7469_v54, %v8803_v58  ;;  %v2626_v15 = vmul.f32 %v7330_v59, %v8804_v33  ;;  %v8806_v59 = vld [vmem:[#allocation62_spill] sm:$0xff] }
 0x1d4   : > { %v1954_v0 = vadd.f32 %v1936_v56, %v1878_v37  ;;  %v8802_v56 = vld [vmem:[#allocation56_spill] sm:$0xff]  ;;  %v3337_v60 = vmax.f32 %v3319_v36, 0.0  ;;  %v2709_v51 = vmul.f32 %v7486_v39, %v8806_v59  ;;  %v2710_v44 = vmul.f32 %v7488_v30, %v8806_v59  ;;  %v8809_v12 = vld [vmem:[#allocation50_spill] sm:$0xff] }
 0x1d5   : > { %v2029_v53 = vadd.f32 %v2011_v43, %v1953_v16  ;;  %v2550_v11 = vmul.f32 %v7302_v4, %v8802_v56  ;;  %v2551_v1 = vmul.f32 %v7306_v29, %v8802_v56  ;;  %v2746_v43 = vrot.slane %v7488_v30, 1  ;;  %v8805_v4 = vld [vmem:[#allocation89_spill] sm:$0xff] }
 0x1d6   : > { %v2030_v2 = vadd.f32 %v2012_v35, %v1954_v0  ;;  %v3320_v35 = vadd.f32 %v7493_v62, %v3295_v48  ;;  %v3296_v16 = vmul.f32 %v7469_v54, %v8805_v4  ;;  %v2822_v29 = vrot.slane %v7488_v30, 2  ;;  %v8811_v4 = vld [vmem:[#allocation69_spill] sm:$0xff] }
 0x1d7   : > { %v2105_v25 = vadd.f32 %v2087_v34, %v2029_v53  ;;  %v2813_v34 = vrot.slane %v7486_v39, 2  ;;  %v3322_v13 = vadd.f32 %v7493_v62, %v3297_v49  ;;  %v2764_v40 = vsel %vm427_vm1, %v2746_v43, %v2737_v26 }
 0x1d8   : > { %v2106_v28 = vadd.f32 %v2088_v61, %v2030_v2  ;;  %v3338_v61 = vmax.f32 %v3320_v35, 0.0  ;;  %v3298_v27 = vmul.f32 %v7469_v54, %v8809_v12  ;;  %v3041_v56 = vrot.slane %v7486_v39, 5 }
 0x1d9   : > { %v2181_v20 = vadd.f32 %v2163_v45, %v2105_v25  ;;  %v2755_v45 = vsel %vm427_vm1, %v2737_v26, %v2746_v43  ;;  %v2831_v25 = vsel %vm504_vm2, %v2813_v34, %v2822_v29  ;;  %v3340_v42 = vmax.f32 %v3322_v13, 0.0 }
 0x1da   : > { %v2182_v17 = vadd.f32 %v2164_v31, %v2106_v28  ;;  %v3321_v31 = vadd.f32 %v7493_v62, %v3296_v16  ;;  %v3355_v2 = vpack.c.bf16 %v3338_v61, %v3337_v60  ;;  %v2840_v14 = vsel %vm504_vm2, %v2822_v29, %v2813_v34 }
 0x1db   : > { %v2264_v57 = vadd.f32 %v2246_v52, %v2181_v20  ;;  %v2889_v52 = vrot.slane %v7486_v39, 3  ;;  %v2974_v20 = vrot.slane %v7488_v30, 4  ;;  %v3050_v36 = vrot.slane %v7488_v30, 5 }
 0x1dc   : > { %v2265_v37 = vadd.f32 %v2247_v18, %v2182_v17  ;;  %v2898_v18 = vrot.slane %v7488_v30, 3  ;;  %4175 = vmatmul.mubr.bf16.vlgmr.msra.gmra.mxu1 %v3355_v2  ;;  %v3301_v29 = vmul.f32 %v7469_v54, %v7454_v63 }
 0x1dd   : > { %v2340_v55 = vadd.f32 %v2322_v32, %v2264_v57  ;;  %v3299_v32 = vmul.f32 %v7469_v54, %v8807_v8  ;;  %4178 = vmatprep.mubr.msk.bf16.mxu1 %vm4280_vm0, %v8776_v38  ;;  %v2983_v33 = vsel %vm658_vm4, %v2965_v7, %v2974_v20  ;;  %v2992_v30 = vsel %vm658_vm4, %v2974_v20, %v2965_v7 }
 0x1de   : > { %v2341_v0 = vadd.f32 %v2323_v21, %v2265_v37  ;;  %v8808_v21 = vld [vmem:[#allocation63_spill] sm:$0xff]  ;;  %v2916_v17 = vsel %vm581_vm3, %v2898_v18, %v2889_v52  ;;  %v3013_v60 = vmul.f32 %v8471_v22, %v2983_v33  ;;  %v3068_v61 = vsel %vm735_vm5, %v3050_v36, %v3041_v56 }
 0x1df   : > { %v2416_v53 = vadd.f32 %v2398_v10, %v2340_v55  ;;  %v2785_v9 = vmul.f32 %v8808_v21, %v2755_v45  ;;  %v2786_v10 = vmul.f32 %v8808_v21, %v2764_v40  ;;  %v3324_v58 = vadd.f32 %v7493_v62, %v3299_v32 }
 0x1e0   : > { %v2417_v41 = vadd.f32 %v2399_v6, %v2341_v0  ;;  %v3339_v6 = vmax.f32 %v3321_v31, 0.0  ;;  %v2938_v16 = vmul.f32 %v8811_v4, %v2916_v17  ;;  %v3326_v40 = vadd.f32 %v7493_v62, %v3301_v29 }
 0x1e1   : > { %v2492_v47 = vadd.f32 %v2474_v5, %v2416_v53  ;;  %v3342_v34 = vmax.f32 %v3324_v58, 0.0  ;;  %v3014_v53 = vmul.f32 %v8471_v22, %v2992_v30 }
 0x1e2   : > { %v2493_v50 = vadd.f32 %v2475_v19, %v2417_v41  ;;  %v2907_v19 = vsel %vm581_vm3, %v2889_v52, %v2898_v18  ;;  %v3356_v49 = vpack.c.bf16 %v3340_v42, %v3339_v6  ;;  %v3090_v41 = vmul.f32 %v8757_v24, %v3068_v61 }
 0x1e3   : > { %v2568_v28 = vadd.f32 %v2550_v11, %v2492_v47  ;;  %v2937_v39 = vmul.f32 %v8811_v4, %v2907_v19  ;;  %v3344_v22 = vmax.f32 %v3326_v40, 0.0 }
 0x1e4   : > { %v2569_v48 = vadd.f32 %v2551_v1, %v2493_v50  ;;  %v8810_v1 = vld [vmem:[#allocation68_spill] sm:$0xff]  ;;  %4179 = vmatmul.mubr.bf16.gmra.mxu1 %v3356_v49 }
 0x1e5   : > { %v2644_v5 = vadd.f32 %v2626_v15, %v2568_v28  ;;  %v2861_v26 = vmul.f32 %v8810_v1, %v2831_v25  ;;  %v2862_v37 = vmul.f32 %v8810_v1, %v2840_v14  ;;  %v3323_v15 = vadd.f32 %v7493_v62, %v3298_v27  ;;  %4182 = vmatprep.mubr.msk.bf16.mxu1 %vm4280_vm0, %v8776_v38 }
 0x1e6   : > { %v2645_v11 = vadd.f32 %v2627_v3, %v2569_v48  ;;  %v3059_v3 = vsel %vm735_vm5, %v3041_v56, %v3050_v36 }
 0x1e7   : > { %v2727_v57 = vadd.f32 %v2709_v51, %v2644_v5  ;;  %v3341_v59 = vmax.f32 %v3323_v15, 0.0  ;;  %v3300_v51 = vmul.f32 %v7469_v54, %v7444_v46  ;;  %v3089_v45 = vmul.f32 %v8757_v24, %v3059_v3 }
 0x1e8   : > { %v2728_v43 = vadd.f32 %v2710_v44, %v2645_v11 }
 0x1e9   : > { %v2803_v35 = vadd.f32 %v2785_v9, %v2727_v57  ;;  %v3357_v23 = vpack.c.bf16 %v3342_v34, %v3341_v59  ;;  %v3325_v47 = vadd.f32 %v7493_v62, %v3300_v51  ;;  %v7615_v59 = vld [vmem:[%s7677_s6] ss:$0 sm:$0xff] }
 0x1ea   : > { %v2804_v55 = vadd.f32 %v2786_v10, %v2728_v43 }
 0x1eb   : > { %v2879_v0 = vadd.f32 %v2861_v26, %v2803_v35  ;;  %v3343_v7 = vmax.f32 %v3325_v47, 0.0 }
 0x1ec   : > { %v2880_v13 = vadd.f32 %v2862_v37, %v2804_v55  ;;  %4183 = vmatmul.mubr.bf16.gmra.mxu1 %v3357_v23 }
 0x1ed   : > { %v2955_v44 = vadd.f32 %v2937_v39, %v2879_v0  ;;  %4186 = vmatprep.mubr.msk.bf16.mxu1 %vm4280_vm0, %v8776_v38  ;;  %v3358_v50 = vpack.c.bf16 %v3344_v22, %v3343_v7 }
 0x1ee   : > { %v2956_v63 = vadd.f32 %v2938_v16, %v2880_v13 }
 0x1ef   : > { %v3031_v31 = vadd.f32 %v3013_v60, %v2955_v44 }
 0x1f0   : > { %v3032_v2 = vadd.f32 %v3014_v53, %v2956_v63 }
 0x1f1   : > { %v3107_v52 = vadd.f32 %v3089_v45, %v3031_v31 }
 0x1f2   : > { %v3108_v18 = vadd.f32 %v3090_v41, %v3032_v2 }
 0x1f4   : > { %v3117_v46 = vpack.c.bf16 %v3108_v18, %v3107_v52  ;;  %4187 = vmatmul.mubr.bf16.gmra.mxu1 %v3358_v50 }
 0x1f5   : > { %4190 = vmatprep.mubr.msk.bf16.mxu1 %vm4280_vm0, %v8776_v38 }
 0x1f6   : > { %4155 = vmatmul.mubr.bf16.gmra.mxu0 %v3117_v46 }
 0x1f9   : > { %v3248_v24 = vpop.f32.mrf.mxu0 }
 0x1fa   : > { %v3302_v25 = vmul.f32 %v7469_v54, %v3248_v24 }
 0x1fb   : > { %v4140_v42 = vpop.f32.mrf.mxu0 }
 0x1fc   : > { %v3327_v32 = vadd.f32 %v7493_v62, %v3302_v25 }
 0x1fd   : > { %v3251_v8 = vpop.f32.mrf.mxu0 }
 0x1fe   : > { %v3303_v28 = vmul.f32 %v7469_v54, %v3251_v8  ;;  %v3345_v10 = vmax.f32 %v3327_v32, 0.0 }
 0x1ff   : > { %v4141_v21 = vpop.f32.mrf.mxu0 }
 0x200   : > { %v3328_v9 = vadd.f32 %v7493_v62, %v3303_v28 }
 0x202   : > { %v3346_v14 = vmax.f32 %v3328_v9, 0.0 }
 0x204   : > { %v3359_v48 = vpack.c.bf16 %v3346_v14, %v3345_v10 }
 0x206   : > { %4191 = vmatmul.mubr.bf16.gmra.mxu1 %v3359_v48 }
 0x207   : > { %4194 = vmatprep.mubr.msk.bf16.mxu1 %vm4280_vm0, %v8776_v38 }
 0x226   : > { %v3256_v20 = vpop.f32.mrf.mxu0 }
 0x227   : > { %v3304_v6 = vmul.f32 %v7469_v54, %v3256_v20 }
 0x228   : > { %v4144_v12 = vpop.f32.mrf.mxu0 }
 0x229   : > { %v3329_v5 = vadd.f32 %v7493_v62, %v3304_v6 }
 0x22a   : > { %v3259_v27 = vpop.f32.mrf.mxu0 }
 0x22b   : > { %v3305_v19 = vmul.f32 %v7469_v54, %v3259_v27  ;;  %v3347_v11 = vmax.f32 %v3329_v5, 0.0 }
 0x22c   : > { %v4145_v17 = vpop.f32.mrf.mxu0 }
 0x22d   : > { %v3330_v56 = vadd.f32 %v7493_v62, %v3305_v19 }
 0x22f   : > { %v3348_v36 = vmax.f32 %v3330_v56, 0.0 }
 0x231   : > { %v3360_v58 = vpack.c.bf16 %v3348_v36, %v3347_v11 }
 0x233   : > { %4195 = vmatmul.mubr.bf16.gmra.mxu1 %v3360_v58 }
 0x234   : > { %4198 = vmatprep.mubr.msk.bf16.mxu1 %vm4280_vm0, %v8776_v38 }
 0x258   : > { %v3264_v49 = vpop.f32.mrf.mxu0 }
 0x259   : > { %v3306_v57 = vmul.f32 %v7469_v54, %v3264_v49 }
 0x25a   : > { %v4148_v1 = vpop.f32.mrf.mxu0 }
 0x25b   : > { %v3331_v43 = vadd.f32 %v7493_v62, %v3306_v57 }
 0x25c   : > { %v3267_v26 = vpop.f32.mrf.mxu0 }
 0x25d   : > { %v3307_v37 = vmul.f32 %v7469_v54, %v3267_v26  ;;  %v3349_v35 = vmax.f32 %v3331_v43, 0.0 }
 0x25e   : > { %v4149_v33 = vpop.f32.mrf.mxu0 }
 0x25f   : > { %v3332_v15 = vadd.f32 %v7493_v62, %v3307_v37 }
 0x261   : > { %v3350_v4 = vmax.f32 %v3332_v15, 0.0 }
 0x263   : > { %v3361_v39 = vpack.c.bf16 %v3350_v4, %v3349_v35 }
 0x265   : > { %4199 = vmatmul.mubr.bf16.gmra.mxu1 %v3361_v39 }
 0x266   : > { %4202 = vmatprep.mubr.msk.bf16.mxu1 %vm4280_vm0, %v8776_v38 }
 0x286   : > { %v3272_v16 = vpop.f32.mrf.mxu0 }
 0x287   : > { %v3308_v30 = vmul.f32 %v7469_v54, %v3272_v16 }
 0x288   : > { %v4152_v55 = vpop.f32.mrf.mxu0 }
 0x289   : > { %v3333_v34 = vadd.f32 %v7493_v62, %v3308_v30 }
 0x28a   : > { %v3275_v3 = vpop.f32.mrf.mxu0 }
 0x28b   : > { %v3309_v29 = vmul.f32 %v7469_v54, %v3275_v3  ;;  %v3351_v61 = vmax.f32 %v3333_v34, 0.0 }
 0x28c   : > { %v4153_v0 = vpop.f32.mrf.mxu0 }
 0x28d   : > { %v3334_v60 = vadd.f32 %v7493_v62, %v3309_v29 }
 0x28f   : > { %v3352_v13 = vmax.f32 %v3334_v60, 0.0 }
 0x291   : > { %v3362_v53 = vpack.c.bf16 %v3352_v13, %v3351_v61 }
 0x293   : > { %4203 = vmatmul.mubr.bf16.gmra.mxu1 %v3362_v53 }
 0x294   : > { %4206 = vmatprep.mubr.msk.bf16.mxu1 %vm4280_vm0, %v8776_v38 }
 0x29c   : > { %v3469_v51 = vpop.f32.mrf.mxu1 }
 0x29d   : > { %v3470_v44 = vadd.f32 %v7615_v59, %v3469_v51 }
 0x29e   : > { %v4176_v45 = vpop.f32.mrf.mxu1 }
 0x29f   : > { %3540 = vst [vmem:[%s7620_s17] sm:$0xff] %v3470_v44 }
 0x2a0   : > { %v3472_v38 = vpop.f32.mrf.mxu1 }
 0x2a1   : > { %v3473_v63 = vadd.f32 %v7615_v59, %v3472_v38 }
 0x2a2   : > { %v4177_v41 = vpop.f32.mrf.mxu1 }
 0x2a3   : > { %3541 = vst [vmem:[%s7620_s17 + $0x8] sm:$0xff] %v3473_v63 }
 0x2a4   : > { %v3477_v40 = vpop.f32.mrf.mxu1 }
 0x2a5   : > { %v3478_v23 = vadd.f32 %v7615_v59, %v3477_v40 }
 0x2a6   : > { %v4180_v31 = vpop.f32.mrf.mxu1 }
 0x2a7   : > { %3542 = vst [vmem:[%s7620_s17 + $0x10] sm:$0xff] %v3478_v23 }
 0x2a8   : > { %v3480_v2 = vpop.f32.mrf.mxu1 }
 0x2a9   : > { %v3481_v47 = vadd.f32 %v7615_v59, %v3480_v2 }
 0x2aa   : > { %v4181_v52 = vpop.f32.mrf.mxu1 }
 0x2ab   : > { %3543 = vst [vmem:[%s7620_s17 + $0x18] sm:$0xff] %v3481_v47 }
 0x2ac   : > { %v3485_v18 = vpop.f32.mrf.mxu1 }
 0x2ad   : > { %v3486_v22 = vadd.f32 %v7615_v59, %v3485_v18 }
 0x2ae   : > { %v4184_v46 = vpop.f32.mrf.mxu1 }
 0x2af   : > { %3544 = vst [vmem:[%s7620_s17 + $0x20] sm:$0xff] %v3486_v22 }
 0x2b0   : > { %v3488_v50 = vpop.f32.mrf.mxu1 }
 0x2b1   : > { %v3489_v25 = vadd.f32 %v7615_v59, %v3488_v50 }
 0x2b2   : > { %v4185_v8 = vpop.f32.mrf.mxu1 }
 0x2b3   : > { %3545 = vst [vmem:[%s7620_s17 + $0x28] sm:$0xff] %v3489_v25 }
 0x2b4   : > { %v3493_v28 = vpop.f32.mrf.mxu1 }
 0x2b5   : > { %v3494_v10 = vadd.f32 %v7615_v59, %v3493_v28 }
 0x2b6   : > { %v3280_v7 = vpop.f32.mrf.mxu0  ;;  %v4188_v48 = vpop.f32.mrf.mxu1 }
 0x2b7   : > { %v3310_v24 = vmul.f32 %v7469_v54, %v3280_v7  ;;  %3546 = vst [vmem:[%s7620_s17 + $0x30] sm:$0xff] %v3494_v10 }
 0x2b8   : > { %v4156_v42 = vpop.f32.mrf.mxu0  ;;  %v3496_v6 = vpop.f32.mrf.mxu1 }
 0x2b9   : > { %v3335_v21 = vadd.f32 %v7493_v62, %v3310_v24  ;;  %v3497_v5 = vadd.f32 %v7615_v59, %v3496_v6 }
 0x2ba   : > { %v3283_v32 = vpop.f32.mrf.mxu0  ;;  %v4189_v19 = vpop.f32.mrf.mxu1 }
 0x2bb   : > { %v3311_v9 = vmul.f32 %v7469_v54, %v3283_v32  ;;  %v3353_v12 = vmax.f32 %v3335_v21, 0.0  ;;  %3547 = vst [vmem:[%s7620_s17 + $0x38] sm:$0xff] %v3497_v5 }
 0x2bc   : > { %v4157_v14 = vpop.f32.mrf.mxu0 }
 0x2bd   : > { %v3336_v20 = vadd.f32 %v7493_v62, %v3311_v9 }
 0x2bf   : > { %v3354_v27 = vmax.f32 %v3336_v20, 0.0 }
 0x2c1   : > { %v3363_v17 = vpack.c.bf16 %v3354_v27, %v3353_v12 }
 0x2c3   : > { %4207 = vmatmul.mubr.bf16.gmra.mxu1 %v3363_v17 }
 0x2c6   : > { %v3501_v54 = vpop.f32.mrf.mxu1 }
 0x2c7   : > { %v3502_v56 = vadd.f32 %v7615_v59, %v3501_v54 }
 0x2c8   : > { %v4192_v11 = vpop.f32.mrf.mxu1 }
 0x2c9   : > { %3548 = vst [vmem:[%s7620_s17 + $0x40] sm:$0xff] %v3502_v56 }
 0x2ca   : > { %v3504_v62 = vpop.f32.mrf.mxu1 }
 0x2cb   : > { %v3505_v36 = vadd.f32 %v7615_v59, %v3504_v62 }
 0x2cc   : > { %v4193_v58 = vpop.f32.mrf.mxu1 }
 0x2cd   : > { %3549 = vst [vmem:[%s7620_s17 + $0x48] sm:$0xff] %v3505_v36 }
 0x2f3   : > { %v3509_v49 = vpop.f32.mrf.mxu1 }
 0x2f4   : > { %v3510_v57 = vadd.f32 %v7615_v59, %v3509_v49 }
 0x2f5   : > { %v4196_v1 = vpop.f32.mrf.mxu1 }
 0x2f6   : > { %3550 = vst [vmem:[%s7620_s17 + $0x50] sm:$0xff] %v3510_v57 }
 0x2f7   : > { %v3512_v26 = vpop.f32.mrf.mxu1 }
 0x2f8   : > { %v3513_v43 = vadd.f32 %v7615_v59, %v3512_v26 }
 0x2f9   : > { %v4197_v37 = vpop.f32.mrf.mxu1 }
 0x2fa   : > { %3551 = vst [vmem:[%s7620_s17 + $0x58] sm:$0xff] %v3513_v43 }
 0x325   : > { %v3517_v33 = vpop.f32.mrf.mxu1 }
 0x326   : > { %v3518_v15 = vadd.f32 %v7615_v59, %v3517_v33 }
 0x327   : > { %v4200_v35 = vpop.f32.mrf.mxu1 }
 0x328   : > { %3552 = vst [vmem:[%s7620_s17 + $0x60] sm:$0xff] %v3518_v15 }
 0x329   : > { %v3520_v4 = vpop.f32.mrf.mxu1 }
 0x32a   : > { %v3521_v39 = vadd.f32 %v7615_v59, %v3520_v4 }
 0x32b   : > { %v4201_v16 = vpop.f32.mrf.mxu1 }
 0x32c   : > { %3553 = vst [vmem:[%s7620_s17 + $0x68] sm:$0xff] %v3521_v39 }
 0x353   : > { %v3525_v30 = vpop.f32.mrf.mxu1 }
 0x354   : > { %v3526_v55 = vadd.f32 %v7615_v59, %v3525_v30 }
 0x355   : > { %v4204_v3 = vpop.f32.mrf.mxu1 }
 0x356   : > { %3554 = vst [vmem:[%s7620_s17 + $0x70] sm:$0xff] %v3526_v55 }
 0x357   : > { %v3528_v34 = vpop.f32.mrf.mxu1 }
 0x358   : > { %v3529_v29 = vadd.f32 %v7615_v59, %v3528_v34 }
 0x359   : > { %v4205_v0 = vpop.f32.mrf.mxu1 }
 0x35a   : > { %3555 = vst [vmem:[%s7620_s17 + $0x78] sm:$0xff] %v3529_v29 }
 0x383   : > { %v3533_v60 = vpop.f32.mrf.mxu1 }
 0x384   : > { %v3534_v61 = vadd.f32 %v7615_v59, %v3533_v60 }
 0x385   : > { %v4208_v13 = vpop.f32.mrf.mxu1 }
 0x386   : > { %3556 = vst [vmem:[%s7620_s17 + $0x80] sm:$0xff] %v3534_v61 }
 0x387   : > { %v3536_v53 = vpop.f32.mrf.mxu1 }
 0x388   : > { %v3537_v51 = vadd.f32 %v7615_v59, %v3536_v53 }
 0x389   : > { %v4209_v44 = vpop.f32.mrf.mxu1 }
 0x38a   : > { %3557 = vst [vmem:[%s7620_s17 + $0x88] sm:$0xff] %v3537_v51 }
 0x38b PF: > { %s17_s26 = sadd.s32 1, %s4277_s26   ;;  %s8812_s24 = smov %s4273_s25 }
 0x38c   : > { %p14_p5 = scmp.ge.s32.totalorder %s17_s26, 4   ;;  %s8813_s25 = smov %s8815_s27 }
 0x38e   :  { %16 = sbr.rel (!%p14_p5) target bundleno = 2 (0x2), region = 92 }

</bundles_post_ra>
